<compile_context>
chip_gen: v7x
topology: tpu7x:2x2x1
jax: 0.10.0
libtpu: 0.0.40
codegen_flags: <defaults>
</compile_context>

<pallas_src>
import functools

import jax
import jax.numpy as jnp
from jax.experimental import pallas as pl
from jax.experimental.pallas import tpu as pltpu

BN_EPS = 1e-5

_VMEM = pl.BlockSpec(memory_space=pltpu.MemorySpace.VMEM)


def _fused_forward_kernel(x_ref,
                          w1_ref, g1_ref, bt1_ref,
                          w2_ref, g2_ref, bt2_ref,
                          w3_ref, g3_ref, bt3_ref,
                          w4_ref, g4_ref, bt4_ref,
                          wh_ref, bh_ref,
                          o_ref):
    """Fused full forward pass: 4x (linear -> BN -> ReLU) + concatenated head."""

    def lin_bn_relu(h, w_ref, g_ref, bt_ref):
        # bf16 x bf16 MXU matmul, f32 accumulate.
        y = jnp.dot(h.astype(jnp.bfloat16), w_ref[...],
                    preferred_element_type=jnp.float32)
        # Linear bias omitted: BN's mean subtraction cancels it exactly.
        mean = jnp.mean(y, axis=0, keepdims=True)
        var = jnp.mean((y - mean) ** 2, axis=0, keepdims=True)
        y = (y - mean) * jax.lax.rsqrt(var + BN_EPS)
        return jnp.maximum(y * g_ref[...] + bt_ref[...], 0.0)

    h = x_ref[...]                                  # [B, in]  f32
    h = lin_bn_relu(h, w1_ref, g1_ref, bt1_ref)     # [B, 2048]
    h = lin_bn_relu(h, w2_ref, g2_ref, bt2_ref)     # [B, 1024]
    h = lin_bn_relu(h, w3_ref, g3_ref, bt3_ref)     # [B, 512]
    h = lin_bn_relu(h, w4_ref, g4_ref, bt4_ref)     # [B, 256]
    # Concatenated, lane-dense head matmul (+ real head biases).
    o_ref[...] = (jnp.dot(h.astype(jnp.bfloat16), wh_ref[...],
                          preferred_element_type=jnp.float32)
                  + bh_ref[...])


def init_params(key, input_size, output_vector):
    """Deterministic synthetic parameters (PyTorch-like uniform fan-in init)."""
    dims = [input_size, 2048, 1024, 512, 256]
    params = {"layers": []}
    for i in range(4):
        fan_in, fan_out = dims[i], dims[i + 1]
        key, kw = jax.random.split(key)
        bound = float(fan_in) ** -0.5
        w = jax.random.uniform(kw, (fan_in, fan_out), jnp.float32, -bound, bound)
        gamma = jnp.ones((1, fan_out), jnp.float32)   # BN weight default = 1
        beta = jnp.zeros((1, fan_out), jnp.float32)   # BN bias default = 0
        # NOTE: the nn.Linear bias for these layers is not materialized: it is
        # exactly cancelled by the BatchNorm mean subtraction that follows.
        params["layers"].append((w.astype(jnp.bfloat16), gamma, beta))

    # Heads: concatenate every [256, out_i] weight into one lane-dense,
    # zero-padded [256, N_pad] matrix (N_pad multiple of 128).
    total = sum(output_vector)
    n_pad = max(128, ((total + 127) // 128) * 128)
    head_w = jnp.zeros((256, n_pad), jnp.float32)
    head_b = jnp.zeros((1, n_pad), jnp.float32)
    bound = 256.0 ** -0.5
    off = 0
    for od in output_vector:
        key, kw, kb = jax.random.split(key, 3)
        w = jax.random.uniform(kw, (256, od), jnp.float32, -bound, bound)
        b = jax.random.uniform(kb, (1, od), jnp.float32, -bound, bound)
        head_w = head_w.at[:, off:off + od].set(w)
        head_b = head_b.at[:, off:off + od].set(b)
        off += od
    params["head_w"] = head_w.astype(jnp.bfloat16)
    params["head_b"] = head_b
    return params


@functools.partial(jax.jit, static_argnames=("head_sizes",))
def multisoftmax_ffnn_bigger_forward(x, params, head_sizes):
    flat_in = [x]
    for (w, g, bt) in params["layers"]:
        flat_in += [w, g, bt]
    flat_in += [params["head_w"], params["head_b"]]

    B = x.shape[0]
    n_pad = params["head_w"].shape[1]

    out = pl.pallas_call(
        _fused_forward_kernel,
        out_shape=jax.ShapeDtypeStruct((B, n_pad), jnp.float32),
        in_specs=[_VMEM] * len(flat_in),
        out_specs=_VMEM,
    )(*flat_in)

    # Slice the padded, lane-dense head output back into the per-head logits.
    yhat = []
    off = 0
    for od in head_sizes:
        yhat.append(out[:, off:off + od])
        off += od
    return yhat
    # TODO(synk): v7x could shard the wide fan_out dims across its 2 TCs, but
    # that needs a cross-core re-gather between layers; not done here.


if __name__ == "__main__":
    key = jax.random.PRNGKey(0)
    input_size = 32
    batch = 8
    output_vector = (4, 6, 3)  # sizes of the multi-head outputs

    kx, kp = jax.random.split(key)
    x = jax.random.normal(kx, (batch, input_size), dtype=jnp.float32)
    params = init_params(kp, input_size, list(output_vector))

    yhat = multisoftmax_ffnn_bigger_forward(x, params, output_vector)
    for y in yhat:
        jax.block_until_ready(y)

    assert len(yhat) == len(output_vector)
    for y, od in zip(yhat, output_vector):
        assert y.shape == (batch, od), (y.shape, od)
        assert bool(jnp.all(jnp.isfinite(y)))

    print("KERNEL_OK")
</pallas_src>

<mosaic_0001>
module attributes {stable_mosaic.version = 11 : i64} {
  func.func @_fused_forward_kernel(%arg0: memref<8x32xf32, #tpu.memory_space<vmem>>, %arg1: memref<32x2048xbf16, #tpu.memory_space<vmem>>, %arg2: memref<1x2048xf32, #tpu.memory_space<vmem>>, %arg3: memref<1x2048xf32, #tpu.memory_space<vmem>>, %arg4: memref<2048x1024xbf16, #tpu.memory_space<vmem>>, %arg5: memref<1x1024xf32, #tpu.memory_space<vmem>>, %arg6: memref<1x1024xf32, #tpu.memory_space<vmem>>, %arg7: memref<1024x512xbf16, #tpu.memory_space<vmem>>, %arg8: memref<1x512xf32, #tpu.memory_space<vmem>>, %arg9: memref<1x512xf32, #tpu.memory_space<vmem>>, %arg10: memref<512x256xbf16, #tpu.memory_space<vmem>>, %arg11: memref<1x256xf32, #tpu.memory_space<vmem>>, %arg12: memref<1x256xf32, #tpu.memory_space<vmem>>, %arg13: memref<256x128xbf16, #tpu.memory_space<vmem>>, %arg14: memref<1x128xf32, #tpu.memory_space<vmem>>, %arg15: memref<8x128xf32, #tpu.memory_space<vmem>>) attributes {dimension_semantics = [], scalar_prefetch = 0 : i64, scratch_operands = 0 : i64, tpu.core_type = #tpu.core_type<tc>} {
    %c0 = arith.constant 0 : index
    %c0_0 = arith.constant 0 : index
    %0 = vector.load %arg0[%c0, %c0_0] : memref<8x32xf32, #tpu.memory_space<vmem>>, vector<8x32xf32>
    %1 = arith.truncf %0 : vector<8x32xf32> to vector<8x32xbf16>
    %c0_1 = arith.constant 0 : index
    %c0_2 = arith.constant 0 : index
    %2 = vector.load %arg1[%c0_1, %c0_2] : memref<32x2048xbf16, #tpu.memory_space<vmem>>, vector<32x2048xbf16>
    %cst = arith.constant dense<0.000000e+00> : vector<8x2048xf32>
    %3 = tpu.matmul %1, %2, %cst {dimension_numbers = #tpu.dot_dimension_numbers<[1], [0], [0], [1], [0, 0, 1, 1], [], []>} : vector<8x32xbf16>, vector<32x2048xbf16>, vector<8x2048xf32> -> vector<8x2048xf32>
    %cst_3 = arith.constant dense<0.000000e+00> : vector<2048xf32>
    %4 = vector.multi_reduction <add>, %3, %cst_3 [0] : vector<8x2048xf32> to vector<2048xf32>
    %5 = vector.shape_cast %4 : vector<2048xf32> to vector<1x2048xf32>
    %cst_4 = arith.constant 8.000000e+00 : f32
    %6 = vector.broadcast %cst_4 : f32 to vector<1x2048xf32>
    %7 = arith.divf %5, %6 : vector<1x2048xf32>
    %8 = vector.broadcast %7 : vector<1x2048xf32> to vector<8x2048xf32>
    %9 = arith.subf %3, %8 : vector<8x2048xf32>
    %10 = arith.mulf %9, %9 : vector<8x2048xf32>
    %cst_5 = arith.constant dense<0.000000e+00> : vector<2048xf32>
    %11 = vector.multi_reduction <add>, %10, %cst_5 [0] : vector<8x2048xf32> to vector<2048xf32>
    %12 = vector.shape_cast %11 : vector<2048xf32> to vector<1x2048xf32>
    %cst_6 = arith.constant 8.000000e+00 : f32
    %13 = vector.broadcast %cst_6 : f32 to vector<1x2048xf32>
    %14 = arith.divf %12, %13 : vector<1x2048xf32>
    %15 = vector.broadcast %7 : vector<1x2048xf32> to vector<8x2048xf32>
    %16 = arith.subf %3, %15 : vector<8x2048xf32>
    %cst_7 = arith.constant 9.99999974E-6 : f32
    %17 = vector.broadcast %cst_7 : f32 to vector<1x2048xf32>
    %18 = arith.addf %14, %17 : vector<1x2048xf32>
    %19 = math.rsqrt %18 : vector<1x2048xf32>
    %20 = vector.broadcast %19 : vector<1x2048xf32> to vector<8x2048xf32>
    %21 = arith.mulf %16, %20 : vector<8x2048xf32>
    %c0_8 = arith.constant 0 : index
    %c0_9 = arith.constant 0 : index
    %22 = vector.load %arg2[%c0_8, %c0_9] : memref<1x2048xf32, #tpu.memory_space<vmem>>, vector<1x2048xf32>
    %23 = vector.broadcast %22 : vector<1x2048xf32> to vector<8x2048xf32>
    %24 = arith.mulf %21, %23 : vector<8x2048xf32>
    %c0_10 = arith.constant 0 : index
    %c0_11 = arith.constant 0 : index
    %25 = vector.load %arg3[%c0_10, %c0_11] : memref<1x2048xf32, #tpu.memory_space<vmem>>, vector<1x2048xf32>
    %26 = vector.broadcast %25 : vector<1x2048xf32> to vector<8x2048xf32>
    %27 = arith.addf %24, %26 : vector<8x2048xf32>
    %cst_12 = arith.constant 0.000000e+00 : f32
    %28 = vector.broadcast %cst_12 : f32 to vector<8x2048xf32>
    %29 = arith.maximumf %27, %28 : vector<8x2048xf32>
    %30 = arith.truncf %29 : vector<8x2048xf32> to vector<8x2048xbf16>
    %c0_13 = arith.constant 0 : index
    %c0_14 = arith.constant 0 : index
    %31 = vector.load %arg4[%c0_13, %c0_14] : memref<2048x1024xbf16, #tpu.memory_space<vmem>>, vector<2048x1024xbf16>
    %cst_15 = arith.constant dense<0.000000e+00> : vector<8x1024xf32>
    %32 = tpu.matmul %30, %31, %cst_15 {dimension_numbers = #tpu.dot_dimension_numbers<[1], [0], [0], [1], [0, 0, 1, 1], [], []>} : vector<8x2048xbf16>, vector<2048x1024xbf16>, vector<8x1024xf32> -> vector<8x1024xf32>
    %cst_16 = arith.constant dense<0.000000e+00> : vector<1024xf32>
    %33 = vector.multi_reduction <add>, %32, %cst_16 [0] : vector<8x1024xf32> to vector<1024xf32>
    %34 = vector.shape_cast %33 : vector<1024xf32> to vector<1x1024xf32>
    %cst_17 = arith.constant 8.000000e+00 : f32
    %35 = vector.broadcast %cst_17 : f32 to vector<1x1024xf32>
    %36 = arith.divf %34, %35 : vector<1x1024xf32>
    %37 = vector.broadcast %36 : vector<1x1024xf32> to vector<8x1024xf32>
    %38 = arith.subf %32, %37 : vector<8x1024xf32>
    %39 = arith.mulf %38, %38 : vector<8x1024xf32>
    %cst_18 = arith.constant dense<0.000000e+00> : vector<1024xf32>
    %40 = vector.multi_reduction <add>, %39, %cst_18 [0] : vector<8x1024xf32> to vector<1024xf32>
    %41 = vector.shape_cast %40 : vector<1024xf32> to vector<1x1024xf32>
    %cst_19 = arith.constant 8.000000e+00 : f32
    %42 = vector.broadcast %cst_19 : f32 to vector<1x1024xf32>
    %43 = arith.divf %41, %42 : vector<1x1024xf32>
    %44 = vector.broadcast %36 : vector<1x1024xf32> to vector<8x1024xf32>
    %45 = arith.subf %32, %44 : vector<8x1024xf32>
    %cst_20 = arith.constant 9.99999974E-6 : f32
    %46 = vector.broadcast %cst_20 : f32 to vector<1x1024xf32>
    %47 = arith.addf %43, %46 : vector<1x1024xf32>
    %48 = math.rsqrt %47 : vector<1x1024xf32>
    %49 = vector.broadcast %48 : vector<1x1024xf32> to vector<8x1024xf32>
    %50 = arith.mulf %45, %49 : vector<8x1024xf32>
    %c0_21 = arith.constant 0 : index
    %c0_22 = arith.constant 0 : index
    %51 = vector.load %arg5[%c0_21, %c0_22] : memref<1x1024xf32, #tpu.memory_space<vmem>>, vector<1x1024xf32>
    %52 = vector.broadcast %51 : vector<1x1024xf32> to vector<8x1024xf32>
    %53 = arith.mulf %50, %52 : vector<8x1024xf32>
    %c0_23 = arith.constant 0 : index
    %c0_24 = arith.constant 0 : index
    %54 = vector.load %arg6[%c0_23, %c0_24] : memref<1x1024xf32, #tpu.memory_space<vmem>>, vector<1x1024xf32>
    %55 = vector.broadcast %54 : vector<1x1024xf32> to vector<8x1024xf32>
    %56 = arith.addf %53, %55 : vector<8x1024xf32>
    %cst_25 = arith.constant 0.000000e+00 : f32
    %57 = vector.broadcast %cst_25 : f32 to vector<8x1024xf32>
    %58 = arith.maximumf %56, %57 : vector<8x1024xf32>
    %59 = arith.truncf %58 : vector<8x1024xf32> to vector<8x1024xbf16>
    %c0_26 = arith.constant 0 : index
    %c0_27 = arith.constant 0 : index
    %60 = vector.load %arg7[%c0_26, %c0_27] : memref<1024x512xbf16, #tpu.memory_space<vmem>>, vector<1024x512xbf16>
    %cst_28 = arith.constant dense<0.000000e+00> : vector<8x512xf32>
    %61 = tpu.matmul %59, %60, %cst_28 {dimension_numbers = #tpu.dot_dimension_numbers<[1], [0], [0], [1], [0, 0, 1, 1], [], []>} : vector<8x1024xbf16>, vector<1024x512xbf16>, vector<8x512xf32> -> vector<8x512xf32>
    %cst_29 = arith.constant dense<0.000000e+00> : vector<512xf32>
    %62 = vector.multi_reduction <add>, %61, %cst_29 [0] : vector<8x512xf32> to vector<512xf32>
    %63 = vector.shape_cast %62 : vector<512xf32> to vector<1x512xf32>
    %cst_30 = arith.constant 8.000000e+00 : f32
    %64 = vector.broadcast %cst_30 : f32 to vector<1x512xf32>
    %65 = arith.divf %63, %64 : vector<1x512xf32>
    %66 = vector.broadcast %65 : vector<1x512xf32> to vector<8x512xf32>
    %67 = arith.subf %61, %66 : vector<8x512xf32>
    %68 = arith.mulf %67, %67 : vector<8x512xf32>
    %cst_31 = arith.constant dense<0.000000e+00> : vector<512xf32>
    %69 = vector.multi_reduction <add>, %68, %cst_31 [0] : vector<8x512xf32> to vector<512xf32>
    %70 = vector.shape_cast %69 : vector<512xf32> to vector<1x512xf32>
    %cst_32 = arith.constant 8.000000e+00 : f32
    %71 = vector.broadcast %cst_32 : f32 to vector<1x512xf32>
    %72 = arith.divf %70, %71 : vector<1x512xf32>
    %73 = vector.broadcast %65 : vector<1x512xf32> to vector<8x512xf32>
    %74 = arith.subf %61, %73 : vector<8x512xf32>
    %cst_33 = arith.constant 9.99999974E-6 : f32
    %75 = vector.broadcast %cst_33 : f32 to vector<1x512xf32>
    %76 = arith.addf %72, %75 : vector<1x512xf32>
    %77 = math.rsqrt %76 : vector<1x512xf32>
    %78 = vector.broadcast %77 : vector<1x512xf32> to vector<8x512xf32>
    %79 = arith.mulf %74, %78 : vector<8x512xf32>
    %c0_34 = arith.constant 0 : index
    %c0_35 = arith.constant 0 : index
    %80 = vector.load %arg8[%c0_34, %c0_35] : memref<1x512xf32, #tpu.memory_space<vmem>>, vector<1x512xf32>
    %81 = vector.broadcast %80 : vector<1x512xf32> to vector<8x512xf32>
    %82 = arith.mulf %79, %81 : vector<8x512xf32>
    %c0_36 = arith.constant 0 : index
    %c0_37 = arith.constant 0 : index
    %83 = vector.load %arg9[%c0_36, %c0_37] : memref<1x512xf32, #tpu.memory_space<vmem>>, vector<1x512xf32>
    %84 = vector.broadcast %83 : vector<1x512xf32> to vector<8x512xf32>
    %85 = arith.addf %82, %84 : vector<8x512xf32>
    %cst_38 = arith.constant 0.000000e+00 : f32
    %86 = vector.broadcast %cst_38 : f32 to vector<8x512xf32>
    %87 = arith.maximumf %85, %86 : vector<8x512xf32>
    %88 = arith.truncf %87 : vector<8x512xf32> to vector<8x512xbf16>
    %c0_39 = arith.constant 0 : index
    %c0_40 = arith.constant 0 : index
    %89 = vector.load %arg10[%c0_39, %c0_40] : memref<512x256xbf16, #tpu.memory_space<vmem>>, vector<512x256xbf16>
    %cst_41 = arith.constant dense<0.000000e+00> : vector<8x256xf32>
    %90 = tpu.matmul %88, %89, %cst_41 {dimension_numbers = #tpu.dot_dimension_numbers<[1], [0], [0], [1], [0, 0, 1, 1], [], []>} : vector<8x512xbf16>, vector<512x256xbf16>, vector<8x256xf32> -> vector<8x256xf32>
    %cst_42 = arith.constant dense<0.000000e+00> : vector<256xf32>
    %91 = vector.multi_reduction <add>, %90, %cst_42 [0] : vector<8x256xf32> to vector<256xf32>
    %92 = vector.shape_cast %91 : vector<256xf32> to vector<1x256xf32>
    %cst_43 = arith.constant 8.000000e+00 : f32
    %93 = vector.broadcast %cst_43 : f32 to vector<1x256xf32>
    %94 = arith.divf %92, %93 : vector<1x256xf32>
    %95 = vector.broadcast %94 : vector<1x256xf32> to vector<8x256xf32>
    %96 = arith.subf %90, %95 : vector<8x256xf32>
    %97 = arith.mulf %96, %96 : vector<8x256xf32>
    %cst_44 = arith.constant dense<0.000000e+00> : vector<256xf32>
    %98 = vector.multi_reduction <add>, %97, %cst_44 [0] : vector<8x256xf32> to vector<256xf32>
    %99 = vector.shape_cast %98 : vector<256xf32> to vector<1x256xf32>
    %cst_45 = arith.constant 8.000000e+00 : f32
    %100 = vector.broadcast %cst_45 : f32 to vector<1x256xf32>
    %101 = arith.divf %99, %100 : vector<1x256xf32>
    %102 = vector.broadcast %94 : vector<1x256xf32> to vector<8x256xf32>
    %103 = arith.subf %90, %102 : vector<8x256xf32>
    %cst_46 = arith.constant 9.99999974E-6 : f32
    %104 = vector.broadcast %cst_46 : f32 to vector<1x256xf32>
    %105 = arith.addf %101, %104 : vector<1x256xf32>
    %106 = math.rsqrt %105 : vector<1x256xf32>
    %107 = vector.broadcast %106 : vector<1x256xf32> to vector<8x256xf32>
    %108 = arith.mulf %103, %107 : vector<8x256xf32>
    %c0_47 = arith.constant 0 : index
    %c0_48 = arith.constant 0 : index
    %109 = vector.load %arg11[%c0_47, %c0_48] : memref<1x256xf32, #tpu.memory_space<vmem>>, vector<1x256xf32>
    %110 = vector.broadcast %109 : vector<1x256xf32> to vector<8x256xf32>
    %111 = arith.mulf %108, %110 : vector<8x256xf32>
    %c0_49 = arith.constant 0 : index
    %c0_50 = arith.constant 0 : index
    %112 = vector.load %arg12[%c0_49, %c0_50] : memref<1x256xf32, #tpu.memory_space<vmem>>, vector<1x256xf32>
    %113 = vector.broadcast %112 : vector<1x256xf32> to vector<8x256xf32>
    %114 = arith.addf %111, %113 : vector<8x256xf32>
    %cst_51 = arith.constant 0.000000e+00 : f32
    %115 = vector.broadcast %cst_51 : f32 to vector<8x256xf32>
    %116 = arith.maximumf %114, %115 : vector<8x256xf32>
    %117 = arith.truncf %116 : vector<8x256xf32> to vector<8x256xbf16>
    %c0_52 = arith.constant 0 : index
    %c0_53 = arith.constant 0 : index
    %118 = vector.load %arg13[%c0_52, %c0_53] : memref<256x128xbf16, #tpu.memory_space<vmem>>, vector<256x128xbf16>
    %cst_54 = arith.constant dense<0.000000e+00> : vector<8x128xf32>
    %119 = tpu.matmul %117, %118, %cst_54 {dimension_numbers = #tpu.dot_dimension_numbers<[1], [0], [0], [1], [0, 0, 1, 1], [], []>} : vector<8x256xbf16>, vector<256x128xbf16>, vector<8x128xf32> -> vector<8x128xf32>
    %c0_55 = arith.constant 0 : index
    %c0_56 = arith.constant 0 : index
    %120 = vector.load %arg14[%c0_55, %c0_56] : memref<1x128xf32, #tpu.memory_space<vmem>>, vector<1x128xf32>
    %121 = vector.broadcast %120 : vector<1x128xf32> to vector<8x128xf32>
    %122 = arith.addf %119, %121 : vector<8x128xf32>
    %c0_57 = arith.constant 0 : index
    %c0_58 = arith.constant 0 : index
    %123 = vector.load %arg15[%c0_57, %c0_58] : memref<8x128xf32, #tpu.memory_space<vmem>>, vector<8x128xf32>
    tpu.vector_store %arg15[%c0_57, %c0_58], %122 {strides = array<i32>} : memref<8x128xf32, #tpu.memory_space<vmem>>, vector<8x128xf32>,
    return
  }
}

</mosaic_0001>

<bundles_post_ra>
// kernel: multisoftmax_ffnn_bigger_forward.1
= control target key start
LH: loop header
LB: loop body
LE: loop exit
PB: predicated region body
PF: predicated region fallthrough
CT: control target
= control target key end

     0   :  { %s15138_s0 = inlined_call_operand.hbm [shape: f32[8,32], index: 0, kind: input, shape index: {}]   ;;  %s15139_s1 = inlined_call_operand.hbm [shape: bf16[32,2048], index: 1, kind: input, shape index: {}]   ;;  %s15140_s2 = inlined_call_operand.hbm [shape: f32[1,2048], index: 2, kind: input, shape index: {}]   ;;  %s15141_s3 = inlined_call_operand.hbm [shape: f32[1,2048], index: 3, kind: input, shape index: {}]   ;;  %s15142_s4 = inlined_call_operand.hbm [shape: bf16[2048,1024], index: 4, kind: input, shape index: {}]   ;;  %s15143_s5 = inlined_call_operand.hbm [shape: f32[1,1024], index: 5, kind: input, shape index: {}]   ;;  %s15144_s6 = inlined_call_operand.hbm [shape: f32[1,1024], index: 6, kind: input, shape index: {}]   ;;  %s15145_s7 = inlined_call_operand.hbm [shape: bf16[1024,512], index: 7, kind: input, shape index: {}]   ;;  %s15146_s8 = inlined_call_operand.hbm [shape: f32[1,512], index: 8, kind: input, shape index: {}]   ;;  %s15147_s9 = inlined_call_operand.hbm [shape: f32[1,512], index: 9, kind: input, shape index: {}]   ;;  %s15148_s10 = inlined_call_operand.hbm [shape: bf16[512,256], index: 10, kind: input, shape index: {}]   ;;  %s15149_s11 = inlined_call_operand.hbm [shape: f32[1,256], index: 11, kind: input, shape index: {}]   ;;  %s15150_s12 = inlined_call_operand.hbm [shape: f32[1,256], index: 12, kind: input, shape index: {}]   ;;  %s15151_s13 = inlined_call_operand.hbm [shape: bf16[256,128], index: 13, kind: input, shape index: {}]   ;;  %s15152_s14 = inlined_call_operand.hbm [shape: f32[1,128], index: 14, kind: input, shape index: {}]   ;;  %s15153_s15 = inlined_call_operand.vmem [shape: f32[8,128], index: 15, kind: output, shape index: {}]  }
   0x1   :  { %15158 = sst [smem:[#allocation35_spill]] %s15153_s15 }
   0x2   :  { %20 = vsyncpa [#allocation3], 0 }
   0x3   :  { %21 = vsyncpa [#allocation5], 0 }
   0x4   :  { %22 = vsyncpa [#allocation8], 0 }
   0x5   :  { %23 = vsyncpa [#allocation11], 0 }
   0x6   :  { %24 = vsyncpa [#allocation14], 0 }
   0x7   :  { %25 = vsyncpa [#allocation17], 0 }
   0x8   :  { %26 = vsyncpa [#allocation20], 0 }
   0x9   :  { %27 = vsyncpa [#allocation23], 0  ;;  %s14239_s18 = smov [#allocation4]   ;;  %s13893_s22 = scalar_lea.hbm %s15139_s1, 4096 }
   0xa   :  { %s43_s19 = sshll.u32 %s14239_s18, 4  ;;  %p13894_p0 = scmp.ne.s32.totalorder %s15139_s1, %s13893_s22  ;;  %s44_s19 = int_to_ptr.vmem [resolvable:$true] %s43_s19 }
   0xb   :  { %p13897_p1 = scmp.lt.u32.totalorder %s13893_s22, %s15139_s1 }
   0xd   :  { %p13899_p2 = pnand %p13897_p1, %p13894_p0 }
   0xf   :  { %13902 = shalt.err (!%p13899_p2)
}
  0x10   :  { %s13903_s27 = scalar_lea.vmem %s44_s19, 4096  ;;  %p13908_p4 = scmp.lt.s32.totalorder %s44_s19, %s44_s19 }
  0x11   :  { %p13904_p3 = scmp.ne.s32.totalorder %s44_s19, %s13903_s27  ;;  %p13909_p5 = scmp.lt.s32.totalorder %s13903_s27, %s13903_s27 }
  0x13   :  { %p13910_p6 = por %p13909_p5, %p13908_p4 }
  0x15   :  { %p13911_p7 = pnand %p13910_p6, %p13904_p3 }
  0x17   :  { %13914 = shalt.err (!%p13911_p7)
}
  0x18   :  { %s14240_s28 = smov 1024   ;;  %s14241_s29 = smov 64  }
  0x19   :  { %49 = dma.hbm_to_vmem [thread:$0]  %s15139_s1, 4096, %s44_s19, [#allocation5], %s14240_s28, %s14240_s28, %s14241_s29  }
  0x1a   :  { %s14242_s17 = smov [#allocation7]   ;;  %s14243_s20 = smov [#allocation10]  }
  0x1b   :  { %s66_s18 = sshll.u32 %s14242_s17, 4  ;;  %s88_s21 = sshll.u32 %s14243_s20, 4  ;;  %s67_s18 = int_to_ptr.vmem [resolvable:$true] %s66_s18  ;;  %s89_s21 = int_to_ptr.vmem [resolvable:$true] %s88_s21 }
  0x1c   :  { %s13915_s24 = scalar_lea.hbm %s15141_s3, 256 }
  0x1d   :  { %p13916_p8 = scmp.ne.s32.totalorder %s15141_s3, %s13915_s24  ;;  %p13919_p9 = scmp.lt.u32.totalorder %s13915_s24, %s15141_s3 }
  0x1f   :  { %p13921_p10 = pnand %p13919_p9, %p13916_p8 }
  0x21   :  { %13924 = shalt.err (!%p13921_p10)
}
  0x22   :  { %s13925_s1 = scalar_lea.vmem %s67_s18, 256  ;;  %p13930_p12 = scmp.lt.s32.totalorder %s67_s18, %s67_s18 }
  0x23   :  { %p13926_p11 = scmp.ne.s32.totalorder %s67_s18, %s13925_s1  ;;  %p13931_p13 = scmp.lt.s32.totalorder %s13925_s1, %s13925_s1 }
  0x25   :  { %p13932_p0 = por %p13931_p13, %p13930_p12 }
  0x27   :  { %p13933_p1 = pnand %p13932_p0, %p13926_p11 }
  0x29   :  { %13936 = shalt.err (!%p13933_p1)
}
  0x2a   :  { %69 = dma.hbm_to_vmem [thread:$0]  %s15141_s3, 256, %s67_s18, [#allocation8]  }
  0x2b   :  { %s13937_s17 = scalar_lea.hbm %s15143_s5, 128 }
  0x2c   :  { %p13938_p2 = scmp.ne.s32.totalorder %s15143_s5, %s13937_s17  ;;  %p13941_p3 = scmp.lt.u32.totalorder %s13937_s17, %s15143_s5 }
  0x2e   :  { %p13943_p4 = pnand %p13941_p3, %p13938_p2 }
  0x30   :  { %13946 = shalt.err (!%p13943_p4)
}
  0x31   :  { %s13947_s24 = scalar_lea.vmem %s89_s21, 128  ;;  %p13952_p6 = scmp.lt.s32.totalorder %s89_s21, %s89_s21 }
  0x32   :  { %p13948_p5 = scmp.ne.s32.totalorder %s89_s21, %s13947_s24  ;;  %p13953_p7 = scmp.lt.s32.totalorder %s13947_s24, %s13947_s24 }
  0x34   :  { %p13954_p8 = por %p13953_p7, %p13952_p6 }
  0x36   :  { %p13955_p9 = pnand %p13954_p8, %p13948_p5 }
  0x38   :  { %13958 = shalt.err (!%p13955_p9)
}
  0x39   :  { %91 = dma.hbm_to_vmem [thread:$0]  %s15143_s5, 128, %s89_s21, [#allocation11]  }
  0x3a   :  { %s14244_s25 = smov [#allocation13]   ;;  %s13959_s19 = scalar_lea.hbm %s15145_s7, 32768 }
  0x3b   :  { %s107_s26 = sshll.u32 %s14244_s25, 4  ;;  %p13960_p10 = scmp.ne.s32.totalorder %s15145_s7, %s13959_s19  ;;  %s108_s26 = int_to_ptr.vmem [resolvable:$true] %s107_s26 }
  0x3c   :  { %p13963_p11 = scmp.lt.u32.totalorder %s13959_s19, %s15145_s7 }
  0x3e   :  { %p13965_p12 = pnand %p13963_p11, %p13960_p10 }
  0x40   :  { %13968 = shalt.err (!%p13965_p12)
}
  0x41   :  { %s13969_s15 = scalar_lea.vmem %s108_s26, 32768  ;;  %p13974_p0 = scmp.lt.s32.totalorder %s108_s26, %s108_s26 }
  0x42   :  { %p13970_p13 = scmp.ne.s32.totalorder %s108_s26, %s13969_s15  ;;  %p13975_p1 = scmp.lt.s32.totalorder %s13969_s15, %s13969_s15 }
  0x44   :  { %p13976_p2 = por %p13975_p1, %p13974_p0 }
  0x46   :  { %p13977_p3 = pnand %p13976_p2, %p13970_p13 }
  0x48   :  { %13980 = shalt.err (!%p13977_p3)
}
  0x49   :  { %s14245_s5 = smov 256   ;;  %s14246_s21 = smov 16  }
  0x4a   :  { %113 = dma.hbm_to_vmem [thread:$0]  %s15145_s7, 32768, %s108_s26, [#allocation14], %s14245_s5, %s14245_s5, %s14246_s21  }
  0x4b   :  { %s14247_s23 = smov [#allocation16]   ;;  %s14248_s3 = smov [#allocation19]  }
  0x4c   :  { %s130_s24 = sshll.u32 %s14247_s23, 4  ;;  %s152_s18 = sshll.u32 %s14248_s3, 4  ;;  %s131_s24 = int_to_ptr.vmem [resolvable:$true] %s130_s24  ;;  %s153_s18 = int_to_ptr.vmem [resolvable:$true] %s152_s18 }
  0x4d   :  { %s13981_s1 = scalar_lea.hbm %s15147_s9, 64 }
  0x4e   :  { %p13982_p4 = scmp.ne.s32.totalorder %s15147_s9, %s13981_s1  ;;  %p13985_p5 = scmp.lt.u32.totalorder %s13981_s1, %s15147_s9 }
  0x50   :  { %p13987_p6 = pnand %p13985_p5, %p13982_p4 }
  0x52   :  { %13990 = shalt.err (!%p13987_p6)
}
  0x53   :  { %s13991_s7 = scalar_lea.vmem %s131_s24, 64  ;;  %p13996_p8 = scmp.lt.s32.totalorder %s131_s24, %s131_s24 }
  0x54   :  { %p13992_p7 = scmp.ne.s32.totalorder %s131_s24, %s13991_s7  ;;  %p13997_p9 = scmp.lt.s32.totalorder %s13991_s7, %s13991_s7 }
  0x56   :  { %p13998_p10 = por %p13997_p9, %p13996_p8 }
  0x58   :  { %p13999_p11 = pnand %p13998_p10, %p13992_p7 }
  0x5a   :  { %14002 = shalt.err (!%p13999_p11)
}
  0x5b   :  { %133 = dma.hbm_to_vmem [thread:$0]  %s15147_s9, 64, %s131_s24, [#allocation17]  }
  0x5c   :  { %s14003_s21 = scalar_lea.hbm %s15149_s11, 32 }
  0x5d   :  { %p14004_p12 = scmp.ne.s32.totalorder %s15149_s11, %s14003_s21  ;;  %p14007_p13 = scmp.lt.u32.totalorder %s14003_s21, %s15149_s11 }
  0x5f   :  { %p14009_p0 = pnand %p14007_p13, %p14004_p12 }
  0x61   :  { %14012 = shalt.err (!%p14009_p0)
}
  0x62   :  { %s14013_s25 = scalar_lea.vmem %s153_s18, 32  ;;  %p14018_p2 = scmp.lt.s32.totalorder %s153_s18, %s153_s18 }
  0x63   :  { %p14014_p1 = scmp.ne.s32.totalorder %s153_s18, %s14013_s25  ;;  %p14019_p3 = scmp.lt.s32.totalorder %s14013_s25, %s14013_s25 }
  0x65   :  { %p14020_p4 = por %p14019_p3, %p14018_p2 }
  0x67   :  { %p14021_p5 = pnand %p14020_p4, %p14014_p1 }
  0x69   :  { %14024 = shalt.err (!%p14021_p5)
}
  0x6a   :  { %155 = dma.hbm_to_vmem [thread:$0]  %s15149_s11, 32, %s153_s18, [#allocation20]  }
  0x6b   :  { %s14249_s27 = smov [#allocation22]   ;;  %s14250_s19 = smov [#allocation2]  }
  0x6c   :  { %s171_s1 = sshll.u32 %s14249_s27, 4  ;;  %s34_s28 = sshll.u32 %s14250_s19, 4  ;;  %s172_s1 = int_to_ptr.vmem [resolvable:$true] %s171_s1  ;;  %s35_s28 = int_to_ptr.vmem [resolvable:$true] %s34_s28 }
  0x6d   :  { %s14025_s7 = scalar_lea.hbm %s15151_s13, 2048 }
  0x6e   :  { %p14026_p6 = scmp.ne.s32.totalorder %s15151_s13, %s14025_s7  ;;  %p14029_p7 = scmp.lt.u32.totalorder %s14025_s7, %s15151_s13 }
  0x70   :  { %p14031_p8 = pnand %p14029_p7, %p14026_p6 }
  0x72   :  { %14034 = shalt.err (!%p14031_p8)
}
  0x73   :  { %s14035_s11 = scalar_lea.vmem %s172_s1, 2048  ;;  %p14040_p10 = scmp.lt.s32.totalorder %s172_s1, %s172_s1 }
  0x74   :  { %p14036_p9 = scmp.ne.s32.totalorder %s172_s1, %s14035_s11  ;;  %p14041_p11 = scmp.lt.s32.totalorder %s14035_s11, %s14035_s11 }
  0x76   :  { %p14042_p12 = por %p14041_p11, %p14040_p10 }
  0x78   :  { %p14043_p13 = pnand %p14042_p12, %p14036_p9 }
  0x7a   :  { %14046 = shalt.err (!%p14043_p13)
}
  0x7b   :  { %s14251_s18 = smov 4   ;;  %s14047_s3 = scalar_lea.hbm %s15138_s0, 128 }
  0x7c   :  { %177 = dma.hbm_to_vmem [thread:$0]  %s15151_s13, 2048, %s172_s1, [#allocation23], %s14241_s29, %s14241_s29, %s14251_s18  }
  0x7d   :  { %p14048_p0 = scmp.ne.s32.totalorder %s15138_s0, %s14047_s3  ;;  %p14051_p1 = scmp.lt.u32.totalorder %s14047_s3, %s15138_s0 }
  0x7f   :  { %p14053_p2 = pnand %p14051_p1, %p14048_p0 }
  0x81   :  { %14056 = shalt.err (!%p14053_p2)
}
  0x82   :  { %s14057_s19 = scalar_lea.vmem %s35_s28, 128  ;;  %p14062_p4 = scmp.lt.s32.totalorder %s35_s28, %s35_s28 }
  0x83   :  { %p14058_p3 = scmp.ne.s32.totalorder %s35_s28, %s14057_s19  ;;  %p14063_p5 = scmp.lt.s32.totalorder %s14057_s19, %s14057_s19 }
  0x85   :  { %p14064_p6 = por %p14063_p5, %p14062_p4 }
  0x87   :  { %p14065_p7 = pnand %p14064_p6, %p14058_p3 }
  0x89   :  { %14068 = shalt.err (!%p14065_p7)
}
  0x8a   :  { %37 = dma.hbm_to_vmem [thread:$0]  %s15138_s0, 128, %s35_s28, [#allocation3]  }
  0x8b   :  { %s14252_s1 = smov [#allocation6]   ;;  %s14253_s16 = smov [#allocation9]  }
  0x8c   :  { %s56_s30 = sshll.u32 %s14252_s1, 4  ;;  %s75_s7 = sshll.u32 %s14253_s16, 4  ;;  %s57_s30 = int_to_ptr.vmem [resolvable:$true] %s56_s30  ;;  %s76_s7 = int_to_ptr.vmem [resolvable:$true] %s75_s7 }
  0x8d   :  { %s14069_s15 = scalar_lea.hbm %s15140_s2, 256 }
  0x8e   :  { %p14070_p8 = scmp.ne.s32.totalorder %s15140_s2, %s14069_s15  ;;  %p14073_p9 = scmp.lt.u32.totalorder %s14069_s15, %s15140_s2 }
  0x90   :  { %p14075_p10 = pnand %p14073_p9, %p14070_p8 }
  0x92   :  { %14078 = shalt.err (!%p14075_p10)
}
  0x93   :  { %s14079_s0 = scalar_lea.vmem %s57_s30, 256  ;;  %p14084_p12 = scmp.lt.s32.totalorder %s57_s30, %s57_s30 }
  0x94   :  { %p14080_p11 = scmp.ne.s32.totalorder %s57_s30, %s14079_s0  ;;  %p14085_p13 = scmp.lt.s32.totalorder %s14079_s0, %s14079_s0 }
  0x96   :  { %p14086_p0 = por %p14085_p13, %p14084_p12 }
  0x98   :  { %p14087_p1 = pnand %p14086_p0, %p14080_p11 }
  0x9a   :  { %14090 = shalt.err (!%p14087_p1)
}
  0x9b   :  { %59 = dma.hbm_to_vmem [thread:$0]  %s15140_s2, 256, %s57_s30, [#allocation5]  }
  0x9c   :  { %s14091_s3 = scalar_lea.hbm %s15142_s4, 131072 }
  0x9d   :  { %p14092_p2 = scmp.ne.s32.totalorder %s15142_s4, %s14091_s3  ;;  %p14095_p3 = scmp.lt.u32.totalorder %s14091_s3, %s15142_s4 }
  0x9f   :  { %p14097_p4 = pnand %p14095_p3, %p14092_p2 }
  0xa1   :  { %14100 = shalt.err (!%p14097_p4)
}
  0xa2   :  { %s14101_s19 = scalar_lea.vmem %s76_s7, 131072  ;;  %p14106_p6 = scmp.lt.s32.totalorder %s76_s7, %s76_s7 }
  0xa3   :  { %p14102_p5 = scmp.ne.s32.totalorder %s76_s7, %s14101_s19  ;;  %p14107_p7 = scmp.lt.s32.totalorder %s14101_s19, %s14101_s19 }
  0xa5   :  { %p14108_p8 = por %p14107_p7, %p14106_p6 }
  0xa7   :  { %p14109_p9 = pnand %p14108_p8, %p14102_p5 }
  0xa9   :  { %14112 = shalt.err (!%p14109_p9)
}
  0xaa   :  { %s14254_s2 = smov 512   ;;  %s14255_s13 = smov 32  }
  0xab   :  { %81 = dma.hbm_to_vmem [thread:$0]  %s15142_s4, 131072, %s76_s7, [#allocation8], %s14254_s2, %s14254_s2, %s14255_s13  }
  0xac   :  { %s14256_s30 = smov [#allocation12]   ;;  %s14257_s26 = smov [#allocation15]  }
  0xad   :  { %s98_s16 = sshll.u32 %s14256_s30, 4  ;;  %s120_s17 = sshll.u32 %s14257_s26, 4  ;;  %s99_s16 = int_to_ptr.vmem [resolvable:$true] %s98_s16  ;;  %s121_s17 = int_to_ptr.vmem [resolvable:$true] %s120_s17 }
  0xae   :  { %s14113_s11 = scalar_lea.hbm %s15144_s6, 128 }
  0xaf   :  { %p14114_p10 = scmp.ne.s32.totalorder %s15144_s6, %s14113_s11  ;;  %p14117_p11 = scmp.lt.u32.totalorder %s14113_s11, %s15144_s6 }
  0xb1   :  { %p14119_p12 = pnand %p14117_p11, %p14114_p10 }
  0xb3   :  { %14122 = shalt.err (!%p14119_p12)
}
  0xb4   :  { %s14123_s4 = scalar_lea.vmem %s99_s16, 128  ;;  %p14128_p0 = scmp.lt.s32.totalorder %s99_s16, %s99_s16 }
  0xb5   :  { %p14124_p13 = scmp.ne.s32.totalorder %s99_s16, %s14123_s4  ;;  %p14129_p1 = scmp.lt.s32.totalorder %s14123_s4, %s14123_s4 }
  0xb7   :  { %p14130_p2 = por %p14129_p1, %p14128_p0 }
  0xb9   :  { %p14131_p3 = pnand %p14130_p2, %p14124_p13 }
  0xbb   :  { %14134 = shalt.err (!%p14131_p3)
}
  0xbc   :  { %101 = dma.hbm_to_vmem [thread:$0]  %s15144_s6, 128, %s99_s16, [#allocation11]  }
  0xbd   :  { %s14135_s3 = scalar_lea.hbm %s15146_s8, 64 }
  0xbe   :  { %p14136_p4 = scmp.ne.s32.totalorder %s15146_s8, %s14135_s3  ;;  %p14139_p5 = scmp.lt.u32.totalorder %s14135_s3, %s15146_s8 }
  0xc0   :  { %p14141_p6 = pnand %p14139_p5, %p14136_p4 }
  0xc2   :  { %14144 = shalt.err (!%p14141_p6)
}
  0xc3   :  { %s14145_s19 = scalar_lea.vmem %s121_s17, 64  ;;  %p14150_p8 = scmp.lt.s32.totalorder %s121_s17, %s121_s17 }
  0xc4   :  { %p14146_p7 = scmp.ne.s32.totalorder %s121_s17, %s14145_s19  ;;  %p14151_p9 = scmp.lt.s32.totalorder %s14145_s19, %s14145_s19 }
  0xc6   :  { %p14152_p10 = por %p14151_p9, %p14150_p8 }
  0xc8   :  { %p14153_p11 = pnand %p14152_p10, %p14146_p7 }
  0xca   :  { %14156 = shalt.err (!%p14153_p11)
}
  0xcb   :  { %123 = dma.hbm_to_vmem [thread:$0]  %s15146_s8, 64, %s121_s17, [#allocation14]  }
  0xcc   :  { %s14258_s13 = smov [#allocation18]   ;;  %s14157_s16 = scalar_lea.hbm %s15148_s10, 8192 }
  0xcd   :  { %s139_s29 = sshll.u32 %s14258_s13, 4  ;;  %p14158_p12 = scmp.ne.s32.totalorder %s15148_s10, %s14157_s16  ;;  %s140_s29 = int_to_ptr.vmem [resolvable:$true] %s139_s29 }
  0xce   :  { %p14161_p13 = scmp.lt.u32.totalorder %s14157_s16, %s15148_s10 }
  0xd0   :  { %p14163_p0 = pnand %p14161_p13, %p14158_p12 }
  0xd2   :  { %14166 = shalt.err (!%p14163_p0)
}
  0xd3   :  { %s14167_s18 = scalar_lea.vmem %s140_s29, 8192  ;;  %p14172_p2 = scmp.lt.s32.totalorder %s140_s29, %s140_s29 }
  0xd4   :  { %p14168_p1 = scmp.ne.s32.totalorder %s140_s29, %s14167_s18  ;;  %p14173_p3 = scmp.lt.s32.totalorder %s14167_s18, %s14167_s18 }
  0xd6   :  { %p14174_p4 = por %p14173_p3, %p14172_p2 }
  0xd8   :  { %p14175_p5 = pnand %p14174_p4, %p14168_p1 }
  0xda   :  { %14178 = shalt.err (!%p14175_p5)
}
  0xdb   :  { %s14259_s8 = smov 128   ;;  %s14260_s17 = smov 8  }
  0xdc   :  { %145 = dma.hbm_to_vmem [thread:$0]  %s15148_s10, 8192, %s140_s29, [#allocation17], %s14259_s8, %s14259_s8, %s14260_s17  }
  0xdd   :  { %s14261_s28 = smov [#allocation21]   ;;  %s14262_s7 = smov [#allocation24]  }
  0xde   :  { %s162_s4 = sshll.u32 %s14261_s28, 4  ;;  %s184_s20 = sshll.u32 %s14262_s7, 4  ;;  %s163_s4 = int_to_ptr.vmem [resolvable:$true] %s162_s4  ;;  %s185_s20 = int_to_ptr.vmem [resolvable:$true] %s184_s20 }
  0xdf   :  { %s14179_s3 = scalar_lea.hbm %s15150_s12, 32 }
  0xe0   :  { %p14180_p6 = scmp.ne.s32.totalorder %s15150_s12, %s14179_s3  ;;  %p14183_p7 = scmp.lt.u32.totalorder %s14179_s3, %s15150_s12 }
  0xe2   :  { %p14185_p8 = pnand %p14183_p7, %p14180_p6 }
  0xe4   :  { %14188 = shalt.err (!%p14185_p8)
}
  0xe5   :  { %s14189_s10 = scalar_lea.vmem %s163_s4, 32  ;;  %p14194_p10 = scmp.lt.s32.totalorder %s163_s4, %s163_s4 }
  0xe6   :  { %p14190_p9 = scmp.ne.s32.totalorder %s163_s4, %s14189_s10  ;;  %p14195_p11 = scmp.lt.s32.totalorder %s14189_s10, %s14189_s10 }
  0xe8   :  { %p14196_p12 = por %p14195_p11, %p14194_p10 }
  0xea   :  { %p14197_p13 = pnand %p14196_p12, %p14190_p9 }
  0xec   :  { %14200 = shalt.err (!%p14197_p13)
}
  0xed   :  { %165 = dma.hbm_to_vmem [thread:$0]  %s15150_s12, 32, %s163_s4, [#allocation20]  }
  0xee   :  { %s14201_s29 = scalar_lea.hbm %s15152_s14, 16 }
  0xef   :  { %p14202_p0 = scmp.ne.s32.totalorder %s15152_s14, %s14201_s29  ;;  %p14205_p1 = scmp.lt.u32.totalorder %s14201_s29, %s15152_s14 }
  0xf1   :  { %p14207_p2 = pnand %p14205_p1, %p14202_p0 }
  0xf3   :  { %14210 = shalt.err (!%p14207_p2)
}
  0xf4   :  { %s14211_s15 = scalar_lea.vmem %s185_s20, 16  ;;  %s14215_s5 = scalar_lea.vmem %s185_s20, 32 }
  0xf5   :  { %p14212_p3 = scmp.ne.s32.totalorder %s185_s20, %s14211_s15  ;;  %p14216_p4 = scmp.lt.s32.totalorder %s185_s20, %s185_s20 }
  0xf6   :  { %p14217_p5 = scmp.lt.s32.totalorder %s14215_s5, %s14211_s15 }
  0xf8   :  { %p14218_p6 = por %p14217_p5, %p14216_p4 }
  0xfa   :  { %p14219_p7 = pnand %p14218_p6, %p14212_p3 }
  0xfc   :  { %14222 = shalt.err (!%p14219_p7)
}
  0xfd   :  { %187 = dma.hbm_to_vmem [thread:$0]  %s15152_s14, 16, %s185_s20, [#allocation23]  }
  0xfe   :  { %14223 = dma.done.wait [#allocation3], 128  }
  0xff   :  { %14224 = vsyncadd [#allocation3], 4294967168 }
 0x100   :  { %14225 = dma.done.wait [#allocation5], 4352  }
 0x101   :  { %14226 = vsyncadd [#allocation5], 4294962944 }
 0x102   :  { %14227 = dma.done.wait [#allocation8], 131328  }
 0x103   :  { %14228 = vsyncadd [#allocation8], 4294835968 }
 0x104   :  { %14229 = dma.done.wait [#allocation11], 256  }
 0x105   :  { %14230 = vsyncadd [#allocation11], 4294967040 }
 0x106   :  { %14231 = dma.done.wait [#allocation14], 32832  }
 0x107   :  { %14232 = vsyncadd [#allocation14], 4294934464 }
 0x108   :  { %14233 = dma.done.wait [#allocation17], 8256  }
 0x109   :  { %14234 = vsyncadd [#allocation17], 4294959040 }
 0x10a   :  { %14235 = dma.done.wait [#allocation20], 64  }
 0x10b   :  { %14236 = vsyncadd [#allocation20], 4294967232 }
 0x10c   :  { %14237 = dma.done.wait [#allocation23], 2064  }
 0x10d   :  { %14238 = vsyncadd [#allocation23], 4294965232  ;;  %v14263_v0 = vmov 0   ;;  %v236_v1 = vld [vmem:[#allocation4] sm:$0xff]  ;;  %v237_v8 = vld [vmem:[#allocation4 + $0x8] sm:$0xff]  ;;  %vm428_vm0 = vcmask 261120  }
 0x10e   :  { %464 = vmatprep.mubr.bf16.mxu0 %v14263_v0  ;;  %669 = vmatprep.mubr.bf16.mxu1 %v14263_v0  ;;  %v244_v2 = vld [vmem:[#allocation4 + $0x40] sm:$0xff]  ;;  %v245_v9 = vld [vmem:[#allocation4 + $0x48] sm:$0xff]  ;;  %v234_v11 = vld [vmem:[#allocation2] sm:$0xff]  ;;  %s15170_s8 = sld [smem:[#allocation35_spill]] }
 0x10f   :  { %v252_v3 = vld [vmem:[#allocation4 + $0x80] sm:$0xff]  ;;  %v11746_v4 = vcombine.high %v236_v1, %v244_v2  ;;  %v11745_v5 = vcombine.low %v236_v1, %v244_v2  ;;  %v11748_v12 = vcombine.high %v237_v8, %v245_v9  ;;  %v253_v13 = vld [vmem:[#allocation4 + $0x88] sm:$0xff]  ;;  %v14529_v19 = vpack.c.bf16 %v234_v11, %v234_v11  ;;  %v243_v24 = vld [vmem:[#allocation4 + $0x38] sm:$0xff] }
 0x110   :  { %v260_v6 = vld [vmem:[#allocation4 + $0xc0] sm:$0xff]  ;;  %v261_v14 = vld [vmem:[#allocation4 + $0xc8] sm:$0xff]  ;;  %v11747_v23 = vcombine.low %v237_v8, %v245_v9  ;;  %v251_v25 = vld [vmem:[#allocation4 + $0x78] sm:$0xff] }
 0x111   :  { %v11762_v7 = vcombine.high %v252_v3, %v260_v6  ;;  %432 = vmatprep.subr.bf16.mxu0 %v11746_v4  ;;  %v11761_v10 = vcombine.low %v252_v3, %v260_v6  ;;  %v241_v15 = vld [vmem:[#allocation4 + $0x28] sm:$0xff]  ;;  %v11764_v26 = vcombine.high %v253_v13, %v261_v14  ;;  %v238_v27 = vld [vmem:[#allocation4 + $0x10] sm:$0xff]  ;;  %v11760_v30 = vcombine.high %v243_v24, %v251_v25  ;;  %v259_v31 = vld [vmem:[#allocation4 + $0xb8] sm:$0xff] }
 0x112   :  { %433 = vmatpush1.bf16.msra.mxu0 %v11745_v5  ;;  %v249_v16 = vld [vmem:[#allocation4 + $0x68] sm:$0xff]  ;;  %v246_v28 = vld [vmem:[#allocation4 + $0x50] sm:$0xff]  ;;  %v11763_v32 = vcombine.low %v253_v13, %v261_v14  ;;  %v267_v35 = vld [vmem:[#allocation4 + $0xf8] sm:$0xff]  ;;  %v11759_v37 = vcombine.low %v243_v24, %v251_v25 }
 0x113   :  { %434 = vmatprep.subr.bf16.mxu0 %v11762_v7  ;;  %v257_v17 = vld [vmem:[#allocation4 + $0xa8] sm:$0xff]  ;;  %v11756_v20 = vcombine.high %v241_v15, %v249_v16  ;;  %v11755_v21 = vcombine.low %v241_v15, %v249_v16  ;;  %v254_v33 = vld [vmem:[#allocation4 + $0x90] sm:$0xff]  ;;  %v11750_v36 = vcombine.high %v238_v27, %v246_v28  ;;  %v1297_v38 = vld [vmem:[#allocation9] sm:$0xff]  ;;  %v11776_v40 = vcombine.high %v259_v31, %v267_v35 }
 0x114   :  { %v265_v18 = vld [vmem:[#allocation4 + $0xe8] sm:$0xff]  ;;  %v262_v34 = vld [vmem:[#allocation4 + $0xd0] sm:$0xff]  ;;  %v1301_v39 = vld [vmem:[#allocation9 + $0x20] sm:$0xff]  ;;  %v11749_v41 = vcombine.low %v238_v27, %v246_v28  ;;  %v11775_v45 = vcombine.low %v259_v31, %v267_v35 }
 0x115   :  { %v11772_v22 = vcombine.high %v257_v17, %v265_v18  ;;  %637 = vmatprep.subr.bf16.mxu1 %v11756_v20  ;;  %v11771_v29 = vcombine.low %v257_v17, %v265_v18  ;;  %v239_v42 = vld [vmem:[#allocation4 + $0x18] sm:$0xff]  ;;  %v11766_v44 = vcombine.high %v254_v33, %v262_v34  ;;  %v1305_v46 = vld [vmem:[#allocation9 + $0x40] sm:$0xff]  ;;  %v11786_v48 = vcombine.high %v1297_v38, %v1301_v39  ;;  %v242_v2 = vld [vmem:[#allocation4 + $0x30] sm:$0xff] }
 0x116   :  { %435 = vmatpush1.bf16.msra.mxu0 %v11761_v10  ;;  %638 = vmatpush1.bf16.msra.mxu1 %v11755_v21  ;;  %v247_v43 = vld [vmem:[#allocation4 + $0x58] sm:$0xff]  ;;  %v1309_v47 = vld [vmem:[#allocation9 + $0x60] sm:$0xff]  ;;  %v11765_v49 = vcombine.low %v254_v33, %v262_v34  ;;  %v11785_v53 = vcombine.low %v1297_v38, %v1301_v39  ;;  %v250_v3 = vld [vmem:[#allocation4 + $0x70] sm:$0xff] }
 0x117   :  { %473 = vmatprep.subr.bf16.mxu0 %v11748_v12  ;;  %639 = vmatprep.subr.bf16.mxu1 %v11772_v22  ;;  %v255_v50 = vld [vmem:[#allocation4 + $0x98] sm:$0xff]  ;;  %v11752_v52 = vcombine.high %v239_v42, %v247_v43  ;;  %v11794_v54 = vcombine.high %v1305_v46, %v1309_v47  ;;  %v11751_v55 = vcombine.low %v239_v42, %v247_v43  ;;  %v240_v56 = vld [vmem:[#allocation4 + $0x20] sm:$0xff]  ;;  %v258_v6 = vld [vmem:[#allocation4 + $0xb0] sm:$0xff] }
 0x118   :  { %v263_v51 = vld [vmem:[#allocation4 + $0xd8] sm:$0xff]  ;;  %v248_v57 = vld [vmem:[#allocation4 + $0x60] sm:$0xff]  ;;  %v11793_v59 = vcombine.low %v1305_v46, %v1309_v47  ;;  %v266_v7 = vld [vmem:[#allocation4 + $0xf0] sm:$0xff]  ;;  %v11758_v8 = vcombine.high %v242_v2, %v250_v3  ;;  %v11757_v9 = vcombine.low %v242_v2, %v250_v3 }
 0x119   :  { %11777 = vmatmul.mubr.msk.bf16.vlgmr.msra.gmra.mrb[0].mxu0 %vm428_vm0, %v14529_v19  ;;  %v11768_v58 = vcombine.high %v255_v50, %v263_v51  ;;  %v11767_v60 = vcombine.low %v255_v50, %v263_v51  ;;  %v256_v61 = vld [vmem:[#allocation4 + $0xa0] sm:$0xff]  ;;  %v11754_v63 = vcombine.high %v240_v56, %v248_v57  ;;  %v11753_v1 = vcombine.low %v240_v56, %v248_v57 }
 0x11a   :  { %474 = vmatpush1.bf16.msra.mxu0 %v11747_v23  ;;  %505 = vmatprep.mubr.bf16.mxu0 %v14263_v0  ;;  %v264_v62 = vld [vmem:[#allocation4 + $0xe0] sm:$0xff]  ;;  %v11774_v10 = vcombine.high %v258_v6, %v266_v7  ;;  %v11773_v11 = vcombine.low %v258_v6, %v266_v7 }
 0x11b   :  { %475 = vmatprep.subr.bf16.mxu0 %v11764_v26  ;;  %640 = vmatpush1.bf16.msra.mxu1 %v11771_v29  ;;  %v11770_v4 = vcombine.high %v256_v61, %v264_v62  ;;  %v11769_v5 = vcombine.low %v256_v61, %v264_v62  ;;  %v1313_v12 = vld [vmem:[#allocation9 + $0x80] sm:$0xff] }
 0x11c   :  { %719 = vmatprep.subr.bf16.mxu1 %v11760_v30  ;;  %v1317_v13 = vld [vmem:[#allocation9 + $0xa0] sm:$0xff] }
 0x11d   :  { %v1425_v14 = vld [vmem:[#allocation9 + $0x400] sm:$0xff]  ;;  %v11802_v15 = vcombine.high %v1313_v12, %v1317_v13  ;;  %v11801_v17 = vcombine.low %v1313_v12, %v1317_v13 }
 0x11e   :  { %476 = vmatpush1.bf16.msra.mxu0 %v11763_v32  ;;  %11782 = vmatmul.mubr.msk.bf16.vlgmr.msra.gmra.mrb[0].mxu1 %vm428_vm0, %v14529_v19  ;;  %v1429_v16 = vld [vmem:[#allocation9 + $0x420] sm:$0xff] }
 0x11f   :  { %514 = vmatprep.subr.bf16.mxu0 %v11750_v36  ;;  %720 = vmatpush1.bf16.msra.mxu1 %v11759_v37  ;;  %v11913_v18 = vcombine.low %v1425_v14, %v1429_v16  ;;  %v11914_v20 = vcombine.high %v1425_v14, %v1429_v16  ;;  %v1321_v21 = vld [vmem:[#allocation9 + $0xc0] sm:$0xff] }
 0x120   :  { %751 = vmatprep.mubr.bf16.mxu1 %v14263_v0  ;;  %721 = vmatprep.subr.bf16.mxu1 %v11776_v40  ;;  %v1325_v22 = vld [vmem:[#allocation9 + $0xe0] sm:$0xff] }
 0x121   :  { %11778 = vmatmul.mubr.msk.bf16.vlgmr.msra.gmra.mrb[4].mxu0 %vm428_vm0, %v14529_v19  ;;  %v1433_v23 = vld [vmem:[#allocation9 + $0x440] sm:$0xff]  ;;  %v11809_v25 = vcombine.low %v1321_v21, %v1325_v22 }
 0x122   :  { %515 = vmatpush1.bf16.msra.mxu0 %v11749_v41  ;;  %546 = vmatprep.mubr.bf16.mxu0 %v14263_v0  ;;  %v1437_v24 = vld [vmem:[#allocation9 + $0x460] sm:$0xff] }
 0x123   :  { %516 = vmatprep.subr.bf16.mxu0 %v11766_v44  ;;  %722 = vmatpush1.bf16.msra.mxu1 %v11775_v45  ;;  %v11921_v26 = vcombine.low %v1433_v23, %v1437_v24  ;;  %v1329_v27 = vld [vmem:[#allocation9 + $0x100] sm:$0xff] }
 0x124   :  { %7441 = vmatprep.subr.bf16.mxu1 %v11786_v48  ;;  %v1333_v28 = vld [vmem:[#allocation9 + $0x120] sm:$0xff] }
 0x125   :  { %v1441_v29 = vld [vmem:[#allocation9 + $0x480] sm:$0xff]  ;;  %v11818_v30 = vcombine.high %v1329_v27, %v1333_v28  ;;  %v11817_v32 = vcombine.low %v1329_v27, %v1333_v28 }
 0x126   :  { %517 = vmatpush1.bf16.msra.mxu0 %v11765_v49  ;;  %11784 = vmatmul.mubr.msk.bf16.vlgmr.msra.gmra.mrb[4].mxu1 %vm428_vm0, %v14529_v19  ;;  %v1445_v31 = vld [vmem:[#allocation9 + $0x4a0] sm:$0xff] }
 0x127   :  { %555 = vmatprep.subr.bf16.mxu0 %v11752_v52  ;;  %7442 = vmatpush1.bf16.msra.mxu1 %v11785_v53  ;;  %v11929_v33 = vcombine.low %v1441_v29, %v1445_v31  ;;  %v11930_v34 = vcombine.high %v1441_v29, %v1445_v31  ;;  %v1337_v35 = vld [vmem:[#allocation9 + $0x140] sm:$0xff] }
 0x128   :  { %7443 = vmatprep.subr.bf16.mxu1 %v11794_v54  ;;  %v1341_v36 = vld [vmem:[#allocation9 + $0x160] sm:$0xff] }
 0x129   :  { %11779 = vmatmul.mubr.msk.bf16.vlgmr.msra.gmra.mrb[8].mxu0 %vm428_vm0, %v14529_v19  ;;  %v1449_v37 = vld [vmem:[#allocation9 + $0x4c0] sm:$0xff]  ;;  %v11826_v38 = vcombine.high %v1337_v35, %v1341_v36  ;;  %v11825_v40 = vcombine.low %v1337_v35, %v1341_v36 }
 0x12a   :  { %556 = vmatpush1.bf16.msra.mxu0 %v11751_v55  ;;  %587 = vmatprep.mubr.bf16.mxu0 %v14263_v0  ;;  %v1453_v39 = vld [vmem:[#allocation9 + $0x4e0] sm:$0xff] }
 0x12b   :  { %557 = vmatprep.subr.bf16.mxu0 %v11768_v58  ;;  %7444 = vmatpush1.bf16.msra.mxu1 %v11793_v59  ;;  %v11937_v41 = vcombine.low %v1449_v37, %v1453_v39  ;;  %v11938_v42 = vcombine.high %v1449_v37, %v1453_v39  ;;  %v1345_v43 = vld [vmem:[#allocation9 + $0x180] sm:$0xff] }
 0x12c   :  { %7445 = vmatprep.subr.bf16.mxu1 %v11802_v15  ;;  %v1349_v44 = vld [vmem:[#allocation9 + $0x1a0] sm:$0xff] }
 0x12d   :  { %v1457_v45 = vld [vmem:[#allocation9 + $0x500] sm:$0xff]  ;;  %v11834_v46 = vcombine.high %v1345_v43, %v1349_v44  ;;  %v11833_v48 = vcombine.low %v1345_v43, %v1349_v44 }
 0x12e   :  { %558 = vmatpush1.bf16.msra.mxu0 %v11767_v60  ;;  %v1461_v47 = vld [vmem:[#allocation9 + $0x520] sm:$0xff] }
 0x12f   :  { %596 = vmatprep.subr.bf16.mxu0 %v11754_v63  ;;  %7446 = vmatpush1.bf16.msra.mxu1 %v11801_v17  ;;  %v11945_v49 = vcombine.low %v1457_v45, %v1461_v47  ;;  %v11946_v50 = vcombine.high %v1457_v45, %v1461_v47  ;;  %v1353_v51 = vld [vmem:[#allocation9 + $0x1c0] sm:$0xff] }
 0x130   :  { %v1357_v52 = vld [vmem:[#allocation9 + $0x1e0] sm:$0xff] }
 0x131   :  { %11780 = vmatmul.mubr.msk.bf16.vlgmr.msra.gmra.mrb[12].mxu0 %vm428_vm0, %v14529_v19  ;;  %v1465_v53 = vld [vmem:[#allocation9 + $0x540] sm:$0xff]  ;;  %v11842_v54 = vcombine.high %v1353_v51, %v1357_v52  ;;  %v11841_v56 = vcombine.low %v1353_v51, %v1357_v52 }
 0x132   :  { %597 = vmatpush1.bf16.msra.mxu0 %v11753_v1  ;;  %628 = vmatprep.mubr.bf16.mxu0 %v14263_v0  ;;  %v1469_v55 = vld [vmem:[#allocation9 + $0x560] sm:$0xff] }
 0x133   :  { %598 = vmatprep.subr.bf16.mxu0 %v11770_v4  ;;  %v11953_v57 = vcombine.low %v1465_v53, %v1469_v55  ;;  %v11954_v58 = vcombine.high %v1465_v53, %v1469_v55  ;;  %v1361_v59 = vld [vmem:[#allocation9 + $0x200] sm:$0xff] }
 0x134   :  { %v1365_v60 = vld [vmem:[#allocation9 + $0x220] sm:$0xff] }
 0x135   :  { %v1473_v61 = vld [vmem:[#allocation9 + $0x580] sm:$0xff]  ;;  %v11850_v62 = vcombine.high %v1361_v59, %v1365_v60  ;;  %v11849_v1 = vcombine.low %v1361_v59, %v1365_v60 }
 0x136   :  { %599 = vmatpush1.bf16.msra.mxu0 %v11769_v5  ;;  %v1477_v63 = vld [vmem:[#allocation9 + $0x5a0] sm:$0xff] }
 0x137   :  { %678 = vmatprep.subr.bf16.mxu0 %v11758_v8  ;;  %v11961_v2 = vcombine.low %v1473_v61, %v1477_v63  ;;  %v11962_v3 = vcombine.high %v1473_v61, %v1477_v63  ;;  %v1369_v4 = vld [vmem:[#allocation9 + $0x240] sm:$0xff]  ;;  %v14553_v61 = vld [vmem:[#allocation9 + $0x8] sm:$0xff] }
 0x138   :  { %v1373_v5 = vld [vmem:[#allocation9 + $0x260] sm:$0xff]  ;;  %v14555_v63 = vld [vmem:[#allocation9 + $0x28] sm:$0xff] }
 0x139   :  { %11781 = vmatmul.mubr.msk.bf16.vlgmr.msra.gmra.mrb[16].mxu0 %vm428_vm0, %v14529_v19  ;;  %v1481_v6 = vld [vmem:[#allocation9 + $0x5c0] sm:$0xff]  ;;  %v11858_v7 = vcombine.high %v1369_v4, %v1373_v5 }
 0x13a   :  { %679 = vmatpush1.bf16.msra.mxu0 %v11757_v9  ;;  %710 = vmatprep.mubr.bf16.mxu0 %v14263_v0  ;;  %v11810_v0 = vcombine.high %v1321_v21, %v1325_v22  ;;  %v1485_v8 = vld [vmem:[#allocation9 + $0x5e0] sm:$0xff]  ;;  %v11857_v9 = vcombine.low %v1369_v4, %v1373_v5 }
 0x13b   :  { %680 = vmatprep.subr.bf16.mxu0 %v11774_v10  ;;  %v11969_v10 = vcombine.low %v1481_v6, %v1485_v8  ;;  %v1377_v12 = vld [vmem:[#allocation9 + $0x280] sm:$0xff] }
 0x13c   :  { %7447 = vmatprep.subr.bf16.mxu1 %v11810_v0  ;;  %v1381_v13 = vld [vmem:[#allocation9 + $0x2a0] sm:$0xff] }
 0x13d   :  { %7448 = vmatpush1.bf16.msra.mxu1 %v11809_v25  ;;  %v1489_v14 = vld [vmem:[#allocation9 + $0x600] sm:$0xff]  ;;  %v11866_v15 = vcombine.high %v1377_v12, %v1381_v13  ;;  %v11865_v17 = vcombine.low %v1377_v12, %v1381_v13 }
 0x13e   :  { %681 = vmatpush1.bf16.msra.mxu0 %v11773_v11  ;;  %7449 = vmatprep.subr.bf16.mxu1 %v11818_v30  ;;  %v11970_v11 = vcombine.high %v1481_v6, %v1485_v8  ;;  %v1493_v16 = vld [vmem:[#allocation9 + $0x620] sm:$0xff] }
 0x13f   :  { %7482 = vmatprep.subr.bf16.mxu0 %v11914_v20  ;;  %v11978_v20 = vcombine.high %v1489_v14, %v1493_v16  ;;  %v1385_v21 = vld [vmem:[#allocation9 + $0x2c0] sm:$0xff] }
 0x140   :  { %v1389_v22 = vld [vmem:[#allocation9 + $0x2e0] sm:$0xff] }
 0x141   :  { %11783 = vmatmul.mubr.msk.bf16.vlgmr.msra.gmra.mrb[20].mxu0 %vm428_vm0, %v14529_v19  ;;  %v11922_v19 = vcombine.high %v1433_v23, %v1437_v24  ;;  %7450 = vmatpush1.bf16.msra.mxu1 %v11817_v32  ;;  %v1497_v23 = vld [vmem:[#allocation9 + $0x640] sm:$0xff]  ;;  %v11874_v0 = vcombine.high %v1385_v21, %v1389_v22  ;;  %v11873_v25 = vcombine.low %v1385_v21, %v1389_v22 }
 0x142   :  { %7483 = vmatpush1.bf16.msra.mxu0 %v11913_v18  ;;  %7451 = vmatprep.subr.bf16.mxu1 %v11826_v38  ;;  %v11977_v18 = vcombine.low %v1489_v14, %v1493_v16  ;;  %v1501_v24 = vld [vmem:[#allocation9 + $0x660] sm:$0xff] }
 0x143   :  { %7484 = vmatprep.subr.bf16.mxu0 %v11922_v19  ;;  %v11986_v19 = vcombine.high %v1497_v23, %v1501_v24  ;;  %v1393_v27 = vld [vmem:[#allocation9 + $0x300] sm:$0xff] }
 0x144   :  { %v1397_v28 = vld [vmem:[#allocation9 + $0x320] sm:$0xff] }
 0x145   :  { %7452 = vmatpush1.bf16.msra.mxu1 %v11825_v40  ;;  %v1505_v29 = vld [vmem:[#allocation9 + $0x680] sm:$0xff]  ;;  %v11882_v30 = vcombine.high %v1393_v27, %v1397_v28  ;;  %v11881_v32 = vcombine.low %v1393_v27, %v1397_v28 }
 0x146   :  { %7485 = vmatpush1.bf16.msra.mxu0 %v11921_v26  ;;  %7453 = vmatprep.subr.bf16.mxu1 %v11834_v46  ;;  %v11985_v26 = vcombine.low %v1497_v23, %v1501_v24  ;;  %v1509_v31 = vld [vmem:[#allocation9 + $0x6a0] sm:$0xff] }
 0x147   :  { %7486 = vmatprep.subr.bf16.mxu0 %v11930_v34  ;;  %v11994_v34 = vcombine.high %v1505_v29, %v1509_v31  ;;  %v1401_v35 = vld [vmem:[#allocation9 + $0x340] sm:$0xff] }
 0x148   :  { %v1405_v36 = vld [vmem:[#allocation9 + $0x360] sm:$0xff] }
 0x149   :  { %7454 = vmatpush1.bf16.msra.mxu1 %v11833_v48  ;;  %v1513_v37 = vld [vmem:[#allocation9 + $0x6c0] sm:$0xff]  ;;  %v11890_v38 = vcombine.high %v1401_v35, %v1405_v36  ;;  %v11889_v40 = vcombine.low %v1401_v35, %v1405_v36 }
 0x14a   :  { %7487 = vmatpush1.bf16.msra.mxu0 %v11929_v33  ;;  %7455 = vmatprep.subr.bf16.mxu1 %v11842_v54  ;;  %v11993_v33 = vcombine.low %v1505_v29, %v1509_v31  ;;  %v1517_v39 = vld [vmem:[#allocation9 + $0x6e0] sm:$0xff] }
 0x14b   :  { %7488 = vmatprep.subr.bf16.mxu0 %v11938_v42  ;;  %v12002_v42 = vcombine.high %v1513_v37, %v1517_v39  ;;  %v1409_v43 = vld [vmem:[#allocation9 + $0x380] sm:$0xff] }
 0x14c   :  { %v1413_v44 = vld [vmem:[#allocation9 + $0x3a0] sm:$0xff] }
 0x14d   :  { %7456 = vmatpush1.bf16.msra.mxu1 %v11841_v56  ;;  %v1521_v45 = vld [vmem:[#allocation9 + $0x700] sm:$0xff]  ;;  %v11898_v46 = vcombine.high %v1409_v43, %v1413_v44  ;;  %v11897_v48 = vcombine.low %v1409_v43, %v1413_v44 }
 0x14e   :  { %7489 = vmatpush1.bf16.msra.mxu0 %v11937_v41  ;;  %7457 = vmatprep.subr.bf16.mxu1 %v11850_v62  ;;  %v12001_v41 = vcombine.low %v1513_v37, %v1517_v39  ;;  %v1525_v47 = vld [vmem:[#allocation9 + $0x720] sm:$0xff] }
 0x14f   :  { %7490 = vmatprep.subr.bf16.mxu0 %v11946_v50  ;;  %v12010_v50 = vcombine.high %v1521_v45, %v1525_v47  ;;  %v1417_v51 = vld [vmem:[#allocation9 + $0x3c0] sm:$0xff] }
 0x150   :  { %v1421_v52 = vld [vmem:[#allocation9 + $0x3e0] sm:$0xff] }
 0x151   :  { %7458 = vmatpush1.bf16.msra.mxu1 %v11849_v1  ;;  %v1529_v53 = vld [vmem:[#allocation9 + $0x740] sm:$0xff]  ;;  %v11906_v54 = vcombine.high %v1417_v51, %v1421_v52  ;;  %v11905_v56 = vcombine.low %v1417_v51, %v1421_v52 }
 0x152   :  { %7491 = vmatpush1.bf16.msra.mxu0 %v11945_v49  ;;  %7459 = vmatprep.subr.bf16.mxu1 %v11858_v7  ;;  %v12009_v49 = vcombine.low %v1521_v45, %v1525_v47  ;;  %v1533_v55 = vld [vmem:[#allocation9 + $0x760] sm:$0xff] }
 0x153   :  { %7492 = vmatprep.subr.bf16.mxu0 %v11954_v58  ;;  %v12018_v58 = vcombine.high %v1529_v53, %v1533_v55  ;;  %v1537_v59 = vld [vmem:[#allocation9 + $0x780] sm:$0xff] }
 0x154   :  { %v1541_v60 = vld [vmem:[#allocation9 + $0x7a0] sm:$0xff] }
 0x155   :  { %7460 = vmatpush1.bf16.msra.mxu1 %v11857_v9  ;;  %v12026_v62 = vcombine.high %v1537_v59, %v1541_v60  ;;  %v12025_v1 = vcombine.low %v1537_v59, %v1541_v60  ;;  %v1545_v4 = vld [vmem:[#allocation9 + $0x7c0] sm:$0xff] }
 0x156   :  { %7493 = vmatpush1.bf16.msra.mxu0 %v11953_v57  ;;  %7461 = vmatprep.subr.bf16.mxu1 %v11866_v15  ;;  %v12017_v57 = vcombine.low %v1529_v53, %v1533_v55  ;;  %v1549_v5 = vld [vmem:[#allocation9 + $0x7e0] sm:$0xff] }
 0x157   :  { %7494 = vmatprep.subr.bf16.mxu0 %v11962_v3  ;;  %v11788_v3 = vcombine.high %v14553_v61, %v14555_v63  ;;  %v12033_v6 = vcombine.low %v1545_v4, %v1549_v5  ;;  %v12034_v7 = vcombine.high %v1545_v4, %v1549_v5  ;;  %v14561_v8 = vld [vmem:[#allocation9 + $0x800] sm:$0xff] }
 0x158   :  { %v14563_v9 = vld [vmem:[#allocation9 + $0x820] sm:$0xff] }
 0x159   :  { %7462 = vmatpush1.bf16.msra.mxu1 %v11865_v17 }
 0x15a   :  { %7495 = vmatpush1.bf16.msra.mxu0 %v11961_v2  ;;  %7463 = vmatprep.subr.bf16.mxu1 %v11874_v0  ;;  %v11787_v2 = vcombine.low %v14553_v61, %v14555_v63 }
 0x15b   :  { %7496 = vmatprep.subr.bf16.mxu0 %v11970_v11  ;;  %v12041_v11 = vcombine.low %v14561_v8, %v14563_v9 }
 0x15d   :  { %7464 = vmatpush1.bf16.msra.mxu1 %v11873_v25 }
 0x15e   :  { %7497 = vmatpush1.bf16.msra.mxu0 %v11969_v10  ;;  %7465 = vmatprep.subr.bf16.mxu1 %v11882_v30  ;;  %v12042_v10 = vcombine.high %v14561_v8, %v14563_v9 }
 0x15f   :  { %7498 = vmatprep.subr.bf16.mxu0 %v11978_v20 }
 0x161   :  { %7466 = vmatpush1.bf16.msra.mxu1 %v11881_v32 }
 0x162   :  { %7499 = vmatpush1.bf16.msra.mxu0 %v11977_v18  ;;  %7467 = vmatprep.subr.bf16.mxu1 %v11890_v38 }
 0x163   :  { %7500 = vmatprep.subr.bf16.mxu0 %v11986_v19 }
 0x165   :  { %7468 = vmatpush1.bf16.msra.mxu1 %v11889_v40 }
 0x166   :  { %7501 = vmatpush1.bf16.msra.mxu0 %v11985_v26  ;;  %7469 = vmatprep.subr.bf16.mxu1 %v11898_v46 }
 0x167   :  { %7502 = vmatprep.subr.bf16.mxu0 %v11994_v34 }
 0x169   :  { %7470 = vmatpush1.bf16.msra.mxu1 %v11897_v48 }
 0x16a   :  { %7503 = vmatpush1.bf16.msra.mxu0 %v11993_v33  ;;  %7471 = vmatprep.subr.bf16.mxu1 %v11906_v54 }
 0x16b   :  { %7504 = vmatprep.subr.bf16.mxu0 %v12002_v42 }
 0x16d   :  { %7472 = vmatpush1.bf16.msra.mxu1 %v11905_v56 }
 0x16e   :  { %7505 = vmatpush1.bf16.msra.mxu0 %v12001_v41  ;;  %7769 = vmatprep.subr.bf16.mxu1 %v11788_v3 }
 0x16f   :  { %7506 = vmatprep.subr.bf16.mxu0 %v12010_v50 }
 0x172   :  { %7507 = vmatpush1.bf16.msra.mxu0 %v12009_v49 }
 0x173   :  { %7508 = vmatprep.subr.bf16.mxu0 %v12018_v58 }
 0x176   :  { %7509 = vmatpush1.bf16.msra.mxu0 %v12017_v57 }
 0x177   :  { %7510 = vmatprep.subr.bf16.mxu0 %v12026_v62 }
 0x17a   :  { %7511 = vmatpush1.bf16.msra.mxu0 %v12025_v1 }
 0x17b   :  { %7512 = vmatprep.subr.bf16.mxu0 %v12034_v7 }
 0x17e   :  { %7513 = vmatpush1.bf16.msra.mxu0 %v12033_v6 }
 0x17f   :  { %7523 = vmatprep.subr.bf16.mxu0 %v12042_v10 }
 0x1ec   :  { %v466_v12 = vpop.f32.mrb[0].mxu0 }
 0x1ed   :  { %v760_v13 = vrot.slane %v466_v12, 4  ;;  %v468_v14 = vpop.f32.mrb[1].mxu0 }
 0x1ee   :  { %v766_v15 = vrot.slane %v468_v14, 4  ;;  %v470_v16 = vpop.f32.mrb[2].mxu0 }
 0x1ef   :  { %v761_v17 = vadd.f32 %v760_v13, %v466_v12  ;;  %v471_v18 = vpop.f32.mrb[3].mxu0 }
 0x1f0   :  { %v767_v20 = vadd.f32 %v766_v15, %v468_v14 }
 0x1f1   :  { %v762_v21 = vrot.slane %v761_v17, 2  ;;  %v14581_v4 = vpop.f32.mrb[0].mxu1 }
 0x1f2   :  { %v768_v22 = vrot.slane %v767_v20, 2 }
 0x1f3   :  { %v763_v23 = vadd.f32 %v762_v21, %v761_v17 }
 0x1f4   :  { %v769_v0 = vadd.f32 %v768_v22, %v767_v20  ;;  %v507_v24 = vpop.f32.mrb[4].mxu0 }
 0x1f5   :  { %v764_v25 = vrot.slane %v763_v23, 1  ;;  %v772_v26 = vrot.slane %v507_v24, 4  ;;  %v509_v19 = vpop.f32.mrb[5].mxu0 }
 0x1f6   :  { %v770_v27 = vrot.slane %v769_v0, 1  ;;  %v778_v28 = vrot.slane %v509_v19, 4  ;;  %v511_v29 = vpop.f32.mrb[6].mxu0 }
 0x1f7   :  { %v765_v30 = vadd.f32 %v764_v25, %v763_v23  ;;  %v773_v31 = vadd.f32 %v772_v26, %v507_v24  ;;  %v512_v32 = vpop.f32.mrb[7].mxu0 }
 0x1f8   :  { %v771_v33 = vadd.f32 %v770_v27, %v769_v0  ;;  %v779_v34 = vadd.f32 %v778_v28, %v509_v19 }
 0x1f9   :  { %v857_v35 = vmul.f32 0.125, %v765_v30  ;;  %v774_v36 = vrot.slane %v773_v31, 2 }
 0x1fa   :  { %v858_v37 = vmul.f32 0.125, %v771_v33  ;;  %v780_v38 = vrot.slane %v779_v34, 2 }
 0x1fb   :  { %v14569_v39 = vsub.f32 %v466_v12, %v857_v35  ;;  %v775_v40 = vadd.f32 %v774_v36, %v773_v31  ;;  %v14587_v12 = vpop.f32.mrb[1].mxu1 }
 0x1fc   :  { %v14571_v41 = vsub.f32 %v468_v14, %v858_v37  ;;  %v781_v42 = vadd.f32 %v780_v38, %v779_v34  ;;  %v14573_v43 = vpop.f32.mrb[8].mxu0  ;;  %v675_v16 = vpop.f32.mrb[2].mxu1  ;;  %v1069_v34 = vlaneseq }
 0x1fd   :  { %v889_v44 = vmul.f32 %v14569_v39, %v14569_v39  ;;  %v776_v45 = vrot.slane %v775_v40, 1  ;;  %v550_v46 = vpop.f32.mrb[9].mxu0  ;;  %v676_v21 = vpop.f32.mrb[3].mxu1  ;;  %v784_v29 = vrot.slane %v14573_v43, 4 }
 0x1fe   :  { %v890_v47 = vmul.f32 %v14571_v41, %v14571_v41  ;;  %v782_v48 = vrot.slane %v781_v42, 1  ;;  %v790_v49 = vrot.slane %v550_v46, 4  ;;  %v552_v50 = vpop.f32.mrb[10].mxu0  ;;  %v14596_v36 = vpop.f32.mrb[4].mxu1 }
 0x1ff   :  { %v905_v51 = vrot.slane %v889_v44, 4  ;;  %v777_v52 = vadd.f32 %v776_v45, %v775_v40  ;;  %v553_v53 = vpop.f32.mrb[11].mxu0 }
 0x200   :  { %v911_v54 = vrot.slane %v890_v47, 4  ;;  %v783_v55 = vadd.f32 %v782_v48, %v781_v42  ;;  %v791_v56 = vadd.f32 %v790_v49, %v550_v46  ;;  %v785_v48 = vadd.f32 %v784_v29, %v14573_v43 }
 0x201   :  { %v906_v57 = vadd.f32 %v905_v51, %v889_v44  ;;  %v859_v58 = vmul.f32 0.125, %v777_v52  ;;  %v14601_v44 = vpop.f32.mrb[5].mxu1  ;;  %v820_v49 = vrot.slane %v14581_v4, 4 }
 0x202   :  { %v912_v59 = vadd.f32 %v911_v54, %v890_v47  ;;  %v860_v60 = vmul.f32 0.125, %v783_v55  ;;  %v792_v62 = vrot.slane %v791_v56, 2  ;;  %v757_v50 = vpop.f32.mrb[6].mxu1 }
 0x203   :  { %v907_v1 = vrot.slane %v906_v57, 2  ;;  %v14579_v3 = vsub.f32 %v507_v24, %v859_v58  ;;  %v758_v54 = vpop.f32.mrb[7].mxu1 }
 0x204   :  { %v913_v5 = vrot.slane %v912_v59, 2  ;;  %v14583_v6 = vsub.f32 %v509_v19, %v860_v60  ;;  %v793_v7 = vadd.f32 %v792_v62, %v791_v56  ;;  %v14585_v10 = vpop.f32.mrb[12].mxu0  ;;  %v786_v60 = vrot.slane %v785_v48, 2 }
 0x205   :  { %v908_v13 = vadd.f32 %v907_v1, %v906_v57  ;;  %v891_v14 = vmul.f32 %v14579_v3, %v14579_v3  ;;  %v14591_v15 = vpop.f32.mrb[13].mxu0  ;;  %v821_v62 = vadd.f32 %v820_v49, %v14581_v4 }
 0x206   :  { %v914_v17 = vadd.f32 %v913_v5, %v912_v59  ;;  %v892_v18 = vmul.f32 %v14583_v6, %v14583_v6  ;;  %v794_v20 = vrot.slane %v793_v7, 1  ;;  %v593_v22 = vpop.f32.mrb[14].mxu0  ;;  %v802_v42 = vrot.slane %v14591_v15, 4 }
 0x207   :  { %v909_v23 = vrot.slane %v908_v13, 1  ;;  %v917_v0 = vrot.slane %v891_v14, 4  ;;  %v594_v24 = vpop.f32.mrb[15].mxu0  ;;  %v787_v22 = vadd.f32 %v786_v60, %v785_v48  ;;  %v1306_v60 = vld [vmem:[#allocation9 + $0x48] sm:$0xff] }
 0x208   :  { %v915_v25 = vrot.slane %v914_v17, 1  ;;  %v923_v26 = vrot.slane %v892_v18, 4  ;;  %v795_v19 = vadd.f32 %v794_v20, %v793_v7  ;;  %v803_v58 = vadd.f32 %v802_v42, %v14591_v15 }
 0x209   :  { %v910_v27 = vadd.f32 %v909_v23, %v908_v13  ;;  %v918_v28 = vadd.f32 %v917_v0, %v891_v14  ;;  %v822_v23 = vrot.slane %v821_v62, 2 }
 0x20a   :  { %v916_v30 = vadd.f32 %v915_v25, %v914_v17  ;;  %v924_v31 = vadd.f32 %v923_v26, %v892_v18  ;;  %v862_v32 = vmul.f32 0.125, %v795_v19  ;;  %v804_v17 = vrot.slane %v803_v58, 2  ;;  %v14614_v18 = vld [vmem:[#allocation6] sm:$0xff]  ;;  %v14619_v25 = vld [vmem:[#allocation7] sm:$0xff] }
 0x20b   :  { %v1001_v33 = vmul.f32 0.125, %v910_v27  ;;  %v919_v35 = vrot.slane %v918_v28, 2 }
 0x20c   :  { %v1002_v37 = vmul.f32 0.125, %v916_v30  ;;  %v925_v38 = vrot.slane %v924_v31, 2  ;;  %v14598_v40 = vsub.f32 %v550_v46, %v862_v32  ;;  %v14607_v46 = vshrl.u32 %v1069_v34, 7 }
 0x20d   :  { %v1017_v45 = vadd.f32 1e-05, %v1001_v33  ;;  %v920_v47 = vadd.f32 %v919_v35, %v918_v28  ;;  %v805_v27 = vadd.f32 %v804_v17, %v803_v58  ;;  %v788_v30 = vrot.slane %v787_v22, 1 }
 0x20e   :  { %v1018_v51 = vadd.f32 1e-05, %v1002_v37  ;;  %v926_v52 = vadd.f32 %v925_v38, %v924_v31  ;;  %v894_v53 = vmul.f32 %v14598_v40, %v14598_v40  ;;  %v14612_v13 = vsub.s32 0, %v14607_v46 }
 0x20f   :  { %13827 = vrsqrt.f32 %v1017_v45  ;;  %v921_v55 = vrot.slane %v920_v47, 1  ;;  %v14617_v20 = vsub.s32 1, %v14607_v46  ;;  %v823_v31 = vadd.f32 %v822_v23, %v821_v62  ;;  %v1310_v62 = vld [vmem:[#allocation9 + $0x68] sm:$0xff] }
 0x210   :  { %13829 = vrsqrt.f32 %v1018_v51  ;;  %v927_v56 = vrot.slane %v926_v52, 1  ;;  %v935_v57 = vrot.slane %v894_v53, 4  ;;  %v1072_v26 = vrot.slane %v14614_v18, %v14612_v13 }
 0x211   :  { %v922_v59 = vadd.f32 %v921_v55, %v920_v47  ;;  %v1076_v29 = vrot.slane %v14614_v18, %v14617_v20  ;;  %v1172_v34 = vrot.slane %v14619_v25, %v14612_v13  ;;  %v1176_v38 = vrot.slane %v14619_v25, %v14617_v20 }
 0x212   :  { %v928_v1 = vadd.f32 %v927_v56, %v926_v52  ;;  %v936_v5 = vadd.f32 %v935_v57, %v894_v53  ;;  %v14632_v45 = vsub.s32 2, %v14607_v46  ;;  %v806_v48 = vrot.slane %v805_v27, 1 }
 0x213   :  { %v1003_v7 = vmul.f32 0.125, %v922_v59  ;;  %v14635_v50 = vsub.s32 3, %v14607_v46  ;;  %v824_v51 = vrot.slane %v823_v31, 1 }
 0x214   :  { %v1004_v14 = vmul.f32 0.125, %v928_v1  ;;  %v937_v16 = vrot.slane %v936_v5, 2  ;;  %v807_v56 = vadd.f32 %v806_v48, %v805_v27  ;;  %v1314_v27 = vld [vmem:[#allocation9 + $0x88] sm:$0xff] }
 0x215   :  { %v1019_v21 = vadd.f32 1e-05, %v1003_v7  ;;  %15159 = vst [vmem:[#allocation33_spill] sm:$0xff] %v14635_v50  ;;  %v1084_v58 = vrot.slane %v14614_v18, %v14635_v50  ;;  %v1326_v48 = vld [vmem:[#allocation9 + $0xe8] sm:$0xff] }
 0x216   :  { %v1020_v0 = vadd.f32 1e-05, %v1004_v14  ;;  %v938_v24 = vadd.f32 %v937_v16, %v936_v5  ;;  %v825_v5 = vadd.f32 %v824_v51, %v823_v31  ;;  %v1180_v16 = vrot.slane %v14619_v25, %v14632_v45 }
 0x217   :  { %13831 = vrsqrt.f32 %v1019_v21  ;;  %v11795_v31 = vcombine.low %v1306_v60, %v1310_v62 }
 0x218   :  { %13833 = vrsqrt.f32 %v1020_v0  ;;  %v939_v19 = vrot.slane %v938_v24, 1 }
 0x219   :  { %v13828_v28 = vpop.eup %13827 }
 0x21a   :  { %v13830_v32 = vpop.eup %13829  ;;  %v1049_v33 = vmul.f32 %v13828_v28, %v14569_v39  ;;  %v940_v35 = vadd.f32 %v939_v19, %v938_v24  ;;  %v789_v39 = vadd.f32 %v788_v30, %v787_v22  ;;  %v1184_v22 = vrot.slane %v14619_v25, %v14635_v50 }
 0x21b   :  { %v1050_v37 = vmul.f32 %v13830_v32, %v14571_v41  ;;  %v1080_v41 = vrot.slane %v14614_v18, %v14632_v45  ;;  %v11796_v24 = vcombine.high %v1306_v60, %v1310_v62  ;;  %v1573_v60 = vld [vmem:[#allocation9 + $0x8a0] sm:$0xff]  ;;  %v1330_v62 = vld [vmem:[#allocation9 + $0x108] sm:$0xff] }
 0x21c   :  { %v1149_v42 = vmul.f32 %v1072_v26, %v1049_v33  ;;  %v1006_v47 = vmul.f32 0.125, %v940_v35  ;;  %v861_v1 = vmul.f32 0.125, %v789_v39  ;;  %v864_v26 = vmul.f32 0.125, %v807_v56  ;;  %v1569_v56 = vld [vmem:[#allocation9 + $0x880] sm:$0xff] }
 0x21d   :  { %v1150_v49 = vmul.f32 %v1076_v29, %v1050_v37  ;;  %v867_v29 = vmul.f32 0.125, %v825_v5  ;;  %v844_v37 = vrot.slane %v14596_v36, 4  ;;  %v850_v5 = vrot.slane %v14601_v44, 4 }
 0x21e   :  { %v1249_v52 = vadd.f32 %v1172_v34, %v1149_v42  ;;  %v1022_v53 = vadd.f32 1e-05, %v1006_v47  ;;  %v14653_v28 = vsub.f32 %v14573_v43, %v861_v1  ;;  %v1561_v43 = vld [vmem:[#allocation9 + $0x840] sm:$0xff]  ;;  %v14664_v35 = vsub.f32 %v14591_v15, %v864_v26  ;;  %v1322_v47 = vld [vmem:[#allocation9 + $0xc8] sm:$0xff] }
 0x21f   :  { %v1250_v54 = vadd.f32 %v1176_v38, %v1150_v49  ;;  %v1565_v42 = vld [vmem:[#allocation9 + $0x860] sm:$0xff]  ;;  %v845_v15 = vadd.f32 %v844_v37, %v14596_v36  ;;  %v1334_v1 = vld [vmem:[#allocation9 + $0x128] sm:$0xff]  ;;  %v12057_v9 = vcombine.low %v1569_v56, %v1573_v60 }
 0x220   :  { %v1265_v55 = vmax.f32 %v1249_v52, 0.0  ;;  %13835 = vrsqrt.f32 %v1022_v53  ;;  %v893_v61 = vmul.f32 %v14653_v28, %v14653_v28  ;;  %v1577_v26 = vld [vmem:[#allocation9 + $0x8c0] sm:$0xff] }
 0x221   :  { %v13832_v57 = vpop.eup %13831  ;;  %v1266_v59 = vmax.f32 %v1250_v54, 0.0 }
 0x222   :  { %v13834_v7 = vpop.eup %13833  ;;  %v1051_v14 = vmul.f32 %v13832_v57, %v14579_v3  ;;  %v14649_v0 = vpack.c.bf16 %v1265_v55, %v1265_v55  ;;  %v1318_v3 = vld [vmem:[#allocation9 + $0xa8] sm:$0xff]  ;;  %v11812_v55 = vcombine.high %v1322_v47, %v1326_v48  ;;  %v846_v57 = vrot.slane %v845_v15, 2 }
 0x223   :  { %v1052_v17 = vmul.f32 %v13834_v7, %v14583_v6  ;;  %v14645_v21 = vpack.c.bf16 %v1266_v59, %v1266_v59  ;;  %v14656_v6 = vsub.s32 5, %v14607_v46  ;;  %v11804_v33 = vcombine.high %v1314_v27, %v1318_v3 }
 0x224   :  { %v1151_v23 = vmul.f32 %v1080_v41, %v1051_v14  ;;  %v11803_v52 = vcombine.low %v1314_v27, %v1318_v3  ;;  %v12050_v41 = vcombine.high %v1561_v43, %v1565_v42  ;;  %v12049_v7 = vcombine.low %v1561_v43, %v1565_v42 }
 0x225   :  { %15160 = vst [vmem:[#allocation34_spill] sm:$0xff] %v14645_v21  ;;  %v1152_v19 = vmul.f32 %v1084_v58, %v1052_v17  ;;  %7473 = vmatprep.mubr.bf16.mxu1 %v14645_v21  ;;  %v1092_v63 = vrot.slane %v14614_v18, %v14656_v6  ;;  %v1192_v54 = vrot.slane %v14619_v25, %v14656_v6  ;;  %v929_v58 = vrot.slane %v893_v61, 4 }
 0x226   :  { %7474 = vmatmul.mubr.bf16.vlgmr.msra.gmra.mrb[8].mxu1 %v14649_v0  ;;  %v1251_v30 = vadd.f32 %v1180_v16, %v1151_v23  ;;  %v847_v14 = vadd.f32 %v846_v57, %v845_v15  ;;  %v11811_v16 = vcombine.low %v1322_v47, %v1326_v48  ;;  %v12058_v23 = vcombine.high %v1569_v56, %v1573_v60  ;;  %v1585_v48 = vld [vmem:[#allocation9 + $0x900] sm:$0xff] }
 0x227   :  { %7770 = vmatpush1.bf16.msra.mxu1 %v11787_v2  ;;  %7801 = vmatprep.mubr.bf16.mxu1 %v14645_v21  ;;  %v1252_v32 = vadd.f32 %v1184_v22, %v1152_v19  ;;  %v14672_v2 = vsub.f32 %v14581_v4, %v867_v29  ;;  %v896_v4 = vmul.f32 %v14664_v35, %v14664_v35  ;;  %v1581_v29 = vld [vmem:[#allocation9 + $0x8e0] sm:$0xff] }
 0x228   :  { %7771 = vmatprep.subr.bf16.mxu1 %v11796_v24  ;;  %v1267_v34 = vmax.f32 %v1251_v30, 0.0  ;;  %v851_v22 = vadd.f32 %v850_v5, %v14601_v44  ;;  %v11820_v24 = vcombine.high %v1330_v62, %v1334_v1  ;;  %v848_v27 = vrot.slane %v847_v14, 1  ;;  %v1338_v30 = vld [vmem:[#allocation9 + $0x148] sm:$0xff]  ;;  %v1593_v5 = vld [vmem:[#allocation9 + $0x940] sm:$0xff] }
 0x229   :  { %v1268_v38 = vmax.f32 %v1252_v32, 0.0  ;;  %v947_v19 = vrot.slane %v896_v4, 4  ;;  %v930_v3 = vadd.f32 %v929_v58, %v893_v61  ;;  %v12066_v42 = vcombine.high %v1577_v26, %v1581_v29 }
 0x22a   :  { %v13836_v49 = vpop.eup %13835  ;;  %v14674_v39 = vpack.c.bf16 %v1267_v34, %v1267_v34  ;;  %v852_v8 = vrot.slane %v851_v22, 2  ;;  %v11819_v34 = vcombine.low %v1330_v62, %v1334_v1 }
 0x22b   :  { %7772 = vmatpush1.bf16.msra.mxu1 %v11795_v31  ;;  %v14677_v51 = vpack.c.bf16 %v1268_v38, %v1268_v38  ;;  %v1054_v53 = vmul.f32 %v13836_v49, %v14598_v40  ;;  %v899_v40 = vmul.f32 %v14672_v2, %v14672_v2  ;;  %v1342_v31 = vld [vmem:[#allocation9 + $0x168] sm:$0xff]  ;;  %v14695_v38 = vpop.f32.mrb[16].mxu0  ;;  %v948_v61 = vadd.f32 %v947_v19, %v896_v4 }
 0x22c   :  { %7773 = vmatprep.subr.bf16.mxu1 %v11804_v33  ;;  %v853_v37 = vadd.f32 %v852_v8, %v851_v22  ;;  %v11828_v47 = vcombine.high %v1338_v30, %v1342_v31  ;;  %v14697_v49 = vpop.f32.mrb[17].mxu0  ;;  %v931_v15 = vrot.slane %v930_v3, 2  ;;  %v11827_v4 = vcombine.low %v1338_v30, %v1342_v31  ;;  %v1601_v31 = vld [vmem:[#allocation9 + $0x980] sm:$0xff] }
 0x22d   :  { %7514 = vmatprep.mubr.bf16.mxu0 %v14677_v51  ;;  %v1154_v59 = vmul.f32 %v1092_v63, %v1054_v53  ;;  %v965_v33 = vrot.slane %v899_v40, 4  ;;  %v1346_v53 = vld [vmem:[#allocation9 + $0x188] sm:$0xff]  ;;  %v634_v56 = vpop.f32.mrb[18].mxu0  ;;  %v1605_v8 = vld [vmem:[#allocation9 + $0x9a0] sm:$0xff] }
 0x22e   :  { %7515 = vmatmul.mubr.bf16.vlgmr.msra.gmra.mrb[24].mxu0 %v14674_v39  ;;  %v635_v58 = vpop.f32.mrb[19].mxu0  ;;  %v1370_v56 = vld [vmem:[#allocation9 + $0x248] sm:$0xff] }
 0x22f   :  { %7524 = vmatpush1.bf16.msra.mxu0 %v12041_v11  ;;  %7774 = vmatpush1.bf16.msra.mxu1 %v11803_v52  ;;  %v1254_v17 = vadd.f32 %v1192_v54, %v1154_v59  ;;  %v849_v11 = vadd.f32 %v848_v27, %v847_v14  ;;  %v1589_v52 = vld [vmem:[#allocation9 + $0x920] sm:$0xff]  ;;  %v1350_v54 = vld [vmem:[#allocation9 + $0x1a8] sm:$0xff]  ;;  %v12065_v59 = vcombine.low %v1577_v26, %v1581_v29  ;;  %v949_v14 = vrot.slane %v948_v61, 2 }
 0x230   :  { %7525 = vmatprep.subr.bf16.mxu0 %v12050_v41  ;;  %7775 = vmatprep.subr.bf16.mxu1 %v11812_v55  ;;  %v966_v41 = vadd.f32 %v965_v33, %v899_v40  ;;  %v854_v55 = vrot.slane %v853_v37, 1  ;;  %v12074_v62 = vcombine.high %v1585_v48, %v1589_v52  ;;  %v11836_v1 = vcombine.high %v1346_v53, %v1350_v54 }
 0x231   :  { %v1270_v32 = vmax.f32 %v1254_v17, 0.0  ;;  %v871_v63 = vmul.f32 0.125, %v849_v11  ;;  %v1354_v17 = vld [vmem:[#allocation9 + $0x1c8] sm:$0xff]  ;;  %v11835_v26 = vcombine.low %v1346_v53, %v1350_v54 }
 0x232   :  { %v855_v60 = vadd.f32 %v854_v55, %v853_v37  ;;  %v967_v22 = vrot.slane %v966_v41, 2  ;;  %v1366_v11 = vld [vmem:[#allocation9 + $0x228] sm:$0xff]  ;;  %v1613_v55 = vld [vmem:[#allocation9 + $0x9e0] sm:$0xff] }
 0x233   :  { %7526 = vmatpush1.bf16.msra.mxu0 %v12049_v7  ;;  %7776 = vmatpush1.bf16.msra.mxu1 %v11811_v16  ;;  %v14693_v43 = vpack.c.bf16 %v1270_v32, %v1270_v32  ;;  %v14701_v57 = vsub.f32 %v14596_v36, %v871_v63  ;;  %v1597_v7 = vld [vmem:[#allocation9 + $0x960] sm:$0xff]  ;;  %v932_v16 = vadd.f32 %v931_v15, %v930_v3  ;;  %v1358_v36 = vld [vmem:[#allocation9 + $0x1e8] sm:$0xff] }
 0x234   :  { %7527 = vmatprep.subr.bf16.mxu0 %v12058_v23  ;;  %7777 = vmatprep.subr.bf16.mxu1 %v11820_v24  ;;  %v872_v23 = vmul.f32 0.125, %v855_v60  ;;  %v12073_v24 = vcombine.low %v1585_v48, %v1589_v52  ;;  %v12082_v27 = vcombine.high %v1593_v5, %v1597_v7  ;;  %v11844_v30 = vcombine.high %v1354_v17, %v1358_v36 }
 0x235   :  { %7555 = vmatprep.mubr.bf16.mxu0 %v14693_v43  ;;  %v903_v40 = vmul.f32 %v14701_v57, %v14701_v57  ;;  %v950_v32 = vadd.f32 %v949_v14, %v948_v61  ;;  %v933_v3 = vrot.slane %v932_v16, 1  ;;  %v12090_v63 = vcombine.high %v1601_v31, %v1605_v8  ;;  %v1609_v61 = vld [vmem:[#allocation9 + $0x9c0] sm:$0xff] }
 0x236   :  { %v14706_v29 = vsub.f32 %v14601_v44, %v872_v23  ;;  %v11843_v44 = vcombine.low %v1354_v17, %v1358_v36  ;;  %v1617_v14 = vld [vmem:[#allocation9 + $0xa00] sm:$0xff] }
 0x237   :  { %7528 = vmatpush1.bf16.msra.mxu0 %v12057_v9  ;;  %7778 = vmatpush1.bf16.msra.mxu1 %v11819_v34  ;;  %v989_v19 = vrot.slane %v903_v40, 4  ;;  %v1362_v9 = vld [vmem:[#allocation9 + $0x208] sm:$0xff]  ;;  %v968_v34 = vadd.f32 %v967_v22, %v966_v41  ;;  %v951_v52 = vrot.slane %v950_v32, 1  ;;  %v934_v54 = vadd.f32 %v933_v3, %v932_v16  ;;  %v1621_v36 = vld [vmem:[#allocation9 + $0xa20] sm:$0xff] }
 0x238   :  { %7529 = vmatprep.subr.bf16.mxu0 %v12066_v42  ;;  %7779 = vmatprep.subr.bf16.mxu1 %v11828_v47  ;;  %v904_v37 = vmul.f32 %v14706_v29, %v14706_v29  ;;  %v12081_v47 = vcombine.low %v1593_v5, %v1597_v7  ;;  %v11852_v15 = vcombine.high %v1362_v9, %v1366_v11  ;;  %v1374_v41 = vld [vmem:[#allocation9 + $0x268] sm:$0xff]  ;;  %v1625_v3 = vld [vmem:[#allocation9 + $0xa40] sm:$0xff] }
 0x239   :  { %v990_v33 = vadd.f32 %v989_v19, %v903_v40  ;;  %v969_v58 = vrot.slane %v968_v34, 1  ;;  %v11851_v60 = vcombine.low %v1362_v9, %v1366_v11  ;;  %v12098_v5 = vcombine.high %v1609_v61, %v1613_v55  ;;  %v1378_v16 = vld [vmem:[#allocation9 + $0x288] sm:$0xff] }
 0x23a   :  { %v995_v48 = vrot.slane %v904_v37, 4  ;;  %v11860_v7 = vcombine.high %v1370_v56, %v1374_v41  ;;  %v952_v40 = vadd.f32 %v951_v52, %v950_v32  ;;  %v1005_v17 = vmul.f32 0.125, %v934_v54  ;;  %v1382_v22 = vld [vmem:[#allocation9 + $0x2a8] sm:$0xff]  ;;  %v14713_v54 = vld [vmem:[#allocation9 + $0xaa0] sm:$0xff] }
 0x23b   :  { %7530 = vmatpush1.bf16.msra.mxu0 %v12065_v59  ;;  %7780 = vmatpush1.bf16.msra.mxu1 %v11827_v4  ;;  %v991_v42 = vrot.slane %v990_v33, 2  ;;  %v12089_v4 = vcombine.low %v1601_v31, %v1605_v8  ;;  %v970_v23 = vadd.f32 %v969_v58, %v968_v34  ;;  %v12097_v19 = vcombine.low %v1609_v61, %v1613_v55  ;;  %v1629_v8 = vld [vmem:[#allocation9 + $0xa60] sm:$0xff]  ;;  %v1386_v11 = vld [vmem:[#allocation9 + $0x2c8] sm:$0xff] }
 0x23c   :  { %7531 = vmatprep.subr.bf16.mxu0 %v12074_v62  ;;  %7781 = vmatprep.subr.bf16.mxu1 %v11836_v1  ;;  %v996_v59 = vadd.f32 %v995_v48, %v904_v37  ;;  %v12106_v31 = vcombine.high %v1617_v14, %v1621_v36  ;;  %v1008_v9 = vmul.f32 0.125, %v952_v40  ;;  %v1021_v32 = vadd.f32 1e-05, %v1005_v17  ;;  %v1390_v37 = vld [vmem:[#allocation9 + $0x2e8] sm:$0xff] }
 0x23d   :  { %v992_v53 = vadd.f32 %v991_v42, %v990_v33  ;;  %v11868_v33 = vcombine.high %v1378_v16, %v1382_v22  ;;  %v796_v42 = vrot.slane %v14585_v10, 4  ;;  %v1011_v34 = vmul.f32 0.125, %v970_v23  ;;  %v1394_v58 = vld [vmem:[#allocation9 + $0x308] sm:$0xff] }
 0x23e   :  { %v997_v1 = vrot.slane %v996_v59, 2  ;;  %v11867_v48 = vcombine.low %v1378_v16, %v1382_v22  ;;  %v12114_v61 = vcombine.high %v1625_v3, %v1629_v8  ;;  %v11876_v52 = vcombine.high %v1386_v11, %v1390_v37  ;;  %v14726_v16 = vld [vmem:[#allocation9 + $0xac0] sm:$0xff] }
 0x23f   :  { %7532 = vmatpush1.bf16.msra.mxu0 %v12073_v24  ;;  %7782 = vmatpush1.bf16.msra.mxu1 %v11835_v26  ;;  %v993_v62 = vrot.slane %v992_v53, 1  ;;  %v11859_v26 = vcombine.low %v1370_v56, %v1374_v41  ;;  %v1024_v55 = vadd.f32 1e-05, %v1008_v9  ;;  %v814_v56 = vrot.slane %v14697_v49, 4  ;;  %v14716_v41 = vpop.f32.mrb[20].mxu0  ;;  %v14728_v22 = vld [vmem:[#allocation9 + $0xae0] sm:$0xff] }
 0x240   :  { %7533 = vmatprep.subr.bf16.mxu0 %v12082_v27  ;;  %7783 = vmatprep.subr.bf16.mxu1 %v11844_v30  ;;  %v998_v24 = vadd.f32 %v997_v1, %v996_v59  ;;  %13837 = vrsqrt.f32 %v1021_v32  ;;  %v1398_v59 = vld [vmem:[#allocation9 + $0x328] sm:$0xff]  ;;  %v14724_v17 = vpop.f32.mrb[21].mxu0  ;;  %v14742_v9 = vld [vmem:[#allocation9 + $0xb20] sm:$0xff] }
 0x241   :  { %v994_v27 = vadd.f32 %v993_v62, %v992_v53  ;;  %v14711_v53 = vld [vmem:[#allocation9 + $0xa80] sm:$0xff]  ;;  %v14720_v62 = vsub.s32 4, %v14607_v46  ;;  %13839 = vrsqrt.f32 %v1024_v55  ;;  %v815_v23 = vadd.f32 %v814_v56, %v14697_v49 }
 0x242   :  { %v999_v30 = vrot.slane %v998_v24, 1  ;;  %v11883_v32 = vcombine.low %v1394_v58, %v1398_v59 }
 0x243   :  { %7534 = vmatpush1.bf16.msra.mxu0 %v12081_v47  ;;  %7784 = vmatpush1.bf16.msra.mxu1 %v11843_v44  ;;  %v12105_v44 = vcombine.low %v1617_v14, %v1621_v36  ;;  %v12122_v14 = vcombine.high %v14711_v53, %v14713_v54  ;;  %v11884_v36 = vcombine.high %v1394_v58, %v1398_v59 }
 0x244   :  { %7535 = vmatprep.subr.bf16.mxu0 %v12090_v63  ;;  %7785 = vmatprep.subr.bf16.mxu1 %v11852_v15  ;;  %v1000_v47 = vadd.f32 %v999_v30, %v998_v24  ;;  %v1015_v63 = vmul.f32 0.125, %v994_v27  ;;  %v832_v24 = vrot.slane %v14716_v41, 4  ;;  %v14734_v27 = vld [vmem:[#allocation9 + $0x368] sm:$0xff] }
 0x246   :  { %v1016_v15 = vmul.f32 0.125, %v1000_v47  ;;  %v1031_v40 = vadd.f32 1e-05, %v1015_v63  ;;  %v838_v47 = vrot.slane %v14724_v17, 4  ;;  %v14757_v63 = vld [vmem:[#allocation9 + $0xb60] sm:$0xff] }
 0x247   :  { %7536 = vmatpush1.bf16.msra.mxu0 %v12089_v4  ;;  %7786 = vmatpush1.bf16.msra.mxu1 %v11851_v60  ;;  %v797_v4 = vadd.f32 %v796_v42, %v14585_v10  ;;  %v1027_v60 = vadd.f32 1e-05, %v1011_v34  ;;  %v14748_v42 = vld [vmem:[#allocation9 + $0x3a8] sm:$0xff]  ;;  %v14750_v34 = vld [vmem:[#allocation9 + $0xb40] sm:$0xff] }
 0x248   :  { %7537 = vmatprep.subr.bf16.mxu0 %v12098_v5  ;;  %7787 = vmatprep.subr.bf16.mxu1 %v11860_v7  ;;  %v1032_v1 = vadd.f32 1e-05, %v1016_v15  ;;  %v12113_v5 = vcombine.low %v1625_v3, %v1629_v8  ;;  %v11875_v7 = vcombine.low %v1386_v11, %v1390_v37  ;;  %v12121_v3 = vcombine.low %v14711_v53, %v14713_v54  ;;  %v14740_v8 = vld [vmem:[#allocation9 + $0xb00] sm:$0xff]  ;;  %v14746_v37 = vld [vmem:[#allocation9 + $0x388] sm:$0xff] }
 0x249   :  { %v798_v30 = vrot.slane %v797_v4, 2  ;;  %13841 = vrsqrt.f32 %v1027_v60  ;;  %v12129_v11 = vcombine.low %v14726_v16, %v14728_v22  ;;  %v14759_v15 = vld [vmem:[#allocation9 + $0x3c8] sm:$0xff]  ;;  %v833_v53 = vadd.f32 %v832_v24, %v14716_v41 }
 0x24a   :  { %13843 = vrsqrt.f32 %v1032_v1  ;;  %v12137_v55 = vcombine.low %v14740_v8, %v14742_v9  ;;  %v839_v58 = vadd.f32 %v838_v47, %v14724_v17  ;;  %v12138_v59 = vcombine.high %v14740_v8, %v14742_v9  ;;  %v14787_v24 = vld [vmem:[#allocation9 + $0x428] sm:$0xff] }
 0x24b   :  { %7538 = vmatpush1.bf16.msra.mxu0 %v12097_v19  ;;  %7788 = vmatpush1.bf16.msra.mxu1 %v11859_v26  ;;  %v716_v19 = vpop.f32.mrb[22].mxu0  ;;  %v14732_v26 = vld [vmem:[#allocation9 + $0x348] sm:$0xff]  ;;  %13845 = vrsqrt.f32 %v1031_v40  ;;  %v799_v56 = vadd.f32 %v798_v30, %v797_v4  ;;  %v11899_v60 = vcombine.low %v14746_v37, %v14748_v42  ;;  %v11900_v1 = vcombine.high %v14746_v37, %v14748_v42  ;;  %v13838_v40 = vpop.eup %13837  ;;  %v14793_v30 = vld [vmem:[#allocation9 + $0xbe0] sm:$0xff] }
 0x24c   :  { %7539 = vmatprep.subr.bf16.mxu0 %v12106_v31  ;;  %7789 = vmatprep.subr.bf16.mxu1 %v11868_v33  ;;  %v717_v31 = vpop.f32.mrb[23].mxu0  ;;  %v11891_v54 = vcombine.low %v14732_v26, %v14734_v27  ;;  %v840_v19 = vrot.slane %v839_v58, 2  ;;  %v13840_v42 = vpop.eup %13839  ;;  %v1053_v47 = vmul.f32 %v13838_v40, %v14653_v28  ;;  %v14811_v28 = vld [vmem:[#allocation6 + $0x8] sm:$0xff] }
 0x24d   :  { %v800_v9 = vrot.slane %v799_v56, 1 }
 0x24e   :  { %v841_v37 = vadd.f32 %v840_v19, %v839_v58  ;;  %v1188_v58 = vrot.slane %v14619_v25, %v14720_v62 }
 0x24f   :  { %7540 = vmatpush1.bf16.msra.mxu0 %v12105_v44  ;;  %7790 = vmatpush1.bf16.msra.mxu1 %v11867_v48  ;;  %v12130_v44 = vcombine.high %v14726_v16, %v14728_v22  ;;  %v11892_v48 = vcombine.high %v14732_v26, %v14734_v27  ;;  %v14785_v22 = vld [vmem:[#allocation9 + $0x408] sm:$0xff]  ;;  %v14791_v27 = vld [vmem:[#allocation9 + $0xbc0] sm:$0xff]  ;;  %v801_v4 = vadd.f32 %v800_v9, %v799_v56  ;;  %v14832_v9 = vld [vmem:[#allocation7 + $0x8] sm:$0xff] }
 0x250   :  { %7541 = vmatprep.subr.bf16.mxu0 %v12114_v61  ;;  %7791 = vmatprep.subr.bf16.mxu1 %v11876_v52  ;;  %v14761_v61 = vld [vmem:[#allocation9 + $0x3e8] sm:$0xff]  ;;  %v816_v52 = vrot.slane %v815_v23, 2 }
 0x251   :  { %v11908_v26 = vcombine.high %v14759_v15, %v14761_v61 }
 0x252   :  { %v817_v31 = vadd.f32 %v816_v52, %v815_v23  ;;  %v11916_v52 = vcombine.high %v14785_v22, %v14787_v24 }
 0x253   :  { %7542 = vmatpush1.bf16.msra.mxu0 %v12113_v5  ;;  %7792 = vmatpush1.bf16.msra.mxu1 %v11875_v7  ;;  %v14775_v5 = vld [vmem:[#allocation9 + $0xb80] sm:$0xff]  ;;  %v13842_v23 = vpop.eup %13841 }
 0x254   :  { %7543 = vmatprep.subr.bf16.mxu0 %v12122_v14  ;;  %7793 = vmatprep.subr.bf16.mxu1 %v11884_v36  ;;  %v14777_v7 = vld [vmem:[#allocation9 + $0xba0] sm:$0xff]  ;;  %v834_v14 = vrot.slane %v833_v53, 2  ;;  %v12146_v36 = vcombine.high %v14750_v34, %v14757_v63  ;;  %v13844_v40 = vpop.eup %13843  ;;  %v1059_v50 = vmul.f32 %v13842_v23, %v14672_v2 }
 0x255   :  { %v13846_v8 = vpop.eup %13845 }
 0x257   :  { %7544 = vmatpush1.bf16.msra.mxu0 %v12121_v3  ;;  %7794 = vmatpush1.bf16.msra.mxu1 %v11883_v32  ;;  %v835_v3 = vadd.f32 %v834_v14, %v833_v53  ;;  %v14798_v32 = vsub.s32 7, %v14607_v46  ;;  %v842_v14 = vrot.slane %v841_v37, 1  ;;  %v1056_v53 = vmul.f32 %v13840_v42, %v14664_v35 }
 0x258   :  { %7545 = vmatprep.subr.bf16.mxu0 %v12130_v44  ;;  %7795 = vmatprep.subr.bf16.mxu1 %v11892_v48  ;;  %v12154_v44 = vcombine.high %v14775_v5, %v14777_v7  ;;  %v1064_v35 = vmul.f32 %v13844_v40, %v14706_v29 }
 0x259   :  { %v836_v16 = vrot.slane %v835_v3, 1  ;;  %v1100_v33 = vrot.slane %v14614_v18, %v14798_v32  ;;  %v843_v21 = vadd.f32 %v842_v14, %v841_v37  ;;  %v1200_v42 = vrot.slane %v14619_v25, %v14798_v32 }
 0x25a   :  { %v15163_v25 = vcombine.low %v14759_v15, %v14761_v61  ;;  %v1442_v15 = vld [vmem:[#allocation9 + $0x488] sm:$0xff] }
 0x25b   :  { %7546 = vmatpush1.bf16.msra.mxu0 %v12129_v11  ;;  %7796 = vmatpush1.bf16.msra.mxu1 %v11891_v54  ;;  %v14816_v11 = vsub.s32 6, %v14607_v46  ;;  %v818_v54 = vrot.slane %v817_v31, 1  ;;  %v837_v48 = vadd.f32 %v836_v16, %v835_v3  ;;  %v1112_v46 = vrot.slane %v14811_v28, %v14632_v45  ;;  %v1446_v61 = vld [vmem:[#allocation9 + $0x4a8] sm:$0xff] }
 0x25c   :  { %7547 = vmatprep.subr.bf16.mxu0 %v12138_v59  ;;  %7797 = vmatprep.subr.bf16.mxu1 %v11900_v1  ;;  %v15161_v59 = vrot.slane %v14614_v18, %v14720_v62  ;;  %v1132_v16 = vrot.slane %v14811_v28, %v14798_v32  ;;  %v870_v3 = vmul.f32 0.125, %v843_v21  ;;  %v1063_v18 = vmul.f32 %v13846_v8, %v14701_v57  ;;  %v1438_v21 = vld [vmem:[#allocation9 + $0x468] sm:$0xff] }
 0x25d   :  { %v869_v19 = vmul.f32 0.125, %v837_v48  ;;  %v1128_v56 = vrot.slane %v14811_v28, %v14816_v11  ;;  %v819_v2 = vadd.f32 %v818_v54, %v817_v31  ;;  %v1159_v23 = vmul.f32 %v1112_v46, %v1059_v50 }
 0x25e   :  { %v1153_v1 = vmul.f32 %v15161_v59, %v1053_v47  ;;  %v14841_v29 = vsub.f32 %v14724_v17, %v870_v3  ;;  %v1434_v47 = vld [vmem:[#allocation9 + $0x448] sm:$0xff]  ;;  %v1212_v57 = vrot.slane %v14832_v9, %v14632_v45  ;;  %v1164_v17 = vmul.f32 %v1132_v16, %v1064_v35  ;;  %v1689_v3 = vld [vmem:[#allocation9 + $0xc40] sm:$0xff] }
 0x25f   :  { %7548 = vmatpush1.bf16.msra.mxu0 %v12137_v55  ;;  %7798 = vmatpush1.bf16.msra.mxu1 %v11899_v60  ;;  %v14836_v37 = vsub.f32 %v14716_v41, %v869_v19  ;;  %v863_v55 = vmul.f32 0.125, %v801_v4  ;;  %v1156_v60 = vmul.f32 %v1100_v33, %v1056_v53  ;;  %v15162_v41 = vcombine.low %v14750_v34, %v14757_v63  ;;  %v1681_v4 = vld [vmem:[#allocation9 + $0xc00] sm:$0xff] }
 0x260   :  { %7549 = vmatprep.subr.bf16.mxu0 %v12146_v36  ;;  %7799 = vmatprep.subr.bf16.mxu1 %v11908_v26  ;;  %v1253_v48 = vadd.f32 %v1188_v58, %v1153_v1  ;;  %v902_v33 = vmul.f32 %v14841_v29, %v14841_v29  ;;  %v1232_v50 = vrot.slane %v14832_v9, %v14798_v32  ;;  %v1685_v26 = vld [vmem:[#allocation9 + $0xc20] sm:$0xff]  ;;  %v866_v8 = vmul.f32 0.125, %v819_v2  ;;  %v1454_v2 = vld [vmem:[#allocation9 + $0x4e8] sm:$0xff] }
 0x261   :  { %v901_v36 = vmul.f32 %v14836_v37, %v14836_v37  ;;  %v1163_v31 = vmul.f32 %v1128_v56, %v1063_v18  ;;  %v1228_v34 = vrot.slane %v14832_v9, %v14816_v11  ;;  %v11924_v63 = vcombine.high %v1434_v47, %v1438_v21 }
 0x262   :  { %v14860_v58 = vsub.f32 %v14585_v10, %v863_v55  ;;  %v1256_v14 = vadd.f32 %v1200_v42, %v1156_v60  ;;  %v983_v40 = vrot.slane %v902_v33, 4  ;;  %v14863_v54 = vadd.f32 %v1212_v57, %v1159_v23 }
 0x263   :  { %7550 = vmatpush1.bf16.msra.mxu0 %v15162_v41  ;;  %7800 = vmatpush1.bf16.msra.mxu1 %v15163_v25  ;;  %v977_v53 = vrot.slane %v901_v36, 4  ;;  %v15164_v59 = vcombine.low %v14775_v5, %v14777_v7  ;;  %v15165_v1 = vcombine.low %v14785_v22, %v14787_v24  ;;  %v12170_v46 = vcombine.high %v1681_v4, %v1685_v26  ;;  %v1693_v22 = vld [vmem:[#allocation9 + $0xc60] sm:$0xff]  ;;  %v1450_v24 = vld [vmem:[#allocation9 + $0x4c8] sm:$0xff] }
 0x264   :  { %7551 = vmatprep.subr.bf16.mxu0 %v12154_v44  ;;  %7810 = vmatprep.subr.bf16.mxu1 %v11916_v52  ;;  %v11923_v44 = vcombine.low %v1434_v47, %v1438_v21  ;;  %v1269_v52 = vmax.f32 %v1253_v48, 0.0  ;;  %v984_v10 = vadd.f32 %v983_v40, %v902_v33  ;;  %v14871_v56 = vadd.f32 %v1232_v50, %v1164_v17  ;;  %v1697_v25 = vld [vmem:[#allocation9 + $0xc80] sm:$0xff] }
 0x265   :  { %v978_v19 = vadd.f32 %v977_v53, %v901_v36  ;;  %v15166_v35 = vcombine.high %v14791_v27, %v14793_v30  ;;  %v11932_v16 = vcombine.high %v1442_v15, %v1446_v61  ;;  %v14878_v18 = vsub.f32 %v14697_v49, %v866_v8  ;;  %v1458_v8 = vld [vmem:[#allocation9 + $0x508] sm:$0xff] }
 0x266   :  { %7802 = vmatmul.mubr.bf16.vlgmr.msra.gmra.mrb[12].mxu1 %v14649_v0  ;;  %v14880_v7 = vadd.f32 %v1228_v34, %v1163_v31  ;;  %v895_v55 = vmul.f32 %v14860_v58, %v14860_v58  ;;  %v1272_v60 = vmax.f32 %v1256_v14, 0.0  ;;  %v985_v42 = vrot.slane %v984_v10, 2  ;;  %v1701_v31 = vld [vmem:[#allocation9 + $0xca0] sm:$0xff]  ;;  %v1462_v53 = vld [vmem:[#allocation9 + $0x528] sm:$0xff] }
 0x267   :  { %7552 = vmatpush1.bf16.msra.mxu0 %v15164_v59  ;;  %7811 = vmatpush1.bf16.msra.mxu1 %v15165_v1  ;;  %v979_v5 = vrot.slane %v978_v19, 2  ;;  %v14884_v47 = vpack.c.bf16 %v1269_v52, %v1269_v52  ;;  %v15167_v48 = vcombine.low %v14791_v27, %v14793_v30  ;;  %v12169_v49 = vcombine.low %v1681_v4, %v1685_v26  ;;  %v1705_v14 = vld [vmem:[#allocation9 + $0xcc0] sm:$0xff]  ;;  %v1466_v59 = vld [vmem:[#allocation9 + $0x548] sm:$0xff] }
 0x268   :  { %7842 = vmatprep.mubr.bf16.mxu1 %v14677_v51  ;;  %7553 = vmatprep.subr.bf16.mxu0 %v15166_v35  ;;  %v11931_v23 = vcombine.low %v1442_v15, %v1446_v61  ;;  %v986_v36 = vadd.f32 %v985_v42, %v984_v10  ;;  %v12178_v57 = vcombine.high %v1689_v3, %v1693_v22  ;;  %v941_v50 = vrot.slane %v895_v55, 4  ;;  %v1470_v1 = vld [vmem:[#allocation9 + $0x568] sm:$0xff] }
 0x269   :  { %7812 = vmatprep.subr.bf16.mxu1 %v11924_v63  ;;  %v980_v21 = vadd.f32 %v979_v5, %v978_v19  ;;  %v11940_v41 = vcombine.high %v1450_v24, %v1454_v2  ;;  %v898_v17 = vmul.f32 %v14878_v18, %v14878_v18  ;;  %v14891_v34 = vpack.c.bf16 %v1272_v60, %v1272_v60  ;;  %v1709_v19 = vld [vmem:[#allocation9 + $0xce0] sm:$0xff]  ;;  %v1474_v42 = vld [vmem:[#allocation9 + $0x588] sm:$0xff] }
 0x26a   :  { %v987_v27 = vrot.slane %v986_v36, 1  ;;  %v12177_v4 = vcombine.low %v1689_v3, %v1693_v22  ;;  %v11939_v26 = vcombine.low %v1450_v24, %v1454_v2  ;;  %v12186_v15 = vcombine.high %v1697_v25, %v1701_v31  ;;  %v1713_v24 = vld [vmem:[#allocation9 + $0xd00] sm:$0xff] }
 0x26b   :  { %7554 = vmatpush1.bf16.msra.mxu0 %v15167_v48  ;;  %7813 = vmatpush1.bf16.msra.mxu1 %v11923_v44  ;;  %v981_v33 = vrot.slane %v980_v21, 1  ;;  %v11948_v61 = vcombine.high %v1458_v8, %v1462_v53  ;;  %v959_v40 = vrot.slane %v898_v17, 4  ;;  %v942_v52 = vadd.f32 %v941_v50, %v895_v55  ;;  %v1717_v60 = vld [vmem:[#allocation9 + $0xd20] sm:$0xff]  ;;  %v1482_v50 = vld [vmem:[#allocation9 + $0x5c8] sm:$0xff] }
 0x26c   :  { %7564 = vmatprep.subr.bf16.mxu0 %v12170_v46  ;;  %7814 = vmatprep.subr.bf16.mxu1 %v11932_v16  ;;  %v988_v63 = vadd.f32 %v987_v27, %v986_v36  ;;  %v12185_v35 = vcombine.low %v1697_v25, %v1701_v31  ;;  %v11947_v16 = vcombine.low %v1458_v8, %v1462_v53 }
 0x26d   :  { %v982_v30 = vadd.f32 %v981_v33, %v980_v21  ;;  %v12194_v5 = vcombine.high %v1705_v14, %v1709_v19  ;;  %v11956_v22 = vcombine.high %v1466_v59, %v1470_v1  ;;  %v960_v2 = vadd.f32 %v959_v40, %v898_v17  ;;  %v1478_v21 = vld [vmem:[#allocation9 + $0x5a8] sm:$0xff]  ;;  %v1725_v33 = vld [vmem:[#allocation9 + $0xd60] sm:$0xff] }
 0x26e   :  { %7556 = vmatmul.mubr.bf16.vlgmr.msra.gmra.mrb[24].mxu0 %v14884_v47  ;;  %v1014_v46 = vmul.f32 0.125, %v988_v63  ;;  %v943_v55 = vrot.slane %v942_v52, 2  ;;  %v12193_v48 = vcombine.low %v1705_v14, %v1709_v19  ;;  %v11964_v36 = vcombine.high %v1474_v42, %v1478_v21  ;;  %v1486_v17 = vld [vmem:[#allocation9 + $0x5e8] sm:$0xff]  ;;  %v1733_v63 = vld [vmem:[#allocation9 + $0xda0] sm:$0xff] }
 0x26f   :  { %7565 = vmatpush1.bf16.msra.mxu0 %v12169_v49  ;;  %7815 = vmatpush1.bf16.msra.mxu1 %v11931_v23  ;;  %v1013_v44 = vmul.f32 0.125, %v982_v30  ;;  %v11955_v49 = vcombine.low %v1466_v59, %v1470_v1  ;;  %v12202_v23 = vcombine.high %v1713_v24, %v1717_v60  ;;  %v12201_v31 = vcombine.low %v1713_v24, %v1717_v60  ;;  %v1729_v30 = vld [vmem:[#allocation9 + $0xd80] sm:$0xff] }
 0x270   :  { %7566 = vmatprep.subr.bf16.mxu0 %v12178_v57  ;;  %7816 = vmatprep.subr.bf16.mxu1 %v11940_v41  ;;  %v1030_v3 = vadd.f32 1e-05, %v1014_v46  ;;  %v1721_v57 = vld [vmem:[#allocation9 + $0xd40] sm:$0xff]  ;;  %v961_v41 = vrot.slane %v960_v2, 2  ;;  %v944_v25 = vadd.f32 %v943_v55, %v942_v52  ;;  %v11963_v8 = vcombine.low %v1474_v42, %v1478_v21 }
 0x271   :  { %7596 = vmatprep.mubr.bf16.mxu0 %v14891_v34  ;;  %v1029_v10 = vadd.f32 1e-05, %v1013_v44  ;;  %v12210_v53 = vcombine.high %v1721_v57, %v1725_v33  ;;  %v11972_v27 = vcombine.high %v1482_v50, %v1486_v17  ;;  %v1120_v14 = vrot.slane %v14811_v28, %v14720_v62  ;;  %v1737_v1 = vld [vmem:[#allocation9 + $0xdc0] sm:$0xff] }
 0x272   :  { %v1124_v44 = vrot.slane %v14811_v28, %v14656_v6  ;;  %v12209_v19 = vcombine.low %v1721_v57, %v1725_v33  ;;  %v11971_v59 = vcombine.low %v1482_v50, %v1486_v17  ;;  %v1224_v60 = vrot.slane %v14832_v9, %v14656_v6  ;;  %v1749_v33 = vld [vmem:[#allocation9 + $0xe20] sm:$0xff]  ;;  %v1506_v50 = vld [vmem:[#allocation9 + $0x688] sm:$0xff] }
 0x273   :  { %7567 = vmatpush1.bf16.msra.mxu0 %v12177_v4  ;;  %7817 = vmatpush1.bf16.msra.mxu1 %v11939_v26  ;;  %13847 = vrsqrt.f32 %v1029_v10  ;;  %v962_v4 = vadd.f32 %v961_v41, %v960_v2  ;;  %v945_v26 = vrot.slane %v944_v25, 1  ;;  %v12218_v10 = vcombine.high %v1729_v30, %v1733_v63  ;;  %v1510_v17 = vld [vmem:[#allocation9 + $0x6a8] sm:$0xff] }
 0x274   :  { %7568 = vmatprep.subr.bf16.mxu0 %v12186_v15  ;;  %7818 = vmatprep.subr.bf16.mxu1 %v11948_v61  ;;  %13849 = vrsqrt.f32 %v1030_v3  ;;  %v1490_v15 = vld [vmem:[#allocation9 + $0x608] sm:$0xff]  ;;  %v12217_v42 = vcombine.low %v1729_v30, %v1733_v63  ;;  %v1753_v30 = vld [vmem:[#allocation9 + $0xe40] sm:$0xff] }
 0x275   :  { %v1494_v61 = vld [vmem:[#allocation9 + $0x628] sm:$0xff]  ;;  %v946_v2 = vadd.f32 %v945_v26, %v944_v25 }
 0x276   :  { %v1498_v3 = vld [vmem:[#allocation9 + $0x648] sm:$0xff] }
 0x277   :  { %7569 = vmatpush1.bf16.msra.mxu0 %v12185_v35  ;;  %7819 = vmatpush1.bf16.msra.mxu1 %v11947_v16  ;;  %v11980_v35 = vcombine.high %v1490_v15, %v1494_v61  ;;  %v1741_v16 = vld [vmem:[#allocation9 + $0xde0] sm:$0xff]  ;;  %v1007_v25 = vmul.f32 0.125, %v946_v2 }
 0x278   :  { %7570 = vmatprep.subr.bf16.mxu0 %v12194_v5  ;;  %7820 = vmatprep.subr.bf16.mxu1 %v11956_v22  ;;  %v1502_v5 = vld [vmem:[#allocation9 + $0x668] sm:$0xff]  ;;  %v963_v22 = vrot.slane %v962_v4, 1 }
 0x279   :  { %v1023_v63 = vadd.f32 1e-05, %v1007_v25 }
 0x27a   :  { %v964_v57 = vadd.f32 %v963_v22, %v962_v4  ;;  %v1757_v4 = vld [vmem:[#allocation9 + $0xe60] sm:$0xff] }
 0x27b   :  { %7571 = vmatpush1.bf16.msra.mxu0 %v12193_v48  ;;  %7821 = vmatpush1.bf16.msra.mxu1 %v11955_v49  ;;  %v11979_v48 = vcombine.low %v1490_v15, %v1494_v61  ;;  %v12226_v49 = vcombine.high %v1737_v1, %v1741_v16  ;;  %v1514_v15 = vld [vmem:[#allocation9 + $0x6c8] sm:$0xff]  ;;  %13851 = vrsqrt.f32 %v1023_v63 }
 0x27c   :  { %7572 = vmatprep.subr.bf16.mxu0 %v12202_v23  ;;  %7822 = vmatprep.subr.bf16.mxu1 %v11964_v36  ;;  %v11988_v23 = vcombine.high %v1498_v3, %v1502_v5  ;;  %v1745_v36 = vld [vmem:[#allocation9 + $0xe00] sm:$0xff]  ;;  %v1010_v26 = vmul.f32 0.125, %v964_v57  ;;  %v1518_v61 = vld [vmem:[#allocation9 + $0x6e8] sm:$0xff] }
 0x27d   :  { %v13848_v40 = vpop.eup %13847  ;;  %v12003_v22 = vcombine.low %v1514_v15, %v1518_v61 }
 0x27e   :  { %v13850_v52 = vpop.eup %13849  ;;  %v1061_v46 = vmul.f32 %v13848_v40, %v14836_v37  ;;  %v1220_v37 = vrot.slane %v14832_v9, %v14720_v62  ;;  %v12233_v40 = vcombine.low %v1745_v36, %v1749_v33 }
 0x27f   :  { %7573 = vmatpush1.bf16.msra.mxu0 %v12201_v31  ;;  %7823 = vmatpush1.bf16.msra.mxu1 %v11963_v8  ;;  %v1062_v24 = vmul.f32 %v13850_v52, %v14841_v29  ;;  %v12225_v31 = vcombine.low %v1737_v1, %v1741_v16  ;;  %v11987_v8 = vcombine.low %v1498_v3, %v1502_v5  ;;  %v826_v52 = vrot.slane %v14587_v12, 4  ;;  %v1761_v1 = vld [vmem:[#allocation9 + $0xe80] sm:$0xff]  ;;  %v1526_v16 = vld [vmem:[#allocation9 + $0x728] sm:$0xff] }
 0x280   :  { %7574 = vmatprep.subr.bf16.mxu0 %v12210_v53  ;;  %7824 = vmatprep.subr.bf16.mxu1 %v11972_v27  ;;  %v1161_v55 = vmul.f32 %v1120_v14, %v1061_v46  ;;  %v12234_v53 = vcombine.high %v1745_v36, %v1749_v33  ;;  %v11996_v27 = vcombine.high %v1506_v50, %v1510_v17  ;;  %v808_v14 = vrot.slane %v14695_v38, 4  ;;  %v1777_v33 = vld [vmem:[#allocation9 + $0xf00] sm:$0xff] }
 0x281   :  { %v1162_v21 = vmul.f32 %v1124_v44, %v1062_v24  ;;  %v11995_v44 = vcombine.low %v1506_v50, %v1510_v17  ;;  %v1026_v46 = vadd.f32 1e-05, %v1010_v26  ;;  %v12241_v5 = vcombine.low %v1753_v30, %v1757_v4  ;;  %v1781_v50 = vld [vmem:[#allocation9 + $0xf20] sm:$0xff]  ;;  %v1538_v17 = vld [vmem:[#allocation9 + $0x788] sm:$0xff] }
 0x282   :  { %v14907_v41 = vadd.f32 %v1220_v37, %v1161_v55  ;;  %v809_v3 = vadd.f32 %v808_v14, %v14695_v38  ;;  %v827_v24 = vadd.f32 %v826_v52, %v14587_v12  ;;  %v1534_v37 = vld [vmem:[#allocation9 + $0x768] sm:$0xff]  ;;  %v12266_v63 = vcombine.high %v1777_v33, %v1781_v50 }
 0x283   :  { %7575 = vmatpush1.bf16.msra.mxu0 %v12209_v19  ;;  %7825 = vmatpush1.bf16.msra.mxu1 %v11971_v59  ;;  %v14905_v29 = vadd.f32 %v1224_v60, %v1162_v21  ;;  %v12242_v19 = vcombine.high %v1753_v30, %v1757_v4  ;;  %v12004_v59 = vcombine.high %v1514_v15, %v1518_v61  ;;  %v1769_v60 = vld [vmem:[#allocation9 + $0xec0] sm:$0xff]  ;;  %13853 = vrsqrt.f32 %v1026_v46  ;;  %v1530_v21 = vld [vmem:[#allocation9 + $0x748] sm:$0xff] }
 0x284   :  { %7576 = vmatprep.subr.bf16.mxu0 %v12218_v10  ;;  %7826 = vmatprep.subr.bf16.mxu1 %v11980_v35  ;;  %v1765_v10 = vld [vmem:[#allocation9 + $0xea0] sm:$0xff]  ;;  %v1522_v35 = vld [vmem:[#allocation9 + $0x708] sm:$0xff]  ;;  %v828_v36 = vrot.slane %v827_v24, 2  ;;  %v12020_v25 = vcombine.high %v1530_v21, %v1534_v37  ;;  %v12019_v30 = vcombine.low %v1530_v21, %v1534_v37  ;;  %v12265_v46 = vcombine.low %v1777_v33, %v1781_v50  ;;  %v13888_v21 = vld [vmem:[#allocation7] sm:$0xff] }
 0x285   :  { %v12250_v2 = vcombine.high %v1761_v1, %v1765_v10  ;;  %v12012_v55 = vcombine.high %v1522_v35, %v1526_v16  ;;  %v1785_v15 = vld [vmem:[#allocation9 + $0xf40] sm:$0xff]  ;;  %v1546_v14 = vld [vmem:[#allocation9 + $0x7c8] sm:$0xff]  ;;  %v1196_v37 = vrot.slane %v13888_v21, %v14816_v11 }
 0x286   :  { %v829_v26 = vadd.f32 %v828_v36, %v827_v24  ;;  %v1789_v61 = vld [vmem:[#allocation9 + $0xf60] sm:$0xff]  ;;  %v1554_v24 = vld [vmem:[#allocation9 + $0x808] sm:$0xff] }
 0x287   :  { %7577 = vmatpush1.bf16.msra.mxu0 %v12217_v42  ;;  %7827 = vmatpush1.bf16.msra.mxu1 %v11979_v48  ;;  %v1773_v42 = vld [vmem:[#allocation9 + $0xee0] sm:$0xff]  ;;  %v810_v48 = vrot.slane %v809_v3, 2 }
 0x288   :  { %7578 = vmatprep.subr.bf16.mxu0 %v12226_v49  ;;  %7828 = vmatprep.subr.bf16.mxu1 %v11988_v23  ;;  %v12249_v49 = vcombine.low %v1761_v1, %v1765_v10  ;;  %v12011_v23 = vcombine.low %v1522_v35, %v1526_v16  ;;  %v12258_v57 = vcombine.high %v1769_v60, %v1773_v42  ;;  %v830_v35 = vrot.slane %v829_v26, 1  ;;  %v1805_v33 = vld [vmem:[#allocation9 + $0xfe0] sm:$0xff] }
 0x289   :  { %v12274_v16 = vcombine.high %v1785_v15, %v1789_v61  ;;  %v1829_v21 = vld [vmem:[#allocation9 + $0x10a0] sm:$0xff] }
 0x28b   :  { %7579 = vmatpush1.bf16.msra.mxu0 %v12225_v31  ;;  %7829 = vmatpush1.bf16.msra.mxu1 %v11987_v8  ;;  %v1542_v31 = vld [vmem:[#allocation9 + $0x7a8] sm:$0xff]  ;;  %v811_v8 = vadd.f32 %v810_v48, %v809_v3  ;;  %v12273_v48 = vcombine.low %v1785_v15, %v1789_v61  ;;  %v1813_v15 = vld [vmem:[#allocation9 + $0x1020] sm:$0xff] }
 0x28c   :  { %7580 = vmatprep.subr.bf16.mxu0 %v12234_v53  ;;  %7830 = vmatprep.subr.bf16.mxu1 %v11996_v27  ;;  %v13852_v53 = vpop.eup %13851  ;;  %v12257_v27 = vcombine.low %v1769_v60, %v1773_v42  ;;  %v12028_v4 = vcombine.high %v1538_v17, %v1542_v31  ;;  %v12027_v10 = vcombine.low %v1538_v17, %v1542_v31  ;;  %v1562_v17 = vld [vmem:[#allocation9 + $0x848] sm:$0xff] }
 0x28d   :  { %v13854_v52 = vpop.eup %13853  ;;  %v1566_v31 = vld [vmem:[#allocation9 + $0x868] sm:$0xff] }
 0x28e   :  { %v1058_v60 = vmul.f32 %v13854_v52, %v14878_v18  ;;  %v1570_v61 = vld [vmem:[#allocation9 + $0x888] sm:$0xff] }
 0x28f   :  { %7581 = vmatpush1.bf16.msra.mxu0 %v12233_v40  ;;  %7831 = vmatpush1.bf16.msra.mxu1 %v11995_v44  ;;  %v1550_v40 = vld [vmem:[#allocation9 + $0x7e8] sm:$0xff]  ;;  %v812_v44 = vrot.slane %v811_v8, 1 }
 0x290   :  { %7582 = vmatprep.subr.bf16.mxu0 %v12242_v19  ;;  %7832 = vmatprep.subr.bf16.mxu1 %v12004_v59  ;;  %v1055_v19 = vmul.f32 %v13852_v53, %v14860_v58  ;;  %v13887_v59 = vld [vmem:[#allocation6] sm:$0xff]  ;;  %v12036_v3 = vcombine.high %v1546_v14, %v1550_v40  ;;  %v1108_v58 = vrot.slane %v14811_v28, %v14617_v20 }
 0x291   :  { %v1096_v1 = vrot.slane %v13887_v59, %v14816_v11  ;;  %v1208_v28 = vrot.slane %v14832_v9, %v14617_v20 }
 0x292   :  { %v1158_v18 = vmul.f32 %v1108_v58, %v1058_v60  ;;  %v1825_v58 = vld [vmem:[#allocation9 + $0x1080] sm:$0xff] }
 0x293   :  { %7583 = vmatpush1.bf16.msra.mxu0 %v12241_v5  ;;  %7833 = vmatpush1.bf16.msra.mxu1 %v12003_v22  ;;  %v1793_v5 = vld [vmem:[#allocation9 + $0xf80] sm:$0xff]  ;;  %v1155_v42 = vmul.f32 %v1096_v1, %v1055_v19  ;;  %v12051_v19 = vcombine.low %v1562_v17, %v1566_v31 }
 0x294   :  { %7584 = vmatprep.subr.bf16.mxu0 %v12250_v2  ;;  %7834 = vmatprep.subr.bf16.mxu1 %v12012_v55  ;;  %v1797_v22 = vld [vmem:[#allocation9 + $0xfa0] sm:$0xff]  ;;  %v1558_v2 = vld [vmem:[#allocation9 + $0x828] sm:$0xff]  ;;  %v813_v55 = vadd.f32 %v812_v44, %v811_v8  ;;  %v1258_v9 = vadd.f32 %v1208_v28, %v1158_v18 }
 0x295   :  { %v12282_v36 = vcombine.high %v1793_v5, %v1797_v22  ;;  %v1255_v8 = vadd.f32 %v1196_v37, %v1155_v42  ;;  %v12281_v53 = vcombine.low %v1793_v5, %v1797_v22  ;;  %v1586_v37 = vld [vmem:[#allocation9 + $0x908] sm:$0xff]  ;;  %v1837_v28 = vld [vmem:[#allocation9 + $0x10e0] sm:$0xff] }
 0x296   :  { %v865_v50 = vmul.f32 0.125, %v813_v55  ;;  %v1274_v5 = vmax.f32 %v1258_v9, 0.0 }
 0x297   :  { %7585 = vmatpush1.bf16.msra.mxu0 %v12249_v49  ;;  %7835 = vmatpush1.bf16.msra.mxu1 %v12011_v23  ;;  %v12035_v49 = vcombine.low %v1546_v14, %v1550_v40  ;;  %v831_v23 = vadd.f32 %v830_v35, %v829_v26  ;;  %v1574_v14 = vld [vmem:[#allocation9 + $0x8a8] sm:$0xff]  ;;  %v1271_v44 = vmax.f32 %v1255_v8, 0.0  ;;  %v12313_v8 = vcombine.low %v1825_v58, %v1829_v21 }
 0x298   :  { %7586 = vmatprep.subr.bf16.mxu0 %v12258_v57  ;;  %7836 = vmatprep.subr.bf16.mxu1 %v12020_v25  ;;  %v12044_v57 = vcombine.high %v1554_v24, %v1558_v2  ;;  %v1801_v25 = vld [vmem:[#allocation9 + $0xfc0] sm:$0xff]  ;;  %v14922_v40 = vsub.f32 %v14695_v38, %v865_v50  ;;  %v1578_v35 = vld [vmem:[#allocation9 + $0x8c8] sm:$0xff] }
 0x299   :  { %v12290_v26 = vcombine.high %v1801_v25, %v1805_v33  ;;  %v12289_v52 = vcombine.low %v1801_v25, %v1805_v33  ;;  %v1821_v38 = vld [vmem:[#allocation9 + $0x1060] sm:$0xff]  ;;  %v14931_v22 = vpack.c.bf16 %v1271_v44, %v1271_v44  ;;  %v12314_v25 = vcombine.high %v1825_v58, %v1829_v21  ;;  %v1622_v21 = vld [vmem:[#allocation9 + $0xa28] sm:$0xff] }
 0x29a   :  { %v1833_v50 = vld [vmem:[#allocation9 + $0x10c0] sm:$0xff] }
 0x29b   :  { %7587 = vmatpush1.bf16.msra.mxu0 %v12257_v27  ;;  %7837 = vmatpush1.bf16.msra.mxu1 %v12019_v30  ;;  %v12043_v27 = vcombine.low %v1554_v24, %v1558_v2  ;;  %v868_v30 = vmul.f32 0.125, %v831_v23  ;;  %v12059_v24 = vcombine.low %v1570_v61, %v1574_v14  ;;  %v12321_v9 = vcombine.low %v1833_v50, %v1837_v28  ;;  %v1861_v58 = vld [vmem:[#allocation9 + $0x11a0] sm:$0xff] }
 0x29c   :  { %7588 = vmatprep.subr.bf16.mxu0 %v12266_v63  ;;  %7838 = vmatprep.subr.bf16.mxu1 %v12028_v4  ;;  %v1809_v63 = vld [vmem:[#allocation9 + $0x1000] sm:$0xff]  ;;  %v12052_v4 = vcombine.high %v1562_v17, %v1566_v31  ;;  %v1594_v17 = vld [vmem:[#allocation9 + $0x948] sm:$0xff] }
 0x29d   :  { %v14926_v59 = vsub.f32 %v14587_v12, %v868_v30  ;;  %v12298_v1 = vcombine.high %v1809_v63, %v1813_v15  ;;  %v12297_v12 = vcombine.low %v1809_v63, %v1813_v15  ;;  %v1598_v31 = vld [vmem:[#allocation9 + $0x968] sm:$0xff]  ;;  %v12322_v30 = vcombine.high %v1833_v50, %v1837_v28  ;;  %v1841_v63 = vld [vmem:[#allocation9 + $0x1100] sm:$0xff] }
 0x29e   :  { %v1845_v15 = vld [vmem:[#allocation9 + $0x1120] sm:$0xff]  ;;  %v12083_v44 = vcombine.low %v1594_v17, %v1598_v31  ;;  %v1630_v28 = vld [vmem:[#allocation9 + $0xa68] sm:$0xff] }
 0x29f   :  { %7589 = vmatpush1.bf16.msra.mxu0 %v12265_v46  ;;  %7839 = vmatpush1.bf16.msra.mxu1 %v12027_v10  ;;  %v12060_v46 = vcombine.high %v1570_v61, %v1574_v14  ;;  %v1817_v10 = vld [vmem:[#allocation9 + $0x1040] sm:$0xff]  ;;  %v900_v2 = vmul.f32 %v14926_v59, %v14926_v59  ;;  %v1602_v61 = vld [vmem:[#allocation9 + $0x988] sm:$0xff] }
 0x2a0   :  { %7590 = vmatprep.subr.bf16.mxu0 %v12274_v16  ;;  %7840 = vmatprep.subr.bf16.mxu1 %v12036_v3  ;;  %v1582_v16 = vld [vmem:[#allocation9 + $0x8e8] sm:$0xff]  ;;  %v897_v3 = vmul.f32 %v14922_v40, %v14922_v40  ;;  %v12306_v55 = vcombine.high %v1817_v10, %v1821_v38  ;;  %v12305_v23 = vcombine.low %v1817_v10, %v1821_v38  ;;  %v1853_v38 = vld [vmem:[#allocation9 + $0x1160] sm:$0xff] }
 0x2a1   :  { %v12068_v60 = vcombine.high %v1578_v35, %v1582_v16  ;;  %v1606_v14 = vld [vmem:[#allocation9 + $0x9a8] sm:$0xff]  ;;  %v1869_v50 = vld [vmem:[#allocation9 + $0x11e0] sm:$0xff] }
 0x2a2   :  { %v953_v42 = vrot.slane %v897_v3, 4 }
 0x2a3   :  { %7591 = vmatpush1.bf16.msra.mxu0 %v12273_v48  ;;  %7841 = vmatpush1.bf16.msra.mxu1 %v12035_v49  ;;  %v1590_v48 = vld [vmem:[#allocation9 + $0x928] sm:$0xff]  ;;  %v14935_v49 = vpack.c.bf16 %v1274_v5, %v1274_v5  ;;  %v12091_v5 = vcombine.low %v1602_v61, %v1606_v14 }
 0x2a4   :  { %7592 = vmatprep.subr.bf16.mxu0 %v12282_v36  ;;  %7851 = vmatprep.subr.bf16.mxu1 %v12044_v57  ;;  %v12067_v36 = vcombine.low %v1578_v35, %v1582_v16  ;;  %v971_v57 = vrot.slane %v900_v2, 4  ;;  %v12076_v33 = vcombine.high %v1586_v37, %v1590_v48  ;;  %v954_v18 = vadd.f32 %v953_v42, %v897_v3  ;;  %v1610_v35 = vld [vmem:[#allocation9 + $0x9c8] sm:$0xff] }
 0x2a5   :  { %v1614_v16 = vld [vmem:[#allocation9 + $0x9e8] sm:$0xff]  ;;  %v12329_v3 = vcombine.low %v1841_v63, %v1845_v15 }
 0x2a6   :  { %7843 = vmatmul.mubr.bf16.vlgmr.msra.gmra.mrb[12].mxu1 %v14674_v39  ;;  %v1618_v42 = vld [vmem:[#allocation9 + $0xa08] sm:$0xff] }
 0x2a7   :  { %7593 = vmatpush1.bf16.msra.mxu0 %v12281_v53  ;;  %7852 = vmatpush1.bf16.msra.mxu1 %v12043_v27  ;;  %v12075_v53 = vcombine.low %v1586_v37, %v1590_v48  ;;  %v972_v27 = vadd.f32 %v971_v57, %v900_v2  ;;  %v12100_v2 = vcombine.high %v1610_v35, %v1614_v16 }
 0x2a8   :  { %7883 = vmatprep.mubr.bf16.mxu1 %v14693_v43  ;;  %7594 = vmatprep.subr.bf16.mxu0 %v12290_v26  ;;  %v12084_v26 = vcombine.high %v1594_v17, %v1598_v31  ;;  %v12099_v48 = vcombine.low %v1610_v35, %v1614_v16  ;;  %v12108_v57 = vcombine.high %v1618_v42, %v1622_v21 }
 0x2a9   :  { %7853 = vmatprep.subr.bf16.mxu1 %v12052_v4  ;;  %v955_v4 = vrot.slane %v954_v18, 2  ;;  %v12107_v31 = vcombine.low %v1618_v42, %v1622_v21 }
 0x2ab   :  { %7595 = vmatpush1.bf16.msra.mxu0 %v12289_v52  ;;  %7854 = vmatpush1.bf16.msra.mxu1 %v12051_v19  ;;  %v973_v52 = vrot.slane %v972_v27, 2  ;;  %v12330_v19 = vcombine.high %v1841_v63, %v1845_v15  ;;  %v956_v10 = vadd.f32 %v955_v4, %v954_v18  ;;  %v1626_v18 = vld [vmem:[#allocation9 + $0xa48] sm:$0xff]  ;;  %v1877_v63 = vld [vmem:[#allocation9 + $0x1220] sm:$0xff] }
 0x2ac   :  { %7605 = vmatprep.subr.bf16.mxu0 %v12298_v1  ;;  %7855 = vmatprep.subr.bf16.mxu1 %v12060_v46  ;;  %v12092_v1 = vcombine.high %v1602_v61, %v1606_v14  ;;  %v1849_v46 = vld [vmem:[#allocation9 + $0x1140] sm:$0xff]  ;;  %v1634_v4 = vld [vmem:[#allocation9 + $0xa88] sm:$0xff]  ;;  %v12115_v14 = vcombine.low %v1626_v18, %v1630_v28 }
 0x2ad   :  { %v12337_v37 = vcombine.low %v1849_v46, %v1853_v38  ;;  %v1638_v15 = vld [vmem:[#allocation9 + $0xaa8] sm:$0xff] }
 0x2ae   :  { %7597 = vmatmul.mubr.bf16.vlgmr.msra.gmra.mrb[24].mxu0 %v14931_v22  ;;  %v12123_v16 = vcombine.low %v1634_v4, %v1638_v15 }
 0x2af   :  { %7606 = vmatpush1.bf16.msra.mxu0 %v12297_v12  ;;  %7856 = vmatpush1.bf16.msra.mxu1 %v12059_v24  ;;  %v974_v12 = vadd.f32 %v973_v52, %v972_v27  ;;  %v12338_v24 = vcombine.high %v1849_v46, %v1853_v38  ;;  %v12116_v27 = vcombine.high %v1626_v18, %v1630_v28  ;;  %v1885_v46 = vld [vmem:[#allocation9 + $0x1260] sm:$0xff]  ;;  %v1646_v38 = vld [vmem:[#allocation9 + $0xae8] sm:$0xff] }
 0x2b0   :  { %7607 = vmatprep.subr.bf16.mxu0 %v12306_v55  ;;  %7857 = vmatprep.subr.bf16.mxu1 %v12068_v60  ;;  %v1857_v55 = vld [vmem:[#allocation9 + $0x1180] sm:$0xff]  ;;  %v957_v60 = vrot.slane %v956_v10, 1  ;;  %v12124_v52 = vcombine.high %v1634_v4, %v1638_v15 }
 0x2b1   :  { %7637 = vmatprep.mubr.bf16.mxu0 %v14935_v49  ;;  %v12345_v17 = vcombine.low %v1857_v55, %v1861_v58  ;;  %v1905_v28 = vld [vmem:[#allocation9 + $0x1300] sm:$0xff] }
 0x2b2   :  { %v1913_v4 = vld [vmem:[#allocation9 + $0x1340] sm:$0xff] }
 0x2b3   :  { %7608 = vmatpush1.bf16.msra.mxu0 %v12305_v23  ;;  %7858 = vmatpush1.bf16.msra.mxu1 %v12067_v36  ;;  %v975_v23 = vrot.slane %v974_v12, 1  ;;  %v12346_v36 = vcombine.high %v1857_v55, %v1861_v58  ;;  %v1650_v55 = vld [vmem:[#allocation9 + $0xb08] sm:$0xff]  ;;  %v1917_v15 = vld [vmem:[#allocation9 + $0x1360] sm:$0xff] }
 0x2b4   :  { %7609 = vmatprep.subr.bf16.mxu0 %v12314_v25  ;;  %7859 = vmatprep.subr.bf16.mxu1 %v12076_v33  ;;  %v1865_v25 = vld [vmem:[#allocation9 + $0x11c0] sm:$0xff]  ;;  %v958_v33 = vadd.f32 %v957_v60, %v956_v10  ;;  %v1642_v10 = vld [vmem:[#allocation9 + $0xac8] sm:$0xff] }
 0x2b5   :  { %v12353_v61 = vcombine.low %v1865_v25, %v1869_v50  ;;  %v1654_v60 = vld [vmem:[#allocation9 + $0xb28] sm:$0xff]  ;;  %v12131_v42 = vcombine.low %v1642_v10, %v1646_v38 }
 0x2b7   :  { %7610 = vmatpush1.bf16.msra.mxu0 %v12313_v8  ;;  %7860 = vmatpush1.bf16.msra.mxu1 %v12075_v53  ;;  %v976_v8 = vadd.f32 %v975_v23, %v974_v12  ;;  %v12354_v53 = vcombine.high %v1865_v25, %v1869_v50  ;;  %v12132_v12 = vcombine.high %v1642_v10, %v1646_v38  ;;  %v1901_v23 = vld [vmem:[#allocation9 + $0x12e0] sm:$0xff] }
 0x2b8   :  { %7611 = vmatprep.subr.bf16.mxu0 %v12322_v30  ;;  %7861 = vmatprep.subr.bf16.mxu1 %v12084_v26  ;;  %v1873_v30 = vld [vmem:[#allocation9 + $0x1200] sm:$0xff]  ;;  %v1009_v26 = vmul.f32 0.125, %v958_v33  ;;  %v12139_v33 = vcombine.low %v1650_v55, %v1654_v60  ;;  %v12402_v10 = vcombine.high %v1913_v4, %v1917_v15 }
 0x2b9   :  { %v12361_v35 = vcombine.low %v1873_v30, %v1877_v63 }
 0x2bb   :  { %7612 = vmatpush1.bf16.msra.mxu0 %v12321_v9  ;;  %7862 = vmatpush1.bf16.msra.mxu1 %v12083_v44  ;;  %v1012_v9 = vmul.f32 0.125, %v976_v8  ;;  %v12362_v44 = vcombine.high %v1873_v30, %v1877_v63  ;;  %v1670_v8 = vld [vmem:[#allocation9 + $0xba8] sm:$0xff] }
 0x2bc   :  { %7613 = vmatprep.subr.bf16.mxu0 %v12330_v19  ;;  %7863 = vmatprep.subr.bf16.mxu1 %v12092_v1  ;;  %v1881_v19 = vld [vmem:[#allocation9 + $0x1240] sm:$0xff]  ;;  %v1025_v1 = vadd.f32 1e-05, %v1009_v26 }
 0x2bd   :  { %v12369_v58 = vcombine.low %v1881_v19, %v1885_v46 }
 0x2be   :  { %13855 = vrsqrt.f32 %v1025_v1 }
 0x2bf   :  { %7614 = vmatpush1.bf16.msra.mxu0 %v12329_v3  ;;  %7864 = vmatpush1.bf16.msra.mxu1 %v12091_v5  ;;  %v1028_v3 = vadd.f32 1e-05, %v1012_v9  ;;  %v12370_v5 = vcombine.high %v1881_v19, %v1885_v46 }
 0x2c0   :  { %7615 = vmatprep.subr.bf16.mxu0 %v12338_v24  ;;  %7865 = vmatprep.subr.bf16.mxu1 %v12100_v2  ;;  %v1889_v24 = vld [vmem:[#allocation9 + $0x1280] sm:$0xff] }
 0x2c1   :  { %v1893_v2 = vld [vmem:[#allocation9 + $0x12a0] sm:$0xff]  ;;  %13857 = vrsqrt.f32 %v1028_v3 }
 0x2c2   :  { %v12378_v21 = vcombine.high %v1889_v24, %v1893_v2  ;;  %v12377_v25 = vcombine.low %v1889_v24, %v1893_v2  ;;  %v15168_v3 = vld [vmem:[#allocation33_spill] sm:$0xff]  ;;  %v1682_v24 = vld [vmem:[#allocation9 + $0xc08] sm:$0xff] }
 0x2c3   :  { %7616 = vmatpush1.bf16.msra.mxu0 %v12337_v37  ;;  %7866 = vmatpush1.bf16.msra.mxu1 %v12099_v48  ;;  %v12140_v37 = vcombine.high %v1650_v55, %v1654_v60  ;;  %v1897_v48 = vld [vmem:[#allocation9 + $0x12c0] sm:$0xff]  ;;  %v1686_v2 = vld [vmem:[#allocation9 + $0xc28] sm:$0xff]  ;;  %v13890_v55 = vld [vmem:[#allocation7 + $0x8] sm:$0xff] }
 0x2c4   :  { %7617 = vmatprep.subr.bf16.mxu0 %v12346_v36  ;;  %7867 = vmatprep.subr.bf16.mxu1 %v12108_v57  ;;  %v1658_v36 = vld [vmem:[#allocation9 + $0xb48] sm:$0xff]  ;;  %v12386_v50 = vcombine.high %v1897_v48, %v1901_v23  ;;  %v1204_v60 = vrot.slane %v13890_v55, %v14612_v13 }
 0x2c5   :  { %v1662_v57 = vld [vmem:[#allocation9 + $0xb68] sm:$0xff] }
 0x2c6   :  { %v12148_v18 = vcombine.high %v1658_v36, %v1662_v57  ;;  %v12147_v30 = vcombine.low %v1658_v36, %v1662_v57  ;;  %v1216_v36 = vrot.slane %v13890_v55, %v15168_v3  ;;  %v1690_v57 = vld [vmem:[#allocation9 + $0xc48] sm:$0xff] }
 0x2c7   :  { %7618 = vmatpush1.bf16.msra.mxu0 %v12345_v17  ;;  %7868 = vmatpush1.bf16.msra.mxu1 %v12107_v31  ;;  %v1909_v17 = vld [vmem:[#allocation9 + $0x1320] sm:$0xff]  ;;  %v1666_v31 = vld [vmem:[#allocation9 + $0xb88] sm:$0xff] }
 0x2c8   :  { %7619 = vmatprep.subr.bf16.mxu0 %v12354_v53  ;;  %7869 = vmatprep.subr.bf16.mxu1 %v12116_v27  ;;  %v13856_v53 = vpop.eup %13855  ;;  %v12385_v27 = vcombine.low %v1897_v48, %v1901_v23  ;;  %v12394_v26 = vcombine.high %v1905_v28, %v1909_v17  ;;  %v12156_v63 = vcombine.high %v1666_v31, %v1670_v8  ;;  %v1929_v23 = vld [vmem:[#allocation9 + $0x13c0] sm:$0xff] }
 0x2c9   :  { %v12393_v1 = vcombine.low %v1905_v28, %v1909_v17  ;;  %v12155_v46 = vcombine.low %v1666_v31, %v1670_v8  ;;  %v1937_v17 = vld [vmem:[#allocation9 + $0x1400] sm:$0xff] }
 0x2ca   :  { %v1941_v8 = vld [vmem:[#allocation9 + $0x1420] sm:$0xff] }
 0x2cb   :  { %7620 = vmatpush1.bf16.msra.mxu0 %v12353_v61  ;;  %7870 = vmatpush1.bf16.msra.mxu1 %v12115_v14  ;;  %v1674_v61 = vld [vmem:[#allocation9 + $0xbc8] sm:$0xff]  ;;  %v13858_v9 = vpop.eup %13857 }
 0x2cc   :  { %7621 = vmatprep.subr.bf16.mxu0 %v12362_v44  ;;  %7871 = vmatprep.subr.bf16.mxu1 %v12124_v52  ;;  %v1678_v14 = vld [vmem:[#allocation9 + $0xbe8] sm:$0xff]  ;;  %v1057_v44 = vmul.f32 %v13856_v53, %v14922_v40 }
 0x2cd   :  { %v13889_v52 = vld [vmem:[#allocation6 + $0x8] sm:$0xff]  ;;  %v12164_v38 = vcombine.high %v1674_v61, %v1678_v14 }
 0x2ce   :  { %v1104_v19 = vrot.slane %v13889_v52, %v14612_v13  ;;  %v1698_v53 = vld [vmem:[#allocation9 + $0xc88] sm:$0xff] }
 0x2cf   :  { %7622 = vmatpush1.bf16.msra.mxu0 %v12361_v35  ;;  %7872 = vmatpush1.bf16.msra.mxu1 %v12123_v16  ;;  %v1921_v35 = vld [vmem:[#allocation9 + $0x1380] sm:$0xff]  ;;  %v1060_v16 = vmul.f32 %v13858_v9, %v14926_v59 }
 0x2d0   :  { %7623 = vmatprep.subr.bf16.mxu0 %v12370_v5  ;;  %7873 = vmatprep.subr.bf16.mxu1 %v12132_v12  ;;  %v1116_v5 = vrot.slane %v13889_v52, %v15168_v3  ;;  %v1925_v12 = vld [vmem:[#allocation9 + $0x13a0] sm:$0xff]  ;;  %v1157_v40 = vmul.f32 %v1104_v19, %v1057_v44  ;;  %v1706_v19 = vld [vmem:[#allocation9 + $0xcc8] sm:$0xff] }
 0x2d1   :  { %v1933_v59 = vld [vmem:[#allocation9 + $0x13e0] sm:$0xff] }
 0x2d2   :  { %v1160_v48 = vmul.f32 %v1116_v5, %v1060_v16  ;;  %v12418_v28 = vcombine.high %v1929_v23, %v1933_v59  ;;  %v1945_v9 = vld [vmem:[#allocation9 + $0x1440] sm:$0xff] }
 0x2d3   :  { %7624 = vmatpush1.bf16.msra.mxu0 %v12369_v58  ;;  %7874 = vmatpush1.bf16.msra.mxu1 %v12131_v42  ;;  %v12401_v58 = vcombine.low %v1913_v4, %v1917_v15  ;;  %v12163_v42 = vcombine.low %v1674_v61, %v1678_v14  ;;  %v12426_v15 = vcombine.high %v1937_v17, %v1941_v8  ;;  %v1949_v44 = vld [vmem:[#allocation9 + $0x1460] sm:$0xff] }
 0x2d4   :  { %7625 = vmatprep.subr.bf16.mxu0 %v12378_v21  ;;  %7875 = vmatprep.subr.bf16.mxu1 %v12140_v37  ;;  %v12410_v21 = vcombine.high %v1921_v35, %v1925_v12  ;;  %v12172_v37 = vcombine.high %v1682_v24, %v1686_v2  ;;  %v1953_v5 = vld [vmem:[#allocation9 + $0x1480] sm:$0xff] }
 0x2d7   :  { %7626 = vmatpush1.bf16.msra.mxu0 %v12377_v25  ;;  %7876 = vmatpush1.bf16.msra.mxu1 %v12139_v33  ;;  %v1694_v25 = vld [vmem:[#allocation9 + $0xc68] sm:$0xff]  ;;  %v1257_v33 = vadd.f32 %v1204_v60, %v1157_v40  ;;  %v12433_v40 = vcombine.low %v1945_v9, %v1949_v44 }
 0x2d8   :  { %7627 = vmatprep.subr.bf16.mxu0 %v12386_v50  ;;  %7877 = vmatprep.subr.bf16.mxu1 %v12148_v18  ;;  %v12409_v50 = vcombine.low %v1921_v35, %v1925_v12  ;;  %v12171_v18 = vcombine.low %v1682_v24, %v1686_v2  ;;  %v12180_v31 = vcombine.high %v1690_v57, %v1694_v25  ;;  %v1957_v12 = vld [vmem:[#allocation9 + $0x14a0] sm:$0xff]  ;;  %v1714_v24 = vld [vmem:[#allocation9 + $0xd08] sm:$0xff] }
 0x2d9   :  { %v12179_v4 = vcombine.low %v1690_v57, %v1694_v25  ;;  %v1718_v2 = vld [vmem:[#allocation9 + $0xd28] sm:$0xff]  ;;  %v12442_v60 = vcombine.high %v1953_v5, %v1957_v12  ;;  %v1969_v25 = vld [vmem:[#allocation9 + $0x1500] sm:$0xff] }
 0x2db   :  { %7628 = vmatpush1.bf16.msra.mxu0 %v12385_v27  ;;  %7878 = vmatpush1.bf16.msra.mxu1 %v12147_v30  ;;  %v1702_v27 = vld [vmem:[#allocation9 + $0xca8] sm:$0xff]  ;;  %v1260_v30 = vadd.f32 %v1216_v36, %v1160_v48 }
 0x2dc   :  { %7629 = vmatprep.subr.bf16.mxu0 %v12394_v26  ;;  %7879 = vmatprep.subr.bf16.mxu1 %v12156_v63  ;;  %v1273_v26 = vmax.f32 %v1257_v33, 0.0  ;;  %v12417_v63 = vcombine.low %v1929_v23, %v1933_v59  ;;  %v12188_v61 = vcombine.high %v1698_v53, %v1702_v27  ;;  %v1726_v48 = vld [vmem:[#allocation9 + $0xd68] sm:$0xff]  ;;  %v12441_v23 = vcombine.low %v1953_v5, %v1957_v12  ;;  %v1973_v33 = vld [vmem:[#allocation9 + $0x1520] sm:$0xff] }
 0x2dd   :  { %v1276_v14 = vmax.f32 %v1260_v30, 0.0  ;;  %v12203_v59 = vcombine.low %v1714_v24, %v1718_v2  ;;  %v1981_v30 = vld [vmem:[#allocation9 + $0x1560] sm:$0xff] }
 0x2de   :  { %v14947_v52 = vpack.c.bf16 %v1273_v26, %v1273_v26 }
 0x2df   :  { %7630 = vmatpush1.bf16.msra.mxu0 %v12393_v1  ;;  %7880 = vmatpush1.bf16.msra.mxu1 %v12155_v46  ;;  %v1710_v1 = vld [vmem:[#allocation9 + $0xce8] sm:$0xff]  ;;  %v12425_v46 = vcombine.low %v1937_v17, %v1941_v8  ;;  %v14949_v35 = vpack.c.bf16 %v1276_v14, %v1276_v14 }
 0x2e0   :  { %7631 = vmatprep.subr.bf16.mxu0 %v12402_v10  ;;  %7881 = vmatprep.subr.bf16.mxu1 %v12164_v38  ;;  %v12187_v10 = vcombine.low %v1698_v53, %v1702_v27  ;;  %v12434_v38 = vcombine.high %v1945_v9, %v1949_v44  ;;  %v12196_v16 = vcombine.high %v1706_v19, %v1710_v1  ;;  %v1977_v27 = vld [vmem:[#allocation9 + $0x1540] sm:$0xff] }
 0x2e1   :  { %v12195_v55 = vcombine.low %v1706_v19, %v1710_v1  ;;  %v12466_v44 = vcombine.high %v1977_v27, %v1981_v30  ;;  %v1985_v1 = vld [vmem:[#allocation9 + $0x1580] sm:$0xff] }
 0x2e3   :  { %7632 = vmatpush1.bf16.msra.mxu0 %v12401_v58  ;;  %7882 = vmatpush1.bf16.msra.mxu1 %v12163_v42  ;;  %v12204_v58 = vcombine.high %v1714_v24, %v1718_v2  ;;  %v1961_v42 = vld [vmem:[#allocation9 + $0x14c0] sm:$0xff] }
 0x2e4   :  { %7633 = vmatprep.subr.bf16.mxu0 %v12410_v21  ;;  %7892 = vmatprep.subr.bf16.mxu1 %v12172_v37  ;;  %v1965_v21 = vld [vmem:[#allocation9 + $0x14e0] sm:$0xff]  ;;  %v1722_v37 = vld [vmem:[#allocation9 + $0xd48] sm:$0xff] }
 0x2e5   :  { %v12450_v36 = vcombine.high %v1961_v42, %v1965_v21  ;;  %v12212_v57 = vcombine.high %v1722_v37, %v1726_v48  ;;  %v12211_v17 = vcombine.low %v1722_v37, %v1726_v48  ;;  %v1993_v2 = vld [vmem:[#allocation9 + $0x15c0] sm:$0xff] }
 0x2e6   :  { %7884 = vmatmul.mubr.bf16.vlgmr.msra.gmra.mrb[12].mxu1 %v14884_v47  ;;  %v2001_v48 = vld [vmem:[#allocation9 + $0x1600] sm:$0xff] }
 0x2e7   :  { %7634 = vmatpush1.bf16.msra.mxu0 %v12409_v50  ;;  %7893 = vmatpush1.bf16.msra.mxu1 %v12171_v18  ;;  %v1730_v50 = vld [vmem:[#allocation9 + $0xd88] sm:$0xff] }
 0x2e8   :  { %7924 = vmatprep.mubr.bf16.mxu1 %v14891_v34  ;;  %7635 = vmatprep.subr.bf16.mxu0 %v12418_v28  ;;  %v1734_v18 = vld [vmem:[#allocation9 + $0xda8] sm:$0xff]  ;;  %v12449_v28 = vcombine.low %v1961_v42, %v1965_v21 }
 0x2e9   :  { %7894 = vmatprep.subr.bf16.mxu1 %v12180_v31  ;;  %v12458_v31 = vcombine.high %v1969_v25, %v1973_v33  ;;  %v12220_v53 = vcombine.high %v1730_v50, %v1734_v18  ;;  %v12219_v9 = vcombine.low %v1730_v50, %v1734_v18  ;;  %v2009_v18 = vld [vmem:[#allocation9 + $0x1640] sm:$0xff] }
 0x2eb   :  { %7636 = vmatpush1.bf16.msra.mxu0 %v12417_v63  ;;  %7895 = vmatpush1.bf16.msra.mxu1 %v12179_v4  ;;  %v1738_v63 = vld [vmem:[#allocation9 + $0xdc8] sm:$0xff] }
 0x2ec   :  { %7646 = vmatprep.subr.bf16.mxu0 %v12426_v15  ;;  %7896 = vmatprep.subr.bf16.mxu1 %v12188_v61  ;;  %v1742_v4 = vld [vmem:[#allocation9 + $0xde8] sm:$0xff]  ;;  %v12457_v61 = vcombine.low %v1969_v25, %v1973_v33 }
 0x2ed   :  { %v12228_v19 = vcombine.high %v1738_v63, %v1742_v4  ;;  %v12227_v5 = vcombine.low %v1738_v63, %v1742_v4  ;;  %v2017_v4 = vld [vmem:[#allocation9 + $0x1680] sm:$0xff] }
 0x2ee   :  { %7638 = vmatmul.mubr.bf16.vlgmr.msra.gmra.mrb[24].mxu0 %v14947_v52 }
 0x2ef   :  { %7647 = vmatpush1.bf16.msra.mxu0 %v12425_v46  ;;  %7678 = vmatprep.mubr.bf16.mxu0 %v14949_v35  ;;  %v1989_v46 = vld [vmem:[#allocation9 + $0x15a0] sm:$0xff] }
 0x2f0   :  { %7897 = vmatpush1.bf16.msra.mxu1 %v12187_v10  ;;  %7648 = vmatprep.subr.bf16.mxu0 %v12434_v38  ;;  %v1746_v10 = vld [vmem:[#allocation9 + $0xe08] sm:$0xff]  ;;  %v12474_v12 = vcombine.high %v1985_v1, %v1989_v46 }
 0x2f1   :  { %7898 = vmatprep.subr.bf16.mxu1 %v12196_v16  ;;  %v1750_v38 = vld [vmem:[#allocation9 + $0xe28] sm:$0xff]  ;;  %v12465_v16 = vcombine.low %v1977_v27, %v1981_v30 }
 0x2f2   :  { %v12236_v24 = vcombine.high %v1746_v10, %v1750_v38  ;;  %v12235_v42 = vcombine.low %v1746_v10, %v1750_v38  ;;  %v2029_v10 = vld [vmem:[#allocation9 + $0x16e0] sm:$0xff]  ;;  %v1786_v38 = vld [vmem:[#allocation9 + $0xf48] sm:$0xff] }
 0x2f3   :  { %7649 = vmatpush1.bf16.msra.mxu0 %v12433_v40  ;;  %v1997_v40 = vld [vmem:[#allocation9 + $0x15e0] sm:$0xff] }
 0x2f4   :  { %7899 = vmatpush1.bf16.msra.mxu1 %v12195_v55  ;;  %7650 = vmatprep.subr.bf16.mxu0 %v12442_v60  ;;  %v1754_v55 = vld [vmem:[#allocation9 + $0xe48] sm:$0xff]  ;;  %v12482_v21 = vcombine.high %v1993_v2, %v1997_v40 }
 0x2f5   :  { %7900 = vmatprep.subr.bf16.mxu1 %v12204_v58  ;;  %v1758_v60 = vld [vmem:[#allocation9 + $0xe68] sm:$0xff]  ;;  %v12473_v58 = vcombine.low %v1985_v1, %v1989_v46  ;;  %v2025_v46 = vld [vmem:[#allocation9 + $0x16c0] sm:$0xff] }
 0x2f6   :  { %v12244_v37 = vcombine.high %v1754_v55, %v1758_v60  ;;  %v12243_v25 = vcombine.low %v1754_v55, %v1758_v60  ;;  %v2037_v55 = vld [vmem:[#allocation9 + $0x1720] sm:$0xff]  ;;  %v1794_v60 = vld [vmem:[#allocation9 + $0xf88] sm:$0xff] }
 0x2f7   :  { %7651 = vmatpush1.bf16.msra.mxu0 %v12441_v23  ;;  %v2005_v23 = vld [vmem:[#allocation9 + $0x1620] sm:$0xff] }
 0x2f8   :  { %7901 = vmatpush1.bf16.msra.mxu1 %v12203_v59  ;;  %7652 = vmatprep.subr.bf16.mxu0 %v12450_v36  ;;  %v1762_v59 = vld [vmem:[#allocation9 + $0xe88] sm:$0xff]  ;;  %v12490_v33 = vcombine.high %v2001_v48, %v2005_v23 }
 0x2f9   :  { %v14953_v8 = vpop.f32.mrb[8].mxu1  ;;  %7902 = vmatprep.subr.bf16.mxu1 %v12212_v57  ;;  %v1766_v36 = vld [vmem:[#allocation9 + $0xea8] sm:$0xff]  ;;  %v12481_v57 = vcombine.low %v1993_v2, %v1997_v40  ;;  %v2033_v40 = vld [vmem:[#allocation9 + $0x1700] sm:$0xff] }
 0x2fa   :  { %v14955_v26 = vpop.f32.mrb[9].mxu1  ;;  %v12252_v50 = vcombine.high %v1762_v59, %v1766_v36  ;;  %v12251_v27 = vcombine.low %v1762_v59, %v1766_v36  ;;  %v2045_v59 = vld [vmem:[#allocation9 + $0x1760] sm:$0xff]  ;;  %v1802_v36 = vld [vmem:[#allocation9 + $0xfc8] sm:$0xff] }
 0x2fb   :  { %7653 = vmatpush1.bf16.msra.mxu0 %v12449_v28  ;;  %v7479_v15 = vpop.f32.mrb[10].mxu1  ;;  %v2013_v28 = vld [vmem:[#allocation9 + $0x1660] sm:$0xff] }
 0x2fc   :  { %7903 = vmatpush1.bf16.msra.mxu1 %v12211_v17  ;;  %v7480_v14 = vpop.f32.mrb[11].mxu1  ;;  %7654 = vmatprep.subr.bf16.mxu0 %v12458_v31  ;;  %v1770_v17 = vld [vmem:[#allocation9 + $0xec8] sm:$0xff]  ;;  %v12498_v30 = vcombine.high %v2009_v18, %v2013_v28  ;;  %v2021_v15 = vld [vmem:[#allocation9 + $0x16a0] sm:$0xff] }
 0x2fd   :  { %7904 = vmatprep.subr.bf16.mxu1 %v12220_v53  ;;  %v1774_v31 = vld [vmem:[#allocation9 + $0xee8] sm:$0xff]  ;;  %v12489_v53 = vcombine.low %v2001_v48, %v2005_v23  ;;  %v2041_v23 = vld [vmem:[#allocation9 + $0x1740] sm:$0xff] }
 0x2fe   :  { %v12260_v63 = vcombine.high %v1770_v17, %v1774_v31  ;;  %v1782_v14 = vld [vmem:[#allocation9 + $0xf28] sm:$0xff] }
 0x2ff   :  { %7655 = vmatpush1.bf16.msra.mxu0 %v12457_v61  ;;  %v1778_v61 = vld [vmem:[#allocation9 + $0xf08] sm:$0xff] }
 0x300   :  { %7905 = vmatpush1.bf16.msra.mxu1 %v12219_v9  ;;  %7656 = vmatprep.subr.bf16.mxu0 %v12466_v44  ;;  %v12497_v9 = vcombine.low %v2009_v18, %v2013_v28  ;;  %v12259_v44 = vcombine.low %v1770_v17, %v1774_v31  ;;  %v12268_v1 = vcombine.high %v1778_v61, %v1782_v14  ;;  %v2049_v28 = vld [vmem:[#allocation9 + $0x1780] sm:$0xff]  ;;  %v1810_v31 = vld [vmem:[#allocation9 + $0x1008] sm:$0xff] }
 0x301   :  { %7906 = vmatprep.subr.bf16.mxu1 %v12228_v19  ;;  %v12506_v19 = vcombine.high %v2017_v4, %v2021_v15  ;;  %v2053_v17 = vld [vmem:[#allocation9 + $0x17a0] sm:$0xff] }
 0x303   :  { %7657 = vmatpush1.bf16.msra.mxu0 %v12465_v16  ;;  %v1790_v16 = vld [vmem:[#allocation9 + $0xf68] sm:$0xff] }
 0x304   :  { %7907 = vmatpush1.bf16.msra.mxu1 %v12227_v5  ;;  %7658 = vmatprep.subr.bf16.mxu0 %v12474_v12  ;;  %v12505_v5 = vcombine.low %v2017_v4, %v2021_v15  ;;  %v12267_v12 = vcombine.low %v1778_v61, %v1782_v14  ;;  %v12276_v2 = vcombine.high %v1786_v38, %v1790_v16  ;;  %v2057_v15 = vld [vmem:[#allocation9 + $0x17c0] sm:$0xff]  ;;  %v1818_v14 = vld [vmem:[#allocation9 + $0x1048] sm:$0xff] }
 0x305   :  { %7908 = vmatprep.subr.bf16.mxu1 %v12236_v24  ;;  %v12514_v24 = vcombine.high %v2025_v46, %v2029_v10  ;;  %v2061_v61 = vld [vmem:[#allocation9 + $0x17e0] sm:$0xff] }
 0x307   :  { %7659 = vmatpush1.bf16.msra.mxu0 %v12473_v58  ;;  %v1798_v58 = vld [vmem:[#allocation9 + $0xfa8] sm:$0xff] }
 0x308   :  { %7909 = vmatpush1.bf16.msra.mxu1 %v12235_v42  ;;  %7660 = vmatprep.subr.bf16.mxu0 %v12482_v21  ;;  %v12513_v42 = vcombine.low %v2025_v46, %v2029_v10  ;;  %v12275_v21 = vcombine.low %v1786_v38, %v1790_v16  ;;  %v12284_v48 = vcombine.high %v1794_v60, %v1798_v58  ;;  %v2065_v10 = vld [vmem:[#allocation9 + $0x1800] sm:$0xff]  ;;  %v1826_v16 = vld [vmem:[#allocation9 + $0x1088] sm:$0xff] }
 0x309   :  { %7910 = vmatprep.subr.bf16.mxu1 %v12244_v37  ;;  %v12522_v37 = vcombine.high %v2033_v40, %v2037_v55  ;;  %v2069_v38 = vld [vmem:[#allocation9 + $0x1820] sm:$0xff] }
 0x30b   :  { %7661 = vmatpush1.bf16.msra.mxu0 %v12481_v57  ;;  %v1806_v57 = vld [vmem:[#allocation9 + $0xfe8] sm:$0xff] }
 0x30c   :  { %7911 = vmatpush1.bf16.msra.mxu1 %v12243_v25  ;;  %7662 = vmatprep.subr.bf16.mxu0 %v12490_v33  ;;  %v12521_v25 = vcombine.low %v2033_v40, %v2037_v55  ;;  %v12283_v33 = vcombine.low %v1794_v60, %v1798_v58  ;;  %v12292_v18 = vcombine.high %v1802_v36, %v1806_v57  ;;  %v1278_v60 = vmax.f32 %v14905_v29, 0.0  ;;  %v2073_v58 = vld [vmem:[#allocation9 + $0x1840] sm:$0xff]  ;;  %v1842_v29 = vld [vmem:[#allocation9 + $0x1108] sm:$0xff] }
 0x30d   :  { %7912 = vmatprep.subr.bf16.mxu1 %v12252_v50  ;;  %v12530_v50 = vcombine.high %v2041_v23, %v2045_v59  ;;  %v12554_v40 = vcombine.high %v2065_v10, %v2069_v38 }
 0x30f   :  { %7663 = vmatpush1.bf16.msra.mxu0 %v12489_v53  ;;  %v1814_v53 = vld [vmem:[#allocation9 + $0x1028] sm:$0xff] }
 0x310   :  { %7913 = vmatpush1.bf16.msra.mxu1 %v12251_v27  ;;  %7664 = vmatprep.subr.bf16.mxu0 %v12498_v30  ;;  %v12529_v27 = vcombine.low %v2041_v23, %v2045_v59  ;;  %v12291_v30 = vcombine.low %v1802_v36, %v1806_v57  ;;  %v12300_v4 = vcombine.high %v1810_v31, %v1814_v53 }
 0x311   :  { %7914 = vmatprep.subr.bf16.mxu1 %v12260_v63  ;;  %v12538_v63 = vcombine.high %v2049_v28, %v2053_v17 }
 0x313   :  { %7665 = vmatpush1.bf16.msra.mxu0 %v12497_v9  ;;  %v1822_v9 = vld [vmem:[#allocation9 + $0x1068] sm:$0xff] }
 0x314   :  { %7915 = vmatpush1.bf16.msra.mxu1 %v12259_v44  ;;  %7666 = vmatprep.subr.bf16.mxu0 %v12506_v19  ;;  %v12537_v44 = vcombine.low %v2049_v28, %v2053_v17  ;;  %v12299_v19 = vcombine.low %v1810_v31, %v1814_v53  ;;  %v12308_v46 = vcombine.high %v1818_v14, %v1822_v9  ;;  %v2089_v53 = vld [vmem:[#allocation9 + $0x18c0] sm:$0xff] }
 0x315   :  { %7916 = vmatprep.subr.bf16.mxu1 %v12268_v1  ;;  %v12546_v1 = vcombine.high %v2057_v15, %v2061_v61 }
 0x317   :  { %7667 = vmatpush1.bf16.msra.mxu0 %v12505_v5  ;;  %v1830_v5 = vld [vmem:[#allocation9 + $0x10a8] sm:$0xff] }
 0x318   :  { %7917 = vmatpush1.bf16.msra.mxu1 %v12267_v12  ;;  %7668 = vmatprep.subr.bf16.mxu0 %v12514_v24  ;;  %v12545_v12 = vcombine.low %v2057_v15, %v2061_v61  ;;  %v12307_v24 = vcombine.low %v1818_v14, %v1822_v9  ;;  %v12316_v55 = vcombine.high %v1826_v16, %v1830_v5  ;;  %v2097_v9 = vld [vmem:[#allocation9 + $0x1900] sm:$0xff] }
 0x319   :  { %7918 = vmatprep.subr.bf16.mxu1 %v12276_v2  ;;  %v1275_v2 = vmax.f32 %v14863_v54, 0.0  ;;  %v12315_v59 = vcombine.low %v1826_v16, %v1830_v5  ;;  %v14963_v54 = vpack.c.bf16 %v1278_v60, %v1278_v60  ;;  %v2105_v5 = vld [vmem:[#allocation9 + $0x1940] sm:$0xff] }
 0x31b   :  { %7669 = vmatpush1.bf16.msra.mxu0 %v12513_v42  ;;  %v2077_v42 = vld [vmem:[#allocation9 + $0x1860] sm:$0xff]  ;;  %v14961_v23 = vpack.c.bf16 %v1275_v2, %v1275_v2  ;;  %v1870_v2 = vld [vmem:[#allocation9 + $0x11e8] sm:$0xff] }
 0x31c   :  { %7919 = vmatpush1.bf16.msra.mxu1 %v12275_v21  ;;  %7670 = vmatprep.subr.bf16.mxu0 %v12522_v37  ;;  %v1834_v21 = vld [vmem:[#allocation9 + $0x10c8] sm:$0xff]  ;;  %v12562_v36 = vcombine.high %v2073_v58, %v2077_v42 }
 0x31d   :  { %7920 = vmatprep.subr.bf16.mxu1 %v12284_v48  ;;  %v1838_v37 = vld [vmem:[#allocation9 + $0x10e8] sm:$0xff]  ;;  %v12553_v48 = vcombine.low %v2065_v10, %v2069_v38 }
 0x31e   :  { %v12324_v57 = vcombine.high %v1834_v21, %v1838_v37  ;;  %v12323_v28 = vcombine.low %v1834_v21, %v1838_v37  ;;  %v2117_v21 = vld [vmem:[#allocation9 + $0x19a0] sm:$0xff]  ;;  %v1874_v37 = vld [vmem:[#allocation9 + $0x1208] sm:$0xff] }
 0x31f   :  { %7671 = vmatpush1.bf16.msra.mxu0 %v12521_v25  ;;  %v2081_v25 = vld [vmem:[#allocation9 + $0x1880] sm:$0xff] }
 0x320   :  { %7921 = vmatpush1.bf16.msra.mxu1 %v12283_v33  ;;  %7672 = vmatprep.subr.bf16.mxu0 %v12530_v50  ;;  %v2085_v33 = vld [vmem:[#allocation9 + $0x18a0] sm:$0xff]  ;;  %v1846_v50 = vld [vmem:[#allocation9 + $0x1128] sm:$0xff] }
 0x321   :  { %7922 = vmatprep.subr.bf16.mxu1 %v12292_v18  ;;  %v12561_v18 = vcombine.low %v2073_v58, %v2077_v42  ;;  %v12570_v17 = vcombine.high %v2081_v25, %v2085_v33  ;;  %v12332_v31 = vcombine.high %v1842_v29, %v1846_v50  ;;  %v12331_v15 = vcombine.low %v1842_v29, %v1846_v50  ;;  %v2113_v42 = vld [vmem:[#allocation9 + $0x1980] sm:$0xff]  ;;  %v1882_v50 = vld [vmem:[#allocation9 + $0x1248] sm:$0xff] }
 0x322   :  { %v2125_v29 = vld [vmem:[#allocation9 + $0x19e0] sm:$0xff] }
 0x323   :  { %7673 = vmatpush1.bf16.msra.mxu0 %v12529_v27  ;;  %v2093_v27 = vld [vmem:[#allocation9 + $0x18e0] sm:$0xff] }
 0x324   :  { %7923 = vmatpush1.bf16.msra.mxu1 %v12291_v30  ;;  %7674 = vmatprep.subr.bf16.mxu0 %v12538_v63  ;;  %v1850_v30 = vld [vmem:[#allocation9 + $0x1148] sm:$0xff]  ;;  %v12578_v61 = vcombine.high %v2089_v53, %v2093_v27 }
 0x325   :  { %7933 = vmatprep.subr.bf16.mxu1 %v12300_v4  ;;  %v1854_v63 = vld [vmem:[#allocation9 + $0x1168] sm:$0xff]  ;;  %v12569_v4 = vcombine.low %v2081_v25, %v2085_v33  ;;  %v2121_v33 = vld [vmem:[#allocation9 + $0x19c0] sm:$0xff] }
 0x326   :  { %v12340_v14 = vcombine.high %v1850_v30, %v1854_v63  ;;  %v12339_v10 = vcombine.low %v1850_v30, %v1854_v63  ;;  %v2133_v30 = vld [vmem:[#allocation9 + $0x1a20] sm:$0xff]  ;;  %v1890_v63 = vld [vmem:[#allocation9 + $0x1288] sm:$0xff] }
 0x327   :  { %7925 = vmatmul.mubr.bf16.vlgmr.msra.gmra.mrb[12].mxu1 %v14931_v22  ;;  %7675 = vmatpush1.bf16.msra.mxu0 %v12537_v44  ;;  %v2101_v44 = vld [vmem:[#allocation9 + $0x1920] sm:$0xff] }
 0x328   :  { %7934 = vmatpush1.bf16.msra.mxu1 %v12299_v19  ;;  %7965 = vmatprep.mubr.bf16.mxu1 %v14935_v49  ;;  %v1858_v19 = vld [vmem:[#allocation9 + $0x1188] sm:$0xff]  ;;  %v12586_v38 = vcombine.high %v2097_v9, %v2101_v44 }
 0x329   :  { %7676 = vmatprep.subr.bf16.mxu0 %v12546_v1  ;;  %7935 = vmatprep.subr.bf16.mxu1 %v12308_v46  ;;  %v1862_v1 = vld [vmem:[#allocation9 + $0x11a8] sm:$0xff]  ;;  %v12577_v46 = vcombine.low %v2089_v53, %v2093_v27  ;;  %v2129_v27 = vld [vmem:[#allocation9 + $0x1a00] sm:$0xff] }
 0x32a   :  { %v12348_v16 = vcombine.high %v1858_v19, %v1862_v1 }
 0x32b   :  { %7677 = vmatpush1.bf16.msra.mxu0 %v12545_v12  ;;  %v2109_v12 = vld [vmem:[#allocation9 + $0x1960] sm:$0xff] }
 0x32c   :  { %7936 = vmatpush1.bf16.msra.mxu1 %v12307_v24  ;;  %7687 = vmatprep.subr.bf16.mxu0 %v12554_v40  ;;  %v1866_v24 = vld [vmem:[#allocation9 + $0x11c8] sm:$0xff]  ;;  %v12585_v40 = vcombine.low %v2097_v9, %v2101_v44  ;;  %v12594_v60 = vcombine.high %v2105_v5, %v2109_v12  ;;  %v2137_v44 = vld [vmem:[#allocation9 + $0x1a40] sm:$0xff] }
 0x32d   :  { %7937 = vmatprep.subr.bf16.mxu1 %v12316_v55  ;;  %v12347_v55 = vcombine.low %v1858_v19, %v1862_v1  ;;  %v12356_v58 = vcombine.high %v1866_v24, %v1870_v2  ;;  %v2141_v19 = vld [vmem:[#allocation9 + $0x1a60] sm:$0xff]  ;;  %v1898_v1 = vld [vmem:[#allocation9 + $0x12c8] sm:$0xff] }
 0x32e   :  { %7679 = vmatmul.mubr.bf16.vlgmr.msra.gmra.mrb[24].mxu0 %v14961_v23 }
 0x32f   :  { %7688 = vmatpush1.bf16.msra.mxu0 %v12553_v48  ;;  %7719 = vmatprep.mubr.bf16.mxu0 %v14963_v54  ;;  %v1878_v48 = vld [vmem:[#allocation9 + $0x1228] sm:$0xff] }
 0x330   :  { %7938 = vmatpush1.bf16.msra.mxu1 %v12315_v59  ;;  %7689 = vmatprep.subr.bf16.mxu0 %v12562_v36  ;;  %v12593_v59 = vcombine.low %v2105_v5, %v2109_v12  ;;  %v12355_v36 = vcombine.low %v1866_v24, %v1870_v2  ;;  %v12364_v25 = vcombine.high %v1874_v37, %v1878_v48  ;;  %v2145_v12 = vld [vmem:[#allocation9 + $0x1a80] sm:$0xff]  ;;  %v1906_v2 = vld [vmem:[#allocation9 + $0x1308] sm:$0xff] }
 0x331   :  { %7939 = vmatprep.subr.bf16.mxu1 %v12324_v57  ;;  %v12602_v57 = vcombine.high %v2113_v42, %v2117_v21  ;;  %v2149_v24 = vld [vmem:[#allocation9 + $0x1aa0] sm:$0xff] }
 0x333   :  { %7690 = vmatpush1.bf16.msra.mxu0 %v12561_v18  ;;  %v1886_v18 = vld [vmem:[#allocation9 + $0x1268] sm:$0xff] }
 0x334   :  { %7940 = vmatpush1.bf16.msra.mxu1 %v12323_v28  ;;  %7691 = vmatprep.subr.bf16.mxu0 %v12570_v17  ;;  %v12601_v28 = vcombine.low %v2113_v42, %v2117_v21  ;;  %v12363_v17 = vcombine.low %v1874_v37, %v1878_v48  ;;  %v12372_v53 = vcombine.high %v1882_v50, %v1886_v18  ;;  %v2153_v21 = vld [vmem:[#allocation9 + $0x1ac0] sm:$0xff]  ;;  %v1914_v48 = vld [vmem:[#allocation9 + $0x1348] sm:$0xff] }
 0x335   :  { %7941 = vmatprep.subr.bf16.mxu1 %v12332_v31  ;;  %v12610_v31 = vcombine.high %v2121_v33, %v2125_v29  ;;  %v2157_v37 = vld [vmem:[#allocation9 + $0x1ae0] sm:$0xff] }
 0x337   :  { %7692 = vmatpush1.bf16.msra.mxu0 %v12569_v4  ;;  %v1894_v4 = vld [vmem:[#allocation9 + $0x12a8] sm:$0xff] }
 0x338   :  { %7942 = vmatpush1.bf16.msra.mxu1 %v12331_v15  ;;  %7693 = vmatprep.subr.bf16.mxu0 %v12578_v61  ;;  %v12609_v15 = vcombine.low %v2121_v33, %v2125_v29  ;;  %v12371_v61 = vcombine.low %v1882_v50, %v1886_v18  ;;  %v12380_v9 = vcombine.high %v1890_v63, %v1894_v4  ;;  %v2161_v29 = vld [vmem:[#allocation9 + $0x1b00] sm:$0xff]  ;;  %v1922_v18 = vld [vmem:[#allocation9 + $0x1388] sm:$0xff] }
 0x339   :  { %7943 = vmatprep.subr.bf16.mxu1 %v12340_v14  ;;  %v12618_v14 = vcombine.high %v2129_v27, %v2133_v30  ;;  %v2165_v50 = vld [vmem:[#allocation9 + $0x1b20] sm:$0xff] }
 0x33b   :  { %7694 = vmatpush1.bf16.msra.mxu0 %v12577_v46  ;;  %v1902_v46 = vld [vmem:[#allocation9 + $0x12e8] sm:$0xff] }
 0x33c   :  { %7944 = vmatpush1.bf16.msra.mxu1 %v12339_v10  ;;  %7695 = vmatprep.subr.bf16.mxu0 %v12586_v38  ;;  %v12617_v10 = vcombine.low %v2129_v27, %v2133_v30  ;;  %v12379_v38 = vcombine.low %v1890_v63, %v1894_v4  ;;  %v12388_v5 = vcombine.high %v1898_v1, %v1902_v46  ;;  %v2169_v30 = vld [vmem:[#allocation9 + $0x1b40] sm:$0xff]  ;;  %v1930_v4 = vld [vmem:[#allocation9 + $0x13c8] sm:$0xff] }
 0x33d   :  { %7945 = vmatprep.subr.bf16.mxu1 %v12348_v16  ;;  %v12626_v16 = vcombine.high %v2137_v44, %v2141_v19  ;;  %v2173_v63 = vld [vmem:[#allocation9 + $0x1b60] sm:$0xff] }
 0x33f   :  { %7696 = vmatpush1.bf16.msra.mxu0 %v12585_v40  ;;  %v1910_v40 = vld [vmem:[#allocation9 + $0x1328] sm:$0xff] }
 0x340   :  { %7946 = vmatpush1.bf16.msra.mxu1 %v12347_v55  ;;  %7697 = vmatprep.subr.bf16.mxu0 %v12594_v60  ;;  %v12625_v55 = vcombine.low %v2137_v44, %v2141_v19  ;;  %v12387_v60 = vcombine.low %v1898_v1, %v1902_v46  ;;  %v12396_v42 = vcombine.high %v1906_v2, %v1910_v40  ;;  %v2177_v19 = vld [vmem:[#allocation9 + $0x1b80] sm:$0xff]  ;;  %v1938_v46 = vld [vmem:[#allocation9 + $0x1408] sm:$0xff] }
 0x341   :  { %7947 = vmatprep.subr.bf16.mxu1 %v12356_v58  ;;  %v12634_v58 = vcombine.high %v2145_v12, %v2149_v24  ;;  %v2181_v1 = vld [vmem:[#allocation9 + $0x1ba0] sm:$0xff] }
 0x343   :  { %7698 = vmatpush1.bf16.msra.mxu0 %v12593_v59  ;;  %v1918_v59 = vld [vmem:[#allocation9 + $0x1368] sm:$0xff] }
 0x344   :  { %7948 = vmatpush1.bf16.msra.mxu1 %v12355_v36  ;;  %7699 = vmatprep.subr.bf16.mxu0 %v12602_v57  ;;  %v12633_v36 = vcombine.low %v2145_v12, %v2149_v24  ;;  %v12395_v57 = vcombine.low %v1906_v2, %v1910_v40  ;;  %v12404_v33 = vcombine.high %v1914_v48, %v1918_v59  ;;  %v2185_v24 = vld [vmem:[#allocation9 + $0x1bc0] sm:$0xff]  ;;  %v1946_v40 = vld [vmem:[#allocation9 + $0x1448] sm:$0xff] }
 0x345   :  { %7949 = vmatprep.subr.bf16.mxu1 %v12364_v25  ;;  %v12642_v25 = vcombine.high %v2153_v21, %v2157_v37  ;;  %v2189_v2 = vld [vmem:[#allocation9 + $0x1be0] sm:$0xff] }
 0x347   :  { %7700 = vmatpush1.bf16.msra.mxu0 %v12601_v28  ;;  %v1926_v28 = vld [vmem:[#allocation9 + $0x13a8] sm:$0xff] }
 0x348   :  { %7950 = vmatpush1.bf16.msra.mxu1 %v12363_v17  ;;  %7701 = vmatprep.subr.bf16.mxu0 %v12610_v31  ;;  %v12641_v17 = vcombine.low %v2153_v21, %v2157_v37  ;;  %v12403_v31 = vcombine.low %v1914_v48, %v1918_v59  ;;  %v12412_v27 = vcombine.high %v1922_v18, %v1926_v28  ;;  %v2193_v37 = vld [vmem:[#allocation9 + $0x1c00] sm:$0xff]  ;;  %v1954_v59 = vld [vmem:[#allocation9 + $0x1488] sm:$0xff] }
 0x349   :  { %7951 = vmatprep.subr.bf16.mxu1 %v12372_v53  ;;  %v12650_v53 = vcombine.high %v2161_v29, %v2165_v50  ;;  %v2197_v48 = vld [vmem:[#allocation9 + $0x1c20] sm:$0xff] }
 0x34b   :  { %7702 = vmatpush1.bf16.msra.mxu0 %v12609_v15  ;;  %v1934_v15 = vld [vmem:[#allocation9 + $0x13e8] sm:$0xff] }
 0x34c   :  { %7952 = vmatpush1.bf16.msra.mxu1 %v12371_v61  ;;  %7703 = vmatprep.subr.bf16.mxu0 %v12618_v14  ;;  %v12649_v61 = vcombine.low %v2161_v29, %v2165_v50  ;;  %v12411_v14 = vcombine.low %v1922_v18, %v1926_v28  ;;  %v12420_v44 = vcombine.high %v1930_v4, %v1934_v15  ;;  %v1280_v18 = vmax.f32 %v14871_v56, 0.0  ;;  %v2201_v28 = vld [vmem:[#allocation9 + $0x1c40] sm:$0xff]  ;;  %v1970_v56 = vld [vmem:[#allocation9 + $0x1508] sm:$0xff] }
 0x34d   :  { %7953 = vmatprep.subr.bf16.mxu1 %v12380_v9  ;;  %v12658_v9 = vcombine.high %v2169_v30, %v2173_v63  ;;  %v12682_v29 = vcombine.high %v2193_v37, %v2197_v48 }
 0x34f   :  { %7704 = vmatpush1.bf16.msra.mxu0 %v12617_v10  ;;  %v1942_v10 = vld [vmem:[#allocation9 + $0x1428] sm:$0xff] }
 0x350   :  { %7954 = vmatpush1.bf16.msra.mxu1 %v12379_v38  ;;  %7705 = vmatprep.subr.bf16.mxu0 %v12626_v16  ;;  %v12657_v38 = vcombine.low %v2169_v30, %v2173_v63  ;;  %v12419_v16 = vcombine.low %v1930_v4, %v1934_v15  ;;  %v12428_v12 = vcombine.high %v1938_v46, %v1942_v10 }
 0x351   :  { %7955 = vmatprep.subr.bf16.mxu1 %v12388_v5  ;;  %v12666_v5 = vcombine.high %v2177_v19, %v2181_v1 }
 0x353   :  { %7706 = vmatpush1.bf16.msra.mxu0 %v12625_v55  ;;  %v1950_v55 = vld [vmem:[#allocation9 + $0x1468] sm:$0xff] }
 0x354   :  { %7956 = vmatpush1.bf16.msra.mxu1 %v12387_v60  ;;  %7707 = vmatprep.subr.bf16.mxu0 %v12634_v58  ;;  %v12665_v60 = vcombine.low %v2177_v19, %v2181_v1  ;;  %v12427_v58 = vcombine.low %v1938_v46, %v1942_v10  ;;  %v12436_v21 = vcombine.high %v1946_v40, %v1950_v55  ;;  %v2217_v10 = vld [vmem:[#allocation9 + $0x1cc0] sm:$0xff] }
 0x355   :  { %7957 = vmatprep.subr.bf16.mxu1 %v12396_v42  ;;  %v12674_v42 = vcombine.high %v2185_v24, %v2189_v2 }
 0x357   :  { %7708 = vmatpush1.bf16.msra.mxu0 %v12633_v36  ;;  %v1958_v36 = vld [vmem:[#allocation9 + $0x14a8] sm:$0xff] }
 0x358   :  { %7958 = vmatpush1.bf16.msra.mxu1 %v12395_v57  ;;  %7709 = vmatprep.subr.bf16.mxu0 %v12642_v25  ;;  %v12673_v57 = vcombine.low %v2185_v24, %v2189_v2  ;;  %v12435_v25 = vcombine.low %v1946_v40, %v1950_v55  ;;  %v12444_v50 = vcombine.high %v1954_v59, %v1958_v36  ;;  %v2225_v55 = vld [vmem:[#allocation9 + $0x1d00] sm:$0xff] }
 0x359   :  { %7959 = vmatprep.subr.bf16.mxu1 %v12404_v33  ;;  %v1277_v33 = vmax.f32 %v14907_v41, 0.0  ;;  %v12443_v63 = vcombine.low %v1954_v59, %v1958_v36  ;;  %v14973_v41 = vpack.c.bf16 %v1280_v18, %v1280_v18  ;;  %v2233_v36 = vld [vmem:[#allocation9 + $0x1d40] sm:$0xff] }
 0x35b   :  { %7710 = vmatpush1.bf16.msra.mxu0 %v12641_v17  ;;  %v2205_v17 = vld [vmem:[#allocation9 + $0x1c60] sm:$0xff]  ;;  %v14971_v30 = vpack.c.bf16 %v1277_v33, %v1277_v33  ;;  %v1998_v33 = vld [vmem:[#allocation9 + $0x15e8] sm:$0xff] }
 0x35c   :  { %7960 = vmatpush1.bf16.msra.mxu1 %v12403_v31  ;;  %7711 = vmatprep.subr.bf16.mxu0 %v12650_v53  ;;  %v1962_v31 = vld [vmem:[#allocation9 + $0x14c8] sm:$0xff]  ;;  %v12690_v4 = vcombine.high %v2201_v28, %v2205_v17 }
 0x35d   :  { %7961 = vmatprep.subr.bf16.mxu1 %v12412_v27  ;;  %v1966_v53 = vld [vmem:[#allocation9 + $0x14e8] sm:$0xff]  ;;  %v12681_v27 = vcombine.low %v2193_v37, %v2197_v48 }
 0x35e   :  { %v12452_v15 = vcombine.high %v1962_v31, %v1966_v53  ;;  %v12451_v19 = vcombine.low %v1962_v31, %v1966_v53  ;;  %v2245_v31 = vld [vmem:[#allocation9 + $0x1da0] sm:$0xff]  ;;  %v2002_v53 = vld [vmem:[#allocation9 + $0x1608] sm:$0xff] }
 0x35f   :  { %7712 = vmatpush1.bf16.msra.mxu0 %v12649_v61  ;;  %v2209_v61 = vld [vmem:[#allocation9 + $0x1c80] sm:$0xff] }
 0x360   :  { %7962 = vmatpush1.bf16.msra.mxu1 %v12411_v14  ;;  %7713 = vmatprep.subr.bf16.mxu0 %v12658_v9  ;;  %v2213_v14 = vld [vmem:[#allocation9 + $0x1ca0] sm:$0xff]  ;;  %v1974_v9 = vld [vmem:[#allocation9 + $0x1528] sm:$0xff] }
 0x361   :  { %7963 = vmatprep.subr.bf16.mxu1 %v12420_v44  ;;  %v12689_v44 = vcombine.low %v2201_v28, %v2205_v17  ;;  %v12698_v1 = vcombine.high %v2209_v61, %v2213_v14  ;;  %v12460_v46 = vcombine.high %v1970_v56, %v1974_v9  ;;  %v12459_v24 = vcombine.low %v1970_v56, %v1974_v9  ;;  %v2241_v17 = vld [vmem:[#allocation9 + $0x1d80] sm:$0xff]  ;;  %v2010_v9 = vld [vmem:[#allocation9 + $0x1648] sm:$0xff] }
 0x362   :  { %v2253_v56 = vld [vmem:[#allocation9 + $0x1de0] sm:$0xff] }
 0x363   :  { %7714 = vmatpush1.bf16.msra.mxu0 %v12657_v38  ;;  %v2221_v38 = vld [vmem:[#allocation9 + $0x1ce0] sm:$0xff] }
 0x364   :  { %7964 = vmatpush1.bf16.msra.mxu1 %v12419_v16  ;;  %7715 = vmatprep.subr.bf16.mxu0 %v12666_v5  ;;  %v1978_v16 = vld [vmem:[#allocation9 + $0x1548] sm:$0xff]  ;;  %v12706_v2 = vcombine.high %v2217_v10, %v2221_v38 }
 0x365   :  { %7974 = vmatprep.subr.bf16.mxu1 %v12428_v12  ;;  %v1982_v5 = vld [vmem:[#allocation9 + $0x1568] sm:$0xff]  ;;  %v12697_v12 = vcombine.low %v2209_v61, %v2213_v14  ;;  %v2249_v14 = vld [vmem:[#allocation9 + $0x1dc0] sm:$0xff] }
 0x366   :  { %v12468_v40 = vcombine.high %v1978_v16, %v1982_v5  ;;  %v12467_v37 = vcombine.low %v1978_v16, %v1982_v5  ;;  %v2261_v16 = vld [vmem:[#allocation9 + $0x1e20] sm:$0xff]  ;;  %v2018_v5 = vld [vmem:[#allocation9 + $0x1688] sm:$0xff] }
 0x367   :  { %7966 = vmatmul.mubr.bf16.vlgmr.msra.gmra.mrb[12].mxu1 %v14947_v52  ;;  %7716 = vmatpush1.bf16.msra.mxu0 %v12665_v60  ;;  %v2229_v60 = vld [vmem:[#allocation9 + $0x1d20] sm:$0xff] }
 0x368   :  { %7975 = vmatpush1.bf16.msra.mxu1 %v12427_v58  ;;  %8006 = vmatprep.mubr.bf16.mxu1 %v14949_v35  ;;  %v1986_v58 = vld [vmem:[#allocation9 + $0x1588] sm:$0xff]  ;;  %v12714_v48 = vcombine.high %v2225_v55, %v2229_v60 }
 0x369   :  { %7717 = vmatprep.subr.bf16.mxu0 %v12674_v42  ;;  %7976 = vmatprep.subr.bf16.mxu1 %v12436_v21  ;;  %v1990_v42 = vld [vmem:[#allocation9 + $0x15a8] sm:$0xff]  ;;  %v12705_v21 = vcombine.low %v2217_v10, %v2221_v38  ;;  %v2257_v38 = vld [vmem:[#allocation9 + $0x1e00] sm:$0xff] }
 0x36a   :  { %v12476_v59 = vcombine.high %v1986_v58, %v1990_v42 }
 0x36b   :  { %7718 = vmatpush1.bf16.msra.mxu0 %v12673_v57  ;;  %v2237_v57 = vld [vmem:[#allocation9 + $0x1d60] sm:$0xff] }
 0x36c   :  { %7977 = vmatpush1.bf16.msra.mxu1 %v12435_v25  ;;  %7728 = vmatprep.subr.bf16.mxu0 %v12682_v29  ;;  %v1994_v25 = vld [vmem:[#allocation9 + $0x15c8] sm:$0xff]  ;;  %v12713_v29 = vcombine.low %v2225_v55, %v2229_v60  ;;  %v12722_v18 = vcombine.high %v2233_v36, %v2237_v57  ;;  %v2265_v60 = vld [vmem:[#allocation9 + $0x1e40] sm:$0xff] }
 0x36d   :  { %7978 = vmatprep.subr.bf16.mxu1 %v12444_v50  ;;  %v12475_v50 = vcombine.low %v1986_v58, %v1990_v42  ;;  %v12484_v28 = vcombine.high %v1994_v25, %v1998_v33  ;;  %v2269_v58 = vld [vmem:[#allocation9 + $0x1e60] sm:$0xff]  ;;  %v2026_v42 = vld [vmem:[#allocation9 + $0x16c8] sm:$0xff] }
 0x36e   :  { %7720 = vmatmul.mubr.bf16.vlgmr.msra.gmra.mrb[24].mxu0 %v14971_v30 }
 0x36f   :  { %7729 = vmatpush1.bf16.msra.mxu0 %v12681_v27  ;;  %7760 = vmatprep.mubr.bf16.mxu0 %v14973_v41  ;;  %v2006_v27 = vld [vmem:[#allocation9 + $0x1628] sm:$0xff] }
 0x370   :  { %7979 = vmatpush1.bf16.msra.mxu1 %v12443_v63  ;;  %7730 = vmatprep.subr.bf16.mxu0 %v12690_v4  ;;  %v12721_v63 = vcombine.low %v2233_v36, %v2237_v57  ;;  %v12483_v4 = vcombine.low %v1994_v25, %v1998_v33  ;;  %v12492_v61 = vcombine.high %v2002_v53, %v2006_v27  ;;  %v2273_v57 = vld [vmem:[#allocation9 + $0x1e80] sm:$0xff]  ;;  %v2034_v33 = vld [vmem:[#allocation9 + $0x1708] sm:$0xff] }
 0x371   :  { %7980 = vmatprep.subr.bf16.mxu1 %v12452_v15  ;;  %v12730_v15 = vcombine.high %v2241_v17, %v2245_v31  ;;  %v2277_v25 = vld [vmem:[#allocation9 + $0x1ea0] sm:$0xff] }
 0x373   :  { %7731 = vmatpush1.bf16.msra.mxu0 %v12689_v44  ;;  %v2014_v44 = vld [vmem:[#allocation9 + $0x1668] sm:$0xff] }
 0x374   :  { %7981 = vmatpush1.bf16.msra.mxu1 %v12451_v19  ;;  %7732 = vmatprep.subr.bf16.mxu0 %v12698_v1  ;;  %v12729_v19 = vcombine.low %v2241_v17, %v2245_v31  ;;  %v12491_v1 = vcombine.low %v2002_v53, %v2006_v27  ;;  %v12500_v10 = vcombine.high %v2010_v9, %v2014_v44  ;;  %v2281_v31 = vld [vmem:[#allocation9 + $0x1ec0] sm:$0xff]  ;;  %v2042_v27 = vld [vmem:[#allocation9 + $0x1748] sm:$0xff] }
 0x375   :  { %7982 = vmatprep.subr.bf16.mxu1 %v12460_v46  ;;  %v12738_v46 = vcombine.high %v2249_v14, %v2253_v56  ;;  %v2285_v53 = vld [vmem:[#allocation9 + $0x1ee0] sm:$0xff] }
 0x377   :  { %7733 = vmatpush1.bf16.msra.mxu0 %v12697_v12  ;;  %v2022_v12 = vld [vmem:[#allocation9 + $0x16a8] sm:$0xff] }
 0x378   :  { %7983 = vmatpush1.bf16.msra.mxu1 %v12459_v24  ;;  %7734 = vmatprep.subr.bf16.mxu0 %v12706_v2  ;;  %v12737_v24 = vcombine.low %v2249_v14, %v2253_v56  ;;  %v12499_v2 = vcombine.low %v2010_v9, %v2014_v44  ;;  %v12508_v55 = vcombine.high %v2018_v5, %v2022_v12  ;;  %v2289_v56 = vld [vmem:[#allocation9 + $0x1f00] sm:$0xff]  ;;  %v2050_v44 = vld [vmem:[#allocation9 + $0x1788] sm:$0xff] }
 0x379   :  { %7984 = vmatprep.subr.bf16.mxu1 %v12468_v40  ;;  %v12746_v40 = vcombine.high %v2257_v38, %v2261_v16  ;;  %v2293_v9 = vld [vmem:[#allocation9 + $0x1f20] sm:$0xff] }
 0x37b   :  { %7735 = vmatpush1.bf16.msra.mxu0 %v12705_v21  ;;  %v2030_v21 = vld [vmem:[#allocation9 + $0x16e8] sm:$0xff] }
 0x37c   :  { %7985 = vmatpush1.bf16.msra.mxu1 %v12467_v37  ;;  %7736 = vmatprep.subr.bf16.mxu0 %v12714_v48  ;;  %v12745_v37 = vcombine.low %v2257_v38, %v2261_v16  ;;  %v12507_v48 = vcombine.low %v2018_v5, %v2022_v12  ;;  %v12516_v36 = vcombine.high %v2026_v42, %v2030_v21  ;;  %v2297_v16 = vld [vmem:[#allocation9 + $0x1f40] sm:$0xff]  ;;  %v2058_v12 = vld [vmem:[#allocation9 + $0x17c8] sm:$0xff] }
 0x37d   :  { %7986 = vmatprep.subr.bf16.mxu1 %v12476_v59  ;;  %v12754_v59 = vcombine.high %v2265_v60, %v2269_v58  ;;  %v2301_v5 = vld [vmem:[#allocation9 + $0x1f60] sm:$0xff] }
 0x37f   :  { %7737 = vmatpush1.bf16.msra.mxu0 %v12713_v29  ;;  %v2038_v29 = vld [vmem:[#allocation9 + $0x1728] sm:$0xff] }
 0x380   :  { %7987 = vmatpush1.bf16.msra.mxu1 %v12475_v50  ;;  %7738 = vmatprep.subr.bf16.mxu0 %v12722_v18  ;;  %v12753_v50 = vcombine.low %v2265_v60, %v2269_v58  ;;  %v12515_v18 = vcombine.low %v2026_v42, %v2030_v21  ;;  %v12524_v17 = vcombine.high %v2034_v33, %v2038_v29  ;;  %v2305_v58 = vld [vmem:[#allocation9 + $0x1f80] sm:$0xff]  ;;  %v2066_v21 = vld [vmem:[#allocation9 + $0x1808] sm:$0xff] }
 0x381   :  { %7988 = vmatprep.subr.bf16.mxu1 %v12484_v28  ;;  %v12762_v28 = vcombine.high %v2273_v57, %v2277_v25  ;;  %v2309_v42 = vld [vmem:[#allocation9 + $0x1fa0] sm:$0xff] }
 0x383   :  { %7739 = vmatpush1.bf16.msra.mxu0 %v12721_v63  ;;  %v2046_v63 = vld [vmem:[#allocation9 + $0x1768] sm:$0xff] }
 0x384   :  { %7989 = vmatpush1.bf16.msra.mxu1 %v12483_v4  ;;  %7740 = vmatprep.subr.bf16.mxu0 %v12730_v15  ;;  %v12761_v4 = vcombine.low %v2273_v57, %v2277_v25  ;;  %v12523_v15 = vcombine.low %v2034_v33, %v2038_v29  ;;  %v12532_v14 = vcombine.high %v2042_v27, %v2046_v63  ;;  %v2313_v25 = vld [vmem:[#allocation9 + $0x1fc0] sm:$0xff]  ;;  %v2074_v29 = vld [vmem:[#allocation9 + $0x1848] sm:$0xff] }
 0x385   :  { %7990 = vmatprep.subr.bf16.mxu1 %v12492_v61  ;;  %v12770_v61 = vcombine.high %v2281_v31, %v2285_v53  ;;  %v2317_v33 = vld [vmem:[#allocation9 + $0x1fe0] sm:$0xff] }
 0x387   :  { %7741 = vmatpush1.bf16.msra.mxu0 %v12729_v19  ;;  %v2054_v19 = vld [vmem:[#allocation9 + $0x17a8] sm:$0xff] }
 0x388   :  { %7991 = vmatpush1.bf16.msra.mxu1 %v12491_v1  ;;  %7742 = vmatprep.subr.bf16.mxu0 %v12738_v46  ;;  %v12769_v1 = vcombine.low %v2281_v31, %v2285_v53  ;;  %v12531_v46 = vcombine.low %v2042_v27, %v2046_v63  ;;  %v12540_v38 = vcombine.high %v2050_v44, %v2054_v19  ;;  %v1299_v53 = vld [vmem:[#allocation9 + $0x10] sm:$0xff]  ;;  %v2082_v63 = vld [vmem:[#allocation9 + $0x1888] sm:$0xff] }
 0x389   :  { %7992 = vmatprep.subr.bf16.mxu1 %v12500_v10  ;;  %v12778_v10 = vcombine.high %v2289_v56, %v2293_v9  ;;  %v1303_v27 = vld [vmem:[#allocation9 + $0x30] sm:$0xff] }
 0x38b   :  { %7743 = vmatpush1.bf16.msra.mxu0 %v12737_v24  ;;  %v2062_v24 = vld [vmem:[#allocation9 + $0x17e8] sm:$0xff] }
 0x38c   :  { %7993 = vmatpush1.bf16.msra.mxu1 %v12499_v2  ;;  %7744 = vmatprep.subr.bf16.mxu0 %v12746_v40  ;;  %v12777_v2 = vcombine.low %v2289_v56, %v2293_v9  ;;  %v12539_v40 = vcombine.low %v2050_v44, %v2054_v19  ;;  %v12548_v60 = vcombine.high %v2058_v12, %v2062_v24  ;;  %v1307_v44 = vld [vmem:[#allocation9 + $0x50] sm:$0xff] }
 0x38d   :  { %7994 = vmatprep.subr.bf16.mxu1 %v12508_v55  ;;  %v12786_v55 = vcombine.high %v2297_v16, %v2301_v5  ;;  %v11790_v56 = vcombine.high %v1299_v53, %v1303_v27  ;;  %v1311_v19 = vld [vmem:[#allocation9 + $0x70] sm:$0xff] }
 0x38f   :  { %7745 = vmatpush1.bf16.msra.mxu0 %v12745_v37  ;;  %v2070_v37 = vld [vmem:[#allocation9 + $0x1828] sm:$0xff] }
 0x390   :  { %7995 = vmatpush1.bf16.msra.mxu1 %v12507_v48  ;;  %7746 = vmatprep.subr.bf16.mxu0 %v12754_v59  ;;  %v12785_v48 = vcombine.low %v2297_v16, %v2301_v5  ;;  %v12547_v59 = vcombine.low %v2058_v12, %v2062_v24  ;;  %v12556_v57 = vcombine.high %v2066_v21, %v2070_v37  ;;  %v1315_v24 = vld [vmem:[#allocation9 + $0x90] sm:$0xff] }
 0x391   :  { %7996 = vmatprep.subr.bf16.mxu1 %v12516_v36  ;;  %v12794_v36 = vcombine.high %v2305_v58, %v2309_v42  ;;  %v11798_v5 = vcombine.high %v1307_v44, %v1311_v19 }
 0x393   :  { %7747 = vmatpush1.bf16.msra.mxu0 %v12753_v50  ;;  %v2078_v50 = vld [vmem:[#allocation9 + $0x1868] sm:$0xff] }
 0x394   :  { %7997 = vmatpush1.bf16.msra.mxu1 %v12515_v18  ;;  %7748 = vmatprep.subr.bf16.mxu0 %v12762_v28  ;;  %v12793_v18 = vcombine.low %v2305_v58, %v2309_v42  ;;  %v12555_v28 = vcombine.low %v2066_v21, %v2070_v37  ;;  %v12564_v31 = vcombine.high %v2074_v29, %v2078_v50  ;;  %v1323_v37 = vld [vmem:[#allocation9 + $0xd0] sm:$0xff] }
 0x395   :  { %7998 = vmatprep.subr.bf16.mxu1 %v12524_v17  ;;  %v12802_v17 = vcombine.high %v2313_v25, %v2317_v33 }
 0x397   :  { %7749 = vmatpush1.bf16.msra.mxu0 %v12761_v4  ;;  %v2086_v4 = vld [vmem:[#allocation9 + $0x18a8] sm:$0xff] }
 0x398   :  { %7999 = vmatpush1.bf16.msra.mxu1 %v12523_v15  ;;  %7750 = vmatprep.subr.bf16.mxu0 %v12770_v61  ;;  %v12801_v15 = vcombine.low %v2313_v25, %v2317_v33  ;;  %v12563_v61 = vcombine.low %v2074_v29, %v2078_v50  ;;  %v12572_v9 = vcombine.high %v2082_v63, %v2086_v4  ;;  %v1331_v50 = vld [vmem:[#allocation9 + $0x110] sm:$0xff] }
 0x399   :  { %8000 = vmatprep.subr.bf16.mxu1 %v12532_v14  ;;  %v1279_v14 = vmax.f32 %v14880_v7, 0.0  ;;  %v12571_v16 = vcombine.low %v2082_v63, %v2086_v4  ;;  %v1319_v7 = vld [vmem:[#allocation9 + $0xb0] sm:$0xff] }
 0x39a   :  { %v11806_v42 = vcombine.high %v1315_v24, %v1319_v7  ;;  %v1339_v4 = vld [vmem:[#allocation9 + $0x150] sm:$0xff] }
 0x39b   :  { %7751 = vmatpush1.bf16.msra.mxu0 %v12769_v1  ;;  %v2090_v1 = vld [vmem:[#allocation9 + $0x18c8] sm:$0xff] }
 0x39c   :  { %8001 = vmatpush1.bf16.msra.mxu1 %v12531_v46  ;;  %7752 = vmatprep.subr.bf16.mxu0 %v12778_v10  ;;  %v2094_v46 = vld [vmem:[#allocation9 + $0x18e8] sm:$0xff]  ;;  %v11789_v10 = vcombine.low %v1299_v53, %v1303_v27 }
 0x39d   :  { %8002 = vmatprep.subr.bf16.mxu1 %v12540_v38  ;;  %v14980_v38 = vpack.c.bf16 %v1279_v14, %v1279_v14  ;;  %v12580_v12 = vcombine.high %v2090_v1, %v2094_v46  ;;  %v12579_v58 = vcombine.low %v2090_v1, %v2094_v46  ;;  %v2126_v14 = vld [vmem:[#allocation9 + $0x19e8] sm:$0xff]  ;;  %v1347_v1 = vld [vmem:[#allocation9 + $0x190] sm:$0xff] }
 0x39e   :  { %v1351_v46 = vld [vmem:[#allocation9 + $0x1b0] sm:$0xff] }
 0x39f   :  { %7753 = vmatpush1.bf16.msra.mxu0 %v12777_v2  ;;  %v2098_v2 = vld [vmem:[#allocation9 + $0x1908] sm:$0xff] }
 0x3a0   :  { %8003 = vmatpush1.bf16.msra.mxu1 %v12539_v40  ;;  %7754 = vmatprep.subr.bf16.mxu0 %v12786_v55  ;;  %v2102_v40 = vld [vmem:[#allocation9 + $0x1928] sm:$0xff] }
 0x3a1   :  { %8004 = vmatprep.subr.bf16.mxu1 %v12548_v60  ;;  %v15169_v55 = vld [vmem:[#allocation34_spill] sm:$0xff]  ;;  %v11797_v60 = vcombine.low %v1307_v44, %v1311_v19  ;;  %v12588_v21 = vcombine.high %v2098_v2, %v2102_v40  ;;  %v12587_v25 = vcombine.low %v2098_v2, %v2102_v40  ;;  %v1355_v2 = vld [vmem:[#allocation9 + $0x1d0] sm:$0xff] }
 0x3a2   :  { %v1359_v40 = vld [vmem:[#allocation9 + $0x1f0] sm:$0xff] }
 0x3a3   :  { %7755 = vmatpush1.bf16.msra.mxu0 %v12785_v48  ;;  %v1327_v48 = vld [vmem:[#allocation9 + $0xf0] sm:$0xff] }
 0x3a4   :  { %8005 = vmatpush1.bf16.msra.mxu1 %v12547_v59  ;;  %7756 = vmatprep.subr.bf16.mxu0 %v12794_v36  ;;  %v2106_v59 = vld [vmem:[#allocation9 + $0x1948] sm:$0xff]  ;;  %v11814_v33 = vcombine.high %v1323_v37, %v1327_v48 }
 0x3a5   :  { %8015 = vmatprep.subr.bf16.mxu1 %v12556_v57  ;;  %v2110_v36 = vld [vmem:[#allocation9 + $0x1968] sm:$0xff]  ;;  %v11805_v57 = vcombine.low %v1315_v24, %v1319_v7  ;;  %v11838_v24 = vcombine.high %v1347_v1, %v1351_v46 }
 0x3a6   :  { %v12596_v29 = vcombine.high %v2106_v59, %v2110_v36  ;;  %v12595_v53 = vcombine.low %v2106_v59, %v2110_v36  ;;  %v1363_v59 = vld [vmem:[#allocation9 + $0x210] sm:$0xff] }
 0x3a7   :  { %8007 = vmatmul.mubr.bf16.vlgmr.msra.gmra.mrb[12].mxu1 %v14961_v23  ;;  %7757 = vmatpush1.bf16.msra.mxu0 %v12793_v18  ;;  %v1335_v18 = vld [vmem:[#allocation9 + $0x130] sm:$0xff] }
 0x3a8   :  { %8016 = vmatpush1.bf16.msra.mxu1 %v12555_v28  ;;  %8047 = vmatprep.mubr.bf16.mxu1 %v14963_v54  ;;  %v2114_v28 = vld [vmem:[#allocation9 + $0x1988] sm:$0xff]  ;;  %v11822_v27 = vcombine.high %v1331_v50, %v1335_v18  ;;  %v1367_v36 = vld [vmem:[#allocation9 + $0x230] sm:$0xff] }
 0x3a9   :  { %7758 = vmatprep.subr.bf16.mxu0 %v12802_v17  ;;  %8017 = vmatprep.subr.bf16.mxu1 %v12564_v31  ;;  %v2118_v17 = vld [vmem:[#allocation9 + $0x19a8] sm:$0xff]  ;;  %v11813_v31 = vcombine.low %v1323_v37, %v1327_v48  ;;  %v11846_v37 = vcombine.high %v1355_v2, %v1359_v40 }
 0x3aa   :  { %v12604_v63 = vcombine.high %v2114_v28, %v2118_v17 }
 0x3ab   :  { %7759 = vmatpush1.bf16.msra.mxu0 %v12801_v15  ;;  %v1343_v15 = vld [vmem:[#allocation9 + $0x170] sm:$0xff] }
 0x3ac   :  { %8018 = vmatpush1.bf16.msra.mxu1 %v12563_v61  ;;  %8097 = vmatprep.subr.bf16.mxu0 %v11790_v56  ;;  %v2122_v61 = vld [vmem:[#allocation9 + $0x19c8] sm:$0xff]  ;;  %v11821_v56 = vcombine.low %v1331_v50, %v1335_v18  ;;  %v11830_v44 = vcombine.high %v1339_v4, %v1343_v15  ;;  %v11854_v50 = vcombine.high %v1363_v59, %v1367_v36 }
 0x3ad   :  { %8019 = vmatprep.subr.bf16.mxu1 %v12572_v9  ;;  %v12603_v9 = vcombine.low %v2114_v28, %v2118_v17  ;;  %v12612_v19 = vcombine.high %v2122_v61, %v2126_v14  ;;  %v1371_v28 = vld [vmem:[#allocation9 + $0x250] sm:$0xff] }
 0x3ae   :  { %7761 = vmatmul.mubr.bf16.vlgmr.msra.gmra.mrb[24].mxu0 %v14980_v38  ;;  %v1375_v17 = vld [vmem:[#allocation9 + $0x270] sm:$0xff] }
 0x3af   :  { %8098 = vmatpush1.bf16.msra.mxu0 %v11789_v10  ;;  %8129 = vmatprep.mubr.bf16.mxu0 %v15169_v55  ;;  %v2130_v10 = vld [vmem:[#allocation9 + $0x1a08] sm:$0xff] }
 0x3b0   :  { %8020 = vmatpush1.bf16.msra.mxu1 %v12571_v16  ;;  %8099 = vmatprep.subr.bf16.mxu0 %v11798_v5  ;;  %v2134_v16 = vld [vmem:[#allocation9 + $0x1a28] sm:$0xff]  ;;  %v11829_v5 = vcombine.low %v1339_v4, %v1343_v15  ;;  %v11862_v4 = vcombine.high %v1371_v28, %v1375_v17 }
 0x3b1   :  { %8021 = vmatprep.subr.bf16.mxu1 %v12580_v12  ;;  %v12611_v12 = vcombine.low %v2122_v61, %v2126_v14  ;;  %v12620_v7 = vcombine.high %v2130_v10, %v2134_v16  ;;  %v1379_v61 = vld [vmem:[#allocation9 + $0x290] sm:$0xff] }
 0x3b2   :  { %v1383_v14 = vld [vmem:[#allocation9 + $0x2b0] sm:$0xff] }
 0x3b3   :  { %8100 = vmatpush1.bf16.msra.mxu0 %v11797_v60  ;;  %v2138_v60 = vld [vmem:[#allocation9 + $0x1a48] sm:$0xff] }
 0x3b4   :  { %8022 = vmatpush1.bf16.msra.mxu1 %v12579_v58  ;;  %8101 = vmatprep.subr.bf16.mxu0 %v11806_v42  ;;  %v2142_v58 = vld [vmem:[#allocation9 + $0x1a68] sm:$0xff]  ;;  %v11837_v42 = vcombine.low %v1347_v1, %v1351_v46  ;;  %v11870_v1 = vcombine.high %v1379_v61, %v1383_v14 }
 0x3b5   :  { %8023 = vmatprep.subr.bf16.mxu1 %v12588_v21  ;;  %v12619_v21 = vcombine.low %v2130_v10, %v2134_v16  ;;  %v12628_v48 = vcombine.high %v2138_v60, %v2142_v58  ;;  %v1387_v10 = vld [vmem:[#allocation9 + $0x2d0] sm:$0xff] }
 0x3b6   :  { %v1391_v16 = vld [vmem:[#allocation9 + $0x2f0] sm:$0xff] }
 0x3b7   :  { %8102 = vmatpush1.bf16.msra.mxu0 %v11805_v57  ;;  %v2146_v57 = vld [vmem:[#allocation9 + $0x1a88] sm:$0xff] }
 0x3b8   :  { %8024 = vmatpush1.bf16.msra.mxu1 %v12587_v25  ;;  %8103 = vmatprep.subr.bf16.mxu0 %v11814_v33  ;;  %v2150_v25 = vld [vmem:[#allocation9 + $0x1aa8] sm:$0xff]  ;;  %v11845_v33 = vcombine.low %v1355_v2, %v1359_v40  ;;  %v11878_v2 = vcombine.high %v1387_v10, %v1391_v16 }
 0x3b9   :  { %8025 = vmatprep.subr.bf16.mxu1 %v12596_v29  ;;  %v12627_v29 = vcombine.low %v2138_v60, %v2142_v58  ;;  %v12636_v18 = vcombine.high %v2146_v57, %v2150_v25  ;;  %v1395_v60 = vld [vmem:[#allocation9 + $0x310] sm:$0xff] }
 0x3ba   :  { %v1399_v58 = vld [vmem:[#allocation9 + $0x330] sm:$0xff] }
 0x3bb   :  { %8104 = vmatpush1.bf16.msra.mxu0 %v11813_v31  ;;  %v2154_v31 = vld [vmem:[#allocation9 + $0x1ac8] sm:$0xff] }
 0x3bc   :  { %8026 = vmatpush1.bf16.msra.mxu1 %v12595_v53  ;;  %8105 = vmatprep.subr.bf16.mxu0 %v11822_v27  ;;  %v2158_v53 = vld [vmem:[#allocation9 + $0x1ae8] sm:$0xff]  ;;  %v11853_v27 = vcombine.low %v1363_v59, %v1367_v36  ;;  %v11886_v59 = vcombine.high %v1395_v60, %v1399_v58 }
 0x3bd   :  { %8027 = vmatprep.subr.bf16.mxu1 %v12604_v63  ;;  %v12635_v63 = vcombine.low %v2146_v57, %v2150_v25  ;;  %v12644_v15 = vcombine.high %v2154_v31, %v2158_v53  ;;  %v1403_v57 = vld [vmem:[#allocation9 + $0x350] sm:$0xff] }
 0x3be   :  { %v1407_v25 = vld [vmem:[#allocation9 + $0x370] sm:$0xff] }
 0x3bf   :  { %8106 = vmatpush1.bf16.msra.mxu0 %v11821_v56  ;;  %v2162_v56 = vld [vmem:[#allocation9 + $0x1b08] sm:$0xff] }
 0x3c0   :  { %8028 = vmatpush1.bf16.msra.mxu1 %v12603_v9  ;;  %8107 = vmatprep.subr.bf16.mxu0 %v11830_v44  ;;  %v2166_v9 = vld [vmem:[#allocation9 + $0x1b28] sm:$0xff]  ;;  %v11861_v44 = vcombine.low %v1371_v28, %v1375_v17  ;;  %v11894_v28 = vcombine.high %v1403_v57, %v1407_v25 }
 0x3c1   :  { %8029 = vmatprep.subr.bf16.mxu1 %v12612_v19  ;;  %v12643_v19 = vcombine.low %v2154_v31, %v2158_v53  ;;  %v12652_v46 = vcombine.high %v2162_v56, %v2166_v9  ;;  %v1411_v31 = vld [vmem:[#allocation9 + $0x390] sm:$0xff] }
 0x3c2   :  { %v1415_v53 = vld [vmem:[#allocation9 + $0x3b0] sm:$0xff] }
 0x3c3   :  { %8108 = vmatpush1.bf16.msra.mxu0 %v11829_v5  ;;  %v2170_v5 = vld [vmem:[#allocation9 + $0x1b48] sm:$0xff] }
 0x3c4   :  { %8030 = vmatpush1.bf16.msra.mxu1 %v12611_v12  ;;  %8109 = vmatprep.subr.bf16.mxu0 %v11838_v24  ;;  %v2174_v12 = vld [vmem:[#allocation9 + $0x1b68] sm:$0xff]  ;;  %v11869_v24 = vcombine.low %v1379_v61, %v1383_v14  ;;  %v11902_v61 = vcombine.high %v1411_v31, %v1415_v53 }
 0x3c5   :  { %8031 = vmatprep.subr.bf16.mxu1 %v12620_v7  ;;  %v12651_v7 = vcombine.low %v2162_v56, %v2166_v9  ;;  %v12660_v40 = vcombine.high %v2170_v5, %v2174_v12  ;;  %v2202_v56 = vld [vmem:[#allocation9 + $0x1c48] sm:$0xff] }
 0x3c6   :  { %v2206_v9 = vld [vmem:[#allocation9 + $0x1c68] sm:$0xff] }
 0x3c7   :  { %8110 = vmatpush1.bf16.msra.mxu0 %v11837_v42  ;;  %v2178_v42 = vld [vmem:[#allocation9 + $0x1b88] sm:$0xff] }
 0x3c8   :  { %8032 = vmatpush1.bf16.msra.mxu1 %v12619_v21  ;;  %8111 = vmatprep.subr.bf16.mxu0 %v11846_v37  ;;  %v2182_v21 = vld [vmem:[#allocation9 + $0x1ba8] sm:$0xff]  ;;  %v11877_v37 = vcombine.low %v1387_v10, %v1391_v16  ;;  %v12692_v10 = vcombine.high %v2202_v56, %v2206_v9 }
 0x3c9   :  { %8033 = vmatprep.subr.bf16.mxu1 %v12628_v48  ;;  %v12659_v48 = vcombine.low %v2170_v5, %v2174_v12  ;;  %v12668_v36 = vcombine.high %v2178_v42, %v2182_v21  ;;  %v1427_v5 = vld [vmem:[#allocation9 + $0x410] sm:$0xff] }
 0x3ca   :  { %v1431_v12 = vld [vmem:[#allocation9 + $0x430] sm:$0xff] }
 0x3cb   :  { %8112 = vmatpush1.bf16.msra.mxu0 %v11845_v33  ;;  %v2186_v33 = vld [vmem:[#allocation9 + $0x1bc8] sm:$0xff] }
 0x3cc   :  { %8034 = vmatpush1.bf16.msra.mxu1 %v12627_v29  ;;  %8113 = vmatprep.subr.bf16.mxu0 %v11854_v50  ;;  %v2190_v29 = vld [vmem:[#allocation9 + $0x1be8] sm:$0xff]  ;;  %v11885_v50 = vcombine.low %v1395_v60, %v1399_v58  ;;  %v11918_v60 = vcombine.high %v1427_v5, %v1431_v12 }
 0x3cd   :  { %8035 = vmatprep.subr.bf16.mxu1 %v12636_v18  ;;  %v12667_v18 = vcombine.low %v2178_v42, %v2182_v21  ;;  %v12676_v17 = vcombine.high %v2186_v33, %v2190_v29  ;;  %v1435_v42 = vld [vmem:[#allocation9 + $0x450] sm:$0xff] }
 0x3ce   :  { %v1439_v21 = vld [vmem:[#allocation9 + $0x470] sm:$0xff] }
 0x3cf   :  { %8114 = vmatpush1.bf16.msra.mxu0 %v11853_v27  ;;  %v2194_v27 = vld [vmem:[#allocation9 + $0x1c08] sm:$0xff] }
 0x3d0   :  { %8036 = vmatpush1.bf16.msra.mxu1 %v12635_v63  ;;  %8115 = vmatprep.subr.bf16.mxu0 %v11862_v4  ;;  %v2198_v63 = vld [vmem:[#allocation9 + $0x1c28] sm:$0xff]  ;;  %v11893_v4 = vcombine.low %v1403_v57, %v1407_v25  ;;  %v11926_v57 = vcombine.high %v1435_v42, %v1439_v21 }
 0x3d1   :  { %8037 = vmatprep.subr.bf16.mxu1 %v12644_v15  ;;  %v12675_v15 = vcombine.low %v2186_v33, %v2190_v29  ;;  %v12684_v14 = vcombine.high %v2194_v27, %v2198_v63  ;;  %v1443_v33 = vld [vmem:[#allocation9 + $0x490] sm:$0xff] }
 0x3d2   :  { %v1447_v29 = vld [vmem:[#allocation9 + $0x4b0] sm:$0xff] }
 0x3d3   :  { %8116 = vmatpush1.bf16.msra.mxu0 %v11861_v44  ;;  %v1419_v44 = vld [vmem:[#allocation9 + $0x3d0] sm:$0xff] }
 0x3d4   :  { %8038 = vmatpush1.bf16.msra.mxu1 %v12643_v19  ;;  %8117 = vmatprep.subr.bf16.mxu0 %v11870_v1  ;;  %v1423_v19 = vld [vmem:[#allocation9 + $0x3f0] sm:$0xff]  ;;  %v11901_v1 = vcombine.low %v1411_v31, %v1415_v53  ;;  %v11934_v31 = vcombine.high %v1443_v33, %v1447_v29 }
 0x3d5   :  { %8039 = vmatprep.subr.bf16.mxu1 %v12652_v46  ;;  %v12683_v46 = vcombine.low %v2194_v27, %v2198_v63  ;;  %v11910_v16 = vcombine.high %v1419_v44, %v1423_v19  ;;  %v1451_v27 = vld [vmem:[#allocation9 + $0x4d0] sm:$0xff] }
 0x3d6   :  { %v1455_v63 = vld [vmem:[#allocation9 + $0x4f0] sm:$0xff] }
 0x3d7   :  { %8118 = vmatpush1.bf16.msra.mxu0 %v11869_v24  ;;  %v2210_v24 = vld [vmem:[#allocation9 + $0x1c88] sm:$0xff] }
 0x3d8   :  { %8040 = vmatpush1.bf16.msra.mxu1 %v12651_v7  ;;  %8119 = vmatprep.subr.bf16.mxu0 %v11878_v2  ;;  %v2214_v7 = vld [vmem:[#allocation9 + $0x1ca8] sm:$0xff]  ;;  %v11909_v2 = vcombine.low %v1419_v44, %v1423_v19  ;;  %v1459_v44 = vld [vmem:[#allocation9 + $0x510] sm:$0xff] }
 0x3d9   :  { %8041 = vmatprep.subr.bf16.mxu1 %v12660_v40  ;;  %v12691_v40 = vcombine.low %v2202_v56, %v2206_v9  ;;  %v12700_v58 = vcombine.high %v2210_v24, %v2214_v7  ;;  %v11942_v56 = vcombine.high %v1451_v27, %v1455_v63  ;;  %v1463_v19 = vld [vmem:[#allocation9 + $0x530] sm:$0xff] }
 0x3db   :  { %8120 = vmatpush1.bf16.msra.mxu0 %v11877_v37  ;;  %v2218_v37 = vld [vmem:[#allocation9 + $0x1cc8] sm:$0xff] }
 0x3dc   :  { %8042 = vmatpush1.bf16.msra.mxu1 %v12659_v48  ;;  %8121 = vmatprep.subr.bf16.mxu0 %v11886_v59  ;;  %v2222_v48 = vld [vmem:[#allocation9 + $0x1ce8] sm:$0xff]  ;;  %v11917_v59 = vcombine.low %v1427_v5, %v1431_v12  ;;  %v11950_v5 = vcombine.high %v1459_v44, %v1463_v19 }
 0x3dd   :  { %8043 = vmatprep.subr.bf16.mxu1 %v12668_v36  ;;  %v12699_v36 = vcombine.low %v2210_v24, %v2214_v7  ;;  %v12708_v25 = vcombine.high %v2218_v37, %v2222_v48  ;;  %v1467_v24 = vld [vmem:[#allocation9 + $0x550] sm:$0xff] }
 0x3de   :  { %v1471_v7 = vld [vmem:[#allocation9 + $0x570] sm:$0xff] }
 0x3df   :  { %8122 = vmatpush1.bf16.msra.mxu0 %v11885_v50  ;;  %v2226_v50 = vld [vmem:[#allocation9 + $0x1d08] sm:$0xff] }
 0x3e0   :  { %8044 = vmatpush1.bf16.msra.mxu1 %v12667_v18  ;;  %8123 = vmatprep.subr.bf16.mxu0 %v11894_v28  ;;  %v2230_v18 = vld [vmem:[#allocation9 + $0x1d28] sm:$0xff]  ;;  %v11925_v28 = vcombine.low %v1435_v42, %v1439_v21  ;;  %v11958_v42 = vcombine.high %v1467_v24, %v1471_v7 }
 0x3e1   :  { %8045 = vmatprep.subr.bf16.mxu1 %v12676_v17  ;;  %v12707_v17 = vcombine.low %v2218_v37, %v2222_v48  ;;  %v12716_v53 = vcombine.high %v2226_v50, %v2230_v18  ;;  %v1475_v37 = vld [vmem:[#allocation9 + $0x590] sm:$0xff] }
 0x3e2   :  { %v1479_v48 = vld [vmem:[#allocation9 + $0x5b0] sm:$0xff] }
 0x3e3   :  { %8124 = vmatpush1.bf16.msra.mxu0 %v11893_v4  ;;  %v2234_v4 = vld [vmem:[#allocation9 + $0x1d48] sm:$0xff] }
 0x3e4   :  { %8046 = vmatpush1.bf16.msra.mxu1 %v12675_v15  ;;  %8125 = vmatprep.subr.bf16.mxu0 %v11902_v61  ;;  %v2238_v15 = vld [vmem:[#allocation9 + $0x1d68] sm:$0xff]  ;;  %v11933_v61 = vcombine.low %v1443_v33, %v1447_v29  ;;  %v11966_v33 = vcombine.high %v1475_v37, %v1479_v48 }
 0x3e5   :  { %8056 = vmatprep.subr.bf16.mxu1 %v12684_v14  ;;  %v12715_v14 = vcombine.low %v2226_v50, %v2230_v18  ;;  %v12724_v9 = vcombine.high %v2234_v4, %v2238_v15  ;;  %v1483_v50 = vld [vmem:[#allocation9 + $0x5d0] sm:$0xff] }
 0x3e6   :  { %v1487_v18 = vld [vmem:[#allocation9 + $0x5f0] sm:$0xff] }
 0x3e7   :  { %8048 = vmatmul.mubr.bf16.vlgmr.msra.gmra.mrb[12].mxu1 %v14971_v30  ;;  %8126 = vmatpush1.bf16.msra.mxu0 %v11901_v1  ;;  %v2242_v1 = vld [vmem:[#allocation9 + $0x1d88] sm:$0xff] }
 0x3e8   :  { %8057 = vmatpush1.bf16.msra.mxu1 %v12683_v46  ;;  %8088 = vmatprep.mubr.bf16.mxu1 %v14973_v41  ;;  %v2246_v46 = vld [vmem:[#allocation9 + $0x1da8] sm:$0xff] }
 0x3e9   :  { %8058 = vmatprep.subr.bf16.mxu1 %v12692_v10  ;;  %8127 = vmatprep.subr.bf16.mxu0 %v11910_v16  ;;  %v11941_v10 = vcombine.low %v1451_v27, %v1455_v63  ;;  %v12723_v16 = vcombine.low %v2234_v4, %v2238_v15  ;;  %v12732_v12 = vcombine.high %v2242_v1, %v2246_v46  ;;  %v1491_v4 = vld [vmem:[#allocation9 + $0x610] sm:$0xff] }
 0x3ea   :  { %v11974_v27 = vcombine.high %v1483_v50, %v1487_v18  ;;  %v1495_v15 = vld [vmem:[#allocation9 + $0x630] sm:$0xff] }
 0x3eb   :  { %8128 = vmatpush1.bf16.msra.mxu0 %v11909_v2  ;;  %v2250_v2 = vld [vmem:[#allocation9 + $0x1dc8] sm:$0xff] }
 0x3ec   :  { %8059 = vmatpush1.bf16.msra.mxu1 %v12691_v40  ;;  %8138 = vmatprep.subr.bf16.mxu0 %v11918_v60  ;;  %v2254_v40 = vld [vmem:[#allocation9 + $0x1de8] sm:$0xff]  ;;  %v11949_v60 = vcombine.low %v1459_v44, %v1463_v19  ;;  %v11982_v44 = vcombine.high %v1491_v4, %v1495_v15 }
 0x3ed   :  { %8060 = vmatprep.subr.bf16.mxu1 %v12700_v58  ;;  %v12731_v58 = vcombine.low %v2242_v1, %v2246_v46  ;;  %v12740_v21 = vcombine.high %v2250_v2, %v2254_v40  ;;  %v1499_v1 = vld [vmem:[#allocation9 + $0x650] sm:$0xff] }
 0x3ee   :  { %8130 = vmatmul.mubr.bf16.vlgmr.msra.gmra.mrb[28].mxu0 %v14649_v0  ;;  %v1503_v46 = vld [vmem:[#allocation9 + $0x670] sm:$0xff] }
 0x3ef   :  { %8139 = vmatpush1.bf16.msra.mxu0 %v11917_v59  ;;  %8170 = vmatprep.mubr.bf16.mxu0 %v14677_v51  ;;  %v2258_v59 = vld [vmem:[#allocation9 + $0x1e08] sm:$0xff] }
 0x3f0   :  { %8061 = vmatpush1.bf16.msra.mxu1 %v12699_v36  ;;  %8140 = vmatprep.subr.bf16.mxu0 %v11926_v57  ;;  %v2262_v36 = vld [vmem:[#allocation9 + $0x1e28] sm:$0xff]  ;;  %v11957_v57 = vcombine.low %v1467_v24, %v1471_v7  ;;  %v11990_v24 = vcombine.high %v1499_v1, %v1503_v46 }
 0x3f1   :  { %8062 = vmatprep.subr.bf16.mxu1 %v12708_v25  ;;  %v12739_v25 = vcombine.low %v2250_v2, %v2254_v40  ;;  %v12748_v29 = vcombine.high %v2258_v59, %v2262_v36  ;;  %v1507_v2 = vld [vmem:[#allocation9 + $0x690] sm:$0xff] }
 0x3f2   :  { %v1511_v40 = vld [vmem:[#allocation9 + $0x6b0] sm:$0xff] }
 0x3f3   :  { %8141 = vmatpush1.bf16.msra.mxu0 %v11925_v28  ;;  %v2266_v28 = vld [vmem:[#allocation9 + $0x1e48] sm:$0xff] }
 0x3f4   :  { %8063 = vmatpush1.bf16.msra.mxu1 %v12707_v17  ;;  %8142 = vmatprep.subr.bf16.mxu0 %v11934_v31  ;;  %v2270_v17 = vld [vmem:[#allocation9 + $0x1e68] sm:$0xff]  ;;  %v11965_v31 = vcombine.low %v1475_v37, %v1479_v48  ;;  %v11998_v37 = vcombine.high %v1507_v2, %v1511_v40 }
 0x3f5   :  { %8064 = vmatprep.subr.bf16.mxu1 %v12716_v53  ;;  %v12747_v53 = vcombine.low %v2258_v59, %v2262_v36  ;;  %v12756_v63 = vcombine.high %v2266_v28, %v2270_v17  ;;  %v1515_v59 = vld [vmem:[#allocation9 + $0x6d0] sm:$0xff] }
 0x3f6   :  { %v1519_v36 = vld [vmem:[#allocation9 + $0x6f0] sm:$0xff] }
 0x3f7   :  { %8143 = vmatpush1.bf16.msra.mxu0 %v11933_v61  ;;  %v2274_v61 = vld [vmem:[#allocation9 + $0x1e88] sm:$0xff] }
 0x3f8   :  { %8065 = vmatpush1.bf16.msra.mxu1 %v12715_v14  ;;  %8144 = vmatprep.subr.bf16.mxu0 %v11942_v56  ;;  %v2278_v14 = vld [vmem:[#allocation9 + $0x1ea8] sm:$0xff]  ;;  %v11973_v56 = vcombine.low %v1483_v50, %v1487_v18  ;;  %v12006_v50 = vcombine.high %v1515_v59, %v1519_v36 }
 0x3f9   :  { %8066 = vmatprep.subr.bf16.mxu1 %v12724_v9  ;;  %v12755_v9 = vcombine.low %v2266_v28, %v2270_v17  ;;  %v12764_v19 = vcombine.high %v2274_v61, %v2278_v14  ;;  %v1523_v28 = vld [vmem:[#allocation9 + $0x710] sm:$0xff] }
 0x3fa   :  { %v1527_v17 = vld [vmem:[#allocation9 + $0x730] sm:$0xff] }
 0x3fb   :  { %8145 = vmatpush1.bf16.msra.mxu0 %v11941_v10  ;;  %v2282_v10 = vld [vmem:[#allocation9 + $0x1ec8] sm:$0xff] }
 0x3fc   :  { %8067 = vmatpush1.bf16.msra.mxu1 %v12723_v16  ;;  %8146 = vmatprep.subr.bf16.mxu0 %v11950_v5  ;;  %v2286_v16 = vld [vmem:[#allocation9 + $0x1ee8] sm:$0xff]  ;;  %v11981_v5 = vcombine.low %v1491_v4, %v1495_v15  ;;  %v12014_v4 = vcombine.high %v1523_v28, %v1527_v17 }
 0x3fd   :  { %8068 = vmatprep.subr.bf16.mxu1 %v12732_v12  ;;  %v12763_v12 = vcombine.low %v2274_v61, %v2278_v14  ;;  %v12772_v7 = vcombine.high %v2282_v10, %v2286_v16  ;;  %v1531_v61 = vld [vmem:[#allocation9 + $0x750] sm:$0xff] }
 0x3fe   :  { %v1535_v14 = vld [vmem:[#allocation9 + $0x770] sm:$0xff] }
 0x3ff   :  { %8147 = vmatpush1.bf16.msra.mxu0 %v11949_v60  ;;  %v2290_v60 = vld [vmem:[#allocation9 + $0x1f08] sm:$0xff] }
 0x400   :  { %8069 = vmatpush1.bf16.msra.mxu1 %v12731_v58  ;;  %8148 = vmatprep.subr.bf16.mxu0 %v11958_v42  ;;  %v2294_v58 = vld [vmem:[#allocation9 + $0x1f28] sm:$0xff]  ;;  %v11989_v42 = vcombine.low %v1499_v1, %v1503_v46  ;;  %v12022_v1 = vcombine.high %v1531_v61, %v1535_v14 }
 0x401   :  { %8070 = vmatprep.subr.bf16.mxu1 %v12740_v21  ;;  %v12771_v21 = vcombine.low %v2282_v10, %v2286_v16  ;;  %v12780_v48 = vcombine.high %v2290_v60, %v2294_v58  ;;  %v1539_v10 = vld [vmem:[#allocation9 + $0x790] sm:$0xff] }
 0x402   :  { %v1543_v16 = vld [vmem:[#allocation9 + $0x7b0] sm:$0xff] }
 0x403   :  { %8149 = vmatpush1.bf16.msra.mxu0 %v11957_v57  ;;  %v2298_v57 = vld [vmem:[#allocation9 + $0x1f48] sm:$0xff] }
 0x404   :  { %8071 = vmatpush1.bf16.msra.mxu1 %v12739_v25  ;;  %8150 = vmatprep.subr.bf16.mxu0 %v11966_v33  ;;  %v2302_v25 = vld [vmem:[#allocation9 + $0x1f68] sm:$0xff]  ;;  %v11997_v33 = vcombine.low %v1507_v2, %v1511_v40  ;;  %v12030_v2 = vcombine.high %v1539_v10, %v1543_v16 }
 0x405   :  { %8072 = vmatprep.subr.bf16.mxu1 %v12748_v29  ;;  %v12779_v29 = vcombine.low %v2290_v60, %v2294_v58  ;;  %v12788_v18 = vcombine.high %v2298_v57, %v2302_v25  ;;  %v1547_v60 = vld [vmem:[#allocation9 + $0x7d0] sm:$0xff] }
 0x406   :  { %v1551_v58 = vld [vmem:[#allocation9 + $0x7f0] sm:$0xff] }
 0x407   :  { %8151 = vmatpush1.bf16.msra.mxu0 %v11965_v31  ;;  %v2306_v31 = vld [vmem:[#allocation9 + $0x1f88] sm:$0xff] }
 0x408   :  { %8073 = vmatpush1.bf16.msra.mxu1 %v12747_v53  ;;  %8152 = vmatprep.subr.bf16.mxu0 %v11974_v27  ;;  %v2310_v53 = vld [vmem:[#allocation9 + $0x1fa8] sm:$0xff]  ;;  %v12005_v27 = vcombine.low %v1515_v59, %v1519_v36  ;;  %v12038_v59 = vcombine.high %v1547_v60, %v1551_v58 }
 0x409   :  { %8074 = vmatprep.subr.bf16.mxu1 %v12756_v63  ;;  %v12787_v63 = vcombine.low %v2298_v57, %v2302_v25  ;;  %v12796_v15 = vcombine.high %v2306_v31, %v2310_v53  ;;  %v1555_v57 = vld [vmem:[#allocation9 + $0x810] sm:$0xff] }
 0x40a   :  { %v1559_v25 = vld [vmem:[#allocation9 + $0x830] sm:$0xff] }
 0x40b   :  { %8153 = vmatpush1.bf16.msra.mxu0 %v11973_v56  ;;  %v2314_v56 = vld [vmem:[#allocation9 + $0x1fc8] sm:$0xff] }
 0x40c   :  { %8075 = vmatpush1.bf16.msra.mxu1 %v12755_v9  ;;  %8154 = vmatprep.subr.bf16.mxu0 %v11982_v44  ;;  %v2318_v9 = vld [vmem:[#allocation9 + $0x1fe8] sm:$0xff]  ;;  %v12013_v44 = vcombine.low %v1523_v28, %v1527_v17  ;;  %v12046_v28 = vcombine.high %v1555_v57, %v1559_v25 }
 0x40d   :  { %8076 = vmatprep.subr.bf16.mxu1 %v12764_v19  ;;  %v12795_v19 = vcombine.low %v2306_v31, %v2310_v53  ;;  %v12804_v46 = vcombine.high %v2314_v56, %v2318_v9  ;;  %v1563_v31 = vld [vmem:[#allocation9 + $0x850] sm:$0xff] }
 0x40e   :  { %v1567_v53 = vld [vmem:[#allocation9 + $0x870] sm:$0xff] }
 0x40f   :  { %8155 = vmatpush1.bf16.msra.mxu0 %v11981_v5  ;;  %v1300_v5 = vld [vmem:[#allocation9 + $0x18] sm:$0xff] }
 0x410   :  { %8077 = vmatpush1.bf16.msra.mxu1 %v12763_v12  ;;  %8156 = vmatprep.subr.bf16.mxu0 %v11990_v24  ;;  %v1304_v12 = vld [vmem:[#allocation9 + $0x38] sm:$0xff]  ;;  %v12021_v24 = vcombine.low %v1531_v61, %v1535_v14  ;;  %v12054_v61 = vcombine.high %v1563_v31, %v1567_v53 }
 0x411   :  { %8078 = vmatprep.subr.bf16.mxu1 %v12772_v7  ;;  %v12803_v7 = vcombine.low %v2314_v56, %v2318_v9  ;;  %v11792_v40 = vcombine.high %v1300_v5, %v1304_v12  ;;  %v1571_v56 = vld [vmem:[#allocation9 + $0x890] sm:$0xff] }
 0x412   :  { %v1575_v9 = vld [vmem:[#allocation9 + $0x8b0] sm:$0xff] }
 0x413   :  { %8157 = vmatpush1.bf16.msra.mxu0 %v11989_v42  ;;  %v1308_v42 = vld [vmem:[#allocation9 + $0x58] sm:$0xff] }
 0x414   :  { %8079 = vmatpush1.bf16.msra.mxu1 %v12771_v21  ;;  %8158 = vmatprep.subr.bf16.mxu0 %v11998_v37  ;;  %v1312_v21 = vld [vmem:[#allocation9 + $0x78] sm:$0xff]  ;;  %v12029_v37 = vcombine.low %v1539_v10, %v1543_v16  ;;  %v1579_v16 = vld [vmem:[#allocation9 + $0x8d0] sm:$0xff] }
 0x415   :  { %8080 = vmatprep.subr.bf16.mxu1 %v12780_v48  ;;  %v11791_v48 = vcombine.low %v1300_v5, %v1304_v12  ;;  %v11800_v36 = vcombine.high %v1308_v42, %v1312_v21  ;;  %v1583_v5 = vld [vmem:[#allocation9 + $0x8f0] sm:$0xff]  ;;  %v1340_v12 = vld [vmem:[#allocation9 + $0x158] sm:$0xff] }
 0x417   :  { %8159 = vmatpush1.bf16.msra.mxu0 %v11997_v33  ;;  %v1316_v33 = vld [vmem:[#allocation9 + $0x98] sm:$0xff] }
 0x418   :  { %8081 = vmatpush1.bf16.msra.mxu1 %v12779_v29  ;;  %8160 = vmatprep.subr.bf16.mxu0 %v12006_v50  ;;  %v1320_v29 = vld [vmem:[#allocation9 + $0xb8] sm:$0xff]  ;;  %v12037_v50 = vcombine.low %v1547_v60, %v1551_v58  ;;  %v1587_v58 = vld [vmem:[#allocation9 + $0x910] sm:$0xff] }
 0x419   :  { %8082 = vmatprep.subr.bf16.mxu1 %v12788_v18  ;;  %v11799_v18 = vcombine.low %v1308_v42, %v1312_v21  ;;  %v11808_v17 = vcombine.high %v1316_v33, %v1320_v29  ;;  %v1591_v42 = vld [vmem:[#allocation9 + $0x930] sm:$0xff]  ;;  %v1348_v21 = vld [vmem:[#allocation9 + $0x198] sm:$0xff] }
 0x41b   :  { %8161 = vmatpush1.bf16.msra.mxu0 %v12005_v27  ;;  %v1324_v27 = vld [vmem:[#allocation9 + $0xd8] sm:$0xff] }
 0x41c   :  { %8083 = vmatpush1.bf16.msra.mxu1 %v12787_v63  ;;  %8162 = vmatprep.subr.bf16.mxu0 %v12014_v4  ;;  %v1328_v63 = vld [vmem:[#allocation9 + $0xf8] sm:$0xff]  ;;  %v12045_v4 = vcombine.low %v1555_v57, %v1559_v25  ;;  %v1595_v25 = vld [vmem:[#allocation9 + $0x950] sm:$0xff] }
 0x41d   :  { %8084 = vmatprep.subr.bf16.mxu1 %v12796_v15  ;;  %v11807_v15 = vcombine.low %v1316_v33, %v1320_v29  ;;  %v11816_v14 = vcombine.high %v1324_v27, %v1328_v63  ;;  %v1599_v33 = vld [vmem:[#allocation9 + $0x970] sm:$0xff]  ;;  %v1356_v29 = vld [vmem:[#allocation9 + $0x1d8] sm:$0xff] }
 0x41f   :  { %8163 = vmatpush1.bf16.msra.mxu0 %v12013_v44  ;;  %v1336_v44 = vld [vmem:[#allocation9 + $0x138] sm:$0xff] }
 0x420   :  { %8085 = vmatpush1.bf16.msra.mxu1 %v12795_v19  ;;  %8164 = vmatprep.subr.bf16.mxu0 %v12022_v1  ;;  %v12053_v19 = vcombine.low %v1563_v31, %v1567_v53  ;;  %v11815_v1 = vcombine.low %v1324_v27, %v1328_v63  ;;  %v1603_v53 = vld [vmem:[#allocation9 + $0x990] sm:$0xff]  ;;  %v1364_v63 = vld [vmem:[#allocation9 + $0x218] sm:$0xff] }
 0x421   :  { %8086 = vmatprep.subr.bf16.mxu1 %v12804_v46  ;;  %v12062_v46 = vcombine.high %v1571_v56, %v1575_v9  ;;  %v1607_v27 = vld [vmem:[#allocation9 + $0x9b0] sm:$0xff] }
 0x423   :  { %8165 = vmatpush1.bf16.msra.mxu0 %v12021_v24  ;;  %v1344_v24 = vld [vmem:[#allocation9 + $0x178] sm:$0xff] }
 0x424   :  { %8087 = vmatpush1.bf16.msra.mxu1 %v12803_v7  ;;  %8166 = vmatprep.subr.bf16.mxu0 %v12030_v2  ;;  %v12061_v7 = vcombine.low %v1571_v56, %v1575_v9  ;;  %v11832_v60 = vcombine.high %v1340_v12, %v1344_v24  ;;  %v1611_v9 = vld [vmem:[#allocation9 + $0x9d0] sm:$0xff] }
 0x425   :  { %8425 = vmatprep.subr.bf16.mxu1 %v11792_v40  ;;  %v12070_v40 = vcombine.high %v1579_v16, %v1583_v5 }
 0x427   :  { %8089 = vmatmul.mubr.bf16.vlgmr.msra.gmra.mrb[12].mxu1 %v14980_v38  ;;  %8167 = vmatpush1.bf16.msra.mxu0 %v12029_v37  ;;  %v1352_v37 = vld [vmem:[#allocation9 + $0x1b8] sm:$0xff] }
 0x428   :  { %8426 = vmatpush1.bf16.msra.mxu1 %v11791_v48  ;;  %8457 = vmatprep.mubr.bf16.mxu1 %v15169_v55  ;;  %v1332_v55 = vld [vmem:[#allocation9 + $0x118] sm:$0xff]  ;;  %v12069_v48 = vcombine.low %v1579_v16, %v1583_v5  ;;  %v11840_v57 = vcombine.high %v1348_v21, %v1352_v37  ;;  %v1619_v5 = vld [vmem:[#allocation9 + $0xa10] sm:$0xff] }
 0x429   :  { %8168 = vmatprep.subr.bf16.mxu0 %v12038_v59  ;;  %8427 = vmatprep.subr.bf16.mxu1 %v11800_v36  ;;  %v11824_v10 = vcombine.high %v1332_v55, %v1336_v44  ;;  %v11823_v2 = vcombine.low %v1332_v55, %v1336_v44  ;;  %v11831_v59 = vcombine.low %v1340_v12, %v1344_v24  ;;  %v1615_v55 = vld [vmem:[#allocation9 + $0x9f0] sm:$0xff]  ;;  %v1372_v44 = vld [vmem:[#allocation9 + $0x258] sm:$0xff] }
 0x42a   :  { %v12078_v36 = vcombine.high %v1587_v58, %v1591_v42  ;;  %v1623_v12 = vld [vmem:[#allocation9 + $0xa30] sm:$0xff]  ;;  %v1380_v24 = vld [vmem:[#allocation9 + $0x298] sm:$0xff] }
 0x42b   :  { %8169 = vmatpush1.bf16.msra.mxu0 %v12037_v50  ;;  %v1360_v50 = vld [vmem:[#allocation9 + $0x1f8] sm:$0xff] }
 0x42c   :  { %8428 = vmatpush1.bf16.msra.mxu1 %v11799_v18  ;;  %8179 = vmatprep.subr.bf16.mxu0 %v12046_v28  ;;  %v12077_v18 = vcombine.low %v1587_v58, %v1591_v42  ;;  %v11839_v28 = vcombine.low %v1348_v21, %v1352_v37  ;;  %v11848_v31 = vcombine.high %v1356_v29, %v1360_v50  ;;  %v1627_v42 = vld [vmem:[#allocation9 + $0xa50] sm:$0xff]  ;;  %v1388_v37 = vld [vmem:[#allocation9 + $0x2d8] sm:$0xff] }
 0x42d   :  { %8429 = vmatprep.subr.bf16.mxu1 %v11808_v17  ;;  %v12086_v17 = vcombine.high %v1595_v25, %v1599_v33  ;;  %v1631_v21 = vld [vmem:[#allocation9 + $0xa70] sm:$0xff] }
 0x42e   :  { %8171 = vmatmul.mubr.bf16.vlgmr.msra.gmra.mrb[28].mxu0 %v14674_v39 }
 0x42f   :  { %8180 = vmatpush1.bf16.msra.mxu0 %v12045_v4  ;;  %8211 = vmatprep.mubr.bf16.mxu0 %v14693_v43  ;;  %v1368_v4 = vld [vmem:[#allocation9 + $0x238] sm:$0xff] }
 0x430   :  { %8430 = vmatpush1.bf16.msra.mxu1 %v11807_v15  ;;  %8181 = vmatprep.subr.bf16.mxu0 %v12054_v61  ;;  %v12085_v15 = vcombine.low %v1595_v25, %v1599_v33  ;;  %v11847_v61 = vcombine.low %v1356_v29, %v1360_v50  ;;  %v11856_v56 = vcombine.high %v1364_v63, %v1368_v4  ;;  %v1635_v33 = vld [vmem:[#allocation9 + $0xa90] sm:$0xff]  ;;  %v1396_v50 = vld [vmem:[#allocation9 + $0x318] sm:$0xff] }
 0x431   :  { %8431 = vmatprep.subr.bf16.mxu1 %v11816_v14  ;;  %v12094_v14 = vcombine.high %v1603_v53, %v1607_v27  ;;  %v1639_v29 = vld [vmem:[#allocation9 + $0xab0] sm:$0xff] }
 0x433   :  { %8182 = vmatpush1.bf16.msra.mxu0 %v12053_v19  ;;  %v1376_v19 = vld [vmem:[#allocation9 + $0x278] sm:$0xff] }
 0x434   :  { %8432 = vmatpush1.bf16.msra.mxu1 %v11815_v1  ;;  %8183 = vmatprep.subr.bf16.mxu0 %v12062_v46  ;;  %v12093_v1 = vcombine.low %v1603_v53, %v1607_v27  ;;  %v11855_v46 = vcombine.low %v1364_v63, %v1368_v4  ;;  %v11864_v16 = vcombine.high %v1372_v44, %v1376_v19  ;;  %v1643_v27 = vld [vmem:[#allocation9 + $0xad0] sm:$0xff]  ;;  %v1404_v4 = vld [vmem:[#allocation9 + $0x358] sm:$0xff] }
 0x435   :  { %8433 = vmatprep.subr.bf16.mxu1 %v11824_v10  ;;  %v12102_v10 = vcombine.high %v1611_v9, %v1615_v55  ;;  %v1647_v63 = vld [vmem:[#allocation9 + $0xaf0] sm:$0xff] }
 0x437   :  { %8184 = vmatpush1.bf16.msra.mxu0 %v12061_v7  ;;  %v1384_v7 = vld [vmem:[#allocation9 + $0x2b8] sm:$0xff] }
 0x438   :  { %8434 = vmatpush1.bf16.msra.mxu1 %v11823_v2  ;;  %8185 = vmatprep.subr.bf16.mxu0 %v12070_v40  ;;  %v12101_v2 = vcombine.low %v1611_v9, %v1615_v55  ;;  %v11863_v40 = vcombine.low %v1372_v44, %v1376_v19  ;;  %v11872_v58 = vcombine.high %v1380_v24, %v1384_v7  ;;  %v1651_v55 = vld [vmem:[#allocation9 + $0xb10] sm:$0xff]  ;;  %v1412_v19 = vld [vmem:[#allocation9 + $0x398] sm:$0xff] }
 0x439   :  { %8435 = vmatprep.subr.bf16.mxu1 %v11832_v60  ;;  %v12110_v60 = vcombine.high %v1619_v5, %v1623_v12  ;;  %v1655_v44 = vld [vmem:[#allocation9 + $0xb30] sm:$0xff] }
 0x43b   :  { %8186 = vmatpush1.bf16.msra.mxu0 %v12069_v48  ;;  %v1392_v48 = vld [vmem:[#allocation9 + $0x2f8] sm:$0xff] }
 0x43c   :  { %8436 = vmatpush1.bf16.msra.mxu1 %v11831_v59  ;;  %8187 = vmatprep.subr.bf16.mxu0 %v12078_v36  ;;  %v12109_v59 = vcombine.low %v1619_v5, %v1623_v12  ;;  %v11871_v36 = vcombine.low %v1380_v24, %v1384_v7  ;;  %v11880_v25 = vcombine.high %v1388_v37, %v1392_v48  ;;  %v1659_v12 = vld [vmem:[#allocation9 + $0xb50] sm:$0xff]  ;;  %v1420_v7 = vld [vmem:[#allocation9 + $0x3d8] sm:$0xff] }
 0x43d   :  { %8437 = vmatprep.subr.bf16.mxu1 %v11840_v57  ;;  %v12118_v57 = vcombine.high %v1627_v42, %v1631_v21  ;;  %v1663_v24 = vld [vmem:[#allocation9 + $0xb70] sm:$0xff] }
 0x43f   :  { %8188 = vmatpush1.bf16.msra.mxu0 %v12077_v18  ;;  %v1400_v18 = vld [vmem:[#allocation9 + $0x338] sm:$0xff] }
 0x440   :  { %8438 = vmatpush1.bf16.msra.mxu1 %v11839_v28  ;;  %8189 = vmatprep.subr.bf16.mxu0 %v12086_v17  ;;  %v12117_v28 = vcombine.low %v1627_v42, %v1631_v21  ;;  %v11879_v17 = vcombine.low %v1388_v37, %v1392_v48  ;;  %v11888_v53 = vcombine.high %v1396_v50, %v1400_v18  ;;  %v1667_v21 = vld [vmem:[#allocation9 + $0xb90] sm:$0xff]  ;;  %v1428_v48 = vld [vmem:[#allocation9 + $0x418] sm:$0xff] }
 0x441   :  { %8439 = vmatprep.subr.bf16.mxu1 %v11848_v31  ;;  %v12126_v31 = vcombine.high %v1635_v33, %v1639_v29  ;;  %v1671_v37 = vld [vmem:[#allocation9 + $0xbb0] sm:$0xff] }
 0x443   :  { %8190 = vmatpush1.bf16.msra.mxu0 %v12085_v15  ;;  %v1408_v15 = vld [vmem:[#allocation9 + $0x378] sm:$0xff] }
 0x444   :  { %8440 = vmatpush1.bf16.msra.mxu1 %v11847_v61  ;;  %8191 = vmatprep.subr.bf16.mxu0 %v12094_v14  ;;  %v12125_v61 = vcombine.low %v1635_v33, %v1639_v29  ;;  %v11887_v14 = vcombine.low %v1396_v50, %v1400_v18  ;;  %v11896_v9 = vcombine.high %v1404_v4, %v1408_v15  ;;  %v1675_v29 = vld [vmem:[#allocation9 + $0xbd0] sm:$0xff]  ;;  %v1436_v18 = vld [vmem:[#allocation9 + $0x458] sm:$0xff] }
 0x445   :  { %8441 = vmatprep.subr.bf16.mxu1 %v11856_v56  ;;  %v12134_v56 = vcombine.high %v1643_v27, %v1647_v63  ;;  %v1679_v50 = vld [vmem:[#allocation9 + $0xbf0] sm:$0xff] }
 0x447   :  { %8192 = vmatpush1.bf16.msra.mxu0 %v12093_v1  ;;  %v1416_v1 = vld [vmem:[#allocation9 + $0x3b8] sm:$0xff] }
 0x448   :  { %8442 = vmatpush1.bf16.msra.mxu1 %v11855_v46  ;;  %8193 = vmatprep.subr.bf16.mxu0 %v12102_v10  ;;  %v12133_v46 = vcombine.low %v1643_v27, %v1647_v63  ;;  %v11895_v10 = vcombine.low %v1404_v4, %v1408_v15  ;;  %v11904_v5 = vcombine.high %v1412_v19, %v1416_v1  ;;  %v1683_v63 = vld [vmem:[#allocation9 + $0xc10] sm:$0xff]  ;;  %v1444_v15 = vld [vmem:[#allocation9 + $0x498] sm:$0xff] }
 0x449   :  { %8443 = vmatprep.subr.bf16.mxu1 %v11864_v16  ;;  %v12142_v16 = vcombine.high %v1651_v55, %v1655_v44  ;;  %v1687_v4 = vld [vmem:[#allocation9 + $0xc30] sm:$0xff] }
 0x44b   :  { %8194 = vmatpush1.bf16.msra.mxu0 %v12101_v2  ;;  %v1424_v2 = vld [vmem:[#allocation9 + $0x3f8] sm:$0xff] }
 0x44c   :  { %8444 = vmatpush1.bf16.msra.mxu1 %v11863_v40  ;;  %8195 = vmatprep.subr.bf16.mxu0 %v12110_v60  ;;  %v12141_v40 = vcombine.low %v1651_v55, %v1655_v44  ;;  %v11903_v60 = vcombine.low %v1412_v19, %v1416_v1  ;;  %v11912_v42 = vcombine.high %v1420_v7, %v1424_v2  ;;  %v1691_v44 = vld [vmem:[#allocation9 + $0xc50] sm:$0xff]  ;;  %v1452_v1 = vld [vmem:[#allocation9 + $0x4d8] sm:$0xff] }
 0x44d   :  { %8445 = vmatprep.subr.bf16.mxu1 %v11872_v58  ;;  %v12150_v58 = vcombine.high %v1659_v12, %v1663_v24  ;;  %v1695_v19 = vld [vmem:[#allocation9 + $0xc70] sm:$0xff] }
 0x44f   :  { %8196 = vmatpush1.bf16.msra.mxu0 %v12109_v59  ;;  %v1432_v59 = vld [vmem:[#allocation9 + $0x438] sm:$0xff] }
 0x450   :  { %8446 = vmatpush1.bf16.msra.mxu1 %v11871_v36  ;;  %8197 = vmatprep.subr.bf16.mxu0 %v12118_v57  ;;  %v12149_v36 = vcombine.low %v1659_v12, %v1663_v24  ;;  %v11911_v57 = vcombine.low %v1420_v7, %v1424_v2  ;;  %v11920_v33 = vcombine.high %v1428_v48, %v1432_v59  ;;  %v1699_v12 = vld [vmem:[#allocation9 + $0xc90] sm:$0xff]  ;;  %v1464_v7 = vld [vmem:[#allocation9 + $0x538] sm:$0xff] }
 0x451   :  { %8447 = vmatprep.subr.bf16.mxu1 %v11880_v25  ;;  %v12158_v25 = vcombine.high %v1667_v21, %v1671_v37  ;;  %v1703_v24 = vld [vmem:[#allocation9 + $0xcb0] sm:$0xff]  ;;  %v12181_v2 = vcombine.low %v1691_v44, %v1695_v19 }
 0x453   :  { %8198 = vmatpush1.bf16.msra.mxu0 %v12117_v28  ;;  %v1440_v28 = vld [vmem:[#allocation9 + $0x478] sm:$0xff] }
 0x454   :  { %8448 = vmatpush1.bf16.msra.mxu1 %v11879_v17  ;;  %8199 = vmatprep.subr.bf16.mxu0 %v12126_v31  ;;  %v12157_v17 = vcombine.low %v1667_v21, %v1671_v37  ;;  %v11919_v31 = vcombine.low %v1428_v48, %v1432_v59  ;;  %v11928_v27 = vcombine.high %v1436_v18, %v1440_v28  ;;  %v1711_v21 = vld [vmem:[#allocation9 + $0xcf0] sm:$0xff]  ;;  %v1468_v37 = vld [vmem:[#allocation9 + $0x558] sm:$0xff] }
 0x455   :  { %8449 = vmatprep.subr.bf16.mxu1 %v11888_v53  ;;  %v12166_v53 = vcombine.high %v1675_v29, %v1679_v50  ;;  %v1472_v48 = vld [vmem:[#allocation9 + $0x578] sm:$0xff]  ;;  %v12189_v59 = vcombine.low %v1699_v12, %v1703_v24 }
 0x457   :  { %8200 = vmatpush1.bf16.msra.mxu0 %v12125_v61  ;;  %v1448_v61 = vld [vmem:[#allocation9 + $0x4b8] sm:$0xff] }
 0x458   :  { %8450 = vmatpush1.bf16.msra.mxu1 %v11887_v14  ;;  %8201 = vmatprep.subr.bf16.mxu0 %v12134_v56  ;;  %v12165_v14 = vcombine.low %v1675_v29, %v1679_v50  ;;  %v11927_v56 = vcombine.low %v1436_v18, %v1440_v28  ;;  %v11936_v55 = vcombine.high %v1444_v15, %v1448_v61  ;;  %v1719_v29 = vld [vmem:[#allocation9 + $0xd30] sm:$0xff]  ;;  %v1476_v50 = vld [vmem:[#allocation9 + $0x598] sm:$0xff] }
 0x459   :  { %8451 = vmatprep.subr.bf16.mxu1 %v11896_v9  ;;  %v12174_v9 = vcombine.high %v1683_v63, %v1687_v4  ;;  %v1480_v18 = vld [vmem:[#allocation9 + $0x5b8] sm:$0xff] }
 0x45b   :  { %8202 = vmatpush1.bf16.msra.mxu0 %v12133_v46  ;;  %v1456_v46 = vld [vmem:[#allocation9 + $0x4f8] sm:$0xff] }
 0x45c   :  { %8452 = vmatpush1.bf16.msra.mxu1 %v11895_v10  ;;  %8203 = vmatprep.subr.bf16.mxu0 %v12142_v16  ;;  %v12173_v10 = vcombine.low %v1683_v63, %v1687_v4  ;;  %v11935_v16 = vcombine.low %v1444_v15, %v1448_v61  ;;  %v1727_v63 = vld [vmem:[#allocation9 + $0xd70] sm:$0xff]  ;;  %v1484_v4 = vld [vmem:[#allocation9 + $0x5d8] sm:$0xff] }
 0x45d   :  { %8453 = vmatprep.subr.bf16.mxu1 %v11904_v5  ;;  %v11944_v5 = vcombine.high %v1452_v1, %v1456_v46  ;;  %v1488_v15 = vld [vmem:[#allocation9 + $0x5f8] sm:$0xff] }
 0x45f   :  { %8204 = vmatpush1.bf16.msra.mxu0 %v12141_v40  ;;  %v11943_v40 = vcombine.low %v1452_v1, %v1456_v46  ;;  %v1496_v1 = vld [vmem:[#allocation9 + $0x638] sm:$0xff] }
 0x460   :  { %8454 = vmatpush1.bf16.msra.mxu1 %v11903_v60  ;;  %8205 = vmatprep.subr.bf16.mxu0 %v12150_v58  ;;  %v12190_v60 = vcombine.high %v1699_v12, %v1703_v24  ;;  %v1739_v12 = vld [vmem:[#allocation9 + $0xdd0] sm:$0xff] }
 0x461   :  { %8455 = vmatprep.subr.bf16.mxu1 %v11912_v42  ;;  %v1707_v42 = vld [vmem:[#allocation9 + $0xcd0] sm:$0xff] }
 0x462   :  { %v12197_v28 = vcombine.low %v1707_v42, %v1711_v21  ;;  %v1743_v24 = vld [vmem:[#allocation9 + $0xdf0] sm:$0xff] }
 0x463   :  { %8206 = vmatpush1.bf16.msra.mxu0 %v12149_v36 }
 0x464   :  { %8456 = vmatpush1.bf16.msra.mxu1 %v11911_v57  ;;  %8207 = vmatprep.subr.bf16.mxu0 %v12158_v25  ;;  %v12198_v57 = vcombine.high %v1707_v42, %v1711_v21  ;;  %v11960_v25 = vcombine.high %v1468_v37, %v1472_v48 }
 0x465   :  { %8466 = vmatprep.subr.bf16.mxu1 %v11920_v33  ;;  %v1715_v33 = vld [vmem:[#allocation9 + $0xd10] sm:$0xff] }
 0x466   :  { %v12205_v61 = vcombine.low %v1715_v33, %v1719_v29 }
 0x467   :  { %8458 = vmatmul.mubr.bf16.vlgmr.msra.gmra.mrb[16].mxu1 %v14649_v0  ;;  %8208 = vmatpush1.bf16.msra.mxu0 %v12157_v17  ;;  %v12182_v0 = vcombine.high %v1691_v44, %v1695_v19  ;;  %v11959_v17 = vcombine.low %v1468_v37, %v1472_v48  ;;  %v1735_v44 = vld [vmem:[#allocation9 + $0xdb0] sm:$0xff]  ;;  %v1492_v19 = vld [vmem:[#allocation9 + $0x618] sm:$0xff]  ;;  %v12230_v48 = vcombine.high %v1739_v12, %v1743_v24 }
 0x468   :  { %8467 = vmatpush1.bf16.msra.mxu1 %v11919_v31  ;;  %8498 = vmatprep.mubr.bf16.mxu1 %v14677_v51  ;;  %v1460_v51 = vld [vmem:[#allocation9 + $0x518] sm:$0xff]  ;;  %v12206_v31 = vcombine.high %v1715_v33, %v1719_v29  ;;  %v11983_v37 = vcombine.low %v1492_v19, %v1496_v1  ;;  %v12229_v33 = vcombine.low %v1739_v12, %v1743_v24 }
 0x469   :  { %8209 = vmatprep.subr.bf16.mxu0 %v12166_v53  ;;  %8468 = vmatprep.subr.bf16.mxu1 %v11928_v27  ;;  %v11952_v58 = vcombine.high %v1460_v51, %v1464_v7  ;;  %v11951_v36 = vcombine.low %v1460_v51, %v1464_v7  ;;  %v11968_v53 = vcombine.high %v1476_v50, %v1480_v18  ;;  %v1723_v27 = vld [vmem:[#allocation9 + $0xd50] sm:$0xff] }
 0x46a   :  { %v12213_v46 = vcombine.low %v1723_v27, %v1727_v63 }
 0x46b   :  { %8210 = vmatpush1.bf16.msra.mxu0 %v12165_v14  ;;  %v11967_v14 = vcombine.low %v1476_v50, %v1480_v18  ;;  %v1755_v18 = vld [vmem:[#allocation9 + $0xe50] sm:$0xff] }
 0x46c   :  { %8469 = vmatpush1.bf16.msra.mxu1 %v11927_v56  ;;  %8220 = vmatprep.subr.bf16.mxu0 %v12174_v9  ;;  %v12214_v56 = vcombine.high %v1723_v27, %v1727_v63  ;;  %v11976_v9 = vcombine.high %v1484_v4, %v1488_v15 }
 0x46d   :  { %8470 = vmatprep.subr.bf16.mxu1 %v11936_v55  ;;  %v1731_v55 = vld [vmem:[#allocation9 + $0xd90] sm:$0xff] }
 0x46e   :  { %8212 = vmatmul.mubr.bf16.vlgmr.msra.gmra.mrb[28].mxu0 %v14884_v47  ;;  %v12221_v42 = vcombine.low %v1731_v55, %v1735_v44 }
 0x46f   :  { %8221 = vmatpush1.bf16.msra.mxu0 %v12173_v10  ;;  %8252 = vmatprep.mubr.bf16.mxu0 %v14891_v34  ;;  %v11975_v10 = vcombine.low %v1484_v4, %v1488_v15  ;;  %v1763_v15 = vld [vmem:[#allocation9 + $0xe90] sm:$0xff] }
 0x470   :  { %8471 = vmatpush1.bf16.msra.mxu1 %v11935_v16  ;;  %8222 = vmatprep.subr.bf16.mxu0 %v12182_v0  ;;  %v12222_v16 = vcombine.high %v1731_v55, %v1735_v44 }
 0x471   :  { %8472 = vmatprep.subr.bf16.mxu1 %v11944_v5  ;;  %v11984_v5 = vcombine.high %v1492_v19, %v1496_v1  ;;  %v1771_v1 = vld [vmem:[#allocation9 + $0xed0] sm:$0xff] }
 0x473   :  { %8223 = vmatpush1.bf16.msra.mxu0 %v12181_v2  ;;  %v1500_v2 = vld [vmem:[#allocation9 + $0x658] sm:$0xff] }
 0x474   :  { %8473 = vmatpush1.bf16.msra.mxu1 %v11943_v40  ;;  %8224 = vmatprep.subr.bf16.mxu0 %v12190_v60  ;;  %v1504_v40 = vld [vmem:[#allocation9 + $0x678] sm:$0xff] }
 0x475   :  { %8474 = vmatprep.subr.bf16.mxu1 %v11952_v58 }
 0x477   :  { %8225 = vmatpush1.bf16.msra.mxu0 %v12189_v59  ;;  %v11992_v59 = vcombine.high %v1500_v2, %v1504_v40 }
 0x478   :  { %8475 = vmatpush1.bf16.msra.mxu1 %v11951_v36  ;;  %8226 = vmatprep.subr.bf16.mxu0 %v12198_v57  ;;  %v1747_v36 = vld [vmem:[#allocation9 + $0xe10] sm:$0xff] }
 0x479   :  { %8476 = vmatprep.subr.bf16.mxu1 %v11960_v25  ;;  %v1751_v57 = vld [vmem:[#allocation9 + $0xe30] sm:$0xff]  ;;  %v1512_v25 = vld [vmem:[#allocation9 + $0x6b8] sm:$0xff] }
 0x47a   :  { %v12238_v29 = vcombine.high %v1747_v36, %v1751_v57 }
 0x47b   :  { %8227 = vmatpush1.bf16.msra.mxu0 %v12197_v28  ;;  %v1759_v28 = vld [vmem:[#allocation9 + $0xe70] sm:$0xff] }
 0x47c   :  { %8477 = vmatpush1.bf16.msra.mxu1 %v11959_v17  ;;  %8228 = vmatprep.subr.bf16.mxu0 %v12206_v31  ;;  %v1516_v17 = vld [vmem:[#allocation9 + $0x6d8] sm:$0xff]  ;;  %v12246_v63 = vcombine.high %v1755_v18, %v1759_v28 }
 0x47d   :  { %8478 = vmatprep.subr.bf16.mxu1 %v11968_v53  ;;  %v1520_v31 = vld [vmem:[#allocation9 + $0x6f8] sm:$0xff]  ;;  %v12237_v53 = vcombine.low %v1747_v36, %v1751_v57  ;;  %v1791_v36 = vld [vmem:[#allocation9 + $0xf70] sm:$0xff] }
 0x47e   :  { %v12008_v4 = vcombine.high %v1516_v17, %v1520_v31  ;;  %v12007_v55 = vcombine.low %v1516_v17, %v1520_v31  ;;  %v1548_v57 = vld [vmem:[#allocation9 + $0x7d8] sm:$0xff] }
 0x47f   :  { %8229 = vmatpush1.bf16.msra.mxu0 %v12205_v61  ;;  %v1767_v61 = vld [vmem:[#allocation9 + $0xeb0] sm:$0xff]  ;;  %v1560_v17 = vld [vmem:[#allocation9 + $0x838] sm:$0xff] }
 0x480   :  { %8479 = vmatpush1.bf16.msra.mxu1 %v11967_v14  ;;  %8230 = vmatprep.subr.bf16.mxu0 %v12214_v56  ;;  %v1524_v14 = vld [vmem:[#allocation9 + $0x718] sm:$0xff]  ;;  %v12254_v44 = vcombine.high %v1763_v15, %v1767_v61 }
 0x481   :  { %v7762_v0 = vpop.f32.mrb[24].mxu0  ;;  %8480 = vmatprep.subr.bf16.mxu1 %v11976_v9  ;;  %v1528_v56 = vld [vmem:[#allocation9 + $0x738] sm:$0xff]  ;;  %v12245_v9 = vcombine.low %v1755_v18, %v1759_v28  ;;  %v1799_v18 = vld [vmem:[#allocation9 + $0xfb0] sm:$0xff] }
 0x482   :  { %v14997_v51 = vadd.f32 %v7762_v0, %v14953_v8  ;;  %v7764_v7 = vpop.f32.mrb[25].mxu0  ;;  %v1508_v8 = vld [vmem:[#allocation9 + $0x698] sm:$0xff]  ;;  %v12016_v19 = vcombine.high %v1524_v14, %v1528_v56  ;;  %v12253_v0 = vcombine.low %v1763_v15, %v1767_v61  ;;  %v1807_v15 = vld [vmem:[#allocation9 + $0xff0] sm:$0xff] }
 0x483   :  { %v15000_v60 = vadd.f32 %v7764_v7, %v14955_v26  ;;  %v7766_v58 = vpop.f32.mrb[26].mxu0  ;;  %8231 = vmatpush1.bf16.msra.mxu0 %v12213_v46  ;;  %v11991_v26 = vcombine.low %v1500_v2, %v1504_v40  ;;  %v12000_v50 = vcombine.high %v1508_v8, %v1512_v25  ;;  %v11999_v27 = vcombine.low %v1508_v8, %v1512_v25  ;;  %v1775_v46 = vld [vmem:[#allocation9 + $0xef0] sm:$0xff]  ;;  %v1540_v40 = vld [vmem:[#allocation9 + $0x798] sm:$0xff] }
 0x484   :  { %8481 = vmatpush1.bf16.msra.mxu1 %v11975_v10  ;;  %v7767_v21 = vpop.f32.mrb[27].mxu0  ;;  %8232 = vmatprep.subr.bf16.mxu0 %v12222_v16  ;;  %v1532_v10 = vld [vmem:[#allocation9 + $0x758] sm:$0xff]  ;;  %v12262_v12 = vcombine.high %v1771_v1, %v1775_v46  ;;  %v1779_v7 = vld [vmem:[#allocation9 + $0xf10] sm:$0xff] }
 0x485   :  { %8482 = vmatprep.subr.bf16.mxu1 %v11984_v5  ;;  %v1536_v16 = vld [vmem:[#allocation9 + $0x778] sm:$0xff]  ;;  %v12015_v5 = vcombine.low %v1524_v14, %v1528_v56  ;;  %v1783_v2 = vld [vmem:[#allocation9 + $0xf30] sm:$0xff] }
 0x486   :  { %v12024_v24 = vcombine.high %v1532_v10, %v1536_v16  ;;  %v1544_v58 = vld [vmem:[#allocation9 + $0x7b8] sm:$0xff]  ;;  %v12023_v21 = vcombine.low %v1532_v10, %v1536_v16  ;;  %v12269_v25 = vcombine.low %v1779_v7, %v1783_v2 }
 0x487   :  { %8233 = vmatpush1.bf16.msra.mxu0 %v12221_v42  ;;  %v12261_v42 = vcombine.low %v1771_v1, %v1775_v46  ;;  %v1552_v8 = vld [vmem:[#allocation9 + $0x7f8] sm:$0xff]  ;;  %v1815_v1 = vld [vmem:[#allocation9 + $0x1030] sm:$0xff] }
 0x488   :  { %8483 = vmatpush1.bf16.msra.mxu1 %v11983_v37  ;;  %8234 = vmatprep.subr.bf16.mxu0 %v12230_v48  ;;  %v12270_v37 = vcombine.high %v1779_v7, %v1783_v2  ;;  %v12032_v48 = vcombine.high %v1540_v40, %v1544_v58  ;;  %v1556_v28 = vld [vmem:[#allocation9 + $0x818] sm:$0xff]  ;;  %v1823_v7 = vld [vmem:[#allocation9 + $0x1070] sm:$0xff] }
 0x489   :  { %8484 = vmatprep.subr.bf16.mxu1 %v11992_v59  ;;  %v1787_v59 = vld [vmem:[#allocation9 + $0xf50] sm:$0xff]  ;;  %v1564_v61 = vld [vmem:[#allocation9 + $0x858] sm:$0xff] }
 0x48a   :  { %v12277_v31 = vcombine.low %v1787_v59, %v1791_v36  ;;  %v1568_v14 = vld [vmem:[#allocation9 + $0x878] sm:$0xff] }
 0x48b   :  { %8235 = vmatpush1.bf16.msra.mxu0 %v12229_v33  ;;  %v12031_v33 = vcombine.low %v1540_v40, %v1544_v58  ;;  %v1572_v46 = vld [vmem:[#allocation9 + $0x898] sm:$0xff] }
 0x48c   :  { %8485 = vmatpush1.bf16.msra.mxu1 %v11991_v26  ;;  %8236 = vmatprep.subr.bf16.mxu0 %v12238_v29  ;;  %v12278_v26 = vcombine.high %v1787_v59, %v1791_v36  ;;  %v12040_v29 = vcombine.high %v1548_v57, %v1552_v8  ;;  %v1576_v10 = vld [vmem:[#allocation9 + $0x8b8] sm:$0xff] }
 0x48d   :  { %8486 = vmatprep.subr.bf16.mxu1 %v12000_v50  ;;  %v1795_v50 = vld [vmem:[#allocation9 + $0xf90] sm:$0xff]  ;;  %v1580_v2 = vld [vmem:[#allocation9 + $0x8d8] sm:$0xff] }
 0x48e   :  { %v12285_v56 = vcombine.low %v1795_v50, %v1799_v18  ;;  %v1584_v40 = vld [vmem:[#allocation9 + $0x8f8] sm:$0xff] }
 0x48f   :  { %8237 = vmatpush1.bf16.msra.mxu0 %v12237_v53  ;;  %v12039_v53 = vcombine.low %v1548_v57, %v1552_v8  ;;  %v1592_v59 = vld [vmem:[#allocation9 + $0x938] sm:$0xff]  ;;  %v12071_v57 = vcombine.low %v1580_v2, %v1584_v40 }
 0x490   :  { %8487 = vmatpush1.bf16.msra.mxu1 %v11999_v27  ;;  %8238 = vmatprep.subr.bf16.mxu0 %v12246_v63  ;;  %v12286_v27 = vcombine.high %v1795_v50, %v1799_v18  ;;  %v12048_v63 = vcombine.high %v1556_v28, %v1560_v17  ;;  %v1600_v50 = vld [vmem:[#allocation9 + $0x978] sm:$0xff] }
 0x491   :  { %8488 = vmatprep.subr.bf16.mxu1 %v12008_v4  ;;  %v1803_v4 = vld [vmem:[#allocation9 + $0xfd0] sm:$0xff] }
 0x492   :  { %v12293_v16 = vcombine.low %v1803_v4, %v1807_v15 }
 0x493   :  { %8239 = vmatpush1.bf16.msra.mxu0 %v12245_v9  ;;  %v12047_v9 = vcombine.low %v1556_v28, %v1560_v17 }
 0x494   :  { %8489 = vmatpush1.bf16.msra.mxu1 %v12007_v55  ;;  %8240 = vmatprep.subr.bf16.mxu0 %v12254_v44  ;;  %v12294_v55 = vcombine.high %v1803_v4, %v1807_v15  ;;  %v12056_v44 = vcombine.high %v1564_v61, %v1568_v14  ;;  %v1608_v4 = vld [vmem:[#allocation9 + $0x9b8] sm:$0xff] }
 0x495   :  { %8490 = vmatprep.subr.bf16.mxu1 %v12016_v19  ;;  %v1811_v19 = vld [vmem:[#allocation9 + $0x1010] sm:$0xff] }
 0x496   :  { %v12301_v58 = vcombine.low %v1811_v19, %v1815_v1 }
 0x497   :  { %8241 = vmatpush1.bf16.msra.mxu0 %v12253_v0  ;;  %v12055_v0 = vcombine.low %v1564_v61, %v1568_v14 }
 0x498   :  { %8491 = vmatpush1.bf16.msra.mxu1 %v12015_v5  ;;  %8242 = vmatprep.subr.bf16.mxu0 %v12262_v12  ;;  %v12302_v5 = vcombine.high %v1811_v19, %v1815_v1  ;;  %v12064_v12 = vcombine.high %v1572_v46, %v1576_v10  ;;  %v1616_v19 = vld [vmem:[#allocation9 + $0x9f8] sm:$0xff] }
 0x499   :  { %8492 = vmatprep.subr.bf16.mxu1 %v12024_v24  ;;  %v1819_v24 = vld [vmem:[#allocation9 + $0x1050] sm:$0xff] }
 0x49a   :  { %v12309_v36 = vcombine.low %v1819_v24, %v1823_v7 }
 0x49b   :  { %8243 = vmatpush1.bf16.msra.mxu0 %v12261_v42  ;;  %v12063_v42 = vcombine.low %v1572_v46, %v1576_v10 }
 0x49c   :  { %8493 = vmatpush1.bf16.msra.mxu1 %v12023_v21  ;;  %8244 = vmatprep.subr.bf16.mxu0 %v12270_v37  ;;  %v12072_v21 = vcombine.high %v1580_v2, %v1584_v40  ;;  %v1827_v37 = vld [vmem:[#allocation9 + $0x1090] sm:$0xff] }
 0x49d   :  { %8494 = vmatprep.subr.bf16.mxu1 %v12032_v48  ;;  %v1831_v48 = vld [vmem:[#allocation9 + $0x10b0] sm:$0xff] }
 0x49e   :  { %v12318_v8 = vcombine.high %v1827_v37, %v1831_v48  ;;  %v12317_v18 = vcombine.low %v1827_v37, %v1831_v48  ;;  %v1632_v37 = vld [vmem:[#allocation9 + $0xa78] sm:$0xff] }
 0x49f   :  { %8245 = vmatpush1.bf16.msra.mxu0 %v12269_v25 }
 0x4a0   :  { %8495 = vmatpush1.bf16.msra.mxu1 %v12031_v33  ;;  %8246 = vmatprep.subr.bf16.mxu0 %v12278_v26  ;;  %v1835_v33 = vld [vmem:[#allocation9 + $0x10d0] sm:$0xff] }
 0x4a1   :  { %8496 = vmatprep.subr.bf16.mxu1 %v12040_v29  ;;  %v1839_v26 = vld [vmem:[#allocation9 + $0x10f0] sm:$0xff]  ;;  %v1596_v29 = vld [vmem:[#allocation9 + $0x958] sm:$0xff] }
 0x4a2   :  { %v12326_v17 = vcombine.high %v1835_v33, %v1839_v26  ;;  %v12325_v15 = vcombine.low %v1835_v33, %v1839_v26  ;;  %v12087_v61 = vcombine.low %v1596_v29, %v1600_v50  ;;  %v1640_v33 = vld [vmem:[#allocation9 + $0xab8] sm:$0xff] }
 0x4a3   :  { %8247 = vmatpush1.bf16.msra.mxu0 %v12277_v31  ;;  %v12088_v31 = vcombine.high %v1596_v29, %v1600_v50 }
 0x4a4   :  { %8497 = vmatpush1.bf16.msra.mxu1 %v12039_v53  ;;  %8248 = vmatprep.subr.bf16.mxu0 %v12286_v27  ;;  %v1843_v53 = vld [vmem:[#allocation9 + $0x1110] sm:$0xff] }
 0x4a5   :  { %8507 = vmatprep.subr.bf16.mxu1 %v12048_v63  ;;  %v1847_v27 = vld [vmem:[#allocation9 + $0x1130] sm:$0xff]  ;;  %v1604_v63 = vld [vmem:[#allocation9 + $0x998] sm:$0xff] }
 0x4a6   :  { %v12334_v14 = vcombine.high %v1843_v53, %v1847_v27  ;;  %v12333_v1 = vcombine.low %v1843_v53, %v1847_v27  ;;  %v12095_v46 = vcombine.low %v1604_v63, %v1608_v4  ;;  %v1648_v53 = vld [vmem:[#allocation9 + $0xaf8] sm:$0xff] }
 0x4a7   :  { %8499 = vmatmul.mubr.bf16.vlgmr.msra.gmra.mrb[16].mxu1 %v14674_v39  ;;  %8249 = vmatpush1.bf16.msra.mxu0 %v12285_v56  ;;  %v12310_v39 = vcombine.high %v1819_v24, %v1823_v7  ;;  %v12096_v56 = vcombine.high %v1604_v63, %v1608_v4  ;;  %v1624_v24 = vld [vmem:[#allocation9 + $0xa38] sm:$0xff] }
 0x4a8   :  { %8508 = vmatpush1.bf16.msra.mxu1 %v12047_v9  ;;  %8539 = vmatprep.mubr.bf16.mxu1 %v14693_v43  ;;  %v1588_v43 = vld [vmem:[#allocation9 + $0x918] sm:$0xff]  ;;  %v1851_v9 = vld [vmem:[#allocation9 + $0x1150] sm:$0xff] }
 0x4a9   :  { %8250 = vmatprep.subr.bf16.mxu0 %v12294_v55  ;;  %8509 = vmatprep.subr.bf16.mxu1 %v12056_v44  ;;  %v12080_v25 = vcombine.high %v1588_v43, %v1592_v59  ;;  %v12079_v28 = vcombine.low %v1588_v43, %v1592_v59  ;;  %v1855_v55 = vld [vmem:[#allocation9 + $0x1170] sm:$0xff]  ;;  %v1612_v44 = vld [vmem:[#allocation9 + $0x9d8] sm:$0xff] }
 0x4aa   :  { %v12342_v10 = vcombine.high %v1851_v9, %v1855_v55  ;;  %v12341_v7 = vcombine.low %v1851_v9, %v1855_v55  ;;  %v12103_v2 = vcombine.low %v1612_v44, %v1616_v19  ;;  %v1656_v9 = vld [vmem:[#allocation9 + $0xb38] sm:$0xff] }
 0x4ab   :  { %8251 = vmatpush1.bf16.msra.mxu0 %v12293_v16  ;;  %v12104_v16 = vcombine.high %v1612_v44, %v1616_v19 }
 0x4ac   :  { %8510 = vmatpush1.bf16.msra.mxu1 %v12055_v0  ;;  %8261 = vmatprep.subr.bf16.mxu0 %v12302_v5  ;;  %v1859_v0 = vld [vmem:[#allocation9 + $0x1190] sm:$0xff] }
 0x4ad   :  { %8511 = vmatprep.subr.bf16.mxu1 %v12064_v12  ;;  %v1863_v5 = vld [vmem:[#allocation9 + $0x11b0] sm:$0xff]  ;;  %v1620_v12 = vld [vmem:[#allocation9 + $0xa18] sm:$0xff] }
 0x4ae   :  { %8253 = vmatmul.mubr.bf16.vlgmr.msra.gmra.mrb[28].mxu0 %v14931_v22  ;;  %v12350_v40 = vcombine.high %v1859_v0, %v1863_v5  ;;  %v12349_v48 = vcombine.low %v1859_v0, %v1863_v5  ;;  %v12111_v43 = vcombine.low %v1620_v12, %v1624_v24  ;;  %v1664_v0 = vld [vmem:[#allocation9 + $0xb78] sm:$0xff] }
 0x4af   :  { %8262 = vmatpush1.bf16.msra.mxu0 %v12301_v58  ;;  %8293 = vmatprep.mubr.bf16.mxu0 %v14935_v49  ;;  %v12112_v58 = vcombine.high %v1620_v12, %v1624_v24 }
 0x4b0   :  { %8512 = vmatpush1.bf16.msra.mxu1 %v12063_v42  ;;  %8263 = vmatprep.subr.bf16.mxu0 %v12310_v39  ;;  %v1867_v42 = vld [vmem:[#allocation9 + $0x11d0] sm:$0xff] }
 0x4b1   :  { %8513 = vmatprep.subr.bf16.mxu1 %v12072_v21  ;;  %v1871_v39 = vld [vmem:[#allocation9 + $0x11f0] sm:$0xff]  ;;  %v1628_v21 = vld [vmem:[#allocation9 + $0xa58] sm:$0xff] }
 0x4b2   :  { %v12358_v59 = vcombine.high %v1867_v42, %v1871_v39  ;;  %v12357_v26 = vcombine.low %v1867_v42, %v1871_v39  ;;  %v12119_v29 = vcombine.low %v1628_v21, %v1632_v37  ;;  %v1672_v42 = vld [vmem:[#allocation9 + $0xbb8] sm:$0xff] }
 0x4b3   :  { %8264 = vmatpush1.bf16.msra.mxu0 %v12309_v36  ;;  %v12120_v36 = vcombine.high %v1628_v21, %v1632_v37 }
 0x4b4   :  { %8514 = vmatpush1.bf16.msra.mxu1 %v12071_v57  ;;  %8265 = vmatprep.subr.bf16.mxu0 %v12318_v8  ;;  %v1875_v57 = vld [vmem:[#allocation9 + $0x1210] sm:$0xff] }
 0x4b5   :  { %8515 = vmatprep.subr.bf16.mxu1 %v12080_v25  ;;  %v1879_v8 = vld [vmem:[#allocation9 + $0x1230] sm:$0xff]  ;;  %v1636_v25 = vld [vmem:[#allocation9 + $0xa98] sm:$0xff] }
 0x4b6   :  { %v12366_v50 = vcombine.high %v1875_v57, %v1879_v8  ;;  %v12365_v27 = vcombine.low %v1875_v57, %v1879_v8  ;;  %v12127_v63 = vcombine.low %v1636_v25, %v1640_v33  ;;  %v1680_v57 = vld [vmem:[#allocation9 + $0xbf8] sm:$0xff] }
 0x4b7   :  { %8266 = vmatpush1.bf16.msra.mxu0 %v12317_v18  ;;  %v12128_v18 = vcombine.high %v1636_v25, %v1640_v33 }
 0x4b8   :  { %8516 = vmatpush1.bf16.msra.mxu1 %v12079_v28  ;;  %8267 = vmatprep.subr.bf16.mxu0 %v12326_v17  ;;  %v1883_v28 = vld [vmem:[#allocation9 + $0x1250] sm:$0xff] }
 0x4b9   :  { %8517 = vmatprep.subr.bf16.mxu1 %v12088_v31  ;;  %v1887_v17 = vld [vmem:[#allocation9 + $0x1270] sm:$0xff]  ;;  %v1644_v31 = vld [vmem:[#allocation9 + $0xad8] sm:$0xff] }
 0x4ba   :  { %v12374_v4 = vcombine.high %v1883_v28, %v1887_v17  ;;  %v12373_v55 = vcombine.low %v1883_v28, %v1887_v17  ;;  %v12135_v44 = vcombine.low %v1644_v31, %v1648_v53  ;;  %v1688_v28 = vld [vmem:[#allocation9 + $0xc38] sm:$0xff] }
 0x4bb   :  { %8268 = vmatpush1.bf16.msra.mxu0 %v12325_v15  ;;  %v12136_v15 = vcombine.high %v1644_v31, %v1648_v53 }
 0x4bc   :  { %8518 = vmatpush1.bf16.msra.mxu1 %v12087_v61  ;;  %8269 = vmatprep.subr.bf16.mxu0 %v12334_v14  ;;  %v1891_v61 = vld [vmem:[#allocation9 + $0x1290] sm:$0xff] }
 0x4bd   :  { %8519 = vmatprep.subr.bf16.mxu1 %v12096_v56  ;;  %v1895_v14 = vld [vmem:[#allocation9 + $0x12b0] sm:$0xff]  ;;  %v1652_v56 = vld [vmem:[#allocation9 + $0xb18] sm:$0xff] }
 0x4be   :  { %v12382_v19 = vcombine.high %v1891_v61, %v1895_v14  ;;  %v12381_v5 = vcombine.low %v1891_v61, %v1895_v14  ;;  %v12143_v12 = vcombine.low %v1652_v56, %v1656_v9  ;;  %v1696_v61 = vld [vmem:[#allocation9 + $0xc78] sm:$0xff] }
 0x4bf   :  { %8270 = vmatpush1.bf16.msra.mxu0 %v12333_v1  ;;  %v12144_v1 = vcombine.high %v1652_v56, %v1656_v9 }
 0x4c0   :  { %8520 = vmatpush1.bf16.msra.mxu1 %v12095_v46  ;;  %8271 = vmatprep.subr.bf16.mxu0 %v12342_v10  ;;  %v1899_v46 = vld [vmem:[#allocation9 + $0x12d0] sm:$0xff] }
 0x4c1   :  { %8521 = vmatprep.subr.bf16.mxu1 %v12104_v16  ;;  %v1903_v10 = vld [vmem:[#allocation9 + $0x12f0] sm:$0xff]  ;;  %v1660_v16 = vld [vmem:[#allocation9 + $0xb58] sm:$0xff] }
 0x4c2   :  { %v12390_v24 = vcombine.high %v1899_v46, %v1903_v10  ;;  %v12389_v39 = vcombine.low %v1899_v46, %v1903_v10  ;;  %v12151_v21 = vcombine.low %v1660_v16, %v1664_v0  ;;  %v1704_v46 = vld [vmem:[#allocation9 + $0xcb8] sm:$0xff] }
 0x4c3   :  { %8272 = vmatpush1.bf16.msra.mxu0 %v12341_v7  ;;  %v12152_v7 = vcombine.high %v1660_v16, %v1664_v0 }
 0x4c4   :  { %8522 = vmatpush1.bf16.msra.mxu1 %v12103_v2  ;;  %8273 = vmatprep.subr.bf16.mxu0 %v12350_v40  ;;  %v1907_v2 = vld [vmem:[#allocation9 + $0x1310] sm:$0xff] }
 0x4c5   :  { %8523 = vmatprep.subr.bf16.mxu1 %v12112_v58  ;;  %v1911_v40 = vld [vmem:[#allocation9 + $0x1330] sm:$0xff]  ;;  %v1668_v58 = vld [vmem:[#allocation9 + $0xb98] sm:$0xff] }
 0x4c6   :  { %v12398_v37 = vcombine.high %v1907_v2, %v1911_v40  ;;  %v12397_v8 = vcombine.low %v1907_v2, %v1911_v40  ;;  %v12159_v25 = vcombine.low %v1668_v58, %v1672_v42  ;;  %v1712_v2 = vld [vmem:[#allocation9 + $0xcf8] sm:$0xff] }
 0x4c7   :  { %8274 = vmatpush1.bf16.msra.mxu0 %v12349_v48  ;;  %v12160_v48 = vcombine.high %v1668_v58, %v1672_v42 }
 0x4c8   :  { %8524 = vmatpush1.bf16.msra.mxu1 %v12111_v43  ;;  %8275 = vmatprep.subr.bf16.mxu0 %v12358_v59  ;;  %v1915_v43 = vld [vmem:[#allocation9 + $0x1350] sm:$0xff] }
 0x4c9   :  { %8525 = vmatprep.subr.bf16.mxu1 %v12120_v36  ;;  %v1919_v59 = vld [vmem:[#allocation9 + $0x1370] sm:$0xff]  ;;  %v1676_v36 = vld [vmem:[#allocation9 + $0xbd8] sm:$0xff] }
 0x4ca   :  { %v12406_v33 = vcombine.high %v1915_v43, %v1919_v59  ;;  %v12405_v17 = vcombine.low %v1915_v43, %v1919_v59  ;;  %v12167_v31 = vcombine.low %v1676_v36, %v1680_v57 }
 0x4cb   :  { %8276 = vmatpush1.bf16.msra.mxu0 %v12357_v26  ;;  %v12168_v26 = vcombine.high %v1676_v36, %v1680_v57  ;;  %v1963_v57 = vld [vmem:[#allocation9 + $0x14d0] sm:$0xff] }
 0x4cc   :  { %8526 = vmatpush1.bf16.msra.mxu1 %v12119_v29  ;;  %8277 = vmatprep.subr.bf16.mxu0 %v12366_v50  ;;  %v1923_v29 = vld [vmem:[#allocation9 + $0x1390] sm:$0xff] }
 0x4cd   :  { %8527 = vmatprep.subr.bf16.mxu1 %v12128_v18  ;;  %v1927_v50 = vld [vmem:[#allocation9 + $0x13b0] sm:$0xff]  ;;  %v1684_v18 = vld [vmem:[#allocation9 + $0xc18] sm:$0xff] }
 0x4ce   :  { %v12414_v53 = vcombine.high %v1923_v29, %v1927_v50  ;;  %v12413_v14 = vcombine.low %v1923_v29, %v1927_v50  ;;  %v12175_v56 = vcombine.low %v1684_v18, %v1688_v28 }
 0x4cf   :  { %8278 = vmatpush1.bf16.msra.mxu0 %v12365_v27  ;;  %v12176_v27 = vcombine.high %v1684_v18, %v1688_v28  ;;  %v1971_v28 = vld [vmem:[#allocation9 + $0x1510] sm:$0xff] }
 0x4d0   :  { %8528 = vmatpush1.bf16.msra.mxu1 %v12127_v63  ;;  %8279 = vmatprep.subr.bf16.mxu0 %v12374_v4  ;;  %v1931_v63 = vld [vmem:[#allocation9 + $0x13d0] sm:$0xff] }
 0x4d1   :  { %8529 = vmatprep.subr.bf16.mxu1 %v12136_v15  ;;  %v1935_v4 = vld [vmem:[#allocation9 + $0x13f0] sm:$0xff]  ;;  %v1692_v15 = vld [vmem:[#allocation9 + $0xc58] sm:$0xff] }
 0x4d2   :  { %v12422_v9 = vcombine.high %v1931_v63, %v1935_v4  ;;  %v12421_v10 = vcombine.low %v1931_v63, %v1935_v4  ;;  %v12183_v16 = vcombine.low %v1692_v15, %v1696_v61 }
 0x4d3   :  { %8280 = vmatpush1.bf16.msra.mxu0 %v12373_v55  ;;  %v12184_v55 = vcombine.high %v1692_v15, %v1696_v61  ;;  %v1979_v61 = vld [vmem:[#allocation9 + $0x1550] sm:$0xff] }
 0x4d4   :  { %8530 = vmatpush1.bf16.msra.mxu1 %v12135_v44  ;;  %8281 = vmatprep.subr.bf16.mxu0 %v12382_v19  ;;  %v1939_v44 = vld [vmem:[#allocation9 + $0x1410] sm:$0xff] }
 0x4d5   :  { %8531 = vmatprep.subr.bf16.mxu1 %v12144_v1  ;;  %v1943_v19 = vld [vmem:[#allocation9 + $0x1430] sm:$0xff]  ;;  %v1700_v1 = vld [vmem:[#allocation9 + $0xc98] sm:$0xff] }
 0x4d6   :  { %v12430_v0 = vcombine.high %v1939_v44, %v1943_v19  ;;  %v12429_v40 = vcombine.low %v1939_v44, %v1943_v19  ;;  %v12191_v58 = vcombine.low %v1700_v1, %v1704_v46 }
 0x4d7   :  { %8282 = vmatpush1.bf16.msra.mxu0 %v12381_v5  ;;  %v12192_v5 = vcombine.high %v1700_v1, %v1704_v46 }
 0x4d8   :  { %8532 = vmatpush1.bf16.msra.mxu1 %v12143_v12  ;;  %8283 = vmatprep.subr.bf16.mxu0 %v12390_v24  ;;  %v1947_v12 = vld [vmem:[#allocation9 + $0x1450] sm:$0xff] }
 0x4d9   :  { %8533 = vmatprep.subr.bf16.mxu1 %v12152_v7  ;;  %v1951_v24 = vld [vmem:[#allocation9 + $0x1470] sm:$0xff]  ;;  %v1708_v7 = vld [vmem:[#allocation9 + $0xcd8] sm:$0xff] }
 0x4da   :  { %v12200_v42 = vcombine.high %v1708_v7, %v1712_v2  ;;  %v12199_v43 = vcombine.low %v1708_v7, %v1712_v2  ;;  %v1752_v7 = vld [vmem:[#allocation9 + $0xe38] sm:$0xff] }
 0x4db   :  { %8284 = vmatpush1.bf16.msra.mxu0 %v12389_v39  ;;  %v1955_v39 = vld [vmem:[#allocation9 + $0x1490] sm:$0xff] }
 0x4dc   :  { %8534 = vmatpush1.bf16.msra.mxu1 %v12151_v21  ;;  %8285 = vmatprep.subr.bf16.mxu0 %v12398_v37  ;;  %v1959_v21 = vld [vmem:[#allocation9 + $0x14b0] sm:$0xff]  ;;  %v1720_v37 = vld [vmem:[#allocation9 + $0xd38] sm:$0xff] }
 0x4dd   :  { %8535 = vmatprep.subr.bf16.mxu1 %v12160_v48  ;;  %v12437_v48 = vcombine.low %v1947_v12, %v1951_v24  ;;  %v12446_v59 = vcombine.high %v1955_v39, %v1959_v21 }
 0x4df   :  { %8286 = vmatpush1.bf16.msra.mxu0 %v12397_v8  ;;  %v1967_v8 = vld [vmem:[#allocation9 + $0x14f0] sm:$0xff] }
 0x4e0   :  { %8536 = vmatpush1.bf16.msra.mxu1 %v12159_v25  ;;  %8287 = vmatprep.subr.bf16.mxu0 %v12406_v33  ;;  %v1724_v25 = vld [vmem:[#allocation9 + $0xd58] sm:$0xff]  ;;  %v12454_v50 = vcombine.high %v1963_v57, %v1967_v8 }
 0x4e1   :  { %8537 = vmatprep.subr.bf16.mxu1 %v12168_v26  ;;  %v1728_v33 = vld [vmem:[#allocation9 + $0xd78] sm:$0xff]  ;;  %v12445_v26 = vcombine.low %v1955_v39, %v1959_v21  ;;  %v1999_v39 = vld [vmem:[#allocation9 + $0x15f0] sm:$0xff] }
 0x4e2   :  { %v12216_v18 = vcombine.high %v1724_v25, %v1728_v33  ;;  %v12215_v63 = vcombine.low %v1724_v25, %v1728_v33  ;;  %v1756_v21 = vld [vmem:[#allocation9 + $0xe58] sm:$0xff] }
 0x4e3   :  { %8288 = vmatpush1.bf16.msra.mxu0 %v12405_v17  ;;  %v1975_v17 = vld [vmem:[#allocation9 + $0x1530] sm:$0xff]  ;;  %v1768_v25 = vld [vmem:[#allocation9 + $0xeb8] sm:$0xff] }
 0x4e4   :  { %8538 = vmatpush1.bf16.msra.mxu1 %v12167_v31  ;;  %8289 = vmatprep.subr.bf16.mxu0 %v12414_v53  ;;  %v1732_v31 = vld [vmem:[#allocation9 + $0xd98] sm:$0xff]  ;;  %v12462_v4 = vcombine.high %v1971_v28, %v1975_v17  ;;  %v12461_v19 = vcombine.low %v1971_v28, %v1975_v17  ;;  %v2015_v28 = vld [vmem:[#allocation9 + $0x1670] sm:$0xff] }
 0x4e5   :  { %8548 = vmatprep.subr.bf16.mxu1 %v12176_v27  ;;  %v1736_v53 = vld [vmem:[#allocation9 + $0xdb8] sm:$0xff]  ;;  %v12453_v27 = vcombine.low %v1963_v57, %v1967_v8  ;;  %v2007_v57 = vld [vmem:[#allocation9 + $0x1630] sm:$0xff] }
 0x4e6   :  { %v12224_v15 = vcombine.high %v1732_v31, %v1736_v53  ;;  %v12223_v46 = vcombine.low %v1732_v31, %v1736_v53  ;;  %v1764_v8 = vld [vmem:[#allocation9 + $0xe98] sm:$0xff] }
 0x4e7   :  { %8540 = vmatmul.mubr.bf16.vlgmr.msra.gmra.mrb[16].mxu1 %v14884_v47  ;;  %8290 = vmatpush1.bf16.msra.mxu0 %v12413_v14  ;;  %v12438_v47 = vcombine.high %v1947_v12, %v1951_v24  ;;  %v1983_v14 = vld [vmem:[#allocation9 + $0x1570] sm:$0xff]  ;;  %v1748_v24 = vld [vmem:[#allocation9 + $0xe18] sm:$0xff] }
 0x4e8   :  { %8549 = vmatpush1.bf16.msra.mxu1 %v12175_v56  ;;  %8580 = vmatprep.mubr.bf16.mxu1 %v14891_v34  ;;  %v1716_v34 = vld [vmem:[#allocation9 + $0xd18] sm:$0xff]  ;;  %v1991_v12 = vld [vmem:[#allocation9 + $0x15b0] sm:$0xff]  ;;  %v12469_v2 = vcombine.low %v1979_v61, %v1983_v14 }
 0x4e9   :  { %8291 = vmatprep.subr.bf16.mxu0 %v12422_v9  ;;  %8550 = vmatprep.subr.bf16.mxu1 %v12184_v55  ;;  %v12208_v36 = vcombine.high %v1716_v34, %v1720_v37  ;;  %v12207_v29 = vcombine.low %v1716_v34, %v1720_v37  ;;  %v1740_v9 = vld [vmem:[#allocation9 + $0xdd8] sm:$0xff] }
 0x4ea   :  { %v1744_v55 = vld [vmem:[#allocation9 + $0xdf8] sm:$0xff] }
 0x4eb   :  { %8292 = vmatpush1.bf16.msra.mxu0 %v12421_v10  ;;  %v12470_v10 = vcombine.high %v1979_v61, %v1983_v14  ;;  %v1760_v34 = vld [vmem:[#allocation9 + $0xe78] sm:$0xff]  ;;  %v2023_v61 = vld [vmem:[#allocation9 + $0x16b0] sm:$0xff] }
 0x4ec   :  { %8551 = vmatpush1.bf16.msra.mxu1 %v12183_v16  ;;  %8302 = vmatprep.subr.bf16.mxu0 %v12430_v0  ;;  %v12232_v0 = vcombine.high %v1740_v9, %v1744_v55  ;;  %v1772_v17 = vld [vmem:[#allocation9 + $0xed8] sm:$0xff] }
 0x4ed   :  { %8552 = vmatprep.subr.bf16.mxu1 %v12192_v5  ;;  %v1987_v5 = vld [vmem:[#allocation9 + $0x1590] sm:$0xff]  ;;  %v1776_v31 = vld [vmem:[#allocation9 + $0xef8] sm:$0xff] }
 0x4ee   :  { %8294 = vmatmul.mubr.bf16.vlgmr.msra.gmra.mrb[28].mxu0 %v14947_v52  ;;  %v12477_v37 = vcombine.low %v1987_v5, %v1991_v12  ;;  %v1780_v14 = vld [vmem:[#allocation9 + $0xf18] sm:$0xff] }
 0x4ef   :  { %8303 = vmatpush1.bf16.msra.mxu0 %v12429_v40  ;;  %8334 = vmatprep.mubr.bf16.mxu0 %v14949_v35  ;;  %v12231_v40 = vcombine.low %v1740_v9, %v1744_v55  ;;  %v1784_v9 = vld [vmem:[#allocation9 + $0xf38] sm:$0xff] }
 0x4f0   :  { %8553 = vmatpush1.bf16.msra.mxu1 %v12191_v58  ;;  %8304 = vmatprep.subr.bf16.mxu0 %v12438_v47  ;;  %v12478_v58 = vcombine.high %v1987_v5, %v1991_v12  ;;  %v12240_v47 = vcombine.high %v1748_v24, %v1752_v7  ;;  %v1792_v5 = vld [vmem:[#allocation9 + $0xf78] sm:$0xff] }
 0x4f1   :  { %8554 = vmatprep.subr.bf16.mxu1 %v12200_v42  ;;  %v1995_v42 = vld [vmem:[#allocation9 + $0x15d0] sm:$0xff] }
 0x4f2   :  { %v12485_v33 = vcombine.low %v1995_v42, %v1999_v39 }
 0x4f3   :  { %8305 = vmatpush1.bf16.msra.mxu0 %v12437_v48  ;;  %v12239_v48 = vcombine.low %v1748_v24, %v1752_v7  ;;  %v12271_v24 = vcombine.low %v1780_v14, %v1784_v9 }
 0x4f4   :  { %8555 = vmatpush1.bf16.msra.mxu1 %v12199_v43  ;;  %8306 = vmatprep.subr.bf16.mxu0 %v12446_v59  ;;  %v12486_v43 = vcombine.high %v1995_v42, %v1999_v39  ;;  %v12248_v59 = vcombine.high %v1756_v21, %v1760_v34  ;;  %v1800_v42 = vld [vmem:[#allocation9 + $0xfb8] sm:$0xff] }
 0x4f5   :  { %8556 = vmatprep.subr.bf16.mxu1 %v12208_v36  ;;  %v2003_v36 = vld [vmem:[#allocation9 + $0x1610] sm:$0xff] }
 0x4f6   :  { %v12493_v53 = vcombine.low %v2003_v36, %v2007_v57 }
 0x4f7   :  { %8307 = vmatpush1.bf16.msra.mxu0 %v12445_v26  ;;  %v12247_v26 = vcombine.low %v1756_v21, %v1760_v34 }
 0x4f8   :  { %8557 = vmatpush1.bf16.msra.mxu1 %v12207_v29  ;;  %8308 = vmatprep.subr.bf16.mxu0 %v12454_v50  ;;  %v12494_v29 = vcombine.high %v2003_v36, %v2007_v57  ;;  %v12256_v50 = vcombine.high %v1764_v8, %v1768_v25  ;;  %v1808_v36 = vld [vmem:[#allocation9 + $0xff8] sm:$0xff] }
 0x4f9   :  { %8558 = vmatprep.subr.bf16.mxu1 %v12216_v18  ;;  %v2011_v18 = vld [vmem:[#allocation9 + $0x1650] sm:$0xff] }
 0x4fa   :  { %v15010_v56 = vpop.f32.mrb[12].mxu1  ;;  %v12501_v55 = vcombine.low %v2011_v18, %v2015_v28 }
 0x4fb   :  { %v15012_v44 = vpop.f32.mrb[13].mxu1  ;;  %8309 = vmatpush1.bf16.msra.mxu0 %v12453_v27  ;;  %v12255_v27 = vcombine.low %v1764_v8, %v1768_v25 }
 0x4fc   :  { %v8094_v1 = vpop.f32.mrb[14].mxu1  ;;  %8559 = vmatpush1.bf16.msra.mxu1 %v12215_v63  ;;  %8310 = vmatprep.subr.bf16.mxu0 %v12462_v4  ;;  %v12502_v63 = vcombine.high %v2011_v18, %v2015_v28  ;;  %v12264_v4 = vcombine.high %v1772_v17, %v1776_v31  ;;  %v1816_v18 = vld [vmem:[#allocation9 + $0x1038] sm:$0xff] }
 0x4fd   :  { %v8095_v16 = vpop.f32.mrb[15].mxu1  ;;  %8560 = vmatprep.subr.bf16.mxu1 %v12224_v15  ;;  %v2019_v15 = vld [vmem:[#allocation9 + $0x1690] sm:$0xff] }
 0x4fe   :  { %v12510_v1 = vcombine.high %v2019_v15, %v2023_v61  ;;  %v2031_v16 = vld [vmem:[#allocation9 + $0x16f0] sm:$0xff]  ;;  %v12509_v12 = vcombine.low %v2019_v15, %v2023_v61  ;;  %v1824_v15 = vld [vmem:[#allocation9 + $0x1078] sm:$0xff] }
 0x4ff   :  { %8311 = vmatpush1.bf16.msra.mxu0 %v12461_v19  ;;  %v12263_v19 = vcombine.low %v1772_v17, %v1776_v31 }
 0x500   :  { %8561 = vmatpush1.bf16.msra.mxu1 %v12223_v46  ;;  %8312 = vmatprep.subr.bf16.mxu0 %v12470_v10  ;;  %v12272_v46 = vcombine.high %v1780_v14, %v1784_v9  ;;  %v2027_v10 = vld [vmem:[#allocation9 + $0x16d0] sm:$0xff] }
 0x501   :  { %8562 = vmatprep.subr.bf16.mxu1 %v12232_v0  ;;  %v1788_v0 = vld [vmem:[#allocation9 + $0xf58] sm:$0xff]  ;;  %v12518_v7 = vcombine.high %v2027_v10, %v2031_v16  ;;  %v12517_v39 = vcombine.low %v2027_v10, %v2031_v16 }
 0x502   :  { %v12279_v21 = vcombine.low %v1788_v0, %v1792_v5  ;;  %v1832_v10 = vld [vmem:[#allocation9 + $0x10b8] sm:$0xff] }
 0x503   :  { %8313 = vmatpush1.bf16.msra.mxu0 %v12469_v2  ;;  %v12280_v2 = vcombine.high %v1788_v0, %v1792_v5 }
 0x504   :  { %8563 = vmatpush1.bf16.msra.mxu1 %v12231_v40  ;;  %8314 = vmatprep.subr.bf16.mxu0 %v12478_v58  ;;  %v2035_v40 = vld [vmem:[#allocation9 + $0x1710] sm:$0xff] }
 0x505   :  { %8564 = vmatprep.subr.bf16.mxu1 %v12240_v47  ;;  %v2039_v58 = vld [vmem:[#allocation9 + $0x1730] sm:$0xff]  ;;  %v1796_v47 = vld [vmem:[#allocation9 + $0xf98] sm:$0xff] }
 0x506   :  { %v12526_v34 = vcombine.high %v2035_v40, %v2039_v58  ;;  %v12525_v57 = vcombine.low %v2035_v40, %v2039_v58  ;;  %v12287_v8 = vcombine.low %v1796_v47, %v1800_v42  ;;  %v1840_v40 = vld [vmem:[#allocation9 + $0x10f8] sm:$0xff] }
 0x507   :  { %8315 = vmatpush1.bf16.msra.mxu0 %v12477_v37  ;;  %v12288_v37 = vcombine.high %v1796_v47, %v1800_v42 }
 0x508   :  { %8565 = vmatpush1.bf16.msra.mxu1 %v12239_v48  ;;  %8316 = vmatprep.subr.bf16.mxu0 %v12486_v43  ;;  %v2043_v48 = vld [vmem:[#allocation9 + $0x1750] sm:$0xff] }
 0x509   :  { %8566 = vmatprep.subr.bf16.mxu1 %v12248_v59  ;;  %v2047_v43 = vld [vmem:[#allocation9 + $0x1770] sm:$0xff]  ;;  %v1804_v59 = vld [vmem:[#allocation9 + $0xfd8] sm:$0xff] }
 0x50a   :  { %v12534_v25 = vcombine.high %v2043_v48, %v2047_v43  ;;  %v12533_v28 = vcombine.low %v2043_v48, %v2047_v43  ;;  %v12295_v17 = vcombine.low %v1804_v59, %v1808_v36 }
 0x50b   :  { %8317 = vmatpush1.bf16.msra.mxu0 %v12485_v33  ;;  %v12296_v33 = vcombine.high %v1804_v59, %v1808_v36  ;;  %v2091_v36 = vld [vmem:[#allocation9 + $0x18d0] sm:$0xff] }
 0x50c   :  { %8567 = vmatpush1.bf16.msra.mxu1 %v12247_v26  ;;  %8318 = vmatprep.subr.bf16.mxu0 %v12494_v29  ;;  %v2051_v26 = vld [vmem:[#allocation9 + $0x1790] sm:$0xff] }
 0x50d   :  { %8568 = vmatprep.subr.bf16.mxu1 %v12256_v50  ;;  %v2055_v29 = vld [vmem:[#allocation9 + $0x17b0] sm:$0xff]  ;;  %v1812_v50 = vld [vmem:[#allocation9 + $0x1018] sm:$0xff] }
 0x50e   :  { %v12542_v31 = vcombine.high %v2051_v26, %v2055_v29  ;;  %v12541_v61 = vcombine.low %v2051_v26, %v2055_v29  ;;  %v12303_v14 = vcombine.low %v1812_v50, %v1816_v18 }
 0x50f   :  { %8319 = vmatpush1.bf16.msra.mxu0 %v12493_v53  ;;  %v12304_v53 = vcombine.high %v1812_v50, %v1816_v18  ;;  %v2099_v18 = vld [vmem:[#allocation9 + $0x1910] sm:$0xff] }
 0x510   :  { %8569 = vmatpush1.bf16.msra.mxu1 %v12255_v27  ;;  %8320 = vmatprep.subr.bf16.mxu0 %v12502_v63  ;;  %v2059_v27 = vld [vmem:[#allocation9 + $0x17d0] sm:$0xff] }
 0x511   :  { %8570 = vmatprep.subr.bf16.mxu1 %v12264_v4  ;;  %v2063_v63 = vld [vmem:[#allocation9 + $0x17f0] sm:$0xff]  ;;  %v1820_v4 = vld [vmem:[#allocation9 + $0x1058] sm:$0xff] }
 0x512   :  { %v12550_v9 = vcombine.high %v2059_v27, %v2063_v63  ;;  %v12549_v16 = vcombine.low %v2059_v27, %v2063_v63  ;;  %v12311_v0 = vcombine.low %v1820_v4, %v1824_v15 }
 0x513   :  { %8321 = vmatpush1.bf16.msra.mxu0 %v12501_v55  ;;  %v12312_v55 = vcombine.high %v1820_v4, %v1824_v15  ;;  %v2107_v15 = vld [vmem:[#allocation9 + $0x1950] sm:$0xff] }
 0x514   :  { %8571 = vmatpush1.bf16.msra.mxu1 %v12263_v19  ;;  %8322 = vmatprep.subr.bf16.mxu0 %v12510_v1  ;;  %v2067_v19 = vld [vmem:[#allocation9 + $0x1810] sm:$0xff] }
 0x515   :  { %8572 = vmatprep.subr.bf16.mxu1 %v12272_v46  ;;  %v2071_v1 = vld [vmem:[#allocation9 + $0x1830] sm:$0xff]  ;;  %v1828_v46 = vld [vmem:[#allocation9 + $0x1098] sm:$0xff] }
 0x516   :  { %v12558_v5 = vcombine.high %v2067_v19, %v2071_v1  ;;  %v12557_v58 = vcombine.low %v2067_v19, %v2071_v1  ;;  %v12319_v47 = vcombine.low %v1828_v46, %v1832_v10 }
 0x517   :  { %8323 = vmatpush1.bf16.msra.mxu0 %v12509_v12  ;;  %v12320_v12 = vcombine.high %v1828_v46, %v1832_v10  ;;  %v2115_v10 = vld [vmem:[#allocation9 + $0x1990] sm:$0xff] }
 0x518   :  { %8573 = vmatpush1.bf16.msra.mxu1 %v12271_v24  ;;  %8324 = vmatprep.subr.bf16.mxu0 %v12518_v7  ;;  %v2075_v24 = vld [vmem:[#allocation9 + $0x1850] sm:$0xff] }
 0x519   :  { %8574 = vmatprep.subr.bf16.mxu1 %v12280_v2  ;;  %v2079_v7 = vld [vmem:[#allocation9 + $0x1870] sm:$0xff]  ;;  %v1836_v2 = vld [vmem:[#allocation9 + $0x10d8] sm:$0xff] }
 0x51a   :  { %v12328_v42 = vcombine.high %v1836_v2, %v1840_v40  ;;  %v12327_v48 = vcombine.low %v1836_v2, %v1840_v40  ;;  %v2123_v40 = vld [vmem:[#allocation9 + $0x19d0] sm:$0xff] }
 0x51b   :  { %8325 = vmatpush1.bf16.msra.mxu0 %v12517_v39  ;;  %v2083_v39 = vld [vmem:[#allocation9 + $0x1890] sm:$0xff] }
 0x51c   :  { %8575 = vmatpush1.bf16.msra.mxu1 %v12279_v21  ;;  %8326 = vmatprep.subr.bf16.mxu0 %v12526_v34  ;;  %v2087_v21 = vld [vmem:[#allocation9 + $0x18b0] sm:$0xff]  ;;  %v1848_v34 = vld [vmem:[#allocation9 + $0x1138] sm:$0xff] }
 0x51d   :  { %8576 = vmatprep.subr.bf16.mxu1 %v12288_v37  ;;  %v12565_v37 = vcombine.low %v2075_v24, %v2079_v7  ;;  %v12574_v43 = vcombine.high %v2083_v39, %v2087_v21 }
 0x51f   :  { %8327 = vmatpush1.bf16.msra.mxu0 %v12525_v57  ;;  %v2095_v57 = vld [vmem:[#allocation9 + $0x18f0] sm:$0xff] }
 0x520   :  { %8577 = vmatpush1.bf16.msra.mxu1 %v12287_v8  ;;  %8328 = vmatprep.subr.bf16.mxu0 %v12534_v25  ;;  %v1852_v8 = vld [vmem:[#allocation9 + $0x1158] sm:$0xff]  ;;  %v12582_v29 = vcombine.high %v2091_v36, %v2095_v57 }
 0x521   :  { %8578 = vmatprep.subr.bf16.mxu1 %v12296_v33  ;;  %v1856_v25 = vld [vmem:[#allocation9 + $0x1178] sm:$0xff]  ;;  %v12573_v33 = vcombine.low %v2083_v39, %v2087_v21 }
 0x522   :  { %v12344_v50 = vcombine.high %v1852_v8, %v1856_v25  ;;  %v12343_v27 = vcombine.low %v1852_v8, %v1856_v25  ;;  %v2139_v25 = vld [vmem:[#allocation9 + $0x1a50] sm:$0xff] }
 0x523   :  { %8329 = vmatpush1.bf16.msra.mxu0 %v12533_v28  ;;  %v2103_v28 = vld [vmem:[#allocation9 + $0x1930] sm:$0xff] }
 0x524   :  { %8579 = vmatpush1.bf16.msra.mxu1 %v12295_v17  ;;  %8330 = vmatprep.subr.bf16.mxu0 %v12542_v31  ;;  %v1860_v17 = vld [vmem:[#allocation9 + $0x1198] sm:$0xff]  ;;  %v12590_v63 = vcombine.high %v2099_v18, %v2103_v28 }
 0x525   :  { %8589 = vmatprep.subr.bf16.mxu1 %v12304_v53  ;;  %v1864_v31 = vld [vmem:[#allocation9 + $0x11b8] sm:$0xff]  ;;  %v12581_v53 = vcombine.low %v2091_v36, %v2095_v57 }
 0x526   :  { %v12352_v4 = vcombine.high %v1860_v17, %v1864_v31  ;;  %v12351_v19 = vcombine.low %v1860_v17, %v1864_v31 }
 0x527   :  { %8581 = vmatmul.mubr.bf16.vlgmr.msra.gmra.mrb[16].mxu1 %v14931_v22  ;;  %8331 = vmatpush1.bf16.msra.mxu0 %v12541_v61  ;;  %v12566_v22 = vcombine.high %v2075_v24, %v2079_v7  ;;  %v2111_v61 = vld [vmem:[#allocation9 + $0x1970] sm:$0xff] }
 0x528   :  { %8590 = vmatpush1.bf16.msra.mxu1 %v12303_v14  ;;  %8621 = vmatprep.mubr.bf16.mxu1 %v14935_v49  ;;  %v1844_v49 = vld [vmem:[#allocation9 + $0x1118] sm:$0xff]  ;;  %v12598_v1 = vcombine.high %v2107_v15, %v2111_v61 }
 0x529   :  { %8332 = vmatprep.subr.bf16.mxu0 %v12550_v9  ;;  %8591 = vmatprep.subr.bf16.mxu1 %v12312_v55  ;;  %v12336_v59 = vcombine.high %v1844_v49, %v1848_v34  ;;  %v12335_v26 = vcombine.low %v1844_v49, %v1848_v34  ;;  %v1868_v14 = vld [vmem:[#allocation9 + $0x11d8] sm:$0xff]  ;;  %v12589_v55 = vcombine.low %v2099_v18, %v2103_v28  ;;  %v2131_v34 = vld [vmem:[#allocation9 + $0x1a10] sm:$0xff]  ;;  %v8759_v18 = vrot.slane %v15000_v60, 4 }
 0x52a   :  { %v1872_v9 = vld [vmem:[#allocation9 + $0x11f8] sm:$0xff] }
 0x52b   :  { %8333 = vmatpush1.bf16.msra.mxu0 %v12549_v16  ;;  %v12360_v46 = vcombine.high %v1868_v14, %v1872_v9  ;;  %v2119_v16 = vld [vmem:[#allocation9 + $0x19b0] sm:$0xff]  ;;  %v12359_v24 = vcombine.low %v1868_v14, %v1872_v9 }
 0x52c   :  { %8592 = vmatpush1.bf16.msra.mxu1 %v12311_v0  ;;  %8343 = vmatprep.subr.bf16.mxu0 %v12558_v5  ;;  %v1876_v0 = vld [vmem:[#allocation9 + $0x1218] sm:$0xff]  ;;  %v12606_v7 = vcombine.high %v2115_v10, %v2119_v16 }
 0x52d   :  { %8593 = vmatprep.subr.bf16.mxu1 %v12320_v12  ;;  %v1880_v5 = vld [vmem:[#allocation9 + $0x1238] sm:$0xff]  ;;  %v12597_v12 = vcombine.low %v2107_v15, %v2111_v61  ;;  %v8760_v61 = vadd.f32 %v15000_v60, %v8759_v18 }
 0x52e   :  { %8335 = vmatmul.mubr.bf16.vlgmr.msra.gmra.mrb[28].mxu0 %v14961_v23  ;;  %v12368_v2 = vcombine.high %v1876_v0, %v1880_v5  ;;  %v12367_v39 = vcombine.low %v1876_v0, %v1880_v5 }
 0x52f   :  { %8344 = vmatpush1.bf16.msra.mxu0 %v12557_v58  ;;  %8375 = vmatprep.mubr.bf16.mxu0 %v14963_v54  ;;  %v2127_v58 = vld [vmem:[#allocation9 + $0x19f0] sm:$0xff]  ;;  %v8761_v0 = vrot.slane %v8760_v61, 2 }
 0x530   :  { %8594 = vmatpush1.bf16.msra.mxu1 %v12319_v47  ;;  %8345 = vmatprep.subr.bf16.mxu0 %v12566_v22  ;;  %v1884_v47 = vld [vmem:[#allocation9 + $0x1258] sm:$0xff]  ;;  %v12614_v21 = vcombine.high %v2123_v40, %v2127_v58 }
 0x531   :  { %8595 = vmatprep.subr.bf16.mxu1 %v12328_v42  ;;  %v1888_v22 = vld [vmem:[#allocation9 + $0x1278] sm:$0xff]  ;;  %v12605_v42 = vcombine.low %v2115_v10, %v2119_v16 }
 0x532   :  { %v12376_v49 = vcombine.high %v1884_v47, %v1888_v22  ;;  %v12375_v36 = vcombine.low %v1884_v47, %v1888_v22  ;;  %v1920_v10 = vld [vmem:[#allocation9 + $0x1378] sm:$0xff]  ;;  %v8762_v22 = vadd.f32 %v8761_v0, %v8760_v61 }
 0x533   :  { %8346 = vmatpush1.bf16.msra.mxu0 %v12565_v37  ;;  %v2135_v37 = vld [vmem:[#allocation9 + $0x1a30] sm:$0xff] }
 0x534   :  { %8596 = vmatpush1.bf16.msra.mxu1 %v12327_v48  ;;  %8347 = vmatprep.subr.bf16.mxu0 %v12574_v43  ;;  %v1892_v48 = vld [vmem:[#allocation9 + $0x1298] sm:$0xff]  ;;  %v12622_v57 = vcombine.high %v2131_v34, %v2135_v37 }
 0x535   :  { %8597 = vmatprep.subr.bf16.mxu1 %v12336_v59  ;;  %v1896_v43 = vld [vmem:[#allocation9 + $0x12b8] sm:$0xff]  ;;  %v12613_v59 = vcombine.low %v2123_v40, %v2127_v58 }
 0x536   :  { %v12384_v8 = vcombine.high %v1892_v48, %v1896_v43  ;;  %v12383_v28 = vcombine.low %v1892_v48, %v1896_v43  ;;  %v1924_v40 = vld [vmem:[#allocation9 + $0x1398] sm:$0xff] }
 0x537   :  { %8348 = vmatpush1.bf16.msra.mxu0 %v12573_v33  ;;  %v2143_v33 = vld [vmem:[#allocation9 + $0x1a70] sm:$0xff]  ;;  %v1928_v58 = vld [vmem:[#allocation9 + $0x13b8] sm:$0xff] }
 0x538   :  { %8598 = vmatpush1.bf16.msra.mxu1 %v12335_v26  ;;  %8349 = vmatprep.subr.bf16.mxu0 %v12582_v29  ;;  %v1900_v26 = vld [vmem:[#allocation9 + $0x12d8] sm:$0xff]  ;;  %v12630_v17 = vcombine.high %v2139_v25, %v2143_v33  ;;  %v12629_v15 = vcombine.low %v2139_v25, %v2143_v33  ;;  %v2179_v25 = vld [vmem:[#allocation9 + $0x1b90] sm:$0xff] }
 0x539   :  { %8599 = vmatprep.subr.bf16.mxu1 %v12344_v50  ;;  %v1904_v29 = vld [vmem:[#allocation9 + $0x12f8] sm:$0xff]  ;;  %v12621_v50 = vcombine.low %v2131_v34, %v2135_v37  ;;  %v2175_v34 = vld [vmem:[#allocation9 + $0x1b70] sm:$0xff] }
 0x53a   :  { %v12392_v31 = vcombine.high %v1900_v26, %v1904_v29  ;;  %v12391_v14 = vcombine.low %v1900_v26, %v1904_v29  ;;  %v1932_v37 = vld [vmem:[#allocation9 + $0x13d8] sm:$0xff]  ;;  %v2183_v33 = vld [vmem:[#allocation9 + $0x1bb0] sm:$0xff] }
 0x53b   :  { %8350 = vmatpush1.bf16.msra.mxu0 %v12581_v53  ;;  %v2147_v53 = vld [vmem:[#allocation9 + $0x1a90] sm:$0xff]  ;;  %v1936_v48 = vld [vmem:[#allocation9 + $0x13f8] sm:$0xff] }
 0x53c   :  { %8600 = vmatpush1.bf16.msra.mxu1 %v12343_v27  ;;  %8351 = vmatprep.subr.bf16.mxu0 %v12590_v63  ;;  %v2151_v27 = vld [vmem:[#allocation9 + $0x1ab0] sm:$0xff]  ;;  %v1908_v63 = vld [vmem:[#allocation9 + $0x1318] sm:$0xff] }
 0x53d   :  { %8601 = vmatprep.subr.bf16.mxu1 %v12352_v4  ;;  %v1912_v4 = vld [vmem:[#allocation9 + $0x1338] sm:$0xff]  ;;  %v12638_v9 = vcombine.high %v2147_v53, %v2151_v27  ;;  %v12637_v16 = vcombine.low %v2147_v53, %v2151_v27  ;;  %v2187_v53 = vld [vmem:[#allocation9 + $0x1bd0] sm:$0xff] }
 0x53e   :  { %v12399_v5 = vcombine.low %v1908_v63, %v1912_v4  ;;  %v1940_v26 = vld [vmem:[#allocation9 + $0x1418] sm:$0xff]  ;;  %v2191_v27 = vld [vmem:[#allocation9 + $0x1bf0] sm:$0xff] }
 0x53f   :  { %8352 = vmatpush1.bf16.msra.mxu0 %v12589_v55  ;;  %v12400_v55 = vcombine.high %v1908_v63, %v1912_v4  ;;  %v1944_v29 = vld [vmem:[#allocation9 + $0x1438] sm:$0xff] }
 0x540   :  { %8602 = vmatpush1.bf16.msra.mxu1 %v12351_v19  ;;  %8353 = vmatprep.subr.bf16.mxu0 %v12598_v1  ;;  %v2155_v19 = vld [vmem:[#allocation9 + $0x1ad0] sm:$0xff]  ;;  %v1948_v63 = vld [vmem:[#allocation9 + $0x1458] sm:$0xff] }
 0x541   :  { %8603 = vmatprep.subr.bf16.mxu1 %v12360_v46  ;;  %v2159_v1 = vld [vmem:[#allocation9 + $0x1af0] sm:$0xff]  ;;  %v1916_v46 = vld [vmem:[#allocation9 + $0x1358] sm:$0xff] }
 0x542   :  { %v12645_v47 = vcombine.low %v2155_v19, %v2159_v1  ;;  %v1952_v4 = vld [vmem:[#allocation9 + $0x1478] sm:$0xff] }
 0x543   :  { %8354 = vmatpush1.bf16.msra.mxu0 %v12597_v12  ;;  %v12646_v12 = vcombine.high %v2155_v19, %v2159_v1  ;;  %v2195_v19 = vld [vmem:[#allocation9 + $0x1c10] sm:$0xff] }
 0x544   :  { %8604 = vmatpush1.bf16.msra.mxu1 %v12359_v24  ;;  %8355 = vmatprep.subr.bf16.mxu0 %v12606_v7  ;;  %v12408_v24 = vcombine.high %v1916_v46, %v1920_v10  ;;  %v2163_v7 = vld [vmem:[#allocation9 + $0x1b10] sm:$0xff] }
 0x545   :  { %8605 = vmatprep.subr.bf16.mxu1 %v12368_v2  ;;  %v2167_v2 = vld [vmem:[#allocation9 + $0x1b30] sm:$0xff] }
 0x546   :  { %v12653_v43 = vcombine.low %v2163_v7, %v2167_v2  ;;  %v2199_v1 = vld [vmem:[#allocation9 + $0x1c30] sm:$0xff] }
 0x547   :  { %8356 = vmatpush1.bf16.msra.mxu0 %v12605_v42  ;;  %v12407_v42 = vcombine.low %v1916_v46, %v1920_v10  ;;  %v1956_v46 = vld [vmem:[#allocation9 + $0x1498] sm:$0xff] }
 0x548   :  { %8606 = vmatpush1.bf16.msra.mxu1 %v12367_v39  ;;  %8357 = vmatprep.subr.bf16.mxu0 %v12614_v21  ;;  %v12654_v39 = vcombine.high %v2163_v7, %v2167_v2  ;;  %v12416_v21 = vcombine.high %v1924_v40, %v1928_v58  ;;  %v1960_v10 = vld [vmem:[#allocation9 + $0x14b8] sm:$0xff]  ;;  %v2203_v7 = vld [vmem:[#allocation9 + $0x1c50] sm:$0xff] }
 0x549   :  { %8607 = vmatprep.subr.bf16.mxu1 %v12376_v49  ;;  %v2171_v49 = vld [vmem:[#allocation9 + $0x1b50] sm:$0xff] }
 0x54a   :  { %v2207_v2 = vld [vmem:[#allocation9 + $0x1c70] sm:$0xff] }
 0x54b   :  { %8358 = vmatpush1.bf16.msra.mxu0 %v12613_v59  ;;  %v8763_v59 = vrot.slane %v8762_v22, 1 }
 0x54c   :  { %8608 = vmatpush1.bf16.msra.mxu1 %v12375_v36  ;;  %8359 = vmatprep.subr.bf16.mxu0 %v12622_v57  ;;  %v12415_v36 = vcombine.low %v1924_v40, %v1928_v58  ;;  %v12662_v57 = vcombine.high %v2171_v49, %v2175_v34  ;;  %v1964_v40 = vld [vmem:[#allocation9 + $0x14d8] sm:$0xff] }
 0x54d   :  { %8609 = vmatprep.subr.bf16.mxu1 %v12384_v8  ;;  %v12424_v8 = vcombine.high %v1932_v37, %v1936_v48  ;;  %v8764_v18 = vadd.f32 %v8763_v59, %v8762_v22  ;;  %v1968_v58 = vld [vmem:[#allocation9 + $0x14f8] sm:$0xff]  ;;  %v12694_v22 = vcombine.high %v2203_v7, %v2207_v2 }
 0x54f   :  { %8360 = vmatpush1.bf16.msra.mxu0 %v12621_v50  ;;  %v12661_v50 = vcombine.low %v2171_v49, %v2175_v34  ;;  %v8802_v61 = vmul.f32 0.125, %v8764_v18  ;;  %v1976_v49 = vld [vmem:[#allocation9 + $0x1538] sm:$0xff]  ;;  %v12693_v34 = vcombine.low %v2203_v7, %v2207_v2 }
 0x550   :  { %8610 = vmatpush1.bf16.msra.mxu1 %v12383_v28  ;;  %8361 = vmatprep.subr.bf16.mxu0 %v12630_v17  ;;  %v12423_v28 = vcombine.low %v1932_v37, %v1936_v48  ;;  %v12670_v17 = vcombine.high %v2179_v25, %v2183_v33  ;;  %v12455_v48 = vcombine.low %v1964_v40, %v1968_v58  ;;  %v2004_v7 = vld [vmem:[#allocation9 + $0x1618] sm:$0xff] }
 0x551   :  { %8611 = vmatprep.subr.bf16.mxu1 %v12392_v31  ;;  %v12432_v31 = vcombine.high %v1940_v26, %v1944_v29  ;;  %v15022_v0 = vsub.f32 %v15000_v60, %v8802_v61  ;;  %v12447_v60 = vcombine.low %v1956_v46, %v1960_v10  ;;  %v2008_v2 = vld [vmem:[#allocation9 + $0x1638] sm:$0xff] }
 0x553   :  { %8362 = vmatpush1.bf16.msra.mxu0 %v12629_v15  ;;  %v12669_v15 = vcombine.low %v2179_v25, %v2183_v33  ;;  %v1984_v25 = vld [vmem:[#allocation9 + $0x1578] sm:$0xff] }
 0x554   :  { %8612 = vmatpush1.bf16.msra.mxu1 %v12391_v14  ;;  %8363 = vmatprep.subr.bf16.mxu0 %v12638_v9  ;;  %v12431_v14 = vcombine.low %v1940_v26, %v1944_v29  ;;  %v12678_v9 = vcombine.high %v2187_v53, %v2191_v27 }
 0x555   :  { %8613 = vmatprep.subr.bf16.mxu1 %v12400_v55  ;;  %v12440_v55 = vcombine.high %v1948_v63, %v1952_v4 }
 0x557   :  { %8364 = vmatpush1.bf16.msra.mxu0 %v12637_v16  ;;  %v12677_v16 = vcombine.low %v2187_v53, %v2191_v27  ;;  %v1992_v53 = vld [vmem:[#allocation9 + $0x15b8] sm:$0xff] }
 0x558   :  { %8614 = vmatpush1.bf16.msra.mxu1 %v12399_v5  ;;  %8365 = vmatprep.subr.bf16.mxu0 %v12646_v12  ;;  %v12439_v5 = vcombine.low %v1948_v63, %v1952_v4  ;;  %v12686_v12 = vcombine.high %v2195_v19, %v2199_v1 }
 0x559   :  { %8615 = vmatprep.subr.bf16.mxu1 %v12408_v24  ;;  %v12448_v24 = vcombine.high %v1956_v46, %v1960_v10 }
 0x55b   :  { %8366 = vmatpush1.bf16.msra.mxu0 %v12645_v47  ;;  %v12685_v47 = vcombine.low %v2195_v19, %v2199_v1  ;;  %v2000_v19 = vld [vmem:[#allocation9 + $0x15f8] sm:$0xff] }
 0x55c   :  { %8616 = vmatpush1.bf16.msra.mxu1 %v12407_v42  ;;  %8367 = vmatprep.subr.bf16.mxu0 %v12654_v39  ;;  %v2211_v42 = vld [vmem:[#allocation9 + $0x1c90] sm:$0xff] }
 0x55d   :  { %8617 = vmatprep.subr.bf16.mxu1 %v12416_v21  ;;  %v2215_v39 = vld [vmem:[#allocation9 + $0x1cb0] sm:$0xff]  ;;  %v1972_v21 = vld [vmem:[#allocation9 + $0x1518] sm:$0xff] }
 0x55e   :  { %v12464_v59 = vcombine.high %v1972_v21, %v1976_v49  ;;  %v12701_v33 = vcombine.low %v2211_v42, %v2215_v39  ;;  %v12463_v29 = vcombine.low %v1972_v21, %v1976_v49 }
 0x55f   :  { %8368 = vmatpush1.bf16.msra.mxu0 %v12653_v43  ;;  %v12702_v43 = vcombine.high %v2211_v42, %v2215_v39  ;;  %v2012_v42 = vld [vmem:[#allocation9 + $0x1658] sm:$0xff] }
 0x560   :  { %8618 = vmatpush1.bf16.msra.mxu1 %v12415_v36  ;;  %8369 = vmatprep.subr.bf16.mxu0 %v12662_v57  ;;  %v2219_v36 = vld [vmem:[#allocation9 + $0x1cd0] sm:$0xff]  ;;  %v2016_v39 = vld [vmem:[#allocation9 + $0x1678] sm:$0xff] }
 0x561   :  { %8619 = vmatprep.subr.bf16.mxu1 %v12424_v8  ;;  %v2223_v57 = vld [vmem:[#allocation9 + $0x1cf0] sm:$0xff]  ;;  %v1980_v8 = vld [vmem:[#allocation9 + $0x1558] sm:$0xff] }
 0x562   :  { %v12472_v18 = vcombine.high %v1980_v8, %v1984_v25  ;;  %v12709_v27 = vcombine.low %v2219_v36, %v2223_v57  ;;  %v12471_v4 = vcombine.low %v1980_v8, %v1984_v25 }
 0x563   :  { %8370 = vmatpush1.bf16.msra.mxu0 %v12661_v50  ;;  %v12710_v50 = vcombine.high %v2219_v36, %v2223_v57  ;;  %v2020_v36 = vld [vmem:[#allocation9 + $0x1698] sm:$0xff] }
 0x564   :  { %8620 = vmatpush1.bf16.msra.mxu1 %v12423_v28  ;;  %8371 = vmatprep.subr.bf16.mxu0 %v12670_v17  ;;  %v2227_v28 = vld [vmem:[#allocation9 + $0x1d10] sm:$0xff]  ;;  %v2024_v57 = vld [vmem:[#allocation9 + $0x16b8] sm:$0xff] }
 0x565   :  { %8630 = vmatprep.subr.bf16.mxu1 %v12432_v31  ;;  %v2231_v17 = vld [vmem:[#allocation9 + $0x1d30] sm:$0xff]  ;;  %v1988_v31 = vld [vmem:[#allocation9 + $0x1598] sm:$0xff] }
 0x566   :  { %v12480_v61 = vcombine.high %v1988_v31, %v1992_v53  ;;  %v12717_v1 = vcombine.low %v2227_v28, %v2231_v17  ;;  %v12479_v10 = vcombine.low %v1988_v31, %v1992_v53  ;;  %v8753_v31 = vrot.slane %v14997_v51, 4 }
 0x567   :  { %8622 = vmatmul.mubr.bf16.vlgmr.msra.gmra.mrb[16].mxu1 %v14947_v52  ;;  %8372 = vmatpush1.bf16.msra.mxu0 %v12669_v15  ;;  %v8818_v52 = vmul.f32 %v15022_v0, %v15022_v0  ;;  %v12718_v15 = vcombine.high %v2227_v28, %v2231_v17  ;;  %v2028_v28 = vld [vmem:[#allocation9 + $0x16d8] sm:$0xff] }
 0x568   :  { %8631 = vmatpush1.bf16.msra.mxu1 %v12431_v14  ;;  %8662 = vmatprep.mubr.bf16.mxu1 %v14949_v35  ;;  %v12456_v35 = vcombine.high %v1964_v40, %v1968_v58  ;;  %v2235_v14 = vld [vmem:[#allocation9 + $0x1d50] sm:$0xff]  ;;  %v2032_v17 = vld [vmem:[#allocation9 + $0x16f8] sm:$0xff] }
 0x569   :  { %8373 = vmatprep.subr.bf16.mxu0 %v12678_v9  ;;  %8632 = vmatprep.subr.bf16.mxu1 %v12440_v55  ;;  %v8831_v37 = vrot.slane %v8818_v52, 4  ;;  %v2239_v9 = vld [vmem:[#allocation9 + $0x1d70] sm:$0xff]  ;;  %v1996_v55 = vld [vmem:[#allocation9 + $0x15d8] sm:$0xff] }
 0x56a   :  { %v12725_v40 = vcombine.low %v2235_v14, %v2239_v9 }
 0x56b   :  { %8374 = vmatpush1.bf16.msra.mxu0 %v12677_v16  ;;  %v8832_v26 = vadd.f32 %v8831_v37, %v8818_v52  ;;  %v12726_v16 = vcombine.high %v2235_v14, %v2239_v9  ;;  %v2275_v14 = vld [vmem:[#allocation9 + $0x1e90] sm:$0xff] }
 0x56c   :  { %8633 = vmatpush1.bf16.msra.mxu1 %v12439_v5  ;;  %8384 = vmatprep.subr.bf16.mxu0 %v12686_v12  ;;  %v12488_v5 = vcombine.high %v1996_v55, %v2000_v19  ;;  %v2243_v12 = vld [vmem:[#allocation9 + $0x1d90] sm:$0xff] }
 0x56d   :  { %8634 = vmatprep.subr.bf16.mxu1 %v12448_v24  ;;  %v8833_v63 = vrot.slane %v8832_v26, 2  ;;  %v2247_v24 = vld [vmem:[#allocation9 + $0x1db0] sm:$0xff] }
 0x56e   :  { %8376 = vmatmul.mubr.bf16.vlgmr.msra.gmra.mrb[28].mxu0 %v14971_v30  ;;  %v12734_v52 = vcombine.high %v2243_v12, %v2247_v24  ;;  %v12733_v21 = vcombine.low %v2243_v12, %v2247_v24  ;;  %v2279_v9 = vld [vmem:[#allocation9 + $0x1eb0] sm:$0xff] }
 0x56f   :  { %8385 = vmatpush1.bf16.msra.mxu0 %v12685_v47  ;;  %8416 = vmatprep.mubr.bf16.mxu0 %v14973_v41  ;;  %v8834_v46 = vadd.f32 %v8833_v63, %v8832_v26  ;;  %v12487_v47 = vcombine.low %v1996_v55, %v2000_v19  ;;  %v8771_v63 = vrot.slane %v15012_v44, 4  ;;  %v2036_v55 = vld [vmem:[#allocation9 + $0x1718] sm:$0xff]  ;;  %v2283_v24 = vld [vmem:[#allocation9 + $0x1ed0] sm:$0xff] }
 0x570   :  { %8635 = vmatpush1.bf16.msra.mxu1 %v12447_v60  ;;  %8386 = vmatprep.subr.bf16.mxu0 %v12694_v22  ;;  %v12496_v60 = vcombine.high %v2004_v7, %v2008_v2  ;;  %v2251_v22 = vld [vmem:[#allocation9 + $0x1dd0] sm:$0xff]  ;;  %v2040_v19 = vld [vmem:[#allocation9 + $0x1738] sm:$0xff] }
 0x571   :  { %8636 = vmatprep.subr.bf16.mxu1 %v12456_v35  ;;  %v8835_v58 = vrot.slane %v8834_v46, 1  ;;  %v2255_v35 = vld [vmem:[#allocation9 + $0x1df0] sm:$0xff]  ;;  %v12528_v12 = vcombine.high %v2036_v55, %v2040_v19 }
 0x572   :  { %v12742_v37 = vcombine.high %v2251_v22, %v2255_v35  ;;  %v12741_v8 = vcombine.low %v2251_v22, %v2255_v35 }
 0x573   :  { %8387 = vmatpush1.bf16.msra.mxu0 %v12693_v34  ;;  %v8836_v49 = vadd.f32 %v8835_v58, %v8834_v46  ;;  %v12495_v34 = vcombine.low %v2004_v7, %v2008_v2  ;;  %v2287_v7 = vld [vmem:[#allocation9 + $0x1ef0] sm:$0xff]  ;;  %v2044_v2 = vld [vmem:[#allocation9 + $0x1758] sm:$0xff] }
 0x574   :  { %8637 = vmatpush1.bf16.msra.mxu1 %v12455_v48  ;;  %8388 = vmatprep.subr.bf16.mxu0 %v12702_v43  ;;  %v12504_v48 = vcombine.high %v2012_v42, %v2016_v39  ;;  %v2259_v43 = vld [vmem:[#allocation9 + $0x1e10] sm:$0xff]  ;;  %v12774_v22 = vcombine.high %v2283_v24, %v2287_v7 }
 0x575   :  { %8638 = vmatprep.subr.bf16.mxu1 %v12464_v59  ;;  %v2263_v59 = vld [vmem:[#allocation9 + $0x1e30] sm:$0xff]  ;;  %v8874_v25 = vmul.f32 0.125, %v8836_v49  ;;  %v2056_v49 = vld [vmem:[#allocation9 + $0x17b8] sm:$0xff] }
 0x576   :  { %v12750_v26 = vcombine.high %v2259_v43, %v2263_v59  ;;  %v12749_v53 = vcombine.low %v2259_v43, %v2263_v59 }
 0x577   :  { %8389 = vmatpush1.bf16.msra.mxu0 %v12701_v33  ;;  %v12503_v33 = vcombine.low %v2012_v42, %v2016_v39  ;;  %v2291_v42 = vld [vmem:[#allocation9 + $0x1f10] sm:$0xff] }
 0x578   :  { %8639 = vmatpush1.bf16.msra.mxu1 %v12463_v29  ;;  %8390 = vmatprep.subr.bf16.mxu0 %v12710_v50  ;;  %v12512_v29 = vcombine.high %v2020_v36, %v2024_v57  ;;  %v2267_v50 = vld [vmem:[#allocation9 + $0x1e50] sm:$0xff] }
 0x579   :  { %8640 = vmatprep.subr.bf16.mxu1 %v12472_v18  ;;  %v2271_v18 = vld [vmem:[#allocation9 + $0x1e70] sm:$0xff] }
 0x57a   :  { %v12757_v46 = vcombine.low %v2267_v50, %v2271_v18  ;;  %v2295_v39 = vld [vmem:[#allocation9 + $0x1f30] sm:$0xff] }
 0x57b   :  { %8391 = vmatpush1.bf16.msra.mxu0 %v12709_v27  ;;  %v8882_v27 = vadd.f32 1e-05, %v8874_v25  ;;  %v12782_v59 = vcombine.high %v2291_v42, %v2295_v39 }
 0x57c   :  { %8641 = vmatpush1.bf16.msra.mxu1 %v12471_v4  ;;  %8392 = vmatprep.subr.bf16.mxu0 %v12718_v15  ;;  %v12511_v4 = vcombine.low %v2020_v36, %v2024_v57  ;;  %v12758_v15 = vcombine.high %v2267_v50, %v2271_v18  ;;  %v2299_v57 = vld [vmem:[#allocation9 + $0x1f50] sm:$0xff]  ;;  %v12781_v18 = vcombine.low %v2291_v42, %v2295_v39  ;;  %v2084_v42 = vld [vmem:[#allocation9 + $0x1898] sm:$0xff] }
 0x57d   :  { %8642 = vmatprep.subr.bf16.mxu1 %v12480_v61  ;;  %v12520_v61 = vcombine.high %v2028_v28, %v2032_v17  ;;  %13859 = vrsqrt.f32 %v8882_v27  ;;  %v2088_v39 = vld [vmem:[#allocation9 + $0x18b8] sm:$0xff] }
 0x57f   :  { %8393 = vmatpush1.bf16.msra.mxu0 %v12717_v1  ;;  %v8754_v1 = vadd.f32 %v14997_v51, %v8753_v31 }
 0x580   :  { %8643 = vmatpush1.bf16.msra.mxu1 %v12479_v10  ;;  %8394 = vmatprep.subr.bf16.mxu0 %v12726_v16  ;;  %v8772_v10 = vadd.f32 %v8771_v63, %v15012_v44  ;;  %v12519_v16 = vcombine.low %v2028_v28, %v2032_v17  ;;  %v2307_v63 = vld [vmem:[#allocation9 + $0x1f90] sm:$0xff] }
 0x581   :  { %8644 = vmatprep.subr.bf16.mxu1 %v12488_v5  ;;  %v12766_v5 = vcombine.high %v2275_v14, %v2279_v9  ;;  %v8755_v58 = vrot.slane %v8754_v1, 2 }
 0x583   :  { %8395 = vmatpush1.bf16.msra.mxu0 %v12725_v40  ;;  %v2048_v40 = vld [vmem:[#allocation9 + $0x1778] sm:$0xff] }
 0x584   :  { %8645 = vmatpush1.bf16.msra.mxu1 %v12487_v47  ;;  %8396 = vmatprep.subr.bf16.mxu0 %v12734_v52  ;;  %v12765_v47 = vcombine.low %v2275_v14, %v2279_v9  ;;  %v8773_v52 = vrot.slane %v8772_v10, 2  ;;  %v12536_v35 = vcombine.high %v2044_v2, %v2048_v40  ;;  %v12535_v43 = vcombine.low %v2044_v2, %v2048_v40  ;;  %v2072_v14 = vld [vmem:[#allocation9 + $0x1838] sm:$0xff]  ;;  %v15038_v9 = vld [vmem:[#allocation12] sm:$0xff] }
 0x585   :  { %8646 = vmatprep.subr.bf16.mxu1 %v12496_v60  ;;  %v12527_v60 = vcombine.low %v2036_v55, %v2040_v19  ;;  %v2080_v2 = vld [vmem:[#allocation9 + $0x1878] sm:$0xff] }
 0x587   :  { %8397 = vmatpush1.bf16.msra.mxu0 %v12733_v21  ;;  %v2052_v21 = vld [vmem:[#allocation9 + $0x1798] sm:$0xff]  ;;  %v13860_v25 = vpop.eup %13859 }
 0x588   :  { %8647 = vmatpush1.bf16.msra.mxu1 %v12495_v34  ;;  %8398 = vmatprep.subr.bf16.mxu0 %v12742_v37  ;;  %v8756_v34 = vadd.f32 %v8755_v58, %v8754_v1  ;;  %v12773_v37 = vcombine.low %v2283_v24, %v2287_v7  ;;  %v12544_v36 = vcombine.high %v2052_v21, %v2056_v49  ;;  %v2319_v24 = vld [vmem:[#allocation9 + $0x1ff0] sm:$0xff]  ;;  %v2076_v7 = vld [vmem:[#allocation9 + $0x1858] sm:$0xff] }
 0x589   :  { %8648 = vmatprep.subr.bf16.mxu1 %v12504_v48  ;;  %v8774_v48 = vadd.f32 %v8773_v52, %v8772_v10  ;;  %v12543_v17 = vcombine.low %v2052_v21, %v2056_v49 }
 0x58a   :  { %v8757_v50 = vrot.slane %v8756_v34, 1 }
 0x58b   :  { %8399 = vmatpush1.bf16.msra.mxu0 %v12741_v8  ;;  %v2303_v8 = vld [vmem:[#allocation9 + $0x1f70] sm:$0xff]  ;;  %v8775_v28 = vrot.slane %v8774_v48, 1 }
 0x58c   :  { %8649 = vmatpush1.bf16.msra.mxu1 %v12503_v33  ;;  %8400 = vmatprep.subr.bf16.mxu0 %v12750_v26  ;;  %v15033_v33 = vld [vmem:[#allocation10] sm:$0xff]  ;;  %v2060_v26 = vld [vmem:[#allocation9 + $0x17d8] sm:$0xff]  ;;  %v12790_v31 = vcombine.high %v2299_v57, %v2303_v8  ;;  %v8758_v55 = vadd.f32 %v8757_v50, %v8756_v34  ;;  %v12789_v19 = vcombine.low %v2299_v57, %v2303_v8 }
 0x58d   :  { %8650 = vmatprep.subr.bf16.mxu1 %v12512_v29  ;;  %v2064_v29 = vld [vmem:[#allocation9 + $0x17f8] sm:$0xff]  ;;  %v8776_v1 = vadd.f32 %v8775_v28, %v8774_v48  ;;  %v13333_v48 = vld [vmem:[#allocation13 + $0x4] ss:$16 sps:$4 sm:$0xff]   ;;  %v12575_v8 = vcombine.low %v2084_v42, %v2088_v39  ;;  %v13334_v28 = vld [vmem:[#allocation13 + $0x20] ss:$16 sps:$4 sm:$0xff]  }
 0x58e   :  { %v12552_v27 = vcombine.high %v2060_v26, %v2064_v29  ;;  %v8801_v40 = vmul.f32 0.125, %v8758_v55  ;;  %v2096_v57 = vld [vmem:[#allocation9 + $0x18f8] sm:$0xff] }
 0x58f   :  { %8401 = vmatpush1.bf16.msra.mxu0 %v12749_v53  ;;  %v8898_v53 = vmul.f32 %v13860_v25, %v15022_v0  ;;  %v2104_v50 = vld [vmem:[#allocation9 + $0x1938] sm:$0xff] }
 0x590   :  { %8651 = vmatpush1.bf16.msra.mxu1 %v12511_v4  ;;  %8402 = vmatprep.subr.bf16.mxu0 %v12758_v15  ;;  %v2311_v4 = vld [vmem:[#allocation9 + $0x1fb0] sm:$0xff]  ;;  %v8914_v15 = vrot.slane %v15033_v33, %v14617_v20  ;;  %v15043_v21 = vsub.f32 %v14997_v51, %v8801_v40  ;;  %v2128_v40 = vld [vmem:[#allocation9 + $0x19f8] sm:$0xff] }
 0x591   :  { %8652 = vmatprep.subr.bf16.mxu1 %v12520_v61  ;;  %v2068_v61 = vld [vmem:[#allocation9 + $0x1818] sm:$0xff]  ;;  %v12798_v10 = vcombine.high %v2307_v63, %v2311_v4  ;;  %v12797_v58 = vcombine.low %v2307_v63, %v2311_v4 }
 0x592   :  { %v12560_v0 = vcombine.high %v2068_v61, %v2072_v14  ;;  %v12559_v52 = vcombine.low %v2068_v61, %v2072_v14  ;;  %v8817_v51 = vmul.f32 %v15043_v21, %v15043_v21  ;;  %v2108_v63 = vld [vmem:[#allocation9 + $0x1958] sm:$0xff]  ;;  %v13337_v61 = vld [vmem:[#allocation13 + $0x40] ss:$16 sps:$4 sm:$0xff]  }
 0x593   :  { %8403 = vmatpush1.bf16.msra.mxu0 %v12757_v46  ;;  %v12551_v46 = vcombine.low %v2060_v26, %v2064_v29  ;;  %v2100_v29 = vld [vmem:[#allocation9 + $0x1918] sm:$0xff] }
 0x594   :  { %8653 = vmatpush1.bf16.msra.mxu1 %v12519_v16  ;;  %8404 = vmatprep.subr.bf16.mxu0 %v12766_v5  ;;  %v2315_v16 = vld [vmem:[#allocation9 + $0x1fd0] sm:$0xff]  ;;  %v8948_v5 = vmul.f32 %v8914_v15, %v8898_v53  ;;  %v2112_v4 = vld [vmem:[#allocation9 + $0x1978] sm:$0xff]  ;;  %v12591_v55 = vcombine.low %v2100_v29, %v2104_v50 }
 0x595   :  { %8654 = vmatprep.subr.bf16.mxu1 %v12528_v12  ;;  %v8964_v12 = vrot.slane %v15038_v9, %v14617_v20  ;;  %v12805_v49 = vcombine.low %v2315_v16, %v2319_v24  ;;  %v13339_v53 = vld [vmem:[#allocation13 + $0x44] ss:$16 sps:$4 sm:$0xff]  }
 0x597   :  { %8405 = vmatpush1.bf16.msra.mxu0 %v12765_v47  ;;  %v8804_v47 = vmul.f32 0.125, %v8776_v1  ;;  %v12600_v1 = vcombine.high %v2108_v63, %v2112_v4 }
 0x598   :  { %8655 = vmatpush1.bf16.msra.mxu1 %v12527_v60  ;;  %8406 = vmatprep.subr.bf16.mxu0 %v12774_v22  ;;  %v12806_v60 = vcombine.high %v2315_v16, %v2319_v24  ;;  %v12568_v22 = vcombine.high %v2076_v7, %v2080_v2  ;;  %v13340_v16 = vld [vmem:[#allocation13 + $0x60] ss:$16 sps:$4 sm:$0xff]   ;;  %v13345_v24 = vld [vmem:[#allocation13 + $0x84] ss:$16 sps:$4 sm:$0xff]  }
 0x599   :  { %8656 = vmatprep.subr.bf16.mxu1 %v12536_v35  ;;  %v8998_v35 = vadd.f32 %v8964_v12, %v8948_v5  ;;  %v15047_v34 = vsub.f32 %v15012_v44, %v8804_v47  ;;  %v12599_v12 = vcombine.low %v2108_v63, %v2112_v4  ;;  %v13343_v47 = vld [vmem:[#allocation13 + $0x80] ss:$16 sps:$4 sm:$0xff]   ;;  %v2156_v4 = vld [vmem:[#allocation9 + $0x1ad8] sm:$0xff] }
 0x59b   :  { %8407 = vmatpush1.bf16.msra.mxu0 %v12773_v37  ;;  %v12567_v37 = vcombine.low %v2076_v7, %v2080_v2  ;;  %v8820_v44 = vmul.f32 %v15047_v34, %v15047_v34  ;;  %v2124_v2 = vld [vmem:[#allocation9 + $0x19d8] sm:$0xff] }
 0x59c   :  { %8657 = vmatpush1.bf16.msra.mxu1 %v12535_v43  ;;  %8408 = vmatprep.subr.bf16.mxu0 %v12782_v59  ;;  %v12576_v43 = vcombine.high %v2084_v42, %v2088_v39  ;;  %v9006_v59 = vmax.f32 %v8998_v35, 0.0  ;;  %v12616_v35 = vcombine.high %v2124_v2, %v2128_v40  ;;  %v2132_v42 = vld [vmem:[#allocation9 + $0x1a18] sm:$0xff] }
 0x59d   :  { %8658 = vmatprep.subr.bf16.mxu1 %v12544_v36  ;;  %v2092_v36 = vld [vmem:[#allocation9 + $0x18d8] sm:$0xff] }
 0x59e   :  { %v15054_v25 = vpack.c.bf16 %v9006_v59, %v9006_v59  ;;  %v12584_v26 = vcombine.high %v2092_v36, %v2096_v57  ;;  %v2136_v39 = vld [vmem:[#allocation9 + $0x1a38] sm:$0xff]  ;;  %v13351_v59 = vld [vmem:[#allocation13 + $0xc4] ss:$16 sps:$4 sm:$0xff]  }
 0x59f   :  { %8409 = vmatpush1.bf16.msra.mxu0 %v12781_v18  ;;  %v8825_v18 = vrot.slane %v8817_v51, 4 }
 0x5a0   :  { %8659 = vmatpush1.bf16.msra.mxu1 %v12543_v17  ;;  %8410 = vmatprep.subr.bf16.mxu0 %v12790_v31  ;;  %v8843_v17 = vrot.slane %v8820_v44, 4  ;;  %v12583_v31 = vcombine.low %v2092_v36, %v2096_v57  ;;  %v12624_v36 = vcombine.high %v2132_v42, %v2136_v39  ;;  %v2140_v57 = vld [vmem:[#allocation9 + $0x1a58] sm:$0xff] }
 0x5a1   :  { %8660 = vmatprep.subr.bf16.mxu1 %v12552_v27  ;;  %v12592_v27 = vcombine.high %v2100_v29, %v2104_v50  ;;  %v8826_v15 = vadd.f32 %v8825_v18, %v8817_v51  ;;  %v2144_v51 = vld [vmem:[#allocation9 + $0x1a78] sm:$0xff] }
 0x5a2   :  { %v8844_v14 = vadd.f32 %v8843_v17, %v8820_v44  ;;  %v13349_v44 = vld [vmem:[#allocation13 + $0xc0] ss:$16 sps:$4 sm:$0xff]   ;;  %v12632_v29 = vcombine.high %v2140_v57, %v2144_v51  ;;  %v2148_v50 = vld [vmem:[#allocation9 + $0x1a98] sm:$0xff] }
 0x5a3   :  { %8411 = vmatpush1.bf16.msra.mxu0 %v12789_v19  ;;  %v13342_v19 = vld [vmem:[#allocation13 + $0x64] ss:$16 sps:$4 sm:$0xff]   ;;  %v2152_v18 = vld [vmem:[#allocation9 + $0x1ab8] sm:$0xff]  ;;  %v13352_v17 = vld [vmem:[#allocation13 + $0xe0] ss:$16 sps:$4 sm:$0xff]  }
 0x5a4   :  { %8661 = vmatpush1.bf16.msra.mxu1 %v12551_v46  ;;  %8412 = vmatprep.subr.bf16.mxu0 %v12798_v10  ;;  %v2116_v46 = vld [vmem:[#allocation9 + $0x1998] sm:$0xff]  ;;  %v8845_v5 = vrot.slane %v8844_v14, 2  ;;  %v12640_v63 = vcombine.high %v2148_v50, %v2152_v18 }
 0x5a5   :  { %8671 = vmatprep.subr.bf16.mxu1 %v12560_v0  ;;  %v2120_v10 = vld [vmem:[#allocation9 + $0x19b8] sm:$0xff]  ;;  %v8827_v0 = vrot.slane %v8826_v15, 2 }
 0x5a6   :  { %v12608_v7 = vcombine.high %v2116_v46, %v2120_v10 }
 0x5a7   :  { %8663 = vmatmul.mubr.bf16.vlgmr.msra.gmra.mrb[16].mxu1 %v14961_v23  ;;  %8413 = vmatpush1.bf16.msra.mxu0 %v12797_v58  ;;  %v13331_v23 = vld [vmem:[#allocation13] ss:$16 sps:$4 sm:$0xff]   ;;  %v8828_v58 = vadd.f32 %v8827_v0, %v8826_v15  ;;  %v2160_v15 = vld [vmem:[#allocation9 + $0x1af8] sm:$0xff] }
 0x5a8   :  { %8672 = vmatpush1.bf16.msra.mxu1 %v12559_v52  ;;  %8703 = vmatprep.mubr.bf16.mxu1 %v14963_v54  ;;  %v13336_v54 = vld [vmem:[#allocation13 + $0x24] ss:$16 sps:$4 sm:$0xff]   ;;  %v8846_v52 = vadd.f32 %v8845_v5, %v8844_v14  ;;  %v8765_v14 = vrot.slane %v15010_v56, 4  ;;  %v2164_v0 = vld [vmem:[#allocation9 + $0x1b18] sm:$0xff] }
 0x5a9   :  { %8414 = vmatprep.subr.bf16.mxu0 %v12806_v60  ;;  %8673 = vmatprep.subr.bf16.mxu1 %v12568_v22  ;;  %v12607_v60 = vcombine.low %v2116_v46, %v2120_v10  ;;  %v13348_v22 = vld [vmem:[#allocation13 + $0xa4] ss:$16 sps:$4 sm:$0xff]   ;;  %v12648_v10 = vcombine.high %v2156_v4, %v2160_v15 }
 0x5aa   :  { %v13360_v46 = vld [vmem:[#allocation13 + $0x124] ss:$16 sps:$4 sm:$0xff]   ;;  %v8766_v5 = vadd.f32 %v8765_v14, %v15010_v56 }
 0x5ab   :  { %8415 = vmatpush1.bf16.msra.mxu0 %v12805_v49  ;;  %v8829_v49 = vrot.slane %v8828_v58, 1 }
 0x5ac   :  { %8674 = vmatpush1.bf16.msra.mxu1 %v12567_v37  ;;  %10557 = vmatprep.subr.bf16.mxu0 %v13333_v48  ;;  %v13346_v37 = vld [vmem:[#allocation13 + $0xa0] ss:$16 sps:$4 sm:$0xff]   ;;  %v8847_v48 = vrot.slane %v8846_v52, 1 }
 0x5ad   :  { %8675 = vmatprep.subr.bf16.mxu1 %v12576_v43  ;;  %v12615_v43 = vcombine.low %v2124_v2, %v2128_v40  ;;  %v2172_v40 = vld [vmem:[#allocation9 + $0x1b58] sm:$0xff] }
 0x5ae   :  { %8417 = vmatmul.mubr.bf16.vlgmr.msra.gmra.mrb[28].mxu0 %v14980_v38 }
 0x5af   :  { %10558 = vmatpush1.bf16.msra.mxu0 %v13331_v23  ;;  %10589 = vmatprep.mubr.bf16.mxu0 %v15054_v25  ;;  %v8830_v23 = vadd.f32 %v8829_v49, %v8828_v58  ;;  %v2176_v58 = vld [vmem:[#allocation9 + $0x1b78] sm:$0xff] }
 0x5b0   :  { %8676 = vmatpush1.bf16.msra.mxu1 %v12575_v8  ;;  %10559 = vmatprep.subr.bf16.mxu0 %v13336_v54  ;;  %v8848_v8 = vadd.f32 %v8847_v48, %v8846_v52  ;;  %v12623_v54 = vcombine.low %v2132_v42, %v2136_v39  ;;  %v13361_v52 = vld [vmem:[#allocation13 + $0x140] ss:$16 sps:$4 sm:$0xff]   ;;  %v2180_v42 = vld [vmem:[#allocation9 + $0x1b98] sm:$0xff]  ;;  %v12663_v48 = vcombine.low %v2172_v40, %v2176_v58 }
 0x5b1   :  { %8677 = vmatprep.subr.bf16.mxu1 %v12584_v26  ;;  %v13354_v26 = vld [vmem:[#allocation13 + $0xe4] ss:$16 sps:$4 sm:$0xff]   ;;  %v2184_v39 = vld [vmem:[#allocation9 + $0x1bb8] sm:$0xff] }
 0x5b3   :  { %10560 = vmatpush1.bf16.msra.mxu0 %v13334_v28  ;;  %v8873_v28 = vmul.f32 0.125, %v8830_v23  ;;  %v2192_v23 = vld [vmem:[#allocation9 + $0x1bf8] sm:$0xff] }
 0x5b4   :  { %8678 = vmatpush1.bf16.msra.mxu1 %v12583_v31  ;;  %10561 = vmatprep.subr.bf16.mxu0 %v13339_v53  ;;  %v8876_v31 = vmul.f32 0.125, %v8848_v8  ;;  %v12631_v53 = vcombine.low %v2140_v57, %v2144_v51  ;;  %v2188_v51 = vld [vmem:[#allocation9 + $0x1bd8] sm:$0xff]  ;;  %v13367_v8 = vld [vmem:[#allocation13 + $0x180] ss:$16 sps:$4 sm:$0xff]  }
 0x5b5   :  { %8679 = vmatprep.subr.bf16.mxu1 %v12592_v27  ;;  %v13357_v27 = vld [vmem:[#allocation13 + $0x104] ss:$16 sps:$4 sm:$0xff]  }
 0x5b7   :  { %10562 = vmatpush1.bf16.msra.mxu0 %v13337_v61  ;;  %v8881_v61 = vadd.f32 1e-05, %v8873_v28  ;;  %v12680_v28 = vcombine.high %v2188_v51, %v2192_v23 }
 0x5b8   :  { %8680 = vmatpush1.bf16.msra.mxu1 %v12591_v55  ;;  %10563 = vmatprep.subr.bf16.mxu0 %v13342_v19  ;;  %v13355_v55 = vld [vmem:[#allocation13 + $0x100] ss:$16 sps:$4 sm:$0xff]   ;;  %v8884_v19 = vadd.f32 1e-05, %v8876_v31  ;;  %v2196_v31 = vld [vmem:[#allocation9 + $0x1c18] sm:$0xff] }
 0x5b9   :  { %8681 = vmatprep.subr.bf16.mxu1 %v12600_v1  ;;  %v12639_v1 = vcombine.low %v2148_v50, %v2152_v18  ;;  %13861 = vrsqrt.f32 %v8881_v61  ;;  %v13372_v50 = vld [vmem:[#allocation13 + $0x1a4] ss:$16 sps:$4 sm:$0xff]   ;;  %v8960_v61 = vrot.slane %v15038_v9, %v14612_v13 }
 0x5ba   :  { %13863 = vrsqrt.f32 %v8884_v19  ;;  %v2204_v19 = vld [vmem:[#allocation9 + $0x1c58] sm:$0xff] }
 0x5bb   :  { %10564 = vmatpush1.bf16.msra.mxu0 %v13340_v16  ;;  %v2168_v16 = vld [vmem:[#allocation9 + $0x1b38] sm:$0xff] }
 0x5bc   :  { %8682 = vmatpush1.bf16.msra.mxu1 %v12599_v12  ;;  %10565 = vmatprep.subr.bf16.mxu0 %v13345_v24  ;;  %v13358_v12 = vld [vmem:[#allocation13 + $0x120] ss:$16 sps:$4 sm:$0xff]   ;;  %v12647_v24 = vcombine.low %v2156_v4, %v2160_v15  ;;  %v12656_v2 = vcombine.high %v2164_v0, %v2168_v16  ;;  %v12679_v4 = vcombine.low %v2188_v51, %v2192_v23  ;;  %v13375_v15 = vld [vmem:[#allocation13 + $0x1c4] ss:$16 sps:$4 sm:$0xff]  }
 0x5bd   :  { %8683 = vmatprep.subr.bf16.mxu1 %v12608_v7  ;;  %v13363_v7 = vld [vmem:[#allocation13 + $0x144] ss:$16 sps:$4 sm:$0xff]   ;;  %v13382_v51 = vld [vmem:[#allocation13 + $0x220] ss:$16 sps:$4 sm:$0xff]  }
 0x5bf   :  { %10566 = vmatpush1.bf16.msra.mxu0 %v13343_v47  ;;  %v8767_v47 = vrot.slane %v8766_v5, 2 }
 0x5c0   :  { %8684 = vmatpush1.bf16.msra.mxu1 %v12607_v60  ;;  %10567 = vmatprep.subr.bf16.mxu0 %v13348_v22  ;;  %v12655_v60 = vcombine.low %v2164_v0, %v2168_v16  ;;  %v13366_v22 = vld [vmem:[#allocation13 + $0x164] ss:$16 sps:$4 sm:$0xff]  }
 0x5c1   :  { %8685 = vmatprep.subr.bf16.mxu1 %v12616_v35  ;;  %v12664_v35 = vcombine.high %v2172_v40, %v2176_v58  ;;  %v8768_v49 = vadd.f32 %v8767_v47, %v8766_v5  ;;  %v13376_v58 = vld [vmem:[#allocation13 + $0x1e0] ss:$16 sps:$4 sm:$0xff]  }
 0x5c3   :  { %10568 = vmatpush1.bf16.msra.mxu0 %v13346_v37  ;;  %v13364_v37 = vld [vmem:[#allocation13 + $0x160] ss:$16 sps:$4 sm:$0xff]  }
 0x5c4   :  { %8686 = vmatpush1.bf16.msra.mxu1 %v12615_v43  ;;  %10569 = vmatprep.subr.bf16.mxu0 %v13351_v59  ;;  %v13369_v43 = vld [vmem:[#allocation13 + $0x184] ss:$16 sps:$4 sm:$0xff]   ;;  %v13862_v59 = vpop.eup %13861 }
 0x5c5   :  { %8687 = vmatprep.subr.bf16.mxu1 %v12624_v36  ;;  %v12672_v36 = vcombine.high %v2180_v42, %v2184_v39  ;;  %v13864_v57 = vpop.eup %13863 }
 0x5c6   :  { %v8900_v18 = vmul.f32 %v13864_v57, %v15047_v34 }
 0x5c7   :  { %10570 = vmatpush1.bf16.msra.mxu0 %v13349_v44  ;;  %v8769_v44 = vrot.slane %v8768_v49, 1 }
 0x5c8   :  { %8688 = vmatpush1.bf16.msra.mxu1 %v12623_v54  ;;  %10571 = vmatprep.subr.bf16.mxu0 %v13354_v26  ;;  %v8897_v54 = vmul.f32 %v13862_v59, %v15043_v21  ;;  %v8910_v26 = vrot.slane %v15033_v33, %v14612_v13  ;;  %v2228_v59 = vld [vmem:[#allocation9 + $0x1d18] sm:$0xff] }
 0x5c9   :  { %8689 = vmatprep.subr.bf16.mxu1 %v12632_v29  ;;  %v12671_v29 = vcombine.low %v2180_v42, %v2184_v39  ;;  %v2220_v42 = vld [vmem:[#allocation9 + $0x1cd8] sm:$0xff] }
 0x5ca   :  { %v8947_v21 = vmul.f32 %v8910_v26, %v8897_v54  ;;  %v2224_v39 = vld [vmem:[#allocation9 + $0x1cf8] sm:$0xff] }
 0x5cb   :  { %10572 = vmatpush1.bf16.msra.mxu0 %v13352_v17  ;;  %v8922_v17 = vrot.slane %v15033_v33, %v15168_v3  ;;  %v12711_v23 = vcombine.low %v2220_v42, %v2224_v39  ;;  %v2236_v54 = vld [vmem:[#allocation9 + $0x1d58] sm:$0xff] }
 0x5cc   :  { %8690 = vmatpush1.bf16.msra.mxu1 %v12631_v53  ;;  %10573 = vmatprep.subr.bf16.mxu0 %v13357_v27  ;;  %v2200_v53 = vld [vmem:[#allocation9 + $0x1c38] sm:$0xff]  ;;  %v8770_v27 = vadd.f32 %v8769_v44, %v8768_v49  ;;  %v8997_v16 = vadd.f32 %v8960_v61, %v8947_v21  ;;  %v13379_v49 = vld [vmem:[#allocation13 + $0x200] ss:$16 sps:$4 sm:$0xff]   ;;  %v13387_v44 = vld [vmem:[#allocation13 + $0x244] ss:$16 sps:$4 sm:$0xff]  }
 0x5cd   :  { %8691 = vmatprep.subr.bf16.mxu1 %v12640_v63  ;;  %v13370_v63 = vld [vmem:[#allocation13 + $0x1a0] ss:$16 sps:$4 sm:$0xff]   ;;  %v12688_v34 = vcombine.high %v2196_v31, %v2200_v53  ;;  %v8950_v14 = vmul.f32 %v8922_v17, %v8900_v18  ;;  %v12687_v0 = vcombine.low %v2196_v31, %v2200_v53  ;;  %v2240_v26 = vld [vmem:[#allocation9 + $0x1d78] sm:$0xff] }
 0x5ce   :  { %v12728_v17 = vcombine.high %v2236_v54, %v2240_v26  ;;  %v2244_v31 = vld [vmem:[#allocation9 + $0x1d98] sm:$0xff]  ;;  %v12727_v21 = vcombine.low %v2236_v54, %v2240_v26 }
 0x5cf   :  { %10574 = vmatpush1.bf16.msra.mxu0 %v13355_v55  ;;  %v8972_v55 = vrot.slane %v15038_v9, %v15168_v3  ;;  %v2248_v53 = vld [vmem:[#allocation9 + $0x1db8] sm:$0xff] }
 0x5d0   :  { %8692 = vmatpush1.bf16.msra.mxu1 %v12639_v1  ;;  %10575 = vmatprep.subr.bf16.mxu0 %v13360_v46  ;;  %v2208_v1 = vld [vmem:[#allocation9 + $0x1c78] sm:$0xff]  ;;  %v8803_v46 = vmul.f32 0.125, %v8770_v27 }
 0x5d1   :  { %8693 = vmatprep.subr.bf16.mxu1 %v12648_v10  ;;  %v13373_v10 = vld [vmem:[#allocation13 + $0x1c0] ss:$16 sps:$4 sm:$0xff]   ;;  %v12696_v5 = vcombine.high %v2204_v19, %v2208_v1  ;;  %v12695_v47 = vcombine.low %v2204_v19, %v2208_v1  ;;  %v2252_v61 = vld [vmem:[#allocation9 + $0x1dd8] sm:$0xff]  ;;  %v12735_v19 = vcombine.low %v2244_v31, %v2248_v53  ;;  %v13396_v1 = vld [vmem:[#allocation13 + $0x2a4] ss:$16 sps:$4 sm:$0xff]  }
 0x5d2   :  { %v15071_v40 = vsub.f32 %v15010_v56, %v8803_v46  ;;  %v2292_v54 = vld [vmem:[#allocation9 + $0x1f18] sm:$0xff] }
 0x5d3   :  { %10576 = vmatpush1.bf16.msra.mxu0 %v13358_v12  ;;  %v13378_v12 = vld [vmem:[#allocation13 + $0x1e4] ss:$16 sps:$4 sm:$0xff]   ;;  %v2296_v26 = vld [vmem:[#allocation9 + $0x1f38] sm:$0xff] }
 0x5d4   :  { %8694 = vmatpush1.bf16.msra.mxu1 %v12647_v24  ;;  %10577 = vmatprep.subr.bf16.mxu0 %v13363_v7  ;;  %v9000_v24 = vadd.f32 %v8972_v55, %v8950_v14  ;;  %v2212_v7 = vld [vmem:[#allocation9 + $0x1c98] sm:$0xff]  ;;  %v8819_v56 = vmul.f32 %v15071_v40, %v15071_v40  ;;  %v13391_v55 = vld [vmem:[#allocation13 + $0x280] ss:$16 sps:$4 sm:$0xff]  }
 0x5d5   :  { %8695 = vmatprep.subr.bf16.mxu1 %v12656_v2  ;;  %v2216_v2 = vld [vmem:[#allocation9 + $0x1cb8] sm:$0xff] }
 0x5d6   :  { %v8837_v57 = vrot.slane %v8819_v56, 4 }
 0x5d7   :  { %10578 = vmatpush1.bf16.msra.mxu0 %v13361_v52  ;;  %v9005_v52 = vmax.f32 %v8997_v16, 0.0 }
 0x5d8   :  { %8696 = vmatpush1.bf16.msra.mxu1 %v12655_v60  ;;  %10579 = vmatprep.subr.bf16.mxu0 %v13366_v22  ;;  %v13381_v60 = vld [vmem:[#allocation13 + $0x204] ss:$16 sps:$4 sm:$0xff]   ;;  %v12704_v22 = vcombine.high %v2212_v7, %v2216_v2 }
 0x5d9   :  { %8697 = vmatprep.subr.bf16.mxu1 %v12664_v35  ;;  %v9008_v35 = vmax.f32 %v9000_v24, 0.0  ;;  %v13399_v24 = vld [vmem:[#allocation13 + $0x2c4] ss:$16 sps:$4 sm:$0xff]  }
 0x5db   :  { %10580 = vmatpush1.bf16.msra.mxu0 %v13364_v37  ;;  %v15077_v37 = vpack.c.bf16 %v9005_v52, %v9005_v52  ;;  %v13397_v52 = vld [vmem:[#allocation13 + $0x2c0] ss:$16 sps:$4 sm:$0xff]  }
 0x5dc   :  { %8698 = vmatpush1.bf16.msra.mxu1 %v12663_v48  ;;  %10581 = vmatprep.subr.bf16.mxu0 %v13369_v43  ;;  %v15079_v48 = vpack.c.bf16 %v9008_v35, %v9008_v35  ;;  %v12712_v43 = vcombine.high %v2220_v42, %v2224_v39  ;;  %v2276_v42 = vld [vmem:[#allocation9 + $0x1e98] sm:$0xff] }
 0x5dd   :  { %8699 = vmatprep.subr.bf16.mxu1 %v12672_v36  ;;  %v2232_v36 = vld [vmem:[#allocation9 + $0x1d38] sm:$0xff] }
 0x5de   :  { %v12719_v18 = vcombine.low %v2228_v59, %v2232_v36  ;;  %v2280_v39 = vld [vmem:[#allocation9 + $0x1eb8] sm:$0xff] }
 0x5df   :  { %10582 = vmatpush1.bf16.msra.mxu0 %v13367_v8  ;;  %v12720_v8 = vcombine.high %v2228_v59, %v2232_v36  ;;  %v2284_v59 = vld [vmem:[#allocation9 + $0x1ed8] sm:$0xff] }
 0x5e0   :  { %8700 = vmatpush1.bf16.msra.mxu1 %v12671_v29  ;;  %10583 = vmatprep.subr.bf16.mxu0 %v13372_v50  ;;  %v8838_v29 = vadd.f32 %v8837_v57, %v8819_v56  ;;  %v13385_v50 = vld [vmem:[#allocation13 + $0x240] ss:$16 sps:$4 sm:$0xff]   ;;  %v2288_v36 = vld [vmem:[#allocation9 + $0x1ef8] sm:$0xff] }
 0x5e1   :  { %8701 = vmatprep.subr.bf16.mxu1 %v12680_v28  ;;  %v13390_v28 = vld [vmem:[#allocation13 + $0x264] ss:$16 sps:$4 sm:$0xff]  }
 0x5e2   :  { %v8839_v27 = vrot.slane %v8838_v29, 2 }
 0x5e3   :  { %10584 = vmatpush1.bf16.msra.mxu0 %v13370_v63  ;;  %v13388_v63 = vld [vmem:[#allocation13 + $0x260] ss:$16 sps:$4 sm:$0xff]  }
 0x5e4   :  { %8702 = vmatpush1.bf16.msra.mxu1 %v12679_v4  ;;  %10585 = vmatprep.subr.bf16.mxu0 %v13375_v15  ;;  %v13393_v4 = vld [vmem:[#allocation13 + $0x284] ss:$16 sps:$4 sm:$0xff]   ;;  %v12736_v15 = vcombine.high %v2244_v31, %v2248_v53  ;;  %v8840_v14 = vadd.f32 %v8839_v27, %v8838_v29  ;;  %v13406_v29 = vld [vmem:[#allocation13 + $0x320] ss:$16 sps:$4 sm:$0xff]   ;;  %v2304_v31 = vld [vmem:[#allocation9 + $0x1f78] sm:$0xff]  ;;  %v12783_v27 = vcombine.low %v2292_v54, %v2296_v26 }
 0x5e5   :  { %8712 = vmatprep.subr.bf16.mxu1 %v12688_v34  ;;  %v2256_v34 = vld [vmem:[#allocation9 + $0x1df8] sm:$0xff]  ;;  %v13409_v53 = vld [vmem:[#allocation13 + $0x340] ss:$16 sps:$4 sm:$0xff]  }
 0x5e6   :  { %v12744_v46 = vcombine.high %v2252_v61, %v2256_v34  ;;  %v8841_v16 = vrot.slane %v8840_v14, 1 }
 0x5e7   :  { %8704 = vmatmul.mubr.bf16.vlgmr.msra.gmra.mrb[16].mxu1 %v14971_v30  ;;  %10586 = vmatpush1.bf16.msra.mxu0 %v13373_v10  ;;  %v12703_v30 = vcombine.low %v2212_v7, %v2216_v2  ;;  %v2260_v10 = vld [vmem:[#allocation9 + $0x1e18] sm:$0xff] }
 0x5e8   :  { %8713 = vmatpush1.bf16.msra.mxu1 %v12687_v0  ;;  %8744 = vmatprep.mubr.bf16.mxu1 %v14973_v41  ;;  %v13384_v41 = vld [vmem:[#allocation13 + $0x224] ss:$16 sps:$4 sm:$0xff]   ;;  %v2264_v0 = vld [vmem:[#allocation9 + $0x1e38] sm:$0xff] }
 0x5e9   :  { %8714 = vmatprep.subr.bf16.mxu1 %v12696_v5  ;;  %10587 = vmatprep.subr.bf16.mxu0 %v13378_v12  ;;  %v13394_v5 = vld [vmem:[#allocation13 + $0x2a0] ss:$16 sps:$4 sm:$0xff]   ;;  %v12743_v12 = vcombine.low %v2252_v61, %v2256_v34  ;;  %v12752_v7 = vcombine.high %v2260_v10, %v2264_v0  ;;  %v2268_v2 = vld [vmem:[#allocation9 + $0x1e58] sm:$0xff] }
 0x5ea   :  { %v13412_v61 = vld [vmem:[#allocation13 + $0x360] ss:$16 sps:$4 sm:$0xff]  }
 0x5eb   :  { %10588 = vmatpush1.bf16.msra.mxu0 %v13376_v58  ;;  %v2272_v58 = vld [vmem:[#allocation9 + $0x1e78] sm:$0xff] }
 0x5ec   :  { %8715 = vmatpush1.bf16.msra.mxu1 %v12695_v47  ;;  %10598 = vmatprep.subr.bf16.mxu0 %v13381_v60  ;;  %v8842_v47 = vadd.f32 %v8841_v16, %v8840_v14  ;;  %v12751_v60 = vcombine.low %v2260_v10, %v2264_v0  ;;  %v12760_v35 = vcombine.high %v2268_v2, %v2272_v58  ;;  %v13417_v14 = vld [vmem:[#allocation13 + $0x384] ss:$16 sps:$4 sm:$0xff]   ;;  %v13415_v10 = vld [vmem:[#allocation13 + $0x380] ss:$16 sps:$4 sm:$0xff]  }
 0x5ed   :  { %8716 = vmatprep.subr.bf16.mxu1 %v12704_v22  ;;  %v13402_v22 = vld [vmem:[#allocation13 + $0x2e4] ss:$16 sps:$4 sm:$0xff]   ;;  %v8918_v16 = vrot.slane %v15033_v33, %v14632_v45  ;;  %v13421_v33 = vld [vmem:[#allocation13 + $0x3c0] ss:$16 sps:$4 sm:$0xff]  }
 0x5ee   :  { %10590 = vmatmul.mubr.bf16.vlgmr.msra.gmra.mrb[32].mxu0 %v15077_v37  ;;  %v8875_v56 = vmul.f32 0.125, %v8842_v47  ;;  %v13423_v47 = vld [vmem:[#allocation13 + $0x3c4] ss:$16 sps:$4 sm:$0xff]  }
 0x5ef   :  { %10599 = vmatpush1.bf16.msra.mxu0 %v13379_v49  ;;  %10630 = vmatprep.mubr.bf16.mxu0 %v15079_v48  ;;  %v13400_v49 = vld [vmem:[#allocation13 + $0x2e0] ss:$16 sps:$4 sm:$0xff]  }
 0x5f0   :  { %8717 = vmatpush1.bf16.msra.mxu1 %v12703_v30  ;;  %10600 = vmatprep.subr.bf16.mxu0 %v13384_v41  ;;  %v12759_v30 = vcombine.low %v2268_v2, %v2272_v58  ;;  %v13405_v41 = vld [vmem:[#allocation13 + $0x304] ss:$16 sps:$4 sm:$0xff]   ;;  %v8883_v57 = vadd.f32 1e-05, %v8875_v56  ;;  %v13430_v56 = vld [vmem:[#allocation13 + $0x28] ss:$16 sps:$4 sm:$0xff]  }
 0x5f1   :  { %8718 = vmatprep.subr.bf16.mxu1 %v12712_v43  ;;  %v12768_v43 = vcombine.high %v2276_v42, %v2280_v39 }
 0x5f2   :  { %13865 = vrsqrt.f32 %v8883_v57  ;;  %v13436_v57 = vld [vmem:[#allocation13 + $0x68] ss:$16 sps:$4 sm:$0xff]  }
 0x5f3   :  { %10601 = vmatpush1.bf16.msra.mxu0 %v13382_v51  ;;  %v13403_v51 = vld [vmem:[#allocation13 + $0x300] ss:$16 sps:$4 sm:$0xff]  }
 0x5f4   :  { %8719 = vmatpush1.bf16.msra.mxu1 %v12711_v23  ;;  %10602 = vmatprep.subr.bf16.mxu0 %v13387_v44  ;;  %v12767_v23 = vcombine.low %v2276_v42, %v2280_v39  ;;  %v13408_v44 = vld [vmem:[#allocation13 + $0x324] ss:$16 sps:$4 sm:$0xff]   ;;  %v13432_v42 = vld [vmem:[#allocation13 + $0x2c] ss:$16 sps:$4 sm:$0xff]   ;;  %v13427_v39 = vld [vmem:[#allocation13 + $0x3e0] ss:$16 sps:$4 sm:$0xff]  }
 0x5f5   :  { %8720 = vmatprep.subr.bf16.mxu1 %v12720_v8  ;;  %v12776_v8 = vcombine.high %v2284_v59, %v2288_v36 }
 0x5f7   :  { %10603 = vmatpush1.bf16.msra.mxu0 %v13385_v50  ;;  %v12775_v50 = vcombine.low %v2284_v59, %v2288_v36  ;;  %v13433_v59 = vld [vmem:[#allocation13 + $0x48] ss:$16 sps:$4 sm:$0xff]   ;;  %v13501_v36 = vld [vmem:[#allocation13 + $0x424] ss:$16 sps:$4 sm:$0xff]  }
 0x5f8   :  { %8721 = vmatpush1.bf16.msra.mxu1 %v12719_v18  ;;  %10604 = vmatprep.subr.bf16.mxu0 %v13390_v28  ;;  %v13411_v18 = vld [vmem:[#allocation13 + $0x344] ss:$16 sps:$4 sm:$0xff]   ;;  %v12784_v28 = vcombine.high %v2292_v54, %v2296_v26  ;;  %v13444_v26 = vld [vmem:[#allocation13 + $0xac] ss:$16 sps:$4 sm:$0xff]  }
 0x5f9   :  { %8722 = vmatprep.subr.bf16.mxu1 %v12728_v17  ;;  %v2300_v17 = vld [vmem:[#allocation9 + $0x1f58] sm:$0xff]  ;;  %v13513_v54 = vld [vmem:[#allocation13 + $0x464] ss:$16 sps:$4 sm:$0xff]  }
 0x5fa   :  { %v12791_v34 = vcombine.low %v2300_v17, %v2304_v31 }
 0x5fb   :  { %10605 = vmatpush1.bf16.msra.mxu0 %v13388_v63  ;;  %v13414_v63 = vld [vmem:[#allocation13 + $0x364] ss:$16 sps:$4 sm:$0xff]  }
 0x5fc   :  { %8723 = vmatpush1.bf16.msra.mxu1 %v12727_v21  ;;  %10606 = vmatprep.subr.bf16.mxu0 %v13393_v4  ;;  %v12792_v21 = vcombine.high %v2300_v17, %v2304_v31  ;;  %v2308_v4 = vld [vmem:[#allocation9 + $0x1f98] sm:$0xff]  ;;  %v13517_v17 = vld [vmem:[#allocation13 + $0x480] ss:$16 sps:$4 sm:$0xff]  }
 0x5fd   :  { %8724 = vmatprep.subr.bf16.mxu1 %v12736_v15  ;;  %v2312_v15 = vld [vmem:[#allocation9 + $0x1fb8] sm:$0xff] }
 0x5fe   :  { %v13445_v31 = vld [vmem:[#allocation13 + $0xc8] ss:$16 sps:$4 sm:$0xff]  }
 0x5ff   :  { %10607 = vmatpush1.bf16.msra.mxu0 %v13391_v55  ;;  %v13866_v55 = vpop.eup %13865 }
 0x600   :  { %8725 = vmatpush1.bf16.msra.mxu1 %v12735_v19  ;;  %10608 = vmatprep.subr.bf16.mxu0 %v13396_v1  ;;  %v12800_v19 = vcombine.high %v2308_v4, %v2312_v15  ;;  %v2316_v1 = vld [vmem:[#allocation9 + $0x1fd8] sm:$0xff]  ;;  %v8899_v0 = vmul.f32 %v13866_v55, %v15071_v40 }
 0x601   :  { %8726 = vmatprep.subr.bf16.mxu1 %v12744_v46  ;;  %v2320_v46 = vld [vmem:[#allocation9 + $0x1ff8] sm:$0xff] }
 0x602   :  { %v8949_v2 = vmul.f32 %v8918_v16, %v8899_v0  ;;  %v12807_v58 = vcombine.low %v2316_v1, %v2320_v46  ;;  %v13426_v40 = vld [vmem:[#allocation13 + $0xc] ss:$16 sps:$4 sm:$0xff]   ;;  %v13541_v0 = vld [vmem:[#allocation13 + $0x500] ss:$16 sps:$4 sm:$0xff]   ;;  %v13457_v16 = vld [vmem:[#allocation13 + $0x148] ss:$16 sps:$4 sm:$0xff]  }
 0x603   :  { %10609 = vmatpush1.bf16.msra.mxu0 %v13394_v5  ;;  %v12799_v5 = vcombine.low %v2308_v4, %v2312_v15  ;;  %v13531_v4 = vld [vmem:[#allocation13 + $0x4c4] ss:$16 sps:$4 sm:$0xff]   ;;  %v13453_v15 = vld [vmem:[#allocation13 + $0x10c] ss:$16 sps:$4 sm:$0xff]  }
 0x604   :  { %8727 = vmatpush1.bf16.msra.mxu1 %v12743_v12  ;;  %10610 = vmatprep.subr.bf16.mxu0 %v13399_v24  ;;  %v13420_v12 = vld [vmem:[#allocation13 + $0x3a4] ss:$16 sps:$4 sm:$0xff]   ;;  %v12808_v24 = vcombine.high %v2316_v1, %v2320_v46  ;;  %v13456_v55 = vld [vmem:[#allocation13 + $0x12c] ss:$16 sps:$4 sm:$0xff]   ;;  %v13454_v1 = vld [vmem:[#allocation13 + $0x128] ss:$16 sps:$4 sm:$0xff]  }
 0x605   :  { %8728 = vmatprep.subr.bf16.mxu1 %v12752_v7  ;;  %v13418_v7 = vld [vmem:[#allocation13 + $0x3a0] ss:$16 sps:$4 sm:$0xff]   ;;  %v13543_v46 = vld [vmem:[#allocation13 + $0x504] ss:$16 sps:$4 sm:$0xff]  }
 0x607   :  { %10611 = vmatpush1.bf16.msra.mxu0 %v13397_v52  ;;  %v8968_v52 = vrot.slane %v15038_v9, %v14632_v45 }
 0x608   :  { %8729 = vmatpush1.bf16.msra.mxu1 %v12751_v60  ;;  %10612 = vmatprep.subr.bf16.mxu0 %v13402_v22  ;;  %v13424_v60 = vld [vmem:[#allocation13 + $0x8] ss:$16 sps:$4 sm:$0xff]  }
 0x609   :  { %8730 = vmatprep.subr.bf16.mxu1 %v12760_v35  ;;  %v8999_v22 = vadd.f32 %v8968_v52, %v8949_v2  ;;  %v13429_v35 = vld [vmem:[#allocation13 + $0x3e4] ss:$16 sps:$4 sm:$0xff]   ;;  %v13463_v52 = vld [vmem:[#allocation13 + $0x188] ss:$16 sps:$4 sm:$0xff]  }
 0x60a   :  { %v13555_v2 = vld [vmem:[#allocation13 + $0x544] ss:$16 sps:$4 sm:$0xff]  }
 0x60b   :  { %10613 = vmatpush1.bf16.msra.mxu0 %v13400_v49  ;;  %v9007_v9 = vmax.f32 %v8999_v22, 0.0  ;;  %v13495_v49 = vld [vmem:[#allocation13 + $0x404] ss:$16 sps:$4 sm:$0xff]   ;;  %v13466_v22 = vld [vmem:[#allocation13 + $0x1a8] ss:$16 sps:$4 sm:$0xff]  }
 0x60c   :  { %8731 = vmatpush1.bf16.msra.mxu1 %v12759_v30  ;;  %10614 = vmatprep.subr.bf16.mxu0 %v13405_v41  ;;  %v13435_v30 = vld [vmem:[#allocation13 + $0x4c] ss:$16 sps:$4 sm:$0xff]   ;;  %v13493_v41 = vld [vmem:[#allocation13 + $0x400] ss:$16 sps:$4 sm:$0xff]  }
 0x60d   :  { %8732 = vmatprep.subr.bf16.mxu1 %v12768_v43  ;;  %v15090_v43 = vpack.c.bf16 %v9007_v9, %v9007_v9  ;;  %v13573_v9 = vld [vmem:[#allocation13 + $0x5a4] ss:$16 sps:$4 sm:$0xff]  }
 0x60f   :  { %10615 = vmatpush1.bf16.msra.mxu0 %v13403_v51  ;;  %v13507_v51 = vld [vmem:[#allocation13 + $0x444] ss:$16 sps:$4 sm:$0xff]  }
 0x610   :  { %8733 = vmatpush1.bf16.msra.mxu1 %v12767_v23  ;;  %10616 = vmatprep.subr.bf16.mxu0 %v13408_v44  ;;  %v13441_v23 = vld [vmem:[#allocation13 + $0x8c] ss:$16 sps:$4 sm:$0xff]   ;;  %v13505_v44 = vld [vmem:[#allocation13 + $0x440] ss:$16 sps:$4 sm:$0xff]  }
 0x611   :  { %8734 = vmatprep.subr.bf16.mxu1 %v12776_v8  ;;  %v13439_v8 = vld [vmem:[#allocation13 + $0x88] ss:$16 sps:$4 sm:$0xff]  }
 0x613   :  { %10617 = vmatpush1.bf16.msra.mxu0 %v13406_v29  ;;  %v13511_v29 = vld [vmem:[#allocation13 + $0x460] ss:$16 sps:$4 sm:$0xff]  }
 0x614   :  { %8735 = vmatpush1.bf16.msra.mxu1 %v12775_v50  ;;  %10618 = vmatprep.subr.bf16.mxu0 %v13411_v18  ;;  %v13442_v50 = vld [vmem:[#allocation13 + $0xa8] ss:$16 sps:$4 sm:$0xff]   ;;  %v13519_v18 = vld [vmem:[#allocation13 + $0x484] ss:$16 sps:$4 sm:$0xff]  }
 0x615   :  { %8736 = vmatprep.subr.bf16.mxu1 %v12784_v28  ;;  %v13447_v28 = vld [vmem:[#allocation13 + $0xcc] ss:$16 sps:$4 sm:$0xff]  }
 0x617   :  { %10619 = vmatpush1.bf16.msra.mxu0 %v13409_v53  ;;  %v13525_v53 = vld [vmem:[#allocation13 + $0x4a4] ss:$16 sps:$4 sm:$0xff]  }
 0x618   :  { %8737 = vmatpush1.bf16.msra.mxu1 %v12783_v27  ;;  %10620 = vmatprep.subr.bf16.mxu0 %v13414_v63  ;;  %v13450_v27 = vld [vmem:[#allocation13 + $0xec] ss:$16 sps:$4 sm:$0xff]   ;;  %v13523_v63 = vld [vmem:[#allocation13 + $0x4a0] ss:$16 sps:$4 sm:$0xff]  }
 0x619   :  { %8738 = vmatprep.subr.bf16.mxu1 %v12792_v21  ;;  %v13448_v21 = vld [vmem:[#allocation13 + $0xe8] ss:$16 sps:$4 sm:$0xff]  }
 0x61b   :  { %10621 = vmatpush1.bf16.msra.mxu0 %v13412_v61  ;;  %v13529_v61 = vld [vmem:[#allocation13 + $0x4c0] ss:$16 sps:$4 sm:$0xff]  }
 0x61c   :  { %8739 = vmatpush1.bf16.msra.mxu1 %v12791_v34  ;;  %10622 = vmatprep.subr.bf16.mxu0 %v13417_v14  ;;  %v13451_v34 = vld [vmem:[#allocation13 + $0x108] ss:$16 sps:$4 sm:$0xff]   ;;  %v13537_v14 = vld [vmem:[#allocation13 + $0x4e4] ss:$16 sps:$4 sm:$0xff]  }
 0x61d   :  { %8740 = vmatprep.subr.bf16.mxu1 %v12800_v19  ;;  %v13535_v19 = vld [vmem:[#allocation13 + $0x4e0] ss:$16 sps:$4 sm:$0xff]  }
 0x61f   :  { %10623 = vmatpush1.bf16.msra.mxu0 %v13415_v10  ;;  %v13459_v10 = vld [vmem:[#allocation13 + $0x14c] ss:$16 sps:$4 sm:$0xff]  }
 0x620   :  { %8741 = vmatpush1.bf16.msra.mxu1 %v12799_v5  ;;  %10624 = vmatprep.subr.bf16.mxu0 %v13420_v12  ;;  %v13549_v5 = vld [vmem:[#allocation13 + $0x524] ss:$16 sps:$4 sm:$0xff]   ;;  %v13462_v12 = vld [vmem:[#allocation13 + $0x16c] ss:$16 sps:$4 sm:$0xff]  }
 0x621   :  { %8742 = vmatprep.subr.bf16.mxu1 %v12808_v24  ;;  %v13547_v24 = vld [vmem:[#allocation13 + $0x520] ss:$16 sps:$4 sm:$0xff]  }
 0x623   :  { %10625 = vmatpush1.bf16.msra.mxu0 %v13418_v7  ;;  %v13460_v7 = vld [vmem:[#allocation13 + $0x168] ss:$16 sps:$4 sm:$0xff]  }
 0x624   :  { %8743 = vmatpush1.bf16.msra.mxu1 %v12807_v58  ;;  %10626 = vmatprep.subr.bf16.mxu0 %v13423_v47  ;;  %v13465_v58 = vld [vmem:[#allocation13 + $0x18c] ss:$16 sps:$4 sm:$0xff]   ;;  %v13553_v47 = vld [vmem:[#allocation13 + $0x540] ss:$16 sps:$4 sm:$0xff]  }
 0x625   :  { %10721 = vmatprep.subr.bf16.mxu1 %v13426_v40  ;;  %v13561_v40 = vld [vmem:[#allocation13 + $0x564] ss:$16 sps:$4 sm:$0xff]  }
 0x627   :  { %8745 = vmatmul.mubr.bf16.vlgmr.msra.gmra.mrb[16].mxu1 %v14980_v38  ;;  %10627 = vmatpush1.bf16.msra.mxu0 %v13421_v33  ;;  %v13438_v38 = vld [vmem:[#allocation13 + $0x6c] ss:$16 sps:$4 sm:$0xff]  }
 0x628   :  { %10722 = vmatpush1.bf16.msra.mxu1 %v13424_v60  ;;  %10753 = vmatprep.mubr.bf16.mxu1 %v15054_v25  ;;  %v13499_v25 = vld [vmem:[#allocation13 + $0x420] ss:$16 sps:$4 sm:$0xff]   ;;  %v13468_v33 = vld [vmem:[#allocation13 + $0x1ac] ss:$16 sps:$4 sm:$0xff]  }
 0x629   :  { %10628 = vmatprep.subr.bf16.mxu0 %v13429_v35  ;;  %10723 = vmatprep.subr.bf16.mxu1 %v13432_v42  ;;  %v13559_v60 = vld [vmem:[#allocation13 + $0x560] ss:$16 sps:$4 sm:$0xff]   ;;  %v13567_v35 = vld [vmem:[#allocation13 + $0x584] ss:$16 sps:$4 sm:$0xff]   ;;  %v13471_v42 = vld [vmem:[#allocation13 + $0x1cc] ss:$16 sps:$4 sm:$0xff]  }
 0x62b   :  { %10629 = vmatpush1.bf16.msra.mxu0 %v13427_v39  ;;  %v13565_v39 = vld [vmem:[#allocation13 + $0x580] ss:$16 sps:$4 sm:$0xff]  }
 0x62c   :  { %10724 = vmatpush1.bf16.msra.mxu1 %v13430_v56  ;;  %10639 = vmatprep.subr.bf16.mxu0 %v13495_v49  ;;  %v13469_v56 = vld [vmem:[#allocation13 + $0x1c8] ss:$16 sps:$4 sm:$0xff]   ;;  %v13474_v49 = vld [vmem:[#allocation13 + $0x1ec] ss:$16 sps:$4 sm:$0xff]  }
 0x62d   :  { %10725 = vmatprep.subr.bf16.mxu1 %v13435_v30  ;;  %v13571_v30 = vld [vmem:[#allocation13 + $0x5a0] ss:$16 sps:$4 sm:$0xff]  }
 0x62e   :  { %10631 = vmatmul.mubr.bf16.vlgmr.msra.gmra.mrb[32].mxu0 %v15090_v43 }
 0x62f   :  { %10640 = vmatpush1.bf16.msra.mxu0 %v13493_v41  ;;  %v13472_v41 = vld [vmem:[#allocation13 + $0x1e8] ss:$16 sps:$4 sm:$0xff]  }
 0x630   :  { %10726 = vmatpush1.bf16.msra.mxu1 %v13433_v59  ;;  %10641 = vmatprep.subr.bf16.mxu0 %v13501_v36  ;;  %v13579_v59 = vld [vmem:[#allocation13 + $0x5c4] ss:$16 sps:$4 sm:$0xff]   ;;  %v13477_v36 = vld [vmem:[#allocation13 + $0x20c] ss:$16 sps:$4 sm:$0xff]  }
 0x631   :  { %10727 = vmatprep.subr.bf16.mxu1 %v13438_v38  ;;  %v13577_v38 = vld [vmem:[#allocation13 + $0x5c0] ss:$16 sps:$4 sm:$0xff]  }
 0x633   :  { %10642 = vmatpush1.bf16.msra.mxu0 %v13499_v25  ;;  %v13475_v25 = vld [vmem:[#allocation13 + $0x208] ss:$16 sps:$4 sm:$0xff]  }
 0x634   :  { %10728 = vmatpush1.bf16.msra.mxu1 %v13436_v57  ;;  %10643 = vmatprep.subr.bf16.mxu0 %v13507_v51  ;;  %v13480_v57 = vld [vmem:[#allocation13 + $0x22c] ss:$16 sps:$4 sm:$0xff]   ;;  %v13585_v51 = vld [vmem:[#allocation13 + $0x5e4] ss:$16 sps:$4 sm:$0xff]  }
 0x635   :  { %10729 = vmatprep.subr.bf16.mxu1 %v13441_v23  ;;  %v13583_v23 = vld [vmem:[#allocation13 + $0x5e0] ss:$16 sps:$4 sm:$0xff]  }
 0x637   :  { %10644 = vmatpush1.bf16.msra.mxu0 %v13505_v44  ;;  %v13478_v44 = vld [vmem:[#allocation13 + $0x228] ss:$16 sps:$4 sm:$0xff]  }
 0x638   :  { %10730 = vmatpush1.bf16.msra.mxu1 %v13439_v8  ;;  %10645 = vmatprep.subr.bf16.mxu0 %v13513_v54  ;;  %v13621_v8 = vld [vmem:[#allocation13 + $0x604] ss:$16 sps:$4 sm:$0xff]   ;;  %v13483_v54 = vld [vmem:[#allocation13 + $0x24c] ss:$16 sps:$4 sm:$0xff]  }
 0x639   :  { %10731 = vmatprep.subr.bf16.mxu1 %v13444_v26  ;;  %v13481_v26 = vld [vmem:[#allocation13 + $0x248] ss:$16 sps:$4 sm:$0xff]  }
 0x63b   :  { %10646 = vmatpush1.bf16.msra.mxu0 %v13511_v29  ;;  %v13486_v29 = vld [vmem:[#allocation13 + $0x26c] ss:$16 sps:$4 sm:$0xff]  }
 0x63c   :  { %10732 = vmatpush1.bf16.msra.mxu1 %v13442_v50  ;;  %10647 = vmatprep.subr.bf16.mxu0 %v13519_v18  ;;  %v13484_v50 = vld [vmem:[#allocation13 + $0x268] ss:$16 sps:$4 sm:$0xff]  }
 0x63d   :  { %10733 = vmatprep.subr.bf16.mxu1 %v13447_v28  ;;  %v13487_v18 = vld [vmem:[#allocation13 + $0x288] ss:$16 sps:$4 sm:$0xff]   ;;  %v13492_v28 = vld [vmem:[#allocation13 + $0x2ac] ss:$16 sps:$4 sm:$0xff]  }
 0x63f   :  { %10648 = vmatpush1.bf16.msra.mxu0 %v13517_v17  ;;  %v13498_v17 = vld [vmem:[#allocation13 + $0x2cc] ss:$16 sps:$4 sm:$0xff]  }
 0x640   :  { %10734 = vmatpush1.bf16.msra.mxu1 %v13445_v31  ;;  %10649 = vmatprep.subr.bf16.mxu0 %v13525_v53  ;;  %v13496_v31 = vld [vmem:[#allocation13 + $0x2c8] ss:$16 sps:$4 sm:$0xff]   ;;  %v13504_v53 = vld [vmem:[#allocation13 + $0x2ec] ss:$16 sps:$4 sm:$0xff]  }
 0x641   :  { %10735 = vmatprep.subr.bf16.mxu1 %v13450_v27  ;;  %v13502_v27 = vld [vmem:[#allocation13 + $0x2e8] ss:$16 sps:$4 sm:$0xff]  }
 0x643   :  { %10650 = vmatpush1.bf16.msra.mxu0 %v13523_v63 }
 0x644   :  { %10736 = vmatpush1.bf16.msra.mxu1 %v13448_v21  ;;  %10651 = vmatprep.subr.bf16.mxu0 %v13531_v4  ;;  %v13510_v21 = vld [vmem:[#allocation13 + $0x30c] ss:$16 sps:$4 sm:$0xff]  }
 0x645   :  { %10737 = vmatprep.subr.bf16.mxu1 %v13453_v15 }
 0x647   :  { %10652 = vmatpush1.bf16.msra.mxu0 %v13529_v61 }
 0x648   :  { %10738 = vmatpush1.bf16.msra.mxu1 %v13451_v34  ;;  %10653 = vmatprep.subr.bf16.mxu0 %v13537_v14 }
 0x649   :  { %10739 = vmatprep.subr.bf16.mxu1 %v13456_v55 }
 0x64b   :  { %10654 = vmatpush1.bf16.msra.mxu0 %v13535_v19  ;;  %v13508_v19 = vld [vmem:[#allocation13 + $0x308] ss:$16 sps:$4 sm:$0xff]  }
 0x64c   :  { %10740 = vmatpush1.bf16.msra.mxu1 %v13454_v1  ;;  %10655 = vmatprep.subr.bf16.mxu0 %v13543_v46  ;;  %v13516_v46 = vld [vmem:[#allocation13 + $0x32c] ss:$16 sps:$4 sm:$0xff]  }
 0x64d   :  { %10741 = vmatprep.subr.bf16.mxu1 %v13459_v10 }
 0x64f   :  { %10656 = vmatpush1.bf16.msra.mxu0 %v13541_v0 }
 0x650   :  { %10742 = vmatpush1.bf16.msra.mxu1 %v13457_v16  ;;  %10657 = vmatprep.subr.bf16.mxu0 %v13549_v5  ;;  %v13514_v5 = vld [vmem:[#allocation13 + $0x328] ss:$16 sps:$4 sm:$0xff]  }
 0x651   :  { %10743 = vmatprep.subr.bf16.mxu1 %v13462_v12 }
 0x653   :  { %10658 = vmatpush1.bf16.msra.mxu0 %v13547_v24  ;;  %v13522_v24 = vld [vmem:[#allocation13 + $0x34c] ss:$16 sps:$4 sm:$0xff]  }
 0x654   :  { %10744 = vmatpush1.bf16.msra.mxu1 %v13460_v7  ;;  %10659 = vmatprep.subr.bf16.mxu0 %v13555_v2 }
 0x655   :  { %10745 = vmatprep.subr.bf16.mxu1 %v13465_v58 }
 0x657   :  { %10660 = vmatpush1.bf16.msra.mxu0 %v13553_v47  ;;  %v13520_v47 = vld [vmem:[#allocation13 + $0x348] ss:$16 sps:$4 sm:$0xff]  }
 0x658   :  { %10746 = vmatpush1.bf16.msra.mxu1 %v13463_v52  ;;  %10661 = vmatprep.subr.bf16.mxu0 %v13561_v40  ;;  %v13528_v40 = vld [vmem:[#allocation13 + $0x36c] ss:$16 sps:$4 sm:$0xff]  }
 0x659   :  { %10747 = vmatprep.subr.bf16.mxu1 %v13468_v33 }
 0x65b   :  { %10662 = vmatpush1.bf16.msra.mxu0 %v13559_v60 }
 0x65c   :  { %10748 = vmatpush1.bf16.msra.mxu1 %v13466_v22  ;;  %10663 = vmatprep.subr.bf16.mxu0 %v13567_v35  ;;  %v13526_v35 = vld [vmem:[#allocation13 + $0x368] ss:$16 sps:$4 sm:$0xff]  }
 0x65d   :  { %10749 = vmatprep.subr.bf16.mxu1 %v13471_v42 }
 0x65f   :  { %10664 = vmatpush1.bf16.msra.mxu0 %v13565_v39  ;;  %v13534_v39 = vld [vmem:[#allocation13 + $0x38c] ss:$16 sps:$4 sm:$0xff]  }
 0x660   :  { %10750 = vmatpush1.bf16.msra.mxu1 %v13469_v56  ;;  %10665 = vmatprep.subr.bf16.mxu0 %v13573_v9 }
 0x661   :  { %10751 = vmatprep.subr.bf16.mxu1 %v13474_v49 }
 0x663   :  { %10666 = vmatpush1.bf16.msra.mxu0 %v13571_v30  ;;  %v13532_v30 = vld [vmem:[#allocation13 + $0x388] ss:$16 sps:$4 sm:$0xff]  }
 0x664   :  { %10752 = vmatpush1.bf16.msra.mxu1 %v13472_v41  ;;  %10667 = vmatprep.subr.bf16.mxu0 %v13579_v59  ;;  %v13540_v59 = vld [vmem:[#allocation13 + $0x3ac] ss:$16 sps:$4 sm:$0xff]  }
 0x665   :  { %10762 = vmatprep.subr.bf16.mxu1 %v13477_v36 }
 0x667   :  { %10754 = vmatmul.mubr.bf16.vlgmr.msra.gmra.mrb[20].mxu1 %v15077_v37  ;;  %10668 = vmatpush1.bf16.msra.mxu0 %v13577_v38  ;;  %v13489_v37 = vld [vmem:[#allocation13 + $0x28c] ss:$16 sps:$4 sm:$0xff]  }
 0x668   :  { %10763 = vmatpush1.bf16.msra.mxu1 %v13475_v25  ;;  %10794 = vmatprep.mubr.bf16.mxu1 %v15079_v48  ;;  %v13490_v48 = vld [vmem:[#allocation13 + $0x2a8] ss:$16 sps:$4 sm:$0xff]  }
 0x669   :  { %10764 = vmatprep.subr.bf16.mxu1 %v13480_v57  ;;  %10669 = vmatprep.subr.bf16.mxu0 %v13585_v51  ;;  %v13538_v57 = vld [vmem:[#allocation13 + $0x3a8] ss:$16 sps:$4 sm:$0xff]  }
 0x66b   :  { %10670 = vmatpush1.bf16.msra.mxu0 %v13583_v23  ;;  %v13546_v23 = vld [vmem:[#allocation13 + $0x3cc] ss:$16 sps:$4 sm:$0xff]  }
 0x66c   :  { %10765 = vmatpush1.bf16.msra.mxu1 %v13478_v44  ;;  %10680 = vmatprep.subr.bf16.mxu0 %v13621_v8 }
 0x66d   :  { %10766 = vmatprep.subr.bf16.mxu1 %v13483_v54 }
 0x670   :  { %10767 = vmatpush1.bf16.msra.mxu1 %v13481_v26  ;;  %v13544_v26 = vld [vmem:[#allocation13 + $0x3c8] ss:$16 sps:$4 sm:$0xff]  }
 0x671   :  { %10768 = vmatprep.subr.bf16.mxu1 %v13486_v29 }
 0x674   :  { %10769 = vmatpush1.bf16.msra.mxu1 %v13484_v50  ;;  %v13552_v50 = vld [vmem:[#allocation13 + $0x3ec] ss:$16 sps:$4 sm:$0xff]  }
 0x675   :  { %10770 = vmatprep.subr.bf16.mxu1 %v13489_v37 }
 0x678   :  { %10771 = vmatpush1.bf16.msra.mxu1 %v13487_v18 }
 0x679   :  { %10772 = vmatprep.subr.bf16.mxu1 %v13492_v28 }
 0x67c   :  { %10773 = vmatpush1.bf16.msra.mxu1 %v13490_v48  ;;  %v13550_v48 = vld [vmem:[#allocation13 + $0x3e8] ss:$16 sps:$4 sm:$0xff]  }
 0x67d   :  { %10774 = vmatprep.subr.bf16.mxu1 %v13498_v17 }
 0x680   :  { %10775 = vmatpush1.bf16.msra.mxu1 %v13496_v31  ;;  %v13558_v31 = vld [vmem:[#allocation13 + $0x40c] ss:$16 sps:$4 sm:$0xff]  }
 0x681   :  { %v8418_v63 = vpop.f32.mrb[28].mxu0  ;;  %10776 = vmatprep.subr.bf16.mxu1 %v13504_v53 }
 0x682   :  { %v8777_v4 = vrot.slane %v8418_v63, 4  ;;  %v8420_v15 = vpop.f32.mrb[29].mxu0 }
 0x683   :  { %v8783_v61 = vrot.slane %v8420_v15, 4  ;;  %v8422_v34 = vpop.f32.mrb[30].mxu0 }
 0x684   :  { %v8778_v14 = vadd.f32 %v8777_v4, %v8418_v63  ;;  %10777 = vmatpush1.bf16.msra.mxu1 %v13502_v27  ;;  %v8423_v55 = vpop.f32.mrb[31].mxu0  ;;  %v13562_v4 = vld [vmem:[#allocation13 + $0x428] ss:$16 sps:$4 sm:$0xff]   ;;  %v15096_v34 = vld [vmem:[#allocation10] sm:$0xff] }
 0x685   :  { %v8784_v1 = vadd.f32 %v8783_v61, %v8420_v15  ;;  %10778 = vmatprep.subr.bf16.mxu1 %v13510_v21  ;;  %v13564_v21 = vld [vmem:[#allocation13 + $0x42c] ss:$16 sps:$4 sm:$0xff]   ;;  %v13568_v61 = vld [vmem:[#allocation13 + $0x448] ss:$16 sps:$4 sm:$0xff]  }
 0x686   :  { %v8779_v10 = vrot.slane %v8778_v14, 2  ;;  %v13576_v55 = vld [vmem:[#allocation13 + $0x46c] ss:$16 sps:$4 sm:$0xff]  }
 0x687   :  { %v8785_v0 = vrot.slane %v8784_v1, 2 }
 0x688   :  { %v8780_v16 = vadd.f32 %v8779_v10, %v8778_v14  ;;  %10779 = vmatpush1.bf16.msra.mxu1 %v13508_v19  ;;  %v8926_v14 = vrot.slane %v15096_v34, %v14720_v62 }
 0x689   :  { %v8786_v12 = vadd.f32 %v8785_v0, %v8784_v1  ;;  %10780 = vmatprep.subr.bf16.mxu1 %v13516_v46  ;;  %v8930_v1 = vrot.slane %v15096_v34, %v14656_v6 }
 0x68a   :  { %v8781_v7 = vrot.slane %v8780_v16, 1 }
 0x68b   :  { %v8787_v2 = vrot.slane %v8786_v12, 1 }
 0x68c   :  { %v8782_v58 = vadd.f32 %v8781_v7, %v8780_v16  ;;  %10781 = vmatpush1.bf16.msra.mxu1 %v13514_v5  ;;  %v13574_v5 = vld [vmem:[#allocation13 + $0x468] ss:$16 sps:$4 sm:$0xff]   ;;  %v13582_v7 = vld [vmem:[#allocation13 + $0x48c] ss:$16 sps:$4 sm:$0xff]  }
 0x68d   :  { %v8788_v52 = vadd.f32 %v8787_v2, %v8786_v12  ;;  %10782 = vmatprep.subr.bf16.mxu1 %v13522_v24 }
 0x68e   :  { %v8805_v33 = vmul.f32 0.125, %v8782_v58 }
 0x68f   :  { %v8806_v60 = vmul.f32 0.125, %v8788_v52 }
 0x690   :  { %v8813_v22 = vsub.f32 %v8418_v63, %v8805_v33  ;;  %10783 = vmatpush1.bf16.msra.mxu1 %v13520_v47  ;;  %v13556_v63 = vld [vmem:[#allocation13 + $0x408] ss:$16 sps:$4 sm:$0xff]  }
 0x691   :  { %v8814_v42 = vsub.f32 %v8420_v15, %v8806_v60  ;;  %10784 = vmatprep.subr.bf16.mxu1 %v13528_v40  ;;  %v13570_v15 = vld [vmem:[#allocation13 + $0x44c] ss:$16 sps:$4 sm:$0xff]   ;;  %v13580_v47 = vld [vmem:[#allocation13 + $0x488] ss:$16 sps:$4 sm:$0xff]  }
 0x692   :  { %v8821_v56 = vmul.f32 %v8813_v22, %v8813_v22  ;;  %v13588_v40 = vld [vmem:[#allocation13 + $0x4ac] ss:$16 sps:$4 sm:$0xff]  }
 0x693   :  { %v8822_v9 = vmul.f32 %v8814_v42, %v8814_v42 }
 0x694   :  { %v8849_v49 = vrot.slane %v8821_v56, 4  ;;  %10785 = vmatpush1.bf16.msra.mxu1 %v13526_v35  ;;  %v13619_v35 = vld [vmem:[#allocation13 + $0x600] ss:$16 sps:$4 sm:$0xff]  }
 0x695   :  { %v8855_v41 = vrot.slane %v8822_v9, 4  ;;  %10786 = vmatprep.subr.bf16.mxu1 %v13534_v39  ;;  %v13627_v39 = vld [vmem:[#allocation13 + $0x624] ss:$16 sps:$4 sm:$0xff]  }
 0x696   :  { %v8850_v36 = vadd.f32 %v8849_v49, %v8821_v56  ;;  %v13589_v56 = vld [vmem:[#allocation13 + $0x4c8] ss:$16 sps:$4 sm:$0xff]   ;;  %v13594_v49 = vld [vmem:[#allocation13 + $0x4ec] ss:$16 sps:$4 sm:$0xff]  }
 0x697   :  { %v8856_v38 = vadd.f32 %v8855_v41, %v8822_v9  ;;  %v13625_v9 = vld [vmem:[#allocation13 + $0x620] ss:$16 sps:$4 sm:$0xff]   ;;  %v13592_v41 = vld [vmem:[#allocation13 + $0x4e8] ss:$16 sps:$4 sm:$0xff]  }
 0x698   :  { %v8851_v25 = vrot.slane %v8850_v36, 2  ;;  %10787 = vmatpush1.bf16.msra.mxu1 %v13532_v30  ;;  %v13633_v30 = vld [vmem:[#allocation13 + $0x644] ss:$16 sps:$4 sm:$0xff]  }
 0x699   :  { %v8857_v51 = vrot.slane %v8856_v38, 2  ;;  %10788 = vmatprep.subr.bf16.mxu1 %v13540_v59  ;;  %v13631_v59 = vld [vmem:[#allocation13 + $0x640] ss:$16 sps:$4 sm:$0xff]  }
 0x69a   :  { %v8852_v44 = vadd.f32 %v8851_v25, %v8850_v36  ;;  %v13597_v36 = vld [vmem:[#allocation13 + $0x50c] ss:$16 sps:$4 sm:$0xff]   ;;  %v13595_v25 = vld [vmem:[#allocation13 + $0x508] ss:$16 sps:$4 sm:$0xff]  }
 0x69b   :  { %v8858_v8 = vadd.f32 %v8857_v51, %v8856_v38  ;;  %v13639_v38 = vld [vmem:[#allocation13 + $0x664] ss:$16 sps:$4 sm:$0xff]   ;;  %v13600_v51 = vld [vmem:[#allocation13 + $0x52c] ss:$16 sps:$4 sm:$0xff]  }
 0x69c   :  { %v8853_v54 = vrot.slane %v8852_v44, 1  ;;  %10789 = vmatpush1.bf16.msra.mxu1 %v13538_v57  ;;  %v13637_v57 = vld [vmem:[#allocation13 + $0x660] ss:$16 sps:$4 sm:$0xff]  }
 0x69d   :  { %v8859_v29 = vrot.slane %v8858_v8, 1  ;;  %10790 = vmatprep.subr.bf16.mxu1 %v13546_v23  ;;  %v13645_v23 = vld [vmem:[#allocation13 + $0x684] ss:$16 sps:$4 sm:$0xff]  }
 0x69e   :  { %v8854_v37 = vadd.f32 %v8853_v54, %v8852_v44  ;;  %v13598_v44 = vld [vmem:[#allocation13 + $0x528] ss:$16 sps:$4 sm:$0xff]   ;;  %v13603_v54 = vld [vmem:[#allocation13 + $0x54c] ss:$16 sps:$4 sm:$0xff]  }
 0x69f   :  { %v8860_v18 = vadd.f32 %v8859_v29, %v8858_v8  ;;  %v13643_v8 = vld [vmem:[#allocation13 + $0x680] ss:$16 sps:$4 sm:$0xff]   ;;  %v13601_v29 = vld [vmem:[#allocation13 + $0x548] ss:$16 sps:$4 sm:$0xff]  }
 0x6a0   :  { %v8877_v28 = vmul.f32 0.125, %v8854_v37  ;;  %10791 = vmatpush1.bf16.msra.mxu1 %v13544_v26  ;;  %v13651_v26 = vld [vmem:[#allocation13 + $0x6a4] ss:$16 sps:$4 sm:$0xff]   ;;  %v13606_v37 = vld [vmem:[#allocation13 + $0x56c] ss:$16 sps:$4 sm:$0xff]  }
 0x6a1   :  { %v8878_v17 = vmul.f32 0.125, %v8860_v18  ;;  %10792 = vmatprep.subr.bf16.mxu1 %v13552_v50  ;;  %v13649_v50 = vld [vmem:[#allocation13 + $0x6a0] ss:$16 sps:$4 sm:$0xff]   ;;  %v13657_v18 = vld [vmem:[#allocation13 + $0x6c4] ss:$16 sps:$4 sm:$0xff]  }
 0x6a2   :  { %v8885_v53 = vadd.f32 1e-05, %v8877_v28  ;;  %v13604_v28 = vld [vmem:[#allocation13 + $0x568] ss:$16 sps:$4 sm:$0xff]  }
 0x6a3   :  { %v8886_v27 = vadd.f32 1e-05, %v8878_v17  ;;  %v13609_v17 = vld [vmem:[#allocation13 + $0x58c] ss:$16 sps:$4 sm:$0xff]  }
 0x6a4   :  { %13867 = vrsqrt.f32 %v8885_v53  ;;  %10793 = vmatpush1.bf16.msra.mxu1 %v13550_v48  ;;  %v13655_v48 = vld [vmem:[#allocation13 + $0x6c0] ss:$16 sps:$4 sm:$0xff]   ;;  %v13607_v53 = vld [vmem:[#allocation13 + $0x588] ss:$16 sps:$4 sm:$0xff]  }
 0x6a5   :  { %13869 = vrsqrt.f32 %v8886_v27  ;;  %10803 = vmatprep.subr.bf16.mxu1 %v13558_v31  ;;  %v13663_v31 = vld [vmem:[#allocation13 + $0x6e4] ss:$16 sps:$4 sm:$0xff]   ;;  %v13661_v27 = vld [vmem:[#allocation13 + $0x6e0] ss:$16 sps:$4 sm:$0xff]  }
 0x6a7   :  { %10795 = vmatmul.mubr.bf16.vlgmr.msra.gmra.mrb[20].mxu1 %v15090_v43  ;;  %v15102_v43 = vld [vmem:[#allocation12] sm:$0xff] }
 0x6a8   :  { %10804 = vmatpush1.bf16.msra.mxu1 %v13556_v63  ;;  %v8976_v0 = vrot.slane %v15102_v43, %v14720_v62  ;;  %v8980_v12 = vrot.slane %v15102_v43, %v14656_v6  ;;  %v13591_v6 = vld [vmem:[#allocation13 + $0x4cc] ss:$16 sps:$4 sm:$0xff]  }
 0x6a9   :  { %10805 = vmatprep.subr.bf16.mxu1 %v13564_v21  ;;  %v13612_v63 = vld [vmem:[#allocation13 + $0x5ac] ss:$16 sps:$4 sm:$0xff]   ;;  %v13669_v21 = vld [vmem:[#allocation13 + $0x704] ss:$16 sps:$4 sm:$0xff]  }
 0x6ac   :  { %10806 = vmatpush1.bf16.msra.mxu1 %v13562_v4  ;;  %v13610_v4 = vld [vmem:[#allocation13 + $0x5a8] ss:$16 sps:$4 sm:$0xff]  }
 0x6ad   :  { %10807 = vmatprep.subr.bf16.mxu1 %v13570_v15  ;;  %v13667_v15 = vld [vmem:[#allocation13 + $0x700] ss:$16 sps:$4 sm:$0xff]  }
 0x6ae   :  { %v13868_v19 = vpop.eup %13867 }
 0x6af   :  { %v13870_v46 = vpop.eup %13869  ;;  %v8901_v10 = vmul.f32 %v13868_v19, %v8813_v22  ;;  %v13586_v22 = vld [vmem:[#allocation13 + $0x4a8] ss:$16 sps:$4 sm:$0xff]   ;;  %v13673_v19 = vld [vmem:[#allocation13 + $0x720] ss:$16 sps:$4 sm:$0xff]  }
 0x6b0   :  { %v8902_v16 = vmul.f32 %v13870_v46, %v8814_v42  ;;  %10808 = vmatpush1.bf16.msra.mxu1 %v13568_v61  ;;  %v13615_v61 = vld [vmem:[#allocation13 + $0x5cc] ss:$16 sps:$4 sm:$0xff]   ;;  %v13681_v46 = vld [vmem:[#allocation13 + $0x744] ss:$16 sps:$4 sm:$0xff]  }
 0x6b1   :  { %v8951_v24 = vmul.f32 %v8926_v14, %v8901_v10  ;;  %10809 = vmatprep.subr.bf16.mxu1 %v13576_v55  ;;  %v13675_v14 = vld [vmem:[#allocation13 + $0x724] ss:$16 sps:$4 sm:$0xff]   ;;  %v13613_v55 = vld [vmem:[#allocation13 + $0x5c8] ss:$16 sps:$4 sm:$0xff]  }
 0x6b2   :  { %v8952_v2 = vmul.f32 %v8930_v1, %v8902_v16  ;;  %v13618_v1 = vld [vmem:[#allocation13 + $0x5ec] ss:$16 sps:$4 sm:$0xff]   ;;  %v13616_v10 = vld [vmem:[#allocation13 + $0x5e8] ss:$16 sps:$4 sm:$0xff]  }
 0x6b3   :  { %v9001_v58 = vadd.f32 %v8976_v0, %v8951_v24  ;;  %v13679_v0 = vld [vmem:[#allocation13 + $0x740] ss:$16 sps:$4 sm:$0xff]   ;;  %v13624_v16 = vld [vmem:[#allocation13 + $0x60c] ss:$16 sps:$4 sm:$0xff]  }
 0x6b4   :  { %10810 = vmatpush1.bf16.msra.mxu1 %v13574_v5  ;;  %v9002_v52 = vadd.f32 %v8980_v12, %v8952_v2  ;;  %v13687_v5 = vld [vmem:[#allocation13 + $0x764] ss:$16 sps:$4 sm:$0xff]   ;;  %v13622_v12 = vld [vmem:[#allocation13 + $0x608] ss:$16 sps:$4 sm:$0xff]   ;;  %v13685_v24 = vld [vmem:[#allocation13 + $0x760] ss:$16 sps:$4 sm:$0xff]  }
 0x6b5   :  { %10811 = vmatprep.subr.bf16.mxu1 %v13582_v7  ;;  %v9009_v33 = vmax.f32 %v9001_v58, 0.0  ;;  %v13630_v7 = vld [vmem:[#allocation13 + $0x62c] ss:$16 sps:$4 sm:$0xff]   ;;  %v13693_v2 = vld [vmem:[#allocation13 + $0x784] ss:$16 sps:$4 sm:$0xff]  }
 0x6b6   :  { %v9010_v60 = vmax.f32 %v9002_v52, 0.0  ;;  %v13628_v58 = vld [vmem:[#allocation13 + $0x628] ss:$16 sps:$4 sm:$0xff]   ;;  %v13636_v52 = vld [vmem:[#allocation13 + $0x64c] ss:$16 sps:$4 sm:$0xff]  }
 0x6b7   :  { %v15108_v42 = vpack.c.bf16 %v9009_v33, %v9009_v33  ;;  %v13634_v33 = vld [vmem:[#allocation13 + $0x648] ss:$16 sps:$4 sm:$0xff]  }
 0x6b8   :  { %10812 = vmatpush1.bf16.msra.mxu1 %v13580_v47  ;;  %v9018_v62 = vpack.c.bf16 %v9010_v60, %v9010_v60  ;;  %v13691_v47 = vld [vmem:[#allocation13 + $0x780] ss:$16 sps:$4 sm:$0xff]  }
 0x6b9   :  { %10813 = vmatprep.subr.bf16.mxu1 %v13588_v40  ;;  %v13699_v40 = vld [vmem:[#allocation13 + $0x7a4] ss:$16 sps:$4 sm:$0xff]   ;;  %v13697_v60 = vld [vmem:[#allocation13 + $0x7a0] ss:$16 sps:$4 sm:$0xff]  }
 0x6ba   :  { %10671 = vmatprep.mubr.bf16.mxu0 %v9018_v62  ;;  %10835 = vmatprep.mubr.bf16.mxu1 %v9018_v62  ;;  %v13642_v62 = vld [vmem:[#allocation13 + $0x66c] ss:$16 sps:$4 sm:$0xff]  }
 0x6bb   :  { %10672 = vmatmul.mubr.bf16.vlgmr.msra.gmra.mrb[32].mxu0 %v15108_v42 }
 0x6bc   :  { %10814 = vmatpush1.bf16.msra.mxu1 %v13586_v22  ;;  %10681 = vmatpush1.bf16.msra.mxu0 %v13619_v35  ;;  %v13705_v22 = vld [vmem:[#allocation13 + $0x7c4] ss:$16 sps:$4 sm:$0xff]   ;;  %v13640_v35 = vld [vmem:[#allocation13 + $0x668] ss:$16 sps:$4 sm:$0xff]  }
 0x6bd   :  { %10815 = vmatprep.subr.bf16.mxu1 %v13591_v6  ;;  %10682 = vmatprep.subr.bf16.mxu0 %v13627_v39  ;;  %v13648_v6 = vld [vmem:[#allocation13 + $0x68c] ss:$16 sps:$4 sm:$0xff]   ;;  %v13711_v39 = vld [vmem:[#allocation13 + $0x7e4] ss:$16 sps:$4 sm:$0xff]  }
 0x6c0   :  { %10816 = vmatpush1.bf16.msra.mxu1 %v13589_v56  ;;  %10683 = vmatpush1.bf16.msra.mxu0 %v13625_v9  ;;  %v13646_v56 = vld [vmem:[#allocation13 + $0x688] ss:$16 sps:$4 sm:$0xff]   ;;  %v13709_v9 = vld [vmem:[#allocation13 + $0x7e0] ss:$16 sps:$4 sm:$0xff]  }
 0x6c1   :  { %10817 = vmatprep.subr.bf16.mxu1 %v13594_v49  ;;  %10684 = vmatprep.subr.bf16.mxu0 %v13633_v30  ;;  %v13654_v49 = vld [vmem:[#allocation13 + $0x6ac] ss:$16 sps:$4 sm:$0xff]  }
 0x6c2   :  { %v13717_v30 = vld [vmem:[#allocation18 + $0x4] ss:$8 sps:$4 sm:$0xff]  }
 0x6c4   :  { %10818 = vmatpush1.bf16.msra.mxu1 %v13592_v41  ;;  %10685 = vmatpush1.bf16.msra.mxu0 %v13631_v59  ;;  %v13652_v41 = vld [vmem:[#allocation13 + $0x6a8] ss:$16 sps:$4 sm:$0xff]   ;;  %v13660_v59 = vld [vmem:[#allocation13 + $0x6cc] ss:$16 sps:$4 sm:$0xff]  }
 0x6c5   :  { %10819 = vmatprep.subr.bf16.mxu1 %v13597_v36  ;;  %10686 = vmatprep.subr.bf16.mxu0 %v13639_v38 }
 0x6c8   :  { %10820 = vmatpush1.bf16.msra.mxu1 %v13595_v25  ;;  %10687 = vmatpush1.bf16.msra.mxu0 %v13637_v57 }
 0x6c9   :  { %10821 = vmatprep.subr.bf16.mxu1 %v13600_v51  ;;  %10688 = vmatprep.subr.bf16.mxu0 %v13645_v23  ;;  %v13658_v23 = vld [vmem:[#allocation13 + $0x6c8] ss:$16 sps:$4 sm:$0xff]  }
 0x6cc   :  { %10822 = vmatpush1.bf16.msra.mxu1 %v13598_v44  ;;  %10689 = vmatpush1.bf16.msra.mxu0 %v13643_v8 }
 0x6cd   :  { %10823 = vmatprep.subr.bf16.mxu1 %v13603_v54  ;;  %10690 = vmatprep.subr.bf16.mxu0 %v13651_v26  ;;  %v13666_v54 = vld [vmem:[#allocation13 + $0x6ec] ss:$16 sps:$4 sm:$0xff]  }
 0x6d0   :  { %10824 = vmatpush1.bf16.msra.mxu1 %v13601_v29  ;;  %10691 = vmatpush1.bf16.msra.mxu0 %v13649_v50 }
 0x6d1   :  { %10825 = vmatprep.subr.bf16.mxu1 %v13606_v37  ;;  %10692 = vmatprep.subr.bf16.mxu0 %v13657_v18  ;;  %v13664_v37 = vld [vmem:[#allocation13 + $0x6e8] ss:$16 sps:$4 sm:$0xff]  }
 0x6d4   :  { %10826 = vmatpush1.bf16.msra.mxu1 %v13604_v28  ;;  %10693 = vmatpush1.bf16.msra.mxu0 %v13655_v48  ;;  %v13672_v28 = vld [vmem:[#allocation13 + $0x70c] ss:$16 sps:$4 sm:$0xff]  }
 0x6d5   :  { %10827 = vmatprep.subr.bf16.mxu1 %v13609_v17  ;;  %10694 = vmatprep.subr.bf16.mxu0 %v13663_v31 }
 0x6d8   :  { %10828 = vmatpush1.bf16.msra.mxu1 %v13607_v53  ;;  %10695 = vmatpush1.bf16.msra.mxu0 %v13661_v27  ;;  %v13670_v53 = vld [vmem:[#allocation13 + $0x708] ss:$16 sps:$4 sm:$0xff]  }
 0x6d9   :  { %10829 = vmatprep.subr.bf16.mxu1 %v13612_v63  ;;  %10696 = vmatprep.subr.bf16.mxu0 %v13669_v21  ;;  %v13678_v63 = vld [vmem:[#allocation13 + $0x72c] ss:$16 sps:$4 sm:$0xff]  }
 0x6dc   :  { %10830 = vmatpush1.bf16.msra.mxu1 %v13610_v4  ;;  %10697 = vmatpush1.bf16.msra.mxu0 %v13667_v15 }
 0x6dd   :  { %10831 = vmatprep.subr.bf16.mxu1 %v13615_v61  ;;  %10698 = vmatprep.subr.bf16.mxu0 %v13675_v14  ;;  %v13676_v61 = vld [vmem:[#allocation13 + $0x728] ss:$16 sps:$4 sm:$0xff]  }
 0x6e0   :  { %10832 = vmatpush1.bf16.msra.mxu1 %v13613_v55  ;;  %10699 = vmatpush1.bf16.msra.mxu0 %v13673_v19  ;;  %v13684_v55 = vld [vmem:[#allocation13 + $0x74c] ss:$16 sps:$4 sm:$0xff]  }
 0x6e1   :  { %10833 = vmatprep.subr.bf16.mxu1 %v13618_v1  ;;  %10700 = vmatprep.subr.bf16.mxu0 %v13681_v46 }
 0x6e4   :  { %10834 = vmatpush1.bf16.msra.mxu1 %v13616_v10  ;;  %10701 = vmatpush1.bf16.msra.mxu0 %v13679_v0  ;;  %v13682_v10 = vld [vmem:[#allocation13 + $0x748] ss:$16 sps:$4 sm:$0xff]  }
 0x6e5   :  { %10844 = vmatprep.subr.bf16.mxu1 %v13624_v16  ;;  %10702 = vmatprep.subr.bf16.mxu0 %v13687_v5  ;;  %v13690_v16 = vld [vmem:[#allocation13 + $0x76c] ss:$16 sps:$4 sm:$0xff]  }
 0x6e7   :  { %10836 = vmatmul.mubr.bf16.vlgmr.msra.gmra.mrb[20].mxu1 %v15108_v42  ;;  %v13703_v42 = vld [vmem:[#allocation13 + $0x7c0] ss:$16 sps:$4 sm:$0xff]  }
 0x6e8   :  { %10845 = vmatpush1.bf16.msra.mxu1 %v13622_v12  ;;  %10703 = vmatpush1.bf16.msra.mxu0 %v13685_v24 }
 0x6e9   :  { %10846 = vmatprep.subr.bf16.mxu1 %v13630_v7  ;;  %10704 = vmatprep.subr.bf16.mxu0 %v13693_v2  ;;  %v13688_v7 = vld [vmem:[#allocation13 + $0x768] ss:$16 sps:$4 sm:$0xff]  }
 0x6ec   :  { %10847 = vmatpush1.bf16.msra.mxu1 %v13628_v58  ;;  %10705 = vmatpush1.bf16.msra.mxu0 %v13691_v47  ;;  %v13696_v58 = vld [vmem:[#allocation13 + $0x78c] ss:$16 sps:$4 sm:$0xff]  }
 0x6ed   :  { %10848 = vmatprep.subr.bf16.mxu1 %v13636_v52  ;;  %10706 = vmatprep.subr.bf16.mxu0 %v13699_v40 }
 0x6f0   :  { %10849 = vmatpush1.bf16.msra.mxu1 %v13634_v33  ;;  %10707 = vmatpush1.bf16.msra.mxu0 %v13697_v60  ;;  %v13694_v33 = vld [vmem:[#allocation13 + $0x788] ss:$16 sps:$4 sm:$0xff]  }
 0x6f1   :  { %10850 = vmatprep.subr.bf16.mxu1 %v13642_v62  ;;  %10708 = vmatprep.subr.bf16.mxu0 %v13705_v22  ;;  %v13702_v62 = vld [vmem:[#allocation13 + $0x7ac] ss:$16 sps:$4 sm:$0xff]  }
 0x6f4   :  { %10851 = vmatpush1.bf16.msra.mxu1 %v13640_v35  ;;  %10709 = vmatpush1.bf16.msra.mxu0 %v13703_v42 }
 0x6f5   :  { %10852 = vmatprep.subr.bf16.mxu1 %v13648_v6  ;;  %10710 = vmatprep.subr.bf16.mxu0 %v13711_v39  ;;  %v13700_v6 = vld [vmem:[#allocation13 + $0x7a8] ss:$16 sps:$4 sm:$0xff]  }
 0x6f8   :  { %10853 = vmatpush1.bf16.msra.mxu1 %v13646_v56  ;;  %10711 = vmatpush1.bf16.msra.mxu0 %v13709_v9  ;;  %v13708_v56 = vld [vmem:[#allocation13 + $0x7cc] ss:$16 sps:$4 sm:$0xff]  }
 0x6f9   :  { %10854 = vmatprep.subr.bf16.mxu1 %v13654_v49  ;;  %11405 = vmatprep.subr.bf16.mxu0 %v13717_v30 }
 0x6fa   :  { %v8746_v36 = vpop.f32.mrb[16].mxu1 }
 0x6fb   :  { %v8789_v38 = vrot.slane %v8746_v36, 4  ;;  %v8748_v25 = vpop.f32.mrb[17].mxu1 }
 0x6fc   :  { %v8795_v57 = vrot.slane %v8748_v25, 4  ;;  %v8750_v51 = vpop.f32.mrb[18].mxu1  ;;  %10855 = vmatpush1.bf16.msra.mxu1 %v13652_v41  ;;  %v13706_v41 = vld [vmem:[#allocation13 + $0x7c8] ss:$16 sps:$4 sm:$0xff]  }
 0x6fd   :  { %v8790_v44 = vadd.f32 %v8789_v38, %v8746_v36  ;;  %v8751_v8 = vpop.f32.mrb[19].mxu1  ;;  %10856 = vmatprep.subr.bf16.mxu1 %v13660_v59  ;;  %v13714_v59 = vld [vmem:[#allocation13 + $0x7ec] ss:$16 sps:$4 sm:$0xff]   ;;  %v8934_v38 = vrot.slane %v15096_v34, %v14816_v11 }
 0x6fe   :  { %v8796_v26 = vadd.f32 %v8795_v57, %v8748_v25  ;;  %v8938_v57 = vrot.slane %v15096_v34, %v14798_v32  ;;  %v13723_v34 = vld [vmem:[#allocation18 + $0x24] ss:$8 sps:$4 sm:$0xff]  }
 0x6ff   :  { %v8791_v29 = vrot.slane %v8790_v44, 2 }
 0x700   :  { %v8797_v50 = vrot.slane %v8796_v26, 2  ;;  %10857 = vmatpush1.bf16.msra.mxu1 %v13658_v23 }
 0x701   :  { %v8792_v18 = vadd.f32 %v8791_v29, %v8790_v44  ;;  %10858 = vmatprep.subr.bf16.mxu1 %v13666_v54  ;;  %v8984_v44 = vrot.slane %v15102_v43, %v14816_v11  ;;  %v8988_v54 = vrot.slane %v15102_v43, %v14798_v32  ;;  %v13718_v11 = vld [vmem:[#allocation18 + $0x10] ss:$8 sps:$4 sm:$0xff]   ;;  %v13721_v32 = vld [vmem:[#allocation18 + $0x20] ss:$8 sps:$4 sm:$0xff]   ;;  %v13726_v43 = vld [vmem:[#allocation18 + $0x34] ss:$8 sps:$4 sm:$0xff]  }
 0x702   :  { %v8798_v48 = vadd.f32 %v8797_v50, %v8796_v26 }
 0x703   :  { %v8793_v17 = vrot.slane %v8792_v18, 1 }
 0x704   :  { %v8799_v31 = vrot.slane %v8798_v48, 1  ;;  %10859 = vmatpush1.bf16.msra.mxu1 %v13664_v37 }
 0x705   :  { %v8794_v27 = vadd.f32 %v8793_v17, %v8792_v18  ;;  %10860 = vmatprep.subr.bf16.mxu1 %v13672_v28  ;;  %v13715_v17 = vld [vmem:[#allocation18] ss:$8 sps:$4 sm:$0xff]  }
 0x706   :  { %v8800_v21 = vadd.f32 %v8799_v31, %v8798_v48 }
 0x707   :  { %v8807_v4 = vmul.f32 0.125, %v8794_v27  ;;  %v13724_v27 = vld [vmem:[#allocation18 + $0x30] ss:$8 sps:$4 sm:$0xff]  }
 0x708   :  { %v8808_v15 = vmul.f32 0.125, %v8800_v21  ;;  %10861 = vmatpush1.bf16.msra.mxu1 %v13670_v53  ;;  %v13720_v53 = vld [vmem:[#allocation18 + $0x14] ss:$8 sps:$4 sm:$0xff]   ;;  %v13727_v21 = vld [vmem:[#allocation18 + $0x40] ss:$8 sps:$4 sm:$0xff]  }
 0x709   :  { %v8815_v14 = vsub.f32 %v8746_v36, %v8807_v4  ;;  %10862 = vmatprep.subr.bf16.mxu1 %v13678_v63  ;;  %v13712_v36 = vld [vmem:[#allocation13 + $0x7e8] ss:$16 sps:$4 sm:$0xff]   ;;  %v13729_v63 = vld [vmem:[#allocation18 + $0x44] ss:$8 sps:$4 sm:$0xff]   ;;  %v13732_v4 = vld [vmem:[#allocation18 + $0x54] ss:$8 sps:$4 sm:$0xff]  }
 0x70a   :  { %v8816_v19 = vsub.f32 %v8748_v25, %v8808_v15  ;;  %v13730_v15 = vld [vmem:[#allocation18 + $0x50] ss:$8 sps:$4 sm:$0xff]  }
 0x70b   :  { %v8823_v1 = vmul.f32 %v8815_v14, %v8815_v14 }
 0x70c   :  { %v8824_v46 = vmul.f32 %v8816_v19, %v8816_v19  ;;  %10863 = vmatpush1.bf16.msra.mxu1 %v13676_v61  ;;  %v13735_v61 = vld [vmem:[#allocation18 + $0x64] ss:$8 sps:$4 sm:$0xff]  }
 0x70d   :  { %v8861_v0 = vrot.slane %v8823_v1, 4  ;;  %10864 = vmatprep.subr.bf16.mxu1 %v13684_v55  ;;  %v13738_v55 = vld [vmem:[#allocation18 + $0x74] ss:$8 sps:$4 sm:$0xff]  }
 0x70e   :  { %v8867_v5 = vrot.slane %v8824_v46, 4 }
 0x70f   :  { %v8862_v12 = vadd.f32 %v8861_v0, %v8823_v1  ;;  %v13741_v1 = vld [vmem:[#allocation18 + $0x84] ss:$8 sps:$4 sm:$0xff]   ;;  %v13742_v0 = vld [vmem:[#allocation18 + $0x90] ss:$8 sps:$4 sm:$0xff]  }
 0x710   :  { %v8868_v24 = vadd.f32 %v8867_v5, %v8824_v46  ;;  %10865 = vmatpush1.bf16.msra.mxu1 %v13682_v10  ;;  %v13739_v46 = vld [vmem:[#allocation18 + $0x80] ss:$8 sps:$4 sm:$0xff]   ;;  %v13744_v10 = vld [vmem:[#allocation18 + $0x94] ss:$8 sps:$4 sm:$0xff]  }
 0x711   :  { %v8863_v2 = vrot.slane %v8862_v12, 2  ;;  %10866 = vmatprep.subr.bf16.mxu1 %v13690_v16  ;;  %v13747_v16 = vld [vmem:[#allocation18 + $0xa4] ss:$8 sps:$4 sm:$0xff]   ;;  %v13745_v5 = vld [vmem:[#allocation18 + $0xa0] ss:$8 sps:$4 sm:$0xff]  }
 0x712   :  { %v8869_v47 = vrot.slane %v8868_v24, 2 }
 0x713   :  { %v8864_v52 = vadd.f32 %v8863_v2, %v8862_v12  ;;  %v13750_v12 = vld [vmem:[#allocation18 + $0xb4] ss:$8 sps:$4 sm:$0xff]   ;;  %v13751_v2 = vld [vmem:[#allocation18 + $0xc0] ss:$8 sps:$4 sm:$0xff]  }
 0x714   :  { %v8870_v40 = vadd.f32 %v8869_v47, %v8868_v24  ;;  %10867 = vmatpush1.bf16.msra.mxu1 %v13688_v7  ;;  %v13748_v24 = vld [vmem:[#allocation18 + $0xb0] ss:$8 sps:$4 sm:$0xff]   ;;  %v13753_v7 = vld [vmem:[#allocation18 + $0xc4] ss:$8 sps:$4 sm:$0xff]  }
 0x715   :  { %v8865_v60 = vrot.slane %v8864_v52, 1  ;;  %10868 = vmatprep.subr.bf16.mxu1 %v13696_v58  ;;  %v13756_v58 = vld [vmem:[#allocation18 + $0xd4] ss:$8 sps:$4 sm:$0xff]   ;;  %v13754_v47 = vld [vmem:[#allocation18 + $0xd0] ss:$8 sps:$4 sm:$0xff]  }
 0x716   :  { %v8871_v22 = vrot.slane %v8870_v40, 1 }
 0x717   :  { %v8866_v35 = vadd.f32 %v8865_v60, %v8864_v52  ;;  %v13757_v52 = vld [vmem:[#allocation18 + $0xe0] ss:$8 sps:$4 sm:$0xff]   ;;  %v13760_v60 = vld [vmem:[#allocation18 + $0xf0] ss:$8 sps:$4 sm:$0xff]  }
 0x718   :  { %v8872_v42 = vadd.f32 %v8871_v22, %v8870_v40  ;;  %10869 = vmatpush1.bf16.msra.mxu1 %v13694_v33  ;;  %v13759_v40 = vld [vmem:[#allocation18 + $0xe4] ss:$8 sps:$4 sm:$0xff]   ;;  %v13762_v33 = vld [vmem:[#allocation18 + $0xf4] ss:$8 sps:$4 sm:$0xff]  }
 0x719   :  { %v8879_v39 = vmul.f32 0.125, %v8866_v35  ;;  %10870 = vmatprep.subr.bf16.mxu1 %v13702_v62  ;;  %v13765_v62 = vld [vmem:[#allocation18 + $0x104] ss:$8 sps:$4 sm:$0xff]  }
 0x71a   :  { %v8880_v9 = vmul.f32 0.125, %v8872_v42 }
 0x71b   :  { %v8887_v49 = vadd.f32 1e-05, %v8879_v39 }
 0x71c   :  { %v8888_v30 = vadd.f32 1e-05, %v8880_v9  ;;  %10871 = vmatpush1.bf16.msra.mxu1 %v13700_v6 }
 0x71d   :  { %13871 = vrsqrt.f32 %v8887_v49  ;;  %10872 = vmatprep.subr.bf16.mxu1 %v13708_v56 }
 0x71e   :  { %13873 = vrsqrt.f32 %v8888_v30 }
 0x720   :  { %10873 = vmatpush1.bf16.msra.mxu1 %v13706_v41 }
 0x721   :  { %10874 = vmatprep.subr.bf16.mxu1 %v13714_v59 }
 0x724   :  { %10875 = vmatpush1.bf16.msra.mxu1 %v13712_v36 }
 0x727   :  { %v13872_v25 = vpop.eup %13871 }
 0x728   :  { %v13874_v51 = vpop.eup %13873  ;;  %v8903_v23 = vmul.f32 %v13872_v25, %v8815_v14  ;;  %v13733_v14 = vld [vmem:[#allocation18 + $0x60] ss:$8 sps:$4 sm:$0xff]  }
 0x729   :  { %v8904_v8 = vmul.f32 %v13874_v51, %v8816_v19  ;;  %v13736_v19 = vld [vmem:[#allocation18 + $0x70] ss:$8 sps:$4 sm:$0xff]  }
 0x72a   :  { %v8953_v26 = vmul.f32 %v8934_v38, %v8903_v23 }
 0x72b   :  { %v8954_v29 = vmul.f32 %v8938_v57, %v8904_v8 }
 0x72c   :  { %v9003_v50 = vadd.f32 %v8984_v44, %v8953_v26 }
 0x72d   :  { %v9004_v37 = vadd.f32 %v8988_v54, %v8954_v29 }
 0x72e   :  { %v9011_v18 = vmax.f32 %v9003_v50, 0.0 }
 0x72f   :  { %v9012_v28 = vmax.f32 %v9004_v37, 0.0 }
 0x730   :  { %v9019_v31 = vpack.c.bf16 %v9011_v18, %v9011_v18 }
 0x731   :  { %v9020_v48 = vpack.c.bf16 %v9012_v28, %v9012_v28 }
 0x733   :  { %10712 = vmatprep.mubr.bf16.mxu0 %v9020_v48  ;;  %10876 = vmatprep.mubr.bf16.mxu1 %v9020_v48 }
 0x734   :  { %10713 = vmatmul.mubr.bf16.vlgmr.msra.gmra.mrb[32].mxu0 %v9019_v31  ;;  %10877 = vmatmul.mubr.bf16.vlgmr.msra.gmra.mrb[20].mxu1 %v9019_v31 }
 0x735   :  { %11406 = vmatpush1.bf16.msra.mxu0 %v13715_v17 }
 0x736   :  { %11407 = vmatprep.subr.bf16.mxu0 %v13720_v53 }
 0x739   :  { %11408 = vmatpush1.bf16.msra.mxu0 %v13718_v11 }
 0x73a   :  { %11409 = vmatprep.subr.bf16.mxu0 %v13723_v34 }
 0x73d   :  { %11410 = vmatpush1.bf16.msra.mxu0 %v13721_v32 }
 0x73e   :  { %11411 = vmatprep.subr.bf16.mxu0 %v13726_v43 }
 0x741   :  { %11412 = vmatpush1.bf16.msra.mxu0 %v13724_v27 }
 0x742   :  { %11413 = vmatprep.subr.bf16.mxu0 %v13729_v63 }
 0x745   :  { %11414 = vmatpush1.bf16.msra.mxu0 %v13727_v21 }
 0x746   :  { %11415 = vmatprep.subr.bf16.mxu0 %v13732_v4 }
 0x749   :  { %11416 = vmatpush1.bf16.msra.mxu0 %v13730_v15 }
 0x74a   :  { %11417 = vmatprep.subr.bf16.mxu0 %v13735_v61 }
 0x74d   :  { %11418 = vmatpush1.bf16.msra.mxu0 %v13733_v14 }
 0x74e   :  { %11419 = vmatprep.subr.bf16.mxu0 %v13738_v55 }
 0x751   :  { %11420 = vmatpush1.bf16.msra.mxu0 %v13736_v19 }
 0x752   :  { %11421 = vmatprep.subr.bf16.mxu0 %v13741_v1 }
 0x755   :  { %11422 = vmatpush1.bf16.msra.mxu0 %v13739_v46 }
 0x756   :  { %11423 = vmatprep.subr.bf16.mxu0 %v13744_v10 }
 0x759   :  { %11424 = vmatpush1.bf16.msra.mxu0 %v13742_v0 }
 0x75a   :  { %11425 = vmatprep.subr.bf16.mxu0 %v13747_v16 }
 0x75d   :  { %11426 = vmatpush1.bf16.msra.mxu0 %v13745_v5 }
 0x75e   :  { %11427 = vmatprep.subr.bf16.mxu0 %v13750_v12 }
 0x761   :  { %11428 = vmatpush1.bf16.msra.mxu0 %v13748_v24 }
 0x762   :  { %11429 = vmatprep.subr.bf16.mxu0 %v13753_v7 }
 0x765   :  { %11430 = vmatpush1.bf16.msra.mxu0 %v13751_v2 }
 0x766   :  { %11431 = vmatprep.subr.bf16.mxu0 %v13756_v58 }
 0x769   :  { %11432 = vmatpush1.bf16.msra.mxu0 %v13754_v47 }
 0x76a   :  { %11433 = vmatprep.subr.bf16.mxu0 %v13759_v40 }
 0x76d   :  { %11434 = vmatpush1.bf16.msra.mxu0 %v13757_v52 }
 0x76e   :  { %11435 = vmatprep.subr.bf16.mxu0 %v13762_v33 }
 0x771   :  { %11436 = vmatpush1.bf16.msra.mxu0 %v13760_v60 }
 0x772   :  { %11446 = vmatprep.subr.bf16.mxu0 %v13765_v62 }
 0x807   :  { %v10714_v22 = vpop.f32.mrb[32].mxu0  ;;  %v10878_v35 = vpop.f32.mrb[20].mxu1 }
 0x808   :  { %v10885_v42 = vrot.slane %v10714_v22, 4  ;;  %v10897_v6 = vrot.slane %v10878_v35, 4  ;;  %v10716_v39 = vpop.f32.mrb[33].mxu0  ;;  %v10880_v56 = vpop.f32.mrb[21].mxu1 }
 0x809   :  { %v10891_v9 = vrot.slane %v10716_v39, 4  ;;  %v10903_v49 = vrot.slane %v10880_v56, 4  ;;  %v10718_v30 = vpop.f32.mrb[34].mxu0  ;;  %v10882_v41 = vpop.f32.mrb[22].mxu1 }
 0x80a   :  { %v10886_v59 = vadd.f32 %v10885_v42, %v10714_v22  ;;  %v10898_v36 = vadd.f32 %v10897_v6, %v10878_v35  ;;  %v10719_v38 = vpop.f32.mrb[35].mxu0  ;;  %v10883_v25 = vpop.f32.mrb[23].mxu1 }
 0x80b   :  { %v10892_v57 = vadd.f32 %v10891_v9, %v10716_v39  ;;  %v10904_v51 = vadd.f32 %v10903_v49, %v10880_v56 }
 0x80c   :  { %v10887_v23 = vrot.slane %v10886_v59, 2  ;;  %v10899_v44 = vrot.slane %v10898_v36, 2 }
 0x80d   :  { %v10893_v8 = vrot.slane %v10892_v57, 2  ;;  %v10905_v54 = vrot.slane %v10904_v51, 2 }
 0x80e   :  { %v10888_v26 = vadd.f32 %v10887_v23, %v10886_v59  ;;  %v10900_v29 = vadd.f32 %v10899_v44, %v10898_v36  ;;  %v10961_v23 = vld [vmem:[#allocation15] sm:$0xf]  ;;  %v10987_v44 = vld [vmem:[#allocation16] sm:$0xf] }
 0x80f   :  { %v10894_v50 = vadd.f32 %v10893_v8, %v10892_v57  ;;  %v10906_v37 = vadd.f32 %v10905_v54, %v10904_v51  ;;  %v10966_v8 = vrot.slane %v10961_v23, %v14612_v13 }
 0x810   :  { %v10889_v18 = vrot.slane %v10888_v26, 1  ;;  %v10901_v28 = vrot.slane %v10900_v29, 1 }
 0x811   :  { %v10895_v48 = vrot.slane %v10894_v50, 1  ;;  %v10907_v17 = vrot.slane %v10906_v37, 1 }
 0x812   :  { %v10890_v31 = vadd.f32 %v10889_v18, %v10888_v26  ;;  %v10902_v53 = vadd.f32 %v10901_v28, %v10900_v29  ;;  %v10974_v26 = vrot.slane %v10961_v23, %v14632_v45  ;;  %v10992_v18 = vrot.slane %v10987_v44, %v14612_v13 }
 0x813   :  { %v10896_v11 = vadd.f32 %v10895_v48, %v10894_v50  ;;  %v10908_v34 = vadd.f32 %v10907_v17, %v10906_v37  ;;  %v10970_v37 = vrot.slane %v10961_v23, %v14617_v20  ;;  %v10978_v17 = vrot.slane %v10961_v23, %v15168_v3  ;;  %v13808_v23 = vld [vmem:[#allocation18 + $0x1f0] ss:$8 sps:$4 sm:$0xff]  }
 0x814   :  { %v10909_v32 = vmul.f32 0.125, %v10890_v31  ;;  %v10911_v43 = vmul.f32 0.125, %v10902_v53  ;;  %v11000_v31 = vrot.slane %v10987_v44, %v14632_v45 }
 0x815   :  { %v10910_v27 = vmul.f32 0.125, %v10896_v11  ;;  %v10912_v63 = vmul.f32 0.125, %v10908_v34 }
 0x816   :  { %v10913_v21 = vsub.f32 %v10714_v22, %v10909_v32  ;;  %v10915_v4 = vsub.f32 %v10878_v35, %v10911_v43  ;;  %v10996_v32 = vrot.slane %v10987_v44, %v14617_v20 }
 0x817   :  { %v10914_v15 = vsub.f32 %v10716_v39, %v10910_v27  ;;  %v10916_v61 = vsub.f32 %v10880_v56, %v10912_v63  ;;  %v11004_v63 = vrot.slane %v10987_v44, %v15168_v3  ;;  %v13766_v3 = vld [vmem:[#allocation18 + $0x110] ss:$8 sps:$4 sm:$0xff]  }
 0x818   :  { %v10917_v14 = vmul.f32 %v10913_v21, %v10913_v21  ;;  %v10919_v55 = vmul.f32 %v10915_v4, %v10915_v4 }
 0x819   :  { %v10918_v19 = vmul.f32 %v10914_v15, %v10914_v15  ;;  %v10920_v1 = vmul.f32 %v10916_v61, %v10916_v61 }
 0x81a   :  { %v10921_v46 = vrot.slane %v10917_v14, 4  ;;  %v10933_v10 = vrot.slane %v10919_v55, 4 }
 0x81b   :  { %v10927_v0 = vrot.slane %v10918_v19, 4  ;;  %v10939_v16 = vrot.slane %v10920_v1, 4 }
 0x81c   :  { %v10922_v5 = vadd.f32 %v10921_v46, %v10917_v14  ;;  %v10934_v12 = vadd.f32 %v10933_v10, %v10919_v55 }
 0x81d   :  { %v10928_v24 = vadd.f32 %v10927_v0, %v10918_v19  ;;  %v10940_v7 = vadd.f32 %v10939_v16, %v10920_v1  ;;  %v13763_v16 = vld [vmem:[#allocation18 + $0x100] ss:$8 sps:$4 sm:$0xff]  }
 0x81e   :  { %v10923_v2 = vrot.slane %v10922_v5, 2  ;;  %v10935_v58 = vrot.slane %v10934_v12, 2 }
 0x81f   :  { %v10929_v47 = vrot.slane %v10928_v24, 2  ;;  %v10941_v52 = vrot.slane %v10940_v7, 2 }
 0x820   :  { %v10924_v40 = vadd.f32 %v10923_v2, %v10922_v5  ;;  %v10936_v33 = vadd.f32 %v10935_v58, %v10934_v12  ;;  %v13772_v2 = vld [vmem:[#allocation18 + $0x130] ss:$8 sps:$4 sm:$0xff]   ;;  %v13777_v58 = vld [vmem:[#allocation18 + $0x144] ss:$8 sps:$4 sm:$0xff]  }
 0x821   :  { %v10930_v60 = vadd.f32 %v10929_v47, %v10928_v24  ;;  %v10942_v62 = vadd.f32 %v10941_v52, %v10940_v7  ;;  %v13769_v24 = vld [vmem:[#allocation18 + $0x120] ss:$8 sps:$4 sm:$0xff]   ;;  %v13774_v7 = vld [vmem:[#allocation18 + $0x134] ss:$8 sps:$4 sm:$0xff]  }
 0x822   :  { %v10925_v22 = vrot.slane %v10924_v40, 1  ;;  %v10937_v35 = vrot.slane %v10936_v33, 1  ;;  %v13775_v47 = vld [vmem:[#allocation18 + $0x140] ss:$8 sps:$4 sm:$0xff]   ;;  %v13780_v52 = vld [vmem:[#allocation18 + $0x154] ss:$8 sps:$4 sm:$0xff]  }
 0x823   :  { %v10931_v42 = vrot.slane %v10930_v60, 1  ;;  %v10943_v6 = vrot.slane %v10942_v62, 1 }
 0x824   :  { %v10926_v39 = vadd.f32 %v10925_v22, %v10924_v40  ;;  %v10938_v56 = vadd.f32 %v10937_v35, %v10936_v33  ;;  %v13778_v40 = vld [vmem:[#allocation18 + $0x150] ss:$8 sps:$4 sm:$0xff]   ;;  %v13783_v33 = vld [vmem:[#allocation18 + $0x164] ss:$8 sps:$4 sm:$0xff]  }
 0x825   :  { %v10932_v9 = vadd.f32 %v10931_v42, %v10930_v60  ;;  %v10944_v49 = vadd.f32 %v10943_v6, %v10942_v62  ;;  %v13781_v60 = vld [vmem:[#allocation18 + $0x160] ss:$8 sps:$4 sm:$0xff]   ;;  %v13786_v62 = vld [vmem:[#allocation18 + $0x174] ss:$8 sps:$4 sm:$0xff]   ;;  %v13784_v22 = vld [vmem:[#allocation18 + $0x170] ss:$8 sps:$4 sm:$0xff]  }
 0x826   :  { %v10945_v30 = vmul.f32 0.125, %v10926_v39  ;;  %v10947_v41 = vmul.f32 0.125, %v10938_v56  ;;  %v13789_v35 = vld [vmem:[#allocation18 + $0x184] ss:$8 sps:$4 sm:$0xff]   ;;  %v13787_v42 = vld [vmem:[#allocation18 + $0x180] ss:$8 sps:$4 sm:$0xff]  }
 0x827   :  { %v10946_v59 = vmul.f32 0.125, %v10932_v9  ;;  %v10948_v36 = vmul.f32 0.125, %v10944_v49  ;;  %v13792_v6 = vld [vmem:[#allocation18 + $0x194] ss:$8 sps:$4 sm:$0xff]   ;;  %v13790_v39 = vld [vmem:[#allocation18 + $0x190] ss:$8 sps:$4 sm:$0xff]  }
 0x828   :  { %v10949_v38 = vadd.f32 1e-05, %v10945_v30  ;;  %v10951_v25 = vadd.f32 1e-05, %v10947_v41  ;;  %v13795_v56 = vld [vmem:[#allocation18 + $0x1a4] ss:$8 sps:$4 sm:$0xff]  }
 0x829   :  { %v10950_v57 = vadd.f32 1e-05, %v10946_v59  ;;  %v10952_v51 = vadd.f32 1e-05, %v10948_v36  ;;  %v13793_v9 = vld [vmem:[#allocation18 + $0x1a0] ss:$8 sps:$4 sm:$0xff]  }
 0x82a   :  { %13875 = vrsqrt.f32 %v10949_v38  ;;  %v13798_v49 = vld [vmem:[#allocation18 + $0x1b4] ss:$8 sps:$4 sm:$0xff]   ;;  %v13796_v30 = vld [vmem:[#allocation18 + $0x1b0] ss:$8 sps:$4 sm:$0xff]   ;;  %v13801_v41 = vld [vmem:[#allocation18 + $0x1c4] ss:$8 sps:$4 sm:$0xff]  }
 0x82b   :  { %13877 = vrsqrt.f32 %v10951_v25  ;;  %v13799_v59 = vld [vmem:[#allocation18 + $0x1c0] ss:$8 sps:$4 sm:$0xff]   ;;  %v13804_v36 = vld [vmem:[#allocation18 + $0x1d4] ss:$8 sps:$4 sm:$0xff]   ;;  %v13802_v38 = vld [vmem:[#allocation18 + $0x1d0] ss:$8 sps:$4 sm:$0xff]  }
 0x82c   :  { %13879 = vrsqrt.f32 %v10950_v57  ;;  %v13807_v25 = vld [vmem:[#allocation18 + $0x1e4] ss:$8 sps:$4 sm:$0xff]   ;;  %v13805_v57 = vld [vmem:[#allocation18 + $0x1e0] ss:$8 sps:$4 sm:$0xff]  }
 0x82d   :  { %13881 = vrsqrt.f32 %v10952_v51  ;;  %v13810_v51 = vld [vmem:[#allocation18 + $0x1f4] ss:$8 sps:$4 sm:$0xff]  }
 0x834   :  { %v13876_v54 = vpop.eup %13875 }
 0x835   :  { %v13878_v29 = vpop.eup %13877  ;;  %v10957_v50 = vmul.f32 %v13876_v54, %v10913_v21  ;;  %v13811_v54 = vld [vmem:[#allocation22 + $0x40] sm:$0xff]  }
 0x836   :  { %v13880_v28 = vpop.eup %13879  ;;  %v10959_v48 = vmul.f32 %v13878_v29, %v10915_v4  ;;  %13146 = vmatprep.subr.bf16.mxu1 %v13811_v54  ;;  %v13813_v29 = vld [vmem:[#allocation22 + $0x48] sm:$0xff]  }
 0x837   :  { %v13882_v53 = vpop.eup %13881  ;;  %v10983_v11 = vmul.f32 %v10966_v8, %v10957_v50  ;;  %v10958_v34 = vmul.f32 %v13880_v28, %v10914_v15  ;;  %v13768_v15 = vld [vmem:[#allocation18 + $0x114] ss:$8 sps:$4 sm:$0xff]   ;;  %v13814_v50 = vld [vmem:[#allocation22 + $0x8] sm:$0xff]  }
 0x838   :  { %v10985_v43 = vmul.f32 %v10974_v26, %v10959_v48  ;;  %v10960_v27 = vmul.f32 %v13882_v53, %v10916_v61  ;;  %v13771_v61 = vld [vmem:[#allocation18 + $0x124] ss:$8 sps:$4 sm:$0xff]   ;;  %v13817_v28 = vld [vmem:[#allocation22 + $0x58] sm:$0xff]  }
 0x839   :  { %v10984_v21 = vmul.f32 %v10970_v37, %v10958_v34  ;;  %v11009_v14 = vadd.f32 %v10992_v18, %v10983_v11  ;;  %v13812_v26 = vld [vmem:[#allocation22] sm:$0xff]   ;;  %v13815_v37 = vld [vmem:[#allocation22 + $0x50] sm:$0xff]   ;;  %v13818_v48 = vld [vmem:[#allocation22 + $0x18] sm:$0xff]  }
 0x83a   :  { %v10986_v55 = vmul.f32 %v10978_v17, %v10960_v27  ;;  %v15128_v19 = vadd.f32 %v11000_v31, %v10985_v43  ;;  %13147 = vmatpush3.bf16.msra.mxu1 %v13812_v26  ;;  %v13816_v18 = vld [vmem:[#allocation22 + $0x10] sm:$0xff]   ;;  %v13819_v17 = vld [vmem:[#allocation22 + $0x60] sm:$0xff]   ;;  %v13821_v53 = vld [vmem:[#allocation22 + $0x68] sm:$0xff]  }
 0x83b   :  { %v11010_v1 = vadd.f32 %v10996_v32, %v10984_v21  ;;  %v11013_v4 = vmax.f32 %v11009_v14, 0.0  ;;  %13148 = vmatprep.subr.bf16.mxu1 %v13813_v29  ;;  %v13820_v31 = vld [vmem:[#allocation22 + $0x20] sm:$0xff]   ;;  %v13822_v11 = vld [vmem:[#allocation22 + $0x28] sm:$0xff]   ;;  %v13823_v34 = vld [vmem:[#allocation22 + $0x70] sm:$0xff]  }
 0x83c   :  { %v11012_v46 = vadd.f32 %v11004_v63, %v10986_v55  ;;  %v11015_v44 = vmax.f32 %v15128_v19, 0.0  ;;  %v13824_v32 = vld [vmem:[#allocation22 + $0x30] sm:$0xff]   ;;  %v13825_v43 = vld [vmem:[#allocation22 + $0x78] sm:$0xff]  }
 0x83d   :  { %v11014_v10 = vmax.f32 %v11010_v1, 0.0  ;;  %v11017_v5 = vpack.c.bf16 %v11013_v4, %v11013_v4  ;;  %v13826_v27 = vld [vmem:[#allocation22 + $0x38] sm:$0xff]  }
 0x83e   :  { %v11016_v0 = vmax.f32 %v11012_v46, 0.0  ;;  %v11019_v8 = vpack.c.bf16 %v11015_v44, %v11015_v44  ;;  %13149 = vmatpush3.bf16.msra.mxu1 %v13814_v50 }
 0x83f   :  { %v11018_v45 = vpack.c.bf16 %v11014_v10, %v11014_v10  ;;  %13150 = vmatprep.subr.bf16.mxu1 %v13815_v37 }
 0x840   :  { %v11020_v12 = vpack.c.bf16 %v11016_v0, %v11016_v0 }
 0x841   :  { %11437 = vmatprep.mubr.bf16.mxu0 %v11018_v45 }
 0x842   :  { %11438 = vmatmul.mubr.bf16.vlgmr.msra.gmra.mrb[36].mxu0 %v11017_v5  ;;  %13151 = vmatpush3.bf16.msra.mxu1 %v13816_v18 }
 0x843   :  { %11447 = vmatpush1.bf16.msra.mxu0 %v13763_v16  ;;  %11478 = vmatprep.mubr.bf16.mxu0 %v11020_v12 }
 0x844   :  { %11448 = vmatprep.subr.bf16.mxu0 %v13768_v15  ;;  %13152 = vmatprep.subr.bf16.mxu1 %v13817_v28 }
 0x846   :  { %13153 = vmatpush3.bf16.msra.mxu1 %v13818_v48 }
 0x847   :  { %11449 = vmatpush1.bf16.msra.mxu0 %v13766_v3  ;;  %13154 = vmatprep.subr.bf16.mxu1 %v13819_v17 }
 0x848   :  { %11450 = vmatprep.subr.bf16.mxu0 %v13771_v61 }
 0x84a   :  { %13155 = vmatpush3.bf16.msra.mxu1 %v13820_v31 }
 0x84b   :  { %11451 = vmatpush1.bf16.msra.mxu0 %v13769_v24  ;;  %13156 = vmatprep.subr.bf16.mxu1 %v13821_v53 }
 0x84c   :  { %11452 = vmatprep.subr.bf16.mxu0 %v13774_v7 }
 0x84e   :  { %13157 = vmatpush3.bf16.msra.mxu1 %v13822_v11  ;;  %v13129_v11 = vld [vmem:[#allocation24] ss:$0 sm:$0xff] }
 0x84f   :  { %11453 = vmatpush1.bf16.msra.mxu0 %v13772_v2  ;;  %13158 = vmatprep.subr.bf16.mxu1 %v13823_v34 }
 0x850   :  { %11454 = vmatprep.subr.bf16.mxu0 %v13777_v58 }
 0x852   :  { %13159 = vmatpush3.bf16.msra.mxu1 %v13824_v32 }
 0x853   :  { %11455 = vmatpush1.bf16.msra.mxu0 %v13775_v47  ;;  %13160 = vmatprep.subr.bf16.mxu1 %v13825_v43 }
 0x854   :  { %11456 = vmatprep.subr.bf16.mxu0 %v13780_v52 }
 0x856   :  { %13161 = vmatpush3.bf16.msra.mxu1 %v13826_v27 }
 0x857   :  { %11457 = vmatpush1.bf16.msra.mxu0 %v13778_v40 }
 0x858   :  { %11458 = vmatprep.subr.bf16.mxu0 %v13783_v33 }
 0x85b   :  { %11459 = vmatpush1.bf16.msra.mxu0 %v13781_v60 }
 0x85c   :  { %11460 = vmatprep.subr.bf16.mxu0 %v13786_v62 }
 0x85f   :  { %11461 = vmatpush1.bf16.msra.mxu0 %v13784_v22 }
 0x860   :  { %11462 = vmatprep.subr.bf16.mxu0 %v13789_v35 }
 0x863   :  { %11463 = vmatpush1.bf16.msra.mxu0 %v13787_v42 }
 0x864   :  { %11464 = vmatprep.subr.bf16.mxu0 %v13792_v6 }
 0x867   :  { %11465 = vmatpush1.bf16.msra.mxu0 %v13790_v39 }
 0x868   :  { %11466 = vmatprep.subr.bf16.mxu0 %v13795_v56 }
 0x86b   :  { %11467 = vmatpush1.bf16.msra.mxu0 %v13793_v9 }
 0x86c   :  { %11468 = vmatprep.subr.bf16.mxu0 %v13798_v49 }
 0x86f   :  { %11469 = vmatpush1.bf16.msra.mxu0 %v13796_v30 }
 0x870   :  { %11470 = vmatprep.subr.bf16.mxu0 %v13801_v41 }
 0x873   :  { %11471 = vmatpush1.bf16.msra.mxu0 %v13799_v59 }
 0x874   :  { %11472 = vmatprep.subr.bf16.mxu0 %v13804_v36  ;;  %v11525_v36 = vld [vmem:[#allocation19] sm:$0x3] }
 0x877   :  { %11473 = vmatpush1.bf16.msra.mxu0 %v13802_v38  ;;  %v11539_v38 = vld [vmem:[#allocation21] sm:$0x3] }
 0x878   :  { %11474 = vmatprep.subr.bf16.mxu0 %v13807_v25  ;;  %v11530_v25 = vrot.slane %v11525_v36, %v14612_v13  ;;  %v11548_v26 = vrot.slane %v11539_v38, %v14617_v20 }
 0x87b   :  { %11475 = vmatpush1.bf16.msra.mxu0 %v13805_v57 }
 0x87c   :  { %11476 = vmatprep.subr.bf16.mxu0 %v13810_v51  ;;  %v11534_v51 = vrot.slane %v11525_v36, %v14617_v20 }
 0x87f   :  { %11477 = vmatpush1.bf16.msra.mxu0 %v13808_v23 }
 0x882   :  { %11479 = vmatmul.mubr.bf16.vlgmr.msra.gmra.mrb[36].mxu0 %v11019_v8  ;;  %v11544_v8 = vrot.slane %v11539_v38, %v14612_v13 }
 0x955   :  { %v11480_v63 = vpop.f32.mrb[36].mxu0 }
 0x956   :  { %v11487_v21 = vrot.slane %v11480_v63, 4  ;;  %v11482_v14 = vpop.f32.mrb[37].mxu0 }
 0x957   :  { %v11493_v55 = vrot.slane %v11482_v14, 4  ;;  %v11484_v19 = vpop.f32.mrb[38].mxu0 }
 0x958   :  { %v11488_v1 = vadd.f32 %v11487_v21, %v11480_v63  ;;  %v11485_v4 = vpop.f32.mrb[39].mxu0 }
 0x959   :  { %v11494_v46 = vadd.f32 %v11493_v55, %v11482_v14 }
 0x95a   :  { %v11489_v10 = vrot.slane %v11488_v1, 2 }
 0x95b   :  { %v11495_v0 = vrot.slane %v11494_v46, 2 }
 0x95c   :  { %v11490_v45 = vadd.f32 %v11489_v10, %v11488_v1 }
 0x95d   :  { %v11496_v16 = vadd.f32 %v11495_v0, %v11494_v46 }
 0x95e   :  { %v11491_v5 = vrot.slane %v11490_v45, 1 }
 0x95f   :  { %v11497_v15 = vrot.slane %v11496_v16, 1 }
 0x960   :  { %v11492_v12 = vadd.f32 %v11491_v5, %v11490_v45 }
 0x961   :  { %v11498_v3 = vadd.f32 %v11497_v15, %v11496_v16 }
 0x962   :  { %v11499_v61 = vmul.f32 0.125, %v11492_v12 }
 0x963   :  { %v11500_v24 = vmul.f32 0.125, %v11498_v3 }
 0x964   :  { %v11501_v7 = vsub.f32 %v11480_v63, %v11499_v61 }
 0x965   :  { %v11502_v2 = vsub.f32 %v11482_v14, %v11500_v24 }
 0x966   :  { %v11503_v58 = vmul.f32 %v11501_v7, %v11501_v7 }
 0x967   :  { %v11504_v47 = vmul.f32 %v11502_v2, %v11502_v2 }
 0x968   :  { %v11505_v52 = vrot.slane %v11503_v58, 4 }
 0x969   :  { %v11511_v40 = vrot.slane %v11504_v47, 4 }
 0x96a   :  { %v11506_v33 = vadd.f32 %v11505_v52, %v11503_v58 }
 0x96b   :  { %v11512_v60 = vadd.f32 %v11511_v40, %v11504_v47 }
 0x96c   :  { %v11507_v62 = vrot.slane %v11506_v33, 2 }
 0x96d   :  { %v11513_v22 = vrot.slane %v11512_v60, 2 }
 0x96e   :  { %v11508_v35 = vadd.f32 %v11507_v62, %v11506_v33 }
 0x96f   :  { %v11514_v42 = vadd.f32 %v11513_v22, %v11512_v60 }
 0x970   :  { %v11509_v6 = vrot.slane %v11508_v35, 1 }
 0x971   :  { %v11515_v39 = vrot.slane %v11514_v42, 1 }
 0x972   :  { %v11510_v56 = vadd.f32 %v11509_v6, %v11508_v35 }
 0x973   :  { %v11516_v9 = vadd.f32 %v11515_v39, %v11514_v42 }
 0x974   :  { %v11517_v49 = vmul.f32 0.125, %v11510_v56 }
 0x975   :  { %v11518_v30 = vmul.f32 0.125, %v11516_v9 }
 0x976   :  { %v11519_v41 = vadd.f32 1e-05, %v11517_v49 }
 0x977   :  { %v11520_v59 = vadd.f32 1e-05, %v11518_v30 }
 0x978   :  { %13883 = vrsqrt.f32 %v11519_v41 }
 0x979   :  { %13885 = vrsqrt.f32 %v11520_v59 }
 0x982   :  { %v13884_v57 = vpop.eup %13883 }
 0x983   :  { %v13886_v23 = vpop.eup %13885  ;;  %v11523_v44 = vmul.f32 %v13884_v57, %v11501_v7 }
 0x984   :  { %v11524_v54 = vmul.f32 %v13886_v23, %v11502_v2 }
 0x985   :  { %v11537_v29 = vmul.f32 %v11530_v25, %v11523_v44 }
 0x986   :  { %v11538_v50 = vmul.f32 %v11534_v51, %v11524_v54 }
 0x987   :  { %v11551_v37 = vadd.f32 %v11544_v8, %v11537_v29 }
 0x988   :  { %v11552_v18 = vadd.f32 %v11548_v26, %v11538_v50 }
 0x989   :  { %v11553_v28 = vmax.f32 %v11551_v37, 0.0 }
 0x98a   :  { %v11554_v48 = vmax.f32 %v11552_v18, 0.0 }
 0x98b   :  { %v11555_v31 = vpack.c.bf16 %v11553_v28, %v11553_v28 }
 0x98c   :  { %v11556_v17 = vpack.c.bf16 %v11554_v48, %v11554_v48 }
 0x98e   :  { %11724 = vmatprep.mubr.bf16.mxu1 %v11556_v17 }
 0x98f   :  { %11725 = vmatmul.mubr.bf16.vlgmr.msra.gmra.mrb[24].mxu1 %v11555_v31 }
 0xa62   :  { %v13162_v53 = vpop.f32.mrb[24].mxu1 }
 0xa63   :  { %v13163_v34 = vpop.f32.mrb[25].mxu1 }
 0xa64   :  { %v13164_v32 = vadd.f32 %v13163_v34, %v13162_v53  ;;  %v13165_v43 = vpop.f32.mrb[26].mxu1 }
 0xa65   :  { %v13166_v27 = vpop.f32.mrb[27].mxu1 }
 0xa66   :  { %v11727_v13 = vadd.f32 %v13164_v32, %v13129_v11 }
 0xa68   :  { %11732 = vst [vmem:[%s15170_s8] sm:$0xff] %v11727_v13 }
 0xa69   :  { %11737 = vsyncpa [#allocation3], 1 }
 0xa6a   :  { %11738 = vsyncpa [#allocation5], 1 }
 0xa6b   :  { %11739 = vsyncpa [#allocation8], 1 }
 0xa6c   :  { %11740 = vsyncpa [#allocation11], 1 }
 0xa6d   :  { %11741 = vsyncpa [#allocation14], 1 }
 0xa6e   :  { %11742 = vsyncpa [#allocation17], 1 }
 0xa6f   :  { %11743 = vsyncpa [#allocation20], 1 }
 0xa70   :  { %11744 = vsyncpa [#allocation23], 1 }

</bundles_post_ra>
